<compile_context>
chip_gen: v6e
topology: v6e:2x2x1
jax: 0.10.0
libtpu: 0.0.40
codegen_flags: <defaults>
</compile_context>

<pallas_src>
import functools
import math

import jax
import jax.numpy as jnp
from jax.experimental import pallas as pl
from jax.experimental.pallas import tpu as pltpu


# ----------------------------------------------------------------------------- helpers

def _full_spec(shape):
    """BlockSpec covering the whole array; same (only) block every grid step."""
    nd = len(shape)
    return pl.BlockSpec(tuple(shape), lambda i, _nd=nd: (0,) * _nd)


def _layer_norm(y, gamma, beta, eps):
    mu = jnp.mean(y, axis=-1, keepdims=True)
    var = jnp.mean(jnp.square(y - mu), axis=-1, keepdims=True)
    return (y - mu) * jax.lax.rsqrt(var + eps) * gamma + beta


def _dot_tt(a, b):
    """a @ b^T without an explicit transpose (trailing-dim contraction on both operands)."""
    return jax.lax.dot_general(a, b, (((1,), (1,)), ((), ())),
                               preferred_element_type=jnp.float32)


# ----------------------------------------------------------------------------- fused kernel

def _fused_kernel(h_ref, bias_ref,
                  eg_ref, eb_ref,
                  wqkv_ref, bqkv_ref, wo_ref, bo_ref,
                  g1_ref, bt1_ref, w1_ref, bf1_ref,
                  w2_ref, bf2_ref, g2_ref, bt2_ref,
                  adjb_ref,
                  gw1_ref, gs1_ref, gd1_ref, gb1_ref,
                  gw2_ref, gs2_ref, gd2_ref, gb2_ref,
                  gw3_ref, gs3_ref, gd3_ref, gb3_ref,
                  pool_ref,
                  out_ref,
                  *, num_layers, nodes, seq, heads, head_dim, eps,
                  gat_cfg, neg_slope, out_pad):
    Dh = heads * head_dim

    # ---------------- BERT encoder (all layers, weights VMEM-resident) ----------------
    h = _layer_norm(h_ref[...], eg_ref[...], eb_ref[...], eps)          # [N*S, Dh]
    bias = bias_ref[...]                                                # [N*S, N*S] block-diag + key mask

    for l in range(num_layers):
        # fused QKV projection (1/sqrt(d) already folded into the Q columns at init)
        qkv = jnp.dot(h, wqkv_ref[l], preferred_element_type=jnp.float32) + bqkv_ref[l]
        ctxs = []
        for hd in range(heads):                                         # batched over all nodes
            c0 = hd * head_dim
            q = qkv[:, c0:c0 + head_dim]
            k = qkv[:, Dh + c0:Dh + c0 + head_dim]
            v = qkv[:, 2 * Dh + c0:2 * Dh + c0 + head_dim]
            s = _dot_tt(q, k) + bias                                    # [N*S, N*S], no .T, no per-node loop
            s = s - jnp.max(s, axis=-1, keepdims=True)
            pr = jnp.exp(s)
            pr = pr * pl.reciprocal(jnp.sum(pr, axis=-1, keepdims=True), approx=True)
            ctxs.append(jnp.dot(pr, v, preferred_element_type=jnp.float32))
        attn = jnp.concatenate(ctxs, axis=-1)                           # single lane-dense concat
        a = jnp.dot(attn, wo_ref[l], preferred_element_type=jnp.float32) + bo_ref[l]
        h = _layer_norm(a + h, g1_ref[l], bt1_ref[l], eps)
        ff = jax.nn.gelu(jnp.dot(h, w1_ref[l], preferred_element_type=jnp.float32) + bf1_ref[l],
                         approximate=True)   # TODO(synk): HF BERT uses exact erf GELU
        ff = jnp.dot(ff, w2_ref[l], preferred_element_type=jnp.float32) + bf2_ref[l]
        h = _layer_norm(ff + h, g2_ref[l], bt2_ref[l], eps)

    # ---------------- CLS extraction as one MXU selection matmul ----------------
    row = jax.lax.broadcasted_iota(jnp.int32, (nodes, nodes * seq), 0)
    col = jax.lax.broadcasted_iota(jnp.int32, (nodes, nodes * seq), 1)
    sel = (col == row * seq).astype(jnp.float32)                        # [N, N*S] picks position 0 per node
    x = jnp.dot(sel, h, preferred_element_type=jnp.float32)             # [N, Dh]

    # ---------------- 3x GATConv + scatter_mean ----------------
    adj_bias = adjb_ref[...]                                            # [N, N] 0 / -1e30 additive mask
    gat_packs = ((gw1_ref, gs1_ref, gd1_ref, gb1_ref),
                 (gw2_ref, gs2_ref, gd2_ref, gb2_ref),
                 (gw3_ref, gs3_ref, gd3_ref, gb3_ref))
    for (w_ref, asrc_ref, adst_ref, b_ref), (h_n, f_n, apply_elu) in zip(gat_packs, gat_cfg):
        xp = jnp.dot(x, w_ref[...], preferred_element_type=jnp.float32)      # [N, H*F] lane-dense
        # all-head scores with two matmuls against block-diagonal att matrices (no transposes)
        sc_dst = _dot_tt(xp, adst_ref[...])                                  # [N, H]
        sc_srcT = _dot_tt(asrc_ref[...], xp)                                 # [H, N]
        outs = []
        for hd in range(h_n):
            e = sc_dst[:, hd:hd + 1] + sc_srcT[hd:hd + 1, :]                 # e[dst, src]
            e = jnp.where(e > 0, e, neg_slope * e)                           # LeakyReLU(0.2)
            e = e + adj_bias                                                 # mask non-edges
            e = e - jnp.max(e, axis=-1, keepdims=True)
            pa = jnp.exp(e)                                                  # exp of -1e30 -> 0, no *adj needed
            pa = pa * pl.reciprocal(jnp.sum(pa, axis=-1, keepdims=True), approx=True)
            outs.append(jnp.dot(pa, xp[:, hd * f_n:(hd + 1) * f_n],
                                preferred_element_type=jnp.float32))
        o = jnp.concatenate(outs, axis=-1) if h_n > 1 else outs[0]           # head-concat as a value
        o = o + b_ref[...]
        if apply_elu:
            o = jnp.where(o > 0, o, jnp.exp(jnp.minimum(o, 0.0)) - 1.0)
        x = o

    pooled = jnp.dot(pool_ref[...], x, preferred_element_type=jnp.float32)   # scatter_mean -> [G, out_feats]
    pad = jnp.zeros((pooled.shape[0], out_pad - pooled.shape[1]), jnp.float32)
    out_ref[...] = jnp.concatenate([pooled, pad], axis=-1)                   # single lane-dense store


# ----------------------------------------------------------------------------- wrapper

def triple_gat_bert_forward(p, cfg, input_ids, attention_mask, edge_index, batch):
    N, S = input_ids.shape
    Dh, G = cfg.bert_hidden, cfg.num_graphs
    OUT_PAD = 128

    # XLA glue: embedding gather, attention/adjacency masks, pooling matrix.
    h = (jnp.take(p["word_emb"], input_ids, axis=0)
         + p["pos_emb"][None, :S, :]
         + p["type_emb"][0][None, None, :]).astype(jnp.float32).reshape(N * S, Dh)

    node_id = jnp.arange(N * S) // S
    key_ok = attention_mask.reshape(-1) > 0
    attn_bias = jnp.where((node_id[:, None] == node_id[None, :]) & key_ok[None, :],
                          0.0, -1e9).astype(jnp.float32)                     # [N*S, N*S]

    adj = jnp.zeros((N, N), jnp.float32)
    adj = adj.at[edge_index[1], edge_index[0]].set(1.0)                      # adj[dst, src]
    adj = adj.at[jnp.arange(N), jnp.arange(N)].set(1.0)                      # self loops
    adj_bias = jnp.where(adj > 0, 0.0, -1e30).astype(jnp.float32)

    onehot = (batch[None, :] == jnp.arange(G)[:, None]).astype(jnp.float32)
    pool_mat = onehot / jnp.maximum(jnp.sum(onehot, axis=-1, keepdims=True), 1.0)

    arrays = [h, attn_bias,
              p["emb_ln_g"], p["emb_ln_b"],
              p["wqkv"], p["bqkv"], p["wo"], p["bo"],
              p["ln1_g"], p["ln1_b"], p["w1"], p["b1"],
              p["w2"], p["b2"], p["ln2_g"], p["ln2_b"],
              adj_bias]
    for g in p["gat"]:
        arrays += [g["w"], g["a_src"], g["a_dst"], g["bias"]]
    arrays.append(pool_mat)

    gat_cfg = tuple((g["heads"], g["fout"], elu)
                    for g, elu in zip(p["gat"], (True, True, False)))

    out = pl.pallas_call(
        functools.partial(_fused_kernel,
                          num_layers=cfg.bert_layers, nodes=N, seq=S,
                          heads=cfg.bert_heads, head_dim=Dh // cfg.bert_heads,
                          eps=1e-12, gat_cfg=gat_cfg, neg_slope=0.2, out_pad=OUT_PAD),
        out_shape=jax.ShapeDtypeStruct((G, OUT_PAD), jnp.float32),
        grid_spec=pltpu.PrefetchScalarGridSpec(
            num_scalar_prefetch=0,
            grid=(1,),
            in_specs=[_full_spec(a.shape) for a in arrays],
            out_specs=_full_spec((G, OUT_PAD))),
        compiler_params=pltpu.CompilerParams(dimension_semantics=("arbitrary",)),
    )(*arrays)
    return out[:, :cfg.out_feats]


# ----------------------------------------------------------------------------- params / config

class Cfg:
    vocab = 64
    max_pos = 16
    n_type = 2
    bert_hidden = 32          # == in_feats (CLS feature size)
    bert_heads = 4
    bert_inter = 64
    bert_layers = 2
    in_feats = 32
    hid_feats = 8
    out_feats = 4
    num_nodes = 8
    seq = 8
    num_graphs = 2


def _block_diag_att(vals, heads, fout):
    """[heads*fout] attention vector -> [heads, heads*fout] block-diagonal matrix."""
    m = jnp.zeros((heads, heads * fout), jnp.float32)
    for hd in range(heads):
        m = m.at[hd, hd * fout:(hd + 1) * fout].set(vals[hd * fout:(hd + 1) * fout])
    return m


def init_params(key, cfg):
    ks = iter(jax.random.split(key, 64))
    nrm = lambda shape: 0.02 * jax.random.normal(next(ks), shape, dtype=jnp.float32)
    Dh, I, L = cfg.bert_hidden, cfg.bert_inter, cfg.bert_layers
    d = Dh // cfg.bert_heads
    p = {}
    # BERT embeddings
    p["word_emb"] = nrm((cfg.vocab, Dh))
    p["pos_emb"] = nrm((cfg.max_pos, Dh))
    p["type_emb"] = nrm((cfg.n_type, Dh))
    p["emb_ln_g"] = jnp.ones((1, Dh), jnp.float32)
    p["emb_ln_b"] = jnp.zeros((1, Dh), jnp.float32)
    # stacked per-layer BERT weights; Q/K/V fused, 1/sqrt(d) folded into the Q columns.
    wqkv = nrm((L, Dh, 3 * Dh))
    scale = 1.0 / math.sqrt(d)
    p["wqkv"] = wqkv.at[:, :, :Dh].multiply(scale)
    p["bqkv"] = jnp.zeros((L, 1, 3 * Dh), jnp.float32)
    p["wo"] = nrm((L, Dh, Dh))
    p["bo"] = jnp.zeros((L, 1, Dh), jnp.float32)
    p["ln1_g"] = jnp.ones((L, 1, Dh), jnp.float32)
    p["ln1_b"] = jnp.zeros((L, 1, Dh), jnp.float32)
    p["w1"] = nrm((L, Dh, I))
    p["b1"] = jnp.zeros((L, 1, I), jnp.float32)
    p["w2"] = nrm((L, I, Dh))
    p["b2"] = jnp.zeros((L, 1, Dh), jnp.float32)
    p["ln2_g"] = jnp.ones((L, 1, Dh), jnp.float32)
    p["ln2_b"] = jnp.zeros((L, 1, Dh), jnp.float32)
    # GAT layers (PyG GATConv): att vectors stored as block-diagonal [H, H*F] matrices.
    gat_dims = [(cfg.in_feats, cfg.hid_feats * 2, 8),        # conv1 (concat)  -> 8*16 = 128 lanes
                (cfg.hid_feats * 8 * 2, cfg.hid_feats, 8),   # conv2 (concat)  -> 8*8  = 64 lanes
                (cfg.hid_feats * 8, cfg.out_feats, 1)]       # conv3 (concat=False, heads=1)
    p["gat"] = []
    for fin, fout, heads in gat_dims:
        a_src = nrm((heads * fout,))
        a_dst = nrm((heads * fout,))
        p["gat"].append(dict(
            w=nrm((fin, heads * fout)),
            a_src=_block_diag_att(a_src, heads, fout),
            a_dst=_block_diag_att(a_dst, heads, fout),
            bias=jnp.zeros((1, heads * fout), jnp.float32),
            heads=heads, fout=fout))
    return p


# ----------------------------------------------------------------------------- main

if __name__ == "__main__":
    cfg = Cfg()
    k_ids, k_par = jax.random.split(jax.random.PRNGKey(0))

    input_ids = jax.random.randint(k_ids, (cfg.num_nodes, cfg.seq), 0, cfg.vocab, dtype=jnp.int32)
    attention_mask = jnp.ones((cfg.num_nodes, cfg.seq), jnp.int32)
    # two graphs: nodes 0-3 and 4-7, directed edges (row0 = src, row1 = dst)
    edge_index = jnp.array([[0, 1, 2, 3, 1, 4, 5, 6, 7, 5],
                            [1, 0, 0, 0, 2, 5, 4, 4, 4, 6]], dtype=jnp.int32)
    batch = jnp.array([0, 0, 0, 0, 1, 1, 1, 1], dtype=jnp.int32)

    params = init_params(k_par, cfg)

    fwd = jax.jit(lambda ids, am, ei, bt: triple_gat_bert_forward(params, cfg, ids, am, ei, bt))
    out = jax.block_until_ready(fwd(input_ids, attention_mask, edge_index, batch))

    assert out.shape == (cfg.num_graphs, cfg.out_feats)
    assert bool(jnp.all(jnp.isfinite(out)))
    print("KERNEL_OK")
</pallas_src>

<mosaic_0001>
module attributes {stable_mosaic.version = 11 : i64} {
  func.func @_fused_kernel(%arg0: i32, %arg1: memref<64x32xf32, #tpu.memory_space<vmem>>, %arg2: memref<64x64xf32, #tpu.memory_space<vmem>>, %arg3: memref<1x32xf32, #tpu.memory_space<vmem>>, %arg4: memref<1x32xf32, #tpu.memory_space<vmem>>, %arg5: memref<2x32x96xf32, #tpu.memory_space<vmem>>, %arg6: memref<2x1x96xf32, #tpu.memory_space<vmem>>, %arg7: memref<2x32x32xf32, #tpu.memory_space<vmem>>, %arg8: memref<2x1x32xf32, #tpu.memory_space<vmem>>, %arg9: memref<2x1x32xf32, #tpu.memory_space<vmem>>, %arg10: memref<2x1x32xf32, #tpu.memory_space<vmem>>, %arg11: memref<2x32x64xf32, #tpu.memory_space<vmem>>, %arg12: memref<2x1x64xf32, #tpu.memory_space<vmem>>, %arg13: memref<2x64x32xf32, #tpu.memory_space<vmem>>, %arg14: memref<2x1x32xf32, #tpu.memory_space<vmem>>, %arg15: memref<2x1x32xf32, #tpu.memory_space<vmem>>, %arg16: memref<2x1x32xf32, #tpu.memory_space<vmem>>, %arg17: memref<8x8xf32, #tpu.memory_space<vmem>>, %arg18: memref<32x128xf32, #tpu.memory_space<vmem>>, %arg19: memref<8x128xf32, #tpu.memory_space<vmem>>, %arg20: memref<8x128xf32, #tpu.memory_space<vmem>>, %arg21: memref<1x128xf32, #tpu.memory_space<vmem>>, %arg22: memref<128x64xf32, #tpu.memory_space<vmem>>, %arg23: memref<8x64xf32, #tpu.memory_space<vmem>>, %arg24: memref<8x64xf32, #tpu.memory_space<vmem>>, %arg25: memref<1x64xf32, #tpu.memory_space<vmem>>, %arg26: memref<64x4xf32, #tpu.memory_space<vmem>>, %arg27: memref<1x4xf32, #tpu.memory_space<vmem>>, %arg28: memref<1x4xf32, #tpu.memory_space<vmem>>, %arg29: memref<1x4xf32, #tpu.memory_space<vmem>>, %arg30: memref<2x8xf32, #tpu.memory_space<vmem>>, %arg31: memref<2x128xf32, #tpu.memory_space<vmem>>) attributes {dimension_semantics = [#tpu.dimension_semantics<arbitrary>], iteration_bounds = array<i64: 1>, scalar_prefetch = 0 : i64, scratch_operands = 0 : i64, tpu.core_type = #tpu.core_type<tc>, window_params = [{pipeline_mode = #tpu.pipeline_mode<synchronous>, transform_indices = @transform_0, window_bounds = array<i64: 64, 32>}, {pipeline_mode = #tpu.pipeline_mode<synchronous>, transform_indices = @transform_1, window_bounds = array<i64: 64, 64>}, {pipeline_mode = #tpu.pipeline_mode<synchronous>, transform_indices = @transform_2, window_bounds = array<i64: 1, 32>}, {pipeline_mode = #tpu.pipeline_mode<synchronous>, transform_indices = @transform_3, window_bounds = array<i64: 1, 32>}, {pipeline_mode = #tpu.pipeline_mode<synchronous>, transform_indices = @transform_4, window_bounds = array<i64: 2, 32, 96>}, {pipeline_mode = #tpu.pipeline_mode<synchronous>, transform_indices = @transform_5, window_bounds = array<i64: 2, 1, 96>}, {pipeline_mode = #tpu.pipeline_mode<synchronous>, transform_indices = @transform_6, window_bounds = array<i64: 2, 32, 32>}, {pipeline_mode = #tpu.pipeline_mode<synchronous>, transform_indices = @transform_7, window_bounds = array<i64: 2, 1, 32>}, {pipeline_mode = #tpu.pipeline_mode<synchronous>, transform_indices = @transform_8, window_bounds = array<i64: 2, 1, 32>}, {pipeline_mode = #tpu.pipeline_mode<synchronous>, transform_indices = @transform_9, window_bounds = array<i64: 2, 1, 32>}, {pipeline_mode = #tpu.pipeline_mode<synchronous>, transform_indices = @transform_10, window_bounds = array<i64: 2, 32, 64>}, {pipeline_mode = #tpu.pipeline_mode<synchronous>, transform_indices = @transform_11, window_bounds = array<i64: 2, 1, 64>}, {pipeline_mode = #tpu.pipeline_mode<synchronous>, transform_indices = @transform_12, window_bounds = array<i64: 2, 64, 32>}, {pipeline_mode = #tpu.pipeline_mode<synchronous>, transform_indices = @transform_13, window_bounds = array<i64: 2, 1, 32>}, {pipeline_mode = #tpu.pipeline_mode<synchronous>, transform_indices = @transform_14, window_bounds = array<i64: 2, 1, 32>}, {pipeline_mode = #tpu.pipeline_mode<synchronous>, transform_indices = @transform_15, window_bounds = array<i64: 2, 1, 32>}, {pipeline_mode = #tpu.pipeline_mode<synchronous>, transform_indices = @transform_16, window_bounds = array<i64: 8, 8>}, {pipeline_mode = #tpu.pipeline_mode<synchronous>, transform_indices = @transform_17, window_bounds = array<i64: 32, 128>}, {pipeline_mode = #tpu.pipeline_mode<synchronous>, transform_indices = @transform_18, window_bounds = array<i64: 8, 128>}, {pipeline_mode = #tpu.pipeline_mode<synchronous>, transform_indices = @transform_19, window_bounds = array<i64: 8, 128>}, {pipeline_mode = #tpu.pipeline_mode<synchronous>, transform_indices = @transform_20, window_bounds = array<i64: 1, 128>}, {pipeline_mode = #tpu.pipeline_mode<synchronous>, transform_indices = @transform_21, window_bounds = array<i64: 128, 64>}, {pipeline_mode = #tpu.pipeline_mode<synchronous>, transform_indices = @transform_22, window_bounds = array<i64: 8, 64>}, {pipeline_mode = #tpu.pipeline_mode<synchronous>, transform_indices = @transform_23, window_bounds = array<i64: 8, 64>}, {pipeline_mode = #tpu.pipeline_mode<synchronous>, transform_indices = @transform_24, window_bounds = array<i64: 1, 64>}, {pipeline_mode = #tpu.pipeline_mode<synchronous>, transform_indices = @transform_25, window_bounds = array<i64: 64, 4>}, {pipeline_mode = #tpu.pipeline_mode<synchronous>, transform_indices = @transform_26, window_bounds = array<i64: 1, 4>}, {pipeline_mode = #tpu.pipeline_mode<synchronous>, transform_indices = @transform_27, window_bounds = array<i64: 1, 4>}, {pipeline_mode = #tpu.pipeline_mode<synchronous>, transform_indices = @transform_28, window_bounds = array<i64: 1, 4>}, {pipeline_mode = #tpu.pipeline_mode<synchronous>, transform_indices = @transform_29, window_bounds = array<i64: 2, 8>}, {pipeline_mode = #tpu.pipeline_mode<synchronous>, transform_indices = @transform_30, window_bounds = array<i64: 2, 128>}]} {
    %c0 = arith.constant 0 : index
    %c0_0 = arith.constant 0 : index
    %0 = vector.load %arg1[%c0, %c0_0] : memref<64x32xf32, #tpu.memory_space<vmem>>, vector<64x32xf32>
    %c0_1 = arith.constant 0 : index
    %c0_2 = arith.constant 0 : index
    %1 = vector.load %arg3[%c0_1, %c0_2] : memref<1x32xf32, #tpu.memory_space<vmem>>, vector<1x32xf32>
    %c0_3 = arith.constant 0 : index
    %c0_4 = arith.constant 0 : index
    %2 = vector.load %arg4[%c0_3, %c0_4] : memref<1x32xf32, #tpu.memory_space<vmem>>, vector<1x32xf32>
    %cst = arith.constant dense<0.000000e+00> : vector<64xf32>
    %3 = vector.multi_reduction <add>, %0, %cst [1] : vector<64x32xf32> to vector<64xf32>
    %4 = vector.shape_cast %3 : vector<64xf32> to vector<64x1xf32>
    %cst_5 = arith.constant 3.200000e+01 : f32
    %5 = vector.broadcast %cst_5 : f32 to vector<64x1xf32>
    %6 = arith.divf %4, %5 : vector<64x1xf32>
    %7 = vector.broadcast %6 : vector<64x1xf32> to vector<64x32xf32>
    %8 = arith.subf %0, %7 : vector<64x32xf32>
    %9 = arith.mulf %8, %8 : vector<64x32xf32>
    %cst_6 = arith.constant dense<0.000000e+00> : vector<64xf32>
    %10 = vector.multi_reduction <add>, %9, %cst_6 [1] : vector<64x32xf32> to vector<64xf32>
    %11 = vector.shape_cast %10 : vector<64xf32> to vector<64x1xf32>
    %cst_7 = arith.constant 3.200000e+01 : f32
    %12 = vector.broadcast %cst_7 : f32 to vector<64x1xf32>
    %13 = arith.divf %11, %12 : vector<64x1xf32>
    %14 = vector.broadcast %6 : vector<64x1xf32> to vector<64x32xf32>
    %15 = arith.subf %0, %14 : vector<64x32xf32>
    %cst_8 = arith.constant 9.99999996E-13 : f32
    %16 = vector.broadcast %cst_8 : f32 to vector<64x1xf32>
    %17 = arith.addf %13, %16 : vector<64x1xf32>
    %18 = math.rsqrt %17 : vector<64x1xf32>
    %19 = vector.broadcast %18 : vector<64x1xf32> to vector<64x32xf32>
    %20 = arith.mulf %15, %19 : vector<64x32xf32>
    %21 = vector.broadcast %1 : vector<1x32xf32> to vector<64x32xf32>
    %22 = arith.mulf %20, %21 : vector<64x32xf32>
    %23 = vector.broadcast %2 : vector<1x32xf32> to vector<64x32xf32>
    %24 = arith.addf %22, %23 : vector<64x32xf32>
    %c0_9 = arith.constant 0 : index
    %c0_10 = arith.constant 0 : index
    %25 = vector.load %arg2[%c0_9, %c0_10] : memref<64x64xf32, #tpu.memory_space<vmem>>, vector<64x64xf32>
    %c0_11 = arith.constant 0 : index
    %c0_12 = arith.constant 0 : index
    %c0_13 = arith.constant 0 : index
    %26 = vector.load %arg5[%c0_11, %c0_12, %c0_13] : memref<2x32x96xf32, #tpu.memory_space<vmem>>, vector<1x32x96xf32>
    %27 = vector.shape_cast %26 : vector<1x32x96xf32> to vector<32x96xf32>
    %cst_14 = arith.constant dense<0.000000e+00> : vector<64x96xf32>
    %28 = tpu.matmul %24, %27, %cst_14 {dimension_numbers = #tpu.dot_dimension_numbers<[1], [0], [0], [1], [0, 0, 1, 1], [], []>} : vector<64x32xf32>, vector<32x96xf32>, vector<64x96xf32> -> vector<64x96xf32>
    %c0_15 = arith.constant 0 : index
    %c0_16 = arith.constant 0 : index
    %c0_17 = arith.constant 0 : index
    %29 = vector.load %arg6[%c0_15, %c0_16, %c0_17] : memref<2x1x96xf32, #tpu.memory_space<vmem>>, vector<1x1x96xf32>
    %30 = vector.shape_cast %29 : vector<1x1x96xf32> to vector<1x96xf32>
    %31 = vector.broadcast %30 : vector<1x96xf32> to vector<64x96xf32>
    %32 = arith.addf %28, %31 : vector<64x96xf32>
    %33 = vector.extract_strided_slice %32 {offsets = [0, 0], sizes = [64, 8], strides = [1, 1]} : vector<64x96xf32> to vector<64x8xf32>
    %34 = vector.extract_strided_slice %32 {offsets = [0, 32], sizes = [64, 8], strides = [1, 1]} : vector<64x96xf32> to vector<64x8xf32>
    %35 = vector.extract_strided_slice %32 {offsets = [0, 64], sizes = [64, 8], strides = [1, 1]} : vector<64x96xf32> to vector<64x8xf32>
    %cst_18 = arith.constant dense<0.000000e+00> : vector<64x64xf32>
    %36 = tpu.matmul %33, %34, %cst_18 {dimension_numbers = #tpu.dot_dimension_numbers<[1], [1], [0], [0], [0, 0, 1, 0], [], []>} : vector<64x8xf32>, vector<64x8xf32>, vector<64x64xf32> -> vector<64x64xf32>
    %37 = arith.addf %36, %25 : vector<64x64xf32>
    %cst_19 = arith.constant dense<0xFF800000> : vector<64xf32>
    %38 = vector.multi_reduction <maximumf>, %37, %cst_19 [1] : vector<64x64xf32> to vector<64xf32>
    %39 = vector.shape_cast %38 : vector<64xf32> to vector<64x1xf32>
    %40 = vector.broadcast %39 : vector<64x1xf32> to vector<64x64xf32>
    %41 = arith.subf %37, %40 : vector<64x64xf32>
    %42 = math.exp %41 : vector<64x64xf32>
    %cst_20 = arith.constant dense<0.000000e+00> : vector<64xf32>
    %43 = vector.multi_reduction <add>, %42, %cst_20 [1] : vector<64x64xf32> to vector<64xf32>
    %44 = vector.shape_cast %43 : vector<64xf32> to vector<64x1xf32>
    %45 = tpu.reciprocal %44 {approx = true} : vector<64x1xf32> -> vector<64x1xf32>
    %46 = vector.broadcast %45 : vector<64x1xf32> to vector<64x64xf32>
    %47 = arith.mulf %42, %46 : vector<64x64xf32>
    %cst_21 = arith.constant dense<0.000000e+00> : vector<64x8xf32>
    %48 = tpu.matmul %47, %35, %cst_21 {dimension_numbers = #tpu.dot_dimension_numbers<[1], [0], [0], [1], [0, 0, 1, 1], [], []>} : vector<64x64xf32>, vector<64x8xf32>, vector<64x8xf32> -> vector<64x8xf32>
    %49 = vector.extract_strided_slice %32 {offsets = [0, 8], sizes = [64, 8], strides = [1, 1]} : vector<64x96xf32> to vector<64x8xf32>
    %50 = vector.extract_strided_slice %32 {offsets = [0, 40], sizes = [64, 8], strides = [1, 1]} : vector<64x96xf32> to vector<64x8xf32>
    %51 = vector.extract_strided_slice %32 {offsets = [0, 72], sizes = [64, 8], strides = [1, 1]} : vector<64x96xf32> to vector<64x8xf32>
    %cst_22 = arith.constant dense<0.000000e+00> : vector<64x64xf32>
    %52 = tpu.matmul %49, %50, %cst_22 {dimension_numbers = #tpu.dot_dimension_numbers<[1], [1], [0], [0], [0, 0, 1, 0], [], []>} : vector<64x8xf32>, vector<64x8xf32>, vector<64x64xf32> -> vector<64x64xf32>
    %53 = arith.addf %52, %25 : vector<64x64xf32>
    %cst_23 = arith.constant dense<0xFF800000> : vector<64xf32>
    %54 = vector.multi_reduction <maximumf>, %53, %cst_23 [1] : vector<64x64xf32> to vector<64xf32>
    %55 = vector.shape_cast %54 : vector<64xf32> to vector<64x1xf32>
    %56 = vector.broadcast %55 : vector<64x1xf32> to vector<64x64xf32>
    %57 = arith.subf %53, %56 : vector<64x64xf32>
    %58 = math.exp %57 : vector<64x64xf32>
    %cst_24 = arith.constant dense<0.000000e+00> : vector<64xf32>
    %59 = vector.multi_reduction <add>, %58, %cst_24 [1] : vector<64x64xf32> to vector<64xf32>
    %60 = vector.shape_cast %59 : vector<64xf32> to vector<64x1xf32>
    %61 = tpu.reciprocal %60 {approx = true} : vector<64x1xf32> -> vector<64x1xf32>
    %62 = vector.broadcast %61 : vector<64x1xf32> to vector<64x64xf32>
    %63 = arith.mulf %58, %62 : vector<64x64xf32>
    %cst_25 = arith.constant dense<0.000000e+00> : vector<64x8xf32>
    %64 = tpu.matmul %63, %51, %cst_25 {dimension_numbers = #tpu.dot_dimension_numbers<[1], [0], [0], [1], [0, 0, 1, 1], [], []>} : vector<64x64xf32>, vector<64x8xf32>, vector<64x8xf32> -> vector<64x8xf32>
    %65 = vector.extract_strided_slice %32 {offsets = [0, 16], sizes = [64, 8], strides = [1, 1]} : vector<64x96xf32> to vector<64x8xf32>
    %66 = vector.extract_strided_slice %32 {offsets = [0, 48], sizes = [64, 8], strides = [1, 1]} : vector<64x96xf32> to vector<64x8xf32>
    %67 = vector.extract_strided_slice %32 {offsets = [0, 80], sizes = [64, 8], strides = [1, 1]} : vector<64x96xf32> to vector<64x8xf32>
    %cst_26 = arith.constant dense<0.000000e+00> : vector<64x64xf32>
    %68 = tpu.matmul %65, %66, %cst_26 {dimension_numbers = #tpu.dot_dimension_numbers<[1], [1], [0], [0], [0, 0, 1, 0], [], []>} : vector<64x8xf32>, vector<64x8xf32>, vector<64x64xf32> -> vector<64x64xf32>
    %69 = arith.addf %68, %25 : vector<64x64xf32>
    %cst_27 = arith.constant dense<0xFF800000> : vector<64xf32>
    %70 = vector.multi_reduction <maximumf>, %69, %cst_27 [1] : vector<64x64xf32> to vector<64xf32>
    %71 = vector.shape_cast %70 : vector<64xf32> to vector<64x1xf32>
    %72 = vector.broadcast %71 : vector<64x1xf32> to vector<64x64xf32>
    %73 = arith.subf %69, %72 : vector<64x64xf32>
    %74 = math.exp %73 : vector<64x64xf32>
    %cst_28 = arith.constant dense<0.000000e+00> : vector<64xf32>
    %75 = vector.multi_reduction <add>, %74, %cst_28 [1] : vector<64x64xf32> to vector<64xf32>
    %76 = vector.shape_cast %75 : vector<64xf32> to vector<64x1xf32>
    %77 = tpu.reciprocal %76 {approx = true} : vector<64x1xf32> -> vector<64x1xf32>
    %78 = vector.broadcast %77 : vector<64x1xf32> to vector<64x64xf32>
    %79 = arith.mulf %74, %78 : vector<64x64xf32>
    %cst_29 = arith.constant dense<0.000000e+00> : vector<64x8xf32>
    %80 = tpu.matmul %79, %67, %cst_29 {dimension_numbers = #tpu.dot_dimension_numbers<[1], [0], [0], [1], [0, 0, 1, 1], [], []>} : vector<64x64xf32>, vector<64x8xf32>, vector<64x8xf32> -> vector<64x8xf32>
    %81 = vector.extract_strided_slice %32 {offsets = [0, 24], sizes = [64, 8], strides = [1, 1]} : vector<64x96xf32> to vector<64x8xf32>
    %82 = vector.extract_strided_slice %32 {offsets = [0, 56], sizes = [64, 8], strides = [1, 1]} : vector<64x96xf32> to vector<64x8xf32>
    %83 = vector.extract_strided_slice %32 {offsets = [0, 88], sizes = [64, 8], strides = [1, 1]} : vector<64x96xf32> to vector<64x8xf32>
    %cst_30 = arith.constant dense<0.000000e+00> : vector<64x64xf32>
    %84 = tpu.matmul %81, %82, %cst_30 {dimension_numbers = #tpu.dot_dimension_numbers<[1], [1], [0], [0], [0, 0, 1, 0], [], []>} : vector<64x8xf32>, vector<64x8xf32>, vector<64x64xf32> -> vector<64x64xf32>
    %85 = arith.addf %84, %25 : vector<64x64xf32>
    %cst_31 = arith.constant dense<0xFF800000> : vector<64xf32>
    %86 = vector.multi_reduction <maximumf>, %85, %cst_31 [1] : vector<64x64xf32> to vector<64xf32>
    %87 = vector.shape_cast %86 : vector<64xf32> to vector<64x1xf32>
    %88 = vector.broadcast %87 : vector<64x1xf32> to vector<64x64xf32>
    %89 = arith.subf %85, %88 : vector<64x64xf32>
    %90 = math.exp %89 : vector<64x64xf32>
    %cst_32 = arith.constant dense<0.000000e+00> : vector<64xf32>
    %91 = vector.multi_reduction <add>, %90, %cst_32 [1] : vector<64x64xf32> to vector<64xf32>
    %92 = vector.shape_cast %91 : vector<64xf32> to vector<64x1xf32>
    %93 = tpu.reciprocal %92 {approx = true} : vector<64x1xf32> -> vector<64x1xf32>
    %94 = vector.broadcast %93 : vector<64x1xf32> to vector<64x64xf32>
    %95 = arith.mulf %90, %94 : vector<64x64xf32>
    %cst_33 = arith.constant dense<0.000000e+00> : vector<64x8xf32>
    %96 = tpu.matmul %95, %83, %cst_33 {dimension_numbers = #tpu.dot_dimension_numbers<[1], [0], [0], [1], [0, 0, 1, 1], [], []>} : vector<64x64xf32>, vector<64x8xf32>, vector<64x8xf32> -> vector<64x8xf32>
    %97 = tpu.concatenate %48, %64, %80, %96 in 1 : vector<64x8xf32>, vector<64x8xf32>, vector<64x8xf32>, vector<64x8xf32> -> vector<64x32xf32>
    %c0_34 = arith.constant 0 : index
    %c0_35 = arith.constant 0 : index
    %c0_36 = arith.constant 0 : index
    %98 = vector.load %arg7[%c0_34, %c0_35, %c0_36] : memref<2x32x32xf32, #tpu.memory_space<vmem>>, vector<1x32x32xf32>
    %99 = vector.shape_cast %98 : vector<1x32x32xf32> to vector<32x32xf32>
    %cst_37 = arith.constant dense<0.000000e+00> : vector<64x32xf32>
    %100 = tpu.matmul %97, %99, %cst_37 {dimension_numbers = #tpu.dot_dimension_numbers<[1], [0], [0], [1], [0, 0, 1, 1], [], []>} : vector<64x32xf32>, vector<32x32xf32>, vector<64x32xf32> -> vector<64x32xf32>
    %c0_38 = arith.constant 0 : index
    %c0_39 = arith.constant 0 : index
    %c0_40 = arith.constant 0 : index
    %101 = vector.load %arg8[%c0_38, %c0_39, %c0_40] : memref<2x1x32xf32, #tpu.memory_space<vmem>>, vector<1x1x32xf32>
    %102 = vector.shape_cast %101 : vector<1x1x32xf32> to vector<1x32xf32>
    %103 = vector.broadcast %102 : vector<1x32xf32> to vector<64x32xf32>
    %104 = arith.addf %100, %103 : vector<64x32xf32>
    %105 = arith.addf %104, %24 : vector<64x32xf32>
    %c0_41 = arith.constant 0 : index
    %c0_42 = arith.constant 0 : index
    %c0_43 = arith.constant 0 : index
    %106 = vector.load %arg9[%c0_41, %c0_42, %c0_43] : memref<2x1x32xf32, #tpu.memory_space<vmem>>, vector<1x1x32xf32>
    %107 = vector.shape_cast %106 : vector<1x1x32xf32> to vector<1x32xf32>
    %c0_44 = arith.constant 0 : index
    %c0_45 = arith.constant 0 : index
    %c0_46 = arith.constant 0 : index
    %108 = vector.load %arg10[%c0_44, %c0_45, %c0_46] : memref<2x1x32xf32, #tpu.memory_space<vmem>>, vector<1x1x32xf32>
    %109 = vector.shape_cast %108 : vector<1x1x32xf32> to vector<1x32xf32>
    %cst_47 = arith.constant dense<0.000000e+00> : vector<64xf32>
    %110 = vector.multi_reduction <add>, %105, %cst_47 [1] : vector<64x32xf32> to vector<64xf32>
    %111 = vector.shape_cast %110 : vector<64xf32> to vector<64x1xf32>
    %cst_48 = arith.constant 3.200000e+01 : f32
    %112 = vector.broadcast %cst_48 : f32 to vector<64x1xf32>
    %113 = arith.divf %111, %112 : vector<64x1xf32>
    %114 = vector.broadcast %113 : vector<64x1xf32> to vector<64x32xf32>
    %115 = arith.subf %105, %114 : vector<64x32xf32>
    %116 = arith.mulf %115, %115 : vector<64x32xf32>
    %cst_49 = arith.constant dense<0.000000e+00> : vector<64xf32>
    %117 = vector.multi_reduction <add>, %116, %cst_49 [1] : vector<64x32xf32> to vector<64xf32>
    %118 = vector.shape_cast %117 : vector<64xf32> to vector<64x1xf32>
    %cst_50 = arith.constant 3.200000e+01 : f32
    %119 = vector.broadcast %cst_50 : f32 to vector<64x1xf32>
    %120 = arith.divf %118, %119 : vector<64x1xf32>
    %121 = vector.broadcast %113 : vector<64x1xf32> to vector<64x32xf32>
    %122 = arith.subf %105, %121 : vector<64x32xf32>
    %cst_51 = arith.constant 9.99999996E-13 : f32
    %123 = vector.broadcast %cst_51 : f32 to vector<64x1xf32>
    %124 = arith.addf %120, %123 : vector<64x1xf32>
    %125 = math.rsqrt %124 : vector<64x1xf32>
    %126 = vector.broadcast %125 : vector<64x1xf32> to vector<64x32xf32>
    %127 = arith.mulf %122, %126 : vector<64x32xf32>
    %128 = vector.broadcast %107 : vector<1x32xf32> to vector<64x32xf32>
    %129 = arith.mulf %127, %128 : vector<64x32xf32>
    %130 = vector.broadcast %109 : vector<1x32xf32> to vector<64x32xf32>
    %131 = arith.addf %129, %130 : vector<64x32xf32>
    %c0_52 = arith.constant 0 : index
    %c0_53 = arith.constant 0 : index
    %c0_54 = arith.constant 0 : index
    %132 = vector.load %arg11[%c0_52, %c0_53, %c0_54] : memref<2x32x64xf32, #tpu.memory_space<vmem>>, vector<1x32x64xf32>
    %133 = vector.shape_cast %132 : vector<1x32x64xf32> to vector<32x64xf32>
    %cst_55 = arith.constant dense<0.000000e+00> : vector<64x64xf32>
    %134 = tpu.matmul %131, %133, %cst_55 {dimension_numbers = #tpu.dot_dimension_numbers<[1], [0], [0], [1], [0, 0, 1, 1], [], []>} : vector<64x32xf32>, vector<32x64xf32>, vector<64x64xf32> -> vector<64x64xf32>
    %c0_56 = arith.constant 0 : index
    %c0_57 = arith.constant 0 : index
    %c0_58 = arith.constant 0 : index
    %135 = vector.load %arg12[%c0_56, %c0_57, %c0_58] : memref<2x1x64xf32, #tpu.memory_space<vmem>>, vector<1x1x64xf32>
    %136 = vector.shape_cast %135 : vector<1x1x64xf32> to vector<1x64xf32>
    %137 = vector.broadcast %136 : vector<1x64xf32> to vector<64x64xf32>
    %138 = arith.addf %134, %137 : vector<64x64xf32>
    %139 = arith.mulf %138, %138 : vector<64x64xf32>
    %140 = arith.mulf %138, %139 : vector<64x64xf32>
    %cst_59 = arith.constant 4.471500e-02 : f32
    %141 = vector.broadcast %cst_59 : f32 to vector<64x64xf32>
    %142 = arith.mulf %141, %140 : vector<64x64xf32>
    %143 = arith.addf %138, %142 : vector<64x64xf32>
    %cst_60 = arith.constant 0.797884583 : f32
    %144 = vector.broadcast %cst_60 : f32 to vector<64x64xf32>
    %145 = arith.mulf %144, %143 : vector<64x64xf32>
    %146 = math.tanh %145 : vector<64x64xf32>
    %cst_61 = arith.constant 1.000000e+00 : f32
    %147 = vector.broadcast %cst_61 : f32 to vector<64x64xf32>
    %148 = arith.addf %147, %146 : vector<64x64xf32>
    %cst_62 = arith.constant 5.000000e-01 : f32
    %149 = vector.broadcast %cst_62 : f32 to vector<64x64xf32>
    %150 = arith.mulf %149, %148 : vector<64x64xf32>
    %151 = arith.mulf %138, %150 : vector<64x64xf32>
    %c0_63 = arith.constant 0 : index
    %c0_64 = arith.constant 0 : index
    %c0_65 = arith.constant 0 : index
    %152 = vector.load %arg13[%c0_63, %c0_64, %c0_65] : memref<2x64x32xf32, #tpu.memory_space<vmem>>, vector<1x64x32xf32>
    %153 = vector.shape_cast %152 : vector<1x64x32xf32> to vector<64x32xf32>
    %cst_66 = arith.constant dense<0.000000e+00> : vector<64x32xf32>
    %154 = tpu.matmul %151, %153, %cst_66 {dimension_numbers = #tpu.dot_dimension_numbers<[1], [0], [0], [1], [0, 0, 1, 1], [], []>} : vector<64x64xf32>, vector<64x32xf32>, vector<64x32xf32> -> vector<64x32xf32>
    %c0_67 = arith.constant 0 : index
    %c0_68 = arith.constant 0 : index
    %c0_69 = arith.constant 0 : index
    %155 = vector.load %arg14[%c0_67, %c0_68, %c0_69] : memref<2x1x32xf32, #tpu.memory_space<vmem>>, vector<1x1x32xf32>
    %156 = vector.shape_cast %155 : vector<1x1x32xf32> to vector<1x32xf32>
    %157 = vector.broadcast %156 : vector<1x32xf32> to vector<64x32xf32>
    %158 = arith.addf %154, %157 : vector<64x32xf32>
    %159 = arith.addf %158, %131 : vector<64x32xf32>
    %c0_70 = arith.constant 0 : index
    %c0_71 = arith.constant 0 : index
    %c0_72 = arith.constant 0 : index
    %160 = vector.load %arg15[%c0_70, %c0_71, %c0_72] : memref<2x1x32xf32, #tpu.memory_space<vmem>>, vector<1x1x32xf32>
    %161 = vector.shape_cast %160 : vector<1x1x32xf32> to vector<1x32xf32>
    %c0_73 = arith.constant 0 : index
    %c0_74 = arith.constant 0 : index
    %c0_75 = arith.constant 0 : index
    %162 = vector.load %arg16[%c0_73, %c0_74, %c0_75] : memref<2x1x32xf32, #tpu.memory_space<vmem>>, vector<1x1x32xf32>
    %163 = vector.shape_cast %162 : vector<1x1x32xf32> to vector<1x32xf32>
    %cst_76 = arith.constant dense<0.000000e+00> : vector<64xf32>
    %164 = vector.multi_reduction <add>, %159, %cst_76 [1] : vector<64x32xf32> to vector<64xf32>
    %165 = vector.shape_cast %164 : vector<64xf32> to vector<64x1xf32>
    %cst_77 = arith.constant 3.200000e+01 : f32
    %166 = vector.broadcast %cst_77 : f32 to vector<64x1xf32>
    %167 = arith.divf %165, %166 : vector<64x1xf32>
    %168 = vector.broadcast %167 : vector<64x1xf32> to vector<64x32xf32>
    %169 = arith.subf %159, %168 : vector<64x32xf32>
    %170 = arith.mulf %169, %169 : vector<64x32xf32>
    %cst_78 = arith.constant dense<0.000000e+00> : vector<64xf32>
    %171 = vector.multi_reduction <add>, %170, %cst_78 [1] : vector<64x32xf32> to vector<64xf32>
    %172 = vector.shape_cast %171 : vector<64xf32> to vector<64x1xf32>
    %cst_79 = arith.constant 3.200000e+01 : f32
    %173 = vector.broadcast %cst_79 : f32 to vector<64x1xf32>
    %174 = arith.divf %172, %173 : vector<64x1xf32>
    %175 = vector.broadcast %167 : vector<64x1xf32> to vector<64x32xf32>
    %176 = arith.subf %159, %175 : vector<64x32xf32>
    %cst_80 = arith.constant 9.99999996E-13 : f32
    %177 = vector.broadcast %cst_80 : f32 to vector<64x1xf32>
    %178 = arith.addf %174, %177 : vector<64x1xf32>
    %179 = math.rsqrt %178 : vector<64x1xf32>
    %180 = vector.broadcast %179 : vector<64x1xf32> to vector<64x32xf32>
    %181 = arith.mulf %176, %180 : vector<64x32xf32>
    %182 = vector.broadcast %161 : vector<1x32xf32> to vector<64x32xf32>
    %183 = arith.mulf %181, %182 : vector<64x32xf32>
    %184 = vector.broadcast %163 : vector<1x32xf32> to vector<64x32xf32>
    %185 = arith.addf %183, %184 : vector<64x32xf32>
    %c1 = arith.constant 1 : index
    %c0_81 = arith.constant 0 : index
    %c0_82 = arith.constant 0 : index
    %186 = vector.load %arg5[%c1, %c0_81, %c0_82] : memref<2x32x96xf32, #tpu.memory_space<vmem>>, vector<1x32x96xf32>
    %187 = vector.shape_cast %186 : vector<1x32x96xf32> to vector<32x96xf32>
    %cst_83 = arith.constant dense<0.000000e+00> : vector<64x96xf32>
    %188 = tpu.matmul %185, %187, %cst_83 {dimension_numbers = #tpu.dot_dimension_numbers<[1], [0], [0], [1], [0, 0, 1, 1], [], []>} : vector<64x32xf32>, vector<32x96xf32>, vector<64x96xf32> -> vector<64x96xf32>
    %c1_84 = arith.constant 1 : index
    %c0_85 = arith.constant 0 : index
    %c0_86 = arith.constant 0 : index
    %189 = vector.load %arg6[%c1_84, %c0_85, %c0_86] : memref<2x1x96xf32, #tpu.memory_space<vmem>>, vector<1x1x96xf32>
    %190 = vector.shape_cast %189 : vector<1x1x96xf32> to vector<1x96xf32>
    %191 = vector.broadcast %190 : vector<1x96xf32> to vector<64x96xf32>
    %192 = arith.addf %188, %191 : vector<64x96xf32>
    %193 = vector.extract_strided_slice %192 {offsets = [0, 0], sizes = [64, 8], strides = [1, 1]} : vector<64x96xf32> to vector<64x8xf32>
    %194 = vector.extract_strided_slice %192 {offsets = [0, 32], sizes = [64, 8], strides = [1, 1]} : vector<64x96xf32> to vector<64x8xf32>
    %195 = vector.extract_strided_slice %192 {offsets = [0, 64], sizes = [64, 8], strides = [1, 1]} : vector<64x96xf32> to vector<64x8xf32>
    %cst_87 = arith.constant dense<0.000000e+00> : vector<64x64xf32>
    %196 = tpu.matmul %193, %194, %cst_87 {dimension_numbers = #tpu.dot_dimension_numbers<[1], [1], [0], [0], [0, 0, 1, 0], [], []>} : vector<64x8xf32>, vector<64x8xf32>, vector<64x64xf32> -> vector<64x64xf32>
    %197 = arith.addf %196, %25 : vector<64x64xf32>
    %cst_88 = arith.constant dense<0xFF800000> : vector<64xf32>
    %198 = vector.multi_reduction <maximumf>, %197, %cst_88 [1] : vector<64x64xf32> to vector<64xf32>
    %199 = vector.shape_cast %198 : vector<64xf32> to vector<64x1xf32>
    %200 = vector.broadcast %199 : vector<64x1xf32> to vector<64x64xf32>
    %201 = arith.subf %197, %200 : vector<64x64xf32>
    %202 = math.exp %201 : vector<64x64xf32>
    %cst_89 = arith.constant dense<0.000000e+00> : vector<64xf32>
    %203 = vector.multi_reduction <add>, %202, %cst_89 [1] : vector<64x64xf32> to vector<64xf32>
    %204 = vector.shape_cast %203 : vector<64xf32> to vector<64x1xf32>
    %205 = tpu.reciprocal %204 {approx = true} : vector<64x1xf32> -> vector<64x1xf32>
    %206 = vector.broadcast %205 : vector<64x1xf32> to vector<64x64xf32>
    %207 = arith.mulf %202, %206 : vector<64x64xf32>
    %cst_90 = arith.constant dense<0.000000e+00> : vector<64x8xf32>
    %208 = tpu.matmul %207, %195, %cst_90 {dimension_numbers = #tpu.dot_dimension_numbers<[1], [0], [0], [1], [0, 0, 1, 1], [], []>} : vector<64x64xf32>, vector<64x8xf32>, vector<64x8xf32> -> vector<64x8xf32>
    %209 = vector.extract_strided_slice %192 {offsets = [0, 8], sizes = [64, 8], strides = [1, 1]} : vector<64x96xf32> to vector<64x8xf32>
    %210 = vector.extract_strided_slice %192 {offsets = [0, 40], sizes = [64, 8], strides = [1, 1]} : vector<64x96xf32> to vector<64x8xf32>
    %211 = vector.extract_strided_slice %192 {offsets = [0, 72], sizes = [64, 8], strides = [1, 1]} : vector<64x96xf32> to vector<64x8xf32>
    %cst_91 = arith.constant dense<0.000000e+00> : vector<64x64xf32>
    %212 = tpu.matmul %209, %210, %cst_91 {dimension_numbers = #tpu.dot_dimension_numbers<[1], [1], [0], [0], [0, 0, 1, 0], [], []>} : vector<64x8xf32>, vector<64x8xf32>, vector<64x64xf32> -> vector<64x64xf32>
    %213 = arith.addf %212, %25 : vector<64x64xf32>
    %cst_92 = arith.constant dense<0xFF800000> : vector<64xf32>
    %214 = vector.multi_reduction <maximumf>, %213, %cst_92 [1] : vector<64x64xf32> to vector<64xf32>
    %215 = vector.shape_cast %214 : vector<64xf32> to vector<64x1xf32>
    %216 = vector.broadcast %215 : vector<64x1xf32> to vector<64x64xf32>
    %217 = arith.subf %213, %216 : vector<64x64xf32>
    %218 = math.exp %217 : vector<64x64xf32>
    %cst_93 = arith.constant dense<0.000000e+00> : vector<64xf32>
    %219 = vector.multi_reduction <add>, %218, %cst_93 [1] : vector<64x64xf32> to vector<64xf32>
    %220 = vector.shape_cast %219 : vector<64xf32> to vector<64x1xf32>
    %221 = tpu.reciprocal %220 {approx = true} : vector<64x1xf32> -> vector<64x1xf32>
    %222 = vector.broadcast %221 : vector<64x1xf32> to vector<64x64xf32>
    %223 = arith.mulf %218, %222 : vector<64x64xf32>
    %cst_94 = arith.constant dense<0.000000e+00> : vector<64x8xf32>
    %224 = tpu.matmul %223, %211, %cst_94 {dimension_numbers = #tpu.dot_dimension_numbers<[1], [0], [0], [1], [0, 0, 1, 1], [], []>} : vector<64x64xf32>, vector<64x8xf32>, vector<64x8xf32> -> vector<64x8xf32>
    %225 = vector.extract_strided_slice %192 {offsets = [0, 16], sizes = [64, 8], strides = [1, 1]} : vector<64x96xf32> to vector<64x8xf32>
    %226 = vector.extract_strided_slice %192 {offsets = [0, 48], sizes = [64, 8], strides = [1, 1]} : vector<64x96xf32> to vector<64x8xf32>
    %227 = vector.extract_strided_slice %192 {offsets = [0, 80], sizes = [64, 8], strides = [1, 1]} : vector<64x96xf32> to vector<64x8xf32>
    %cst_95 = arith.constant dense<0.000000e+00> : vector<64x64xf32>
    %228 = tpu.matmul %225, %226, %cst_95 {dimension_numbers = #tpu.dot_dimension_numbers<[1], [1], [0], [0], [0, 0, 1, 0], [], []>} : vector<64x8xf32>, vector<64x8xf32>, vector<64x64xf32> -> vector<64x64xf32>
    %229 = arith.addf %228, %25 : vector<64x64xf32>
    %cst_96 = arith.constant dense<0xFF800000> : vector<64xf32>
    %230 = vector.multi_reduction <maximumf>, %229, %cst_96 [1] : vector<64x64xf32> to vector<64xf32>
    %231 = vector.shape_cast %230 : vector<64xf32> to vector<64x1xf32>
    %232 = vector.broadcast %231 : vector<64x1xf32> to vector<64x64xf32>
    %233 = arith.subf %229, %232 : vector<64x64xf32>
    %234 = math.exp %233 : vector<64x64xf32>
    %cst_97 = arith.constant dense<0.000000e+00> : vector<64xf32>
    %235 = vector.multi_reduction <add>, %234, %cst_97 [1] : vector<64x64xf32> to vector<64xf32>
    %236 = vector.shape_cast %235 : vector<64xf32> to vector<64x1xf32>
    %237 = tpu.reciprocal %236 {approx = true} : vector<64x1xf32> -> vector<64x1xf32>
    %238 = vector.broadcast %237 : vector<64x1xf32> to vector<64x64xf32>
    %239 = arith.mulf %234, %238 : vector<64x64xf32>
    %cst_98 = arith.constant dense<0.000000e+00> : vector<64x8xf32>
    %240 = tpu.matmul %239, %227, %cst_98 {dimension_numbers = #tpu.dot_dimension_numbers<[1], [0], [0], [1], [0, 0, 1, 1], [], []>} : vector<64x64xf32>, vector<64x8xf32>, vector<64x8xf32> -> vector<64x8xf32>
    %241 = vector.extract_strided_slice %192 {offsets = [0, 24], sizes = [64, 8], strides = [1, 1]} : vector<64x96xf32> to vector<64x8xf32>
    %242 = vector.extract_strided_slice %192 {offsets = [0, 56], sizes = [64, 8], strides = [1, 1]} : vector<64x96xf32> to vector<64x8xf32>
    %243 = vector.extract_strided_slice %192 {offsets = [0, 88], sizes = [64, 8], strides = [1, 1]} : vector<64x96xf32> to vector<64x8xf32>
    %cst_99 = arith.constant dense<0.000000e+00> : vector<64x64xf32>
    %244 = tpu.matmul %241, %242, %cst_99 {dimension_numbers = #tpu.dot_dimension_numbers<[1], [1], [0], [0], [0, 0, 1, 0], [], []>} : vector<64x8xf32>, vector<64x8xf32>, vector<64x64xf32> -> vector<64x64xf32>
    %245 = arith.addf %244, %25 : vector<64x64xf32>
    %cst_100 = arith.constant dense<0xFF800000> : vector<64xf32>
    %246 = vector.multi_reduction <maximumf>, %245, %cst_100 [1] : vector<64x64xf32> to vector<64xf32>
    %247 = vector.shape_cast %246 : vector<64xf32> to vector<64x1xf32>
    %248 = vector.broadcast %247 : vector<64x1xf32> to vector<64x64xf32>
    %249 = arith.subf %245, %248 : vector<64x64xf32>
    %250 = math.exp %249 : vector<64x64xf32>
    %cst_101 = arith.constant dense<0.000000e+00> : vector<64xf32>
    %251 = vector.multi_reduction <add>, %250, %cst_101 [1] : vector<64x64xf32> to vector<64xf32>
    %252 = vector.shape_cast %251 : vector<64xf32> to vector<64x1xf32>
    %253 = tpu.reciprocal %252 {approx = true} : vector<64x1xf32> -> vector<64x1xf32>
    %254 = vector.broadcast %253 : vector<64x1xf32> to vector<64x64xf32>
    %255 = arith.mulf %250, %254 : vector<64x64xf32>
    %cst_102 = arith.constant dense<0.000000e+00> : vector<64x8xf32>
    %256 = tpu.matmul %255, %243, %cst_102 {dimension_numbers = #tpu.dot_dimension_numbers<[1], [0], [0], [1], [0, 0, 1, 1], [], []>} : vector<64x64xf32>, vector<64x8xf32>, vector<64x8xf32> -> vector<64x8xf32>
    %257 = tpu.concatenate %208, %224, %240, %256 in 1 : vector<64x8xf32>, vector<64x8xf32>, vector<64x8xf32>, vector<64x8xf32> -> vector<64x32xf32>
    %c1_103 = arith.constant 1 : index
    %c0_104 = arith.constant 0 : index
    %c0_105 = arith.constant 0 : index
    %258 = vector.load %arg7[%c1_103, %c0_104, %c0_105] : memref<2x32x32xf32, #tpu.memory_space<vmem>>, vector<1x32x32xf32>
    %259 = vector.shape_cast %258 : vector<1x32x32xf32> to vector<32x32xf32>
    %cst_106 = arith.constant dense<0.000000e+00> : vector<64x32xf32>
    %260 = tpu.matmul %257, %259, %cst_106 {dimension_numbers = #tpu.dot_dimension_numbers<[1], [0], [0], [1], [0, 0, 1, 1], [], []>} : vector<64x32xf32>, vector<32x32xf32>, vector<64x32xf32> -> vector<64x32xf32>
    %c1_107 = arith.constant 1 : index
    %c0_108 = arith.constant 0 : index
    %c0_109 = arith.constant 0 : index
    %261 = vector.load %arg8[%c1_107, %c0_108, %c0_109] : memref<2x1x32xf32, #tpu.memory_space<vmem>>, vector<1x1x32xf32>
    %262 = vector.shape_cast %261 : vector<1x1x32xf32> to vector<1x32xf32>
    %263 = vector.broadcast %262 : vector<1x32xf32> to vector<64x32xf32>
    %264 = arith.addf %260, %263 : vector<64x32xf32>
    %265 = arith.addf %264, %185 : vector<64x32xf32>
    %c1_110 = arith.constant 1 : index
    %c0_111 = arith.constant 0 : index
    %c0_112 = arith.constant 0 : index
    %266 = vector.load %arg9[%c1_110, %c0_111, %c0_112] : memref<2x1x32xf32, #tpu.memory_space<vmem>>, vector<1x1x32xf32>
    %267 = vector.shape_cast %266 : vector<1x1x32xf32> to vector<1x32xf32>
    %c1_113 = arith.constant 1 : index
    %c0_114 = arith.constant 0 : index
    %c0_115 = arith.constant 0 : index
    %268 = vector.load %arg10[%c1_113, %c0_114, %c0_115] : memref<2x1x32xf32, #tpu.memory_space<vmem>>, vector<1x1x32xf32>
    %269 = vector.shape_cast %268 : vector<1x1x32xf32> to vector<1x32xf32>
    %cst_116 = arith.constant dense<0.000000e+00> : vector<64xf32>
    %270 = vector.multi_reduction <add>, %265, %cst_116 [1] : vector<64x32xf32> to vector<64xf32>
    %271 = vector.shape_cast %270 : vector<64xf32> to vector<64x1xf32>
    %cst_117 = arith.constant 3.200000e+01 : f32
    %272 = vector.broadcast %cst_117 : f32 to vector<64x1xf32>
    %273 = arith.divf %271, %272 : vector<64x1xf32>
    %274 = vector.broadcast %273 : vector<64x1xf32> to vector<64x32xf32>
    %275 = arith.subf %265, %274 : vector<64x32xf32>
    %276 = arith.mulf %275, %275 : vector<64x32xf32>
    %cst_118 = arith.constant dense<0.000000e+00> : vector<64xf32>
    %277 = vector.multi_reduction <add>, %276, %cst_118 [1] : vector<64x32xf32> to vector<64xf32>
    %278 = vector.shape_cast %277 : vector<64xf32> to vector<64x1xf32>
    %cst_119 = arith.constant 3.200000e+01 : f32
    %279 = vector.broadcast %cst_119 : f32 to vector<64x1xf32>
    %280 = arith.divf %278, %279 : vector<64x1xf32>
    %281 = vector.broadcast %273 : vector<64x1xf32> to vector<64x32xf32>
    %282 = arith.subf %265, %281 : vector<64x32xf32>
    %cst_120 = arith.constant 9.99999996E-13 : f32
    %283 = vector.broadcast %cst_120 : f32 to vector<64x1xf32>
    %284 = arith.addf %280, %283 : vector<64x1xf32>
    %285 = math.rsqrt %284 : vector<64x1xf32>
    %286 = vector.broadcast %285 : vector<64x1xf32> to vector<64x32xf32>
    %287 = arith.mulf %282, %286 : vector<64x32xf32>
    %288 = vector.broadcast %267 : vector<1x32xf32> to vector<64x32xf32>
    %289 = arith.mulf %287, %288 : vector<64x32xf32>
    %290 = vector.broadcast %269 : vector<1x32xf32> to vector<64x32xf32>
    %291 = arith.addf %289, %290 : vector<64x32xf32>
    %c1_121 = arith.constant 1 : index
    %c0_122 = arith.constant 0 : index
    %c0_123 = arith.constant 0 : index
    %292 = vector.load %arg11[%c1_121, %c0_122, %c0_123] : memref<2x32x64xf32, #tpu.memory_space<vmem>>, vector<1x32x64xf32>
    %293 = vector.shape_cast %292 : vector<1x32x64xf32> to vector<32x64xf32>
    %cst_124 = arith.constant dense<0.000000e+00> : vector<64x64xf32>
    %294 = tpu.matmul %291, %293, %cst_124 {dimension_numbers = #tpu.dot_dimension_numbers<[1], [0], [0], [1], [0, 0, 1, 1], [], []>} : vector<64x32xf32>, vector<32x64xf32>, vector<64x64xf32> -> vector<64x64xf32>
    %c1_125 = arith.constant 1 : index
    %c0_126 = arith.constant 0 : index
    %c0_127 = arith.constant 0 : index
    %295 = vector.load %arg12[%c1_125, %c0_126, %c0_127] : memref<2x1x64xf32, #tpu.memory_space<vmem>>, vector<1x1x64xf32>
    %296 = vector.shape_cast %295 : vector<1x1x64xf32> to vector<1x64xf32>
    %297 = vector.broadcast %296 : vector<1x64xf32> to vector<64x64xf32>
    %298 = arith.addf %294, %297 : vector<64x64xf32>
    %299 = arith.mulf %298, %298 : vector<64x64xf32>
    %300 = arith.mulf %298, %299 : vector<64x64xf32>
    %cst_128 = arith.constant 4.471500e-02 : f32
    %301 = vector.broadcast %cst_128 : f32 to vector<64x64xf32>
    %302 = arith.mulf %301, %300 : vector<64x64xf32>
    %303 = arith.addf %298, %302 : vector<64x64xf32>
    %cst_129 = arith.constant 0.797884583 : f32
    %304 = vector.broadcast %cst_129 : f32 to vector<64x64xf32>
    %305 = arith.mulf %304, %303 : vector<64x64xf32>
    %306 = math.tanh %305 : vector<64x64xf32>
    %cst_130 = arith.constant 1.000000e+00 : f32
    %307 = vector.broadcast %cst_130 : f32 to vector<64x64xf32>
    %308 = arith.addf %307, %306 : vector<64x64xf32>
    %cst_131 = arith.constant 5.000000e-01 : f32
    %309 = vector.broadcast %cst_131 : f32 to vector<64x64xf32>
    %310 = arith.mulf %309, %308 : vector<64x64xf32>
    %311 = arith.mulf %298, %310 : vector<64x64xf32>
    %c1_132 = arith.constant 1 : index
    %c0_133 = arith.constant 0 : index
    %c0_134 = arith.constant 0 : index
    %312 = vector.load %arg13[%c1_132, %c0_133, %c0_134] : memref<2x64x32xf32, #tpu.memory_space<vmem>>, vector<1x64x32xf32>
    %313 = vector.shape_cast %312 : vector<1x64x32xf32> to vector<64x32xf32>
    %cst_135 = arith.constant dense<0.000000e+00> : vector<64x32xf32>
    %314 = tpu.matmul %311, %313, %cst_135 {dimension_numbers = #tpu.dot_dimension_numbers<[1], [0], [0], [1], [0, 0, 1, 1], [], []>} : vector<64x64xf32>, vector<64x32xf32>, vector<64x32xf32> -> vector<64x32xf32>
    %c1_136 = arith.constant 1 : index
    %c0_137 = arith.constant 0 : index
    %c0_138 = arith.constant 0 : index
    %315 = vector.load %arg14[%c1_136, %c0_137, %c0_138] : memref<2x1x32xf32, #tpu.memory_space<vmem>>, vector<1x1x32xf32>
    %316 = vector.shape_cast %315 : vector<1x1x32xf32> to vector<1x32xf32>
    %317 = vector.broadcast %316 : vector<1x32xf32> to vector<64x32xf32>
    %318 = arith.addf %314, %317 : vector<64x32xf32>
    %319 = arith.addf %318, %291 : vector<64x32xf32>
    %c1_139 = arith.constant 1 : index
    %c0_140 = arith.constant 0 : index
    %c0_141 = arith.constant 0 : index
    %320 = vector.load %arg15[%c1_139, %c0_140, %c0_141] : memref<2x1x32xf32, #tpu.memory_space<vmem>>, vector<1x1x32xf32>
    %321 = vector.shape_cast %320 : vector<1x1x32xf32> to vector<1x32xf32>
    %c1_142 = arith.constant 1 : index
    %c0_143 = arith.constant 0 : index
    %c0_144 = arith.constant 0 : index
    %322 = vector.load %arg16[%c1_142, %c0_143, %c0_144] : memref<2x1x32xf32, #tpu.memory_space<vmem>>, vector<1x1x32xf32>
    %323 = vector.shape_cast %322 : vector<1x1x32xf32> to vector<1x32xf32>
    %cst_145 = arith.constant dense<0.000000e+00> : vector<64xf32>
    %324 = vector.multi_reduction <add>, %319, %cst_145 [1] : vector<64x32xf32> to vector<64xf32>
    %325 = vector.shape_cast %324 : vector<64xf32> to vector<64x1xf32>
    %cst_146 = arith.constant 3.200000e+01 : f32
    %326 = vector.broadcast %cst_146 : f32 to vector<64x1xf32>
    %327 = arith.divf %325, %326 : vector<64x1xf32>
    %328 = vector.broadcast %327 : vector<64x1xf32> to vector<64x32xf32>
    %329 = arith.subf %319, %328 : vector<64x32xf32>
    %330 = arith.mulf %329, %329 : vector<64x32xf32>
    %cst_147 = arith.constant dense<0.000000e+00> : vector<64xf32>
    %331 = vector.multi_reduction <add>, %330, %cst_147 [1] : vector<64x32xf32> to vector<64xf32>
    %332 = vector.shape_cast %331 : vector<64xf32> to vector<64x1xf32>
    %cst_148 = arith.constant 3.200000e+01 : f32
    %333 = vector.broadcast %cst_148 : f32 to vector<64x1xf32>
    %334 = arith.divf %332, %333 : vector<64x1xf32>
    %335 = vector.broadcast %327 : vector<64x1xf32> to vector<64x32xf32>
    %336 = arith.subf %319, %335 : vector<64x32xf32>
    %cst_149 = arith.constant 9.99999996E-13 : f32
    %337 = vector.broadcast %cst_149 : f32 to vector<64x1xf32>
    %338 = arith.addf %334, %337 : vector<64x1xf32>
    %339 = math.rsqrt %338 : vector<64x1xf32>
    %340 = vector.broadcast %339 : vector<64x1xf32> to vector<64x32xf32>
    %341 = arith.mulf %336, %340 : vector<64x32xf32>
    %342 = vector.broadcast %321 : vector<1x32xf32> to vector<64x32xf32>
    %343 = arith.mulf %341, %342 : vector<64x32xf32>
    %344 = vector.broadcast %323 : vector<1x32xf32> to vector<64x32xf32>
    %345 = arith.addf %343, %344 : vector<64x32xf32>
    %346 = tpu.iota {dimensions = array<i32: 0>} : vector<8x64xi32>
    %347 = tpu.iota {dimensions = array<i32: 1>} : vector<8x64xi32>
    %c8_i32 = arith.constant 8 : i32
    %348 = vector.broadcast %c8_i32 : i32 to vector<8x64xi32>
    %349 = arith.muli %346, %348 : vector<8x64xi32>
    %350 = arith.cmpi eq, %347, %349 : vector<8x64xi32>
    %351 = arith.extui %350 : vector<8x64xi1> to vector<8x64xi32>
    %352 = arith.sitofp %351 : vector<8x64xi32> to vector<8x64xf32>
    %cst_150 = arith.constant dense<0.000000e+00> : vector<8x32xf32>
    %353 = tpu.matmul %352, %345, %cst_150 {dimension_numbers = #tpu.dot_dimension_numbers<[1], [0], [0], [1], [0, 0, 1, 1], [], []>} : vector<8x64xf32>, vector<64x32xf32>, vector<8x32xf32> -> vector<8x32xf32>
    %c0_151 = arith.constant 0 : index
    %c0_152 = arith.constant 0 : index
    %354 = vector.load %arg17[%c0_151, %c0_152] : memref<8x8xf32, #tpu.memory_space<vmem>>, vector<8x8xf32>
    %c0_153 = arith.constant 0 : index
    %c0_154 = arith.constant 0 : index
    %355 = vector.load %arg18[%c0_153, %c0_154] : memref<32x128xf32, #tpu.memory_space<vmem>>, vector<32x128xf32>
    %cst_155 = arith.constant dense<0.000000e+00> : vector<8x128xf32>
    %356 = tpu.matmul %353, %355, %cst_155 {dimension_numbers = #tpu.dot_dimension_numbers<[1], [0], [0], [1], [0, 0, 1, 1], [], []>} : vector<8x32xf32>, vector<32x128xf32>, vector<8x128xf32> -> vector<8x128xf32>
    %c0_156 = arith.constant 0 : index
    %c0_157 = arith.constant 0 : index
    %357 = vector.load %arg20[%c0_156, %c0_157] : memref<8x128xf32, #tpu.memory_space<vmem>>, vector<8x128xf32>
    %cst_158 = arith.constant dense<0.000000e+00> : vector<8x8xf32>
    %358 = tpu.matmul %356, %357, %cst_158 {dimension_numbers = #tpu.dot_dimension_numbers<[1], [1], [0], [0], [0, 0, 1, 0], [], []>} : vector<8x128xf32>, vector<8x128xf32>, vector<8x8xf32> -> vector<8x8xf32>
    %c0_159 = arith.constant 0 : index
    %c0_160 = arith.constant 0 : index
    %359 = vector.load %arg19[%c0_159, %c0_160] : memref<8x128xf32, #tpu.memory_space<vmem>>, vector<8x128xf32>
    %cst_161 = arith.constant dense<0.000000e+00> : vector<8x8xf32>
    %360 = tpu.matmul %359, %356, %cst_161 {dimension_numbers = #tpu.dot_dimension_numbers<[1], [1], [0], [0], [0, 0, 1, 0], [], []>} : vector<8x128xf32>, vector<8x128xf32>, vector<8x8xf32> -> vector<8x8xf32>
    %361 = vector.extract_strided_slice %358 {offsets = [0, 0], sizes = [8, 1], strides = [1, 1]} : vector<8x8xf32> to vector<8x1xf32>
    %362 = vector.extract_strided_slice %360 {offsets = [0, 0], sizes = [1, 8], strides = [1, 1]} : vector<8x8xf32> to vector<1x8xf32>
    %363 = vector.broadcast %361 : vector<8x1xf32> to vector<8x8xf32>
    %364 = vector.broadcast %362 : vector<1x8xf32> to vector<8x8xf32>
    %365 = arith.addf %363, %364 : vector<8x8xf32>
    %cst_162 = arith.constant 0.000000e+00 : f32
    %366 = vector.broadcast %cst_162 : f32 to vector<8x8xf32>
    %367 = arith.cmpf ogt, %365, %366 : vector<8x8xf32>
    %cst_163 = arith.constant 2.000000e-01 : f32
    %368 = vector.broadcast %cst_163 : f32 to vector<8x8xf32>
    %369 = arith.mulf %368, %365 : vector<8x8xf32>
    %370 = arith.select %367, %365, %369 : vector<8x8xi1>, vector<8x8xf32>
    %371 = arith.addf %370, %354 : vector<8x8xf32>
    %cst_164 = arith.constant dense<0xFF800000> : vector<8xf32>
    %372 = vector.multi_reduction <maximumf>, %371, %cst_164 [1] : vector<8x8xf32> to vector<8xf32>
    %373 = vector.shape_cast %372 : vector<8xf32> to vector<8x1xf32>
    %374 = vector.broadcast %373 : vector<8x1xf32> to vector<8x8xf32>
    %375 = arith.subf %371, %374 : vector<8x8xf32>
    %376 = math.exp %375 : vector<8x8xf32>
    %cst_165 = arith.constant dense<0.000000e+00> : vector<8xf32>
    %377 = vector.multi_reduction <add>, %376, %cst_165 [1] : vector<8x8xf32> to vector<8xf32>
    %378 = vector.shape_cast %377 : vector<8xf32> to vector<8x1xf32>
    %379 = tpu.reciprocal %378 {approx = true} : vector<8x1xf32> -> vector<8x1xf32>
    %380 = vector.broadcast %379 : vector<8x1xf32> to vector<8x8xf32>
    %381 = arith.mulf %376, %380 : vector<8x8xf32>
    %382 = vector.extract_strided_slice %356 {offsets = [0, 0], sizes = [8, 16], strides = [1, 1]} : vector<8x128xf32> to vector<8x16xf32>
    %cst_166 = arith.constant dense<0.000000e+00> : vector<8x16xf32>
    %383 = tpu.matmul %381, %382, %cst_166 {dimension_numbers = #tpu.dot_dimension_numbers<[1], [0], [0], [1], [0, 0, 1, 1], [], []>} : vector<8x8xf32>, vector<8x16xf32>, vector<8x16xf32> -> vector<8x16xf32>
    %384 = vector.extract_strided_slice %358 {offsets = [0, 1], sizes = [8, 1], strides = [1, 1]} : vector<8x8xf32> to vector<8x1xf32>
    %385 = vector.extract_strided_slice %360 {offsets = [1, 0], sizes = [1, 8], strides = [1, 1]} : vector<8x8xf32> to vector<1x8xf32>
    %386 = vector.broadcast %384 : vector<8x1xf32> to vector<8x8xf32>
    %387 = vector.broadcast %385 : vector<1x8xf32> to vector<8x8xf32>
    %388 = arith.addf %386, %387 : vector<8x8xf32>
    %cst_167 = arith.constant 0.000000e+00 : f32
    %389 = vector.broadcast %cst_167 : f32 to vector<8x8xf32>
    %390 = arith.cmpf ogt, %388, %389 : vector<8x8xf32>
    %cst_168 = arith.constant 2.000000e-01 : f32
    %391 = vector.broadcast %cst_168 : f32 to vector<8x8xf32>
    %392 = arith.mulf %391, %388 : vector<8x8xf32>
    %393 = arith.select %390, %388, %392 : vector<8x8xi1>, vector<8x8xf32>
    %394 = arith.addf %393, %354 : vector<8x8xf32>
    %cst_169 = arith.constant dense<0xFF800000> : vector<8xf32>
    %395 = vector.multi_reduction <maximumf>, %394, %cst_169 [1] : vector<8x8xf32> to vector<8xf32>
    %396 = vector.shape_cast %395 : vector<8xf32> to vector<8x1xf32>
    %397 = vector.broadcast %396 : vector<8x1xf32> to vector<8x8xf32>
    %398 = arith.subf %394, %397 : vector<8x8xf32>
    %399 = math.exp %398 : vector<8x8xf32>
    %cst_170 = arith.constant dense<0.000000e+00> : vector<8xf32>
    %400 = vector.multi_reduction <add>, %399, %cst_170 [1] : vector<8x8xf32> to vector<8xf32>
    %401 = vector.shape_cast %400 : vector<8xf32> to vector<8x1xf32>
    %402 = tpu.reciprocal %401 {approx = true} : vector<8x1xf32> -> vector<8x1xf32>
    %403 = vector.broadcast %402 : vector<8x1xf32> to vector<8x8xf32>
    %404 = arith.mulf %399, %403 : vector<8x8xf32>
    %405 = vector.extract_strided_slice %356 {offsets = [0, 16], sizes = [8, 16], strides = [1, 1]} : vector<8x128xf32> to vector<8x16xf32>
    %cst_171 = arith.constant dense<0.000000e+00> : vector<8x16xf32>
    %406 = tpu.matmul %404, %405, %cst_171 {dimension_numbers = #tpu.dot_dimension_numbers<[1], [0], [0], [1], [0, 0, 1, 1], [], []>} : vector<8x8xf32>, vector<8x16xf32>, vector<8x16xf32> -> vector<8x16xf32>
    %407 = vector.extract_strided_slice %358 {offsets = [0, 2], sizes = [8, 1], strides = [1, 1]} : vector<8x8xf32> to vector<8x1xf32>
    %408 = vector.extract_strided_slice %360 {offsets = [2, 0], sizes = [1, 8], strides = [1, 1]} : vector<8x8xf32> to vector<1x8xf32>
    %409 = vector.broadcast %407 : vector<8x1xf32> to vector<8x8xf32>
    %410 = vector.broadcast %408 : vector<1x8xf32> to vector<8x8xf32>
    %411 = arith.addf %409, %410 : vector<8x8xf32>
    %cst_172 = arith.constant 0.000000e+00 : f32
    %412 = vector.broadcast %cst_172 : f32 to vector<8x8xf32>
    %413 = arith.cmpf ogt, %411, %412 : vector<8x8xf32>
    %cst_173 = arith.constant 2.000000e-01 : f32
    %414 = vector.broadcast %cst_173 : f32 to vector<8x8xf32>
    %415 = arith.mulf %414, %411 : vector<8x8xf32>
    %416 = arith.select %413, %411, %415 : vector<8x8xi1>, vector<8x8xf32>
    %417 = arith.addf %416, %354 : vector<8x8xf32>
    %cst_174 = arith.constant dense<0xFF800000> : vector<8xf32>
    %418 = vector.multi_reduction <maximumf>, %417, %cst_174 [1] : vector<8x8xf32> to vector<8xf32>
    %419 = vector.shape_cast %418 : vector<8xf32> to vector<8x1xf32>
    %420 = vector.broadcast %419 : vector<8x1xf32> to vector<8x8xf32>
    %421 = arith.subf %417, %420 : vector<8x8xf32>
    %422 = math.exp %421 : vector<8x8xf32>
    %cst_175 = arith.constant dense<0.000000e+00> : vector<8xf32>
    %423 = vector.multi_reduction <add>, %422, %cst_175 [1] : vector<8x8xf32> to vector<8xf32>
    %424 = vector.shape_cast %423 : vector<8xf32> to vector<8x1xf32>
    %425 = tpu.reciprocal %424 {approx = true} : vector<8x1xf32> -> vector<8x1xf32>
    %426 = vector.broadcast %425 : vector<8x1xf32> to vector<8x8xf32>
    %427 = arith.mulf %422, %426 : vector<8x8xf32>
    %428 = vector.extract_strided_slice %356 {offsets = [0, 32], sizes = [8, 16], strides = [1, 1]} : vector<8x128xf32> to vector<8x16xf32>
    %cst_176 = arith.constant dense<0.000000e+00> : vector<8x16xf32>
    %429 = tpu.matmul %427, %428, %cst_176 {dimension_numbers = #tpu.dot_dimension_numbers<[1], [0], [0], [1], [0, 0, 1, 1], [], []>} : vector<8x8xf32>, vector<8x16xf32>, vector<8x16xf32> -> vector<8x16xf32>
    %430 = vector.extract_strided_slice %358 {offsets = [0, 3], sizes = [8, 1], strides = [1, 1]} : vector<8x8xf32> to vector<8x1xf32>
    %431 = vector.extract_strided_slice %360 {offsets = [3, 0], sizes = [1, 8], strides = [1, 1]} : vector<8x8xf32> to vector<1x8xf32>
    %432 = vector.broadcast %430 : vector<8x1xf32> to vector<8x8xf32>
    %433 = vector.broadcast %431 : vector<1x8xf32> to vector<8x8xf32>
    %434 = arith.addf %432, %433 : vector<8x8xf32>
    %cst_177 = arith.constant 0.000000e+00 : f32
    %435 = vector.broadcast %cst_177 : f32 to vector<8x8xf32>
    %436 = arith.cmpf ogt, %434, %435 : vector<8x8xf32>
    %cst_178 = arith.constant 2.000000e-01 : f32
    %437 = vector.broadcast %cst_178 : f32 to vector<8x8xf32>
    %438 = arith.mulf %437, %434 : vector<8x8xf32>
    %439 = arith.select %436, %434, %438 : vector<8x8xi1>, vector<8x8xf32>
    %440 = arith.addf %439, %354 : vector<8x8xf32>
    %cst_179 = arith.constant dense<0xFF800000> : vector<8xf32>
    %441 = vector.multi_reduction <maximumf>, %440, %cst_179 [1] : vector<8x8xf32> to vector<8xf32>
    %442 = vector.shape_cast %441 : vector<8xf32> to vector<8x1xf32>
    %443 = vector.broadcast %442 : vector<8x1xf32> to vector<8x8xf32>
    %444 = arith.subf %440, %443 : vector<8x8xf32>
    %445 = math.exp %444 : vector<8x8xf32>
    %cst_180 = arith.constant dense<0.000000e+00> : vector<8xf32>
    %446 = vector.multi_reduction <add>, %445, %cst_180 [1] : vector<8x8xf32> to vector<8xf32>
    %447 = vector.shape_cast %446 : vector<8xf32> to vector<8x1xf32>
    %448 = tpu.reciprocal %447 {approx = true} : vector<8x1xf32> -> vector<8x1xf32>
    %449 = vector.broadcast %448 : vector<8x1xf32> to vector<8x8xf32>
    %450 = arith.mulf %445, %449 : vector<8x8xf32>
    %451 = vector.extract_strided_slice %356 {offsets = [0, 48], sizes = [8, 16], strides = [1, 1]} : vector<8x128xf32> to vector<8x16xf32>
    %cst_181 = arith.constant dense<0.000000e+00> : vector<8x16xf32>
    %452 = tpu.matmul %450, %451, %cst_181 {dimension_numbers = #tpu.dot_dimension_numbers<[1], [0], [0], [1], [0, 0, 1, 1], [], []>} : vector<8x8xf32>, vector<8x16xf32>, vector<8x16xf32> -> vector<8x16xf32>
    %453 = vector.extract_strided_slice %358 {offsets = [0, 4], sizes = [8, 1], strides = [1, 1]} : vector<8x8xf32> to vector<8x1xf32>
    %454 = vector.extract_strided_slice %360 {offsets = [4, 0], sizes = [1, 8], strides = [1, 1]} : vector<8x8xf32> to vector<1x8xf32>
    %455 = vector.broadcast %453 : vector<8x1xf32> to vector<8x8xf32>
    %456 = vector.broadcast %454 : vector<1x8xf32> to vector<8x8xf32>
    %457 = arith.addf %455, %456 : vector<8x8xf32>
    %cst_182 = arith.constant 0.000000e+00 : f32
    %458 = vector.broadcast %cst_182 : f32 to vector<8x8xf32>
    %459 = arith.cmpf ogt, %457, %458 : vector<8x8xf32>
    %cst_183 = arith.constant 2.000000e-01 : f32
    %460 = vector.broadcast %cst_183 : f32 to vector<8x8xf32>
    %461 = arith.mulf %460, %457 : vector<8x8xf32>
    %462 = arith.select %459, %457, %461 : vector<8x8xi1>, vector<8x8xf32>
    %463 = arith.addf %462, %354 : vector<8x8xf32>
    %cst_184 = arith.constant dense<0xFF800000> : vector<8xf32>
    %464 = vector.multi_reduction <maximumf>, %463, %cst_184 [1] : vector<8x8xf32> to vector<8xf32>
    %465 = vector.shape_cast %464 : vector<8xf32> to vector<8x1xf32>
    %466 = vector.broadcast %465 : vector<8x1xf32> to vector<8x8xf32>
    %467 = arith.subf %463, %466 : vector<8x8xf32>
    %468 = math.exp %467 : vector<8x8xf32>
    %cst_185 = arith.constant dense<0.000000e+00> : vector<8xf32>
    %469 = vector.multi_reduction <add>, %468, %cst_185 [1] : vector<8x8xf32> to vector<8xf32>
    %470 = vector.shape_cast %469 : vector<8xf32> to vector<8x1xf32>
    %471 = tpu.reciprocal %470 {approx = true} : vector<8x1xf32> -> vector<8x1xf32>
    %472 = vector.broadcast %471 : vector<8x1xf32> to vector<8x8xf32>
    %473 = arith.mulf %468, %472 : vector<8x8xf32>
    %474 = vector.extract_strided_slice %356 {offsets = [0, 64], sizes = [8, 16], strides = [1, 1]} : vector<8x128xf32> to vector<8x16xf32>
    %cst_186 = arith.constant dense<0.000000e+00> : vector<8x16xf32>
    %475 = tpu.matmul %473, %474, %cst_186 {dimension_numbers = #tpu.dot_dimension_numbers<[1], [0], [0], [1], [0, 0, 1, 1], [], []>} : vector<8x8xf32>, vector<8x16xf32>, vector<8x16xf32> -> vector<8x16xf32>
    %476 = vector.extract_strided_slice %358 {offsets = [0, 5], sizes = [8, 1], strides = [1, 1]} : vector<8x8xf32> to vector<8x1xf32>
    %477 = vector.extract_strided_slice %360 {offsets = [5, 0], sizes = [1, 8], strides = [1, 1]} : vector<8x8xf32> to vector<1x8xf32>
    %478 = vector.broadcast %476 : vector<8x1xf32> to vector<8x8xf32>
    %479 = vector.broadcast %477 : vector<1x8xf32> to vector<8x8xf32>
    %480 = arith.addf %478, %479 : vector<8x8xf32>
    %cst_187 = arith.constant 0.000000e+00 : f32
    %481 = vector.broadcast %cst_187 : f32 to vector<8x8xf32>
    %482 = arith.cmpf ogt, %480, %481 : vector<8x8xf32>
    %cst_188 = arith.constant 2.000000e-01 : f32
    %483 = vector.broadcast %cst_188 : f32 to vector<8x8xf32>
    %484 = arith.mulf %483, %480 : vector<8x8xf32>
    %485 = arith.select %482, %480, %484 : vector<8x8xi1>, vector<8x8xf32>
    %486 = arith.addf %485, %354 : vector<8x8xf32>
    %cst_189 = arith.constant dense<0xFF800000> : vector<8xf32>
    %487 = vector.multi_reduction <maximumf>, %486, %cst_189 [1] : vector<8x8xf32> to vector<8xf32>
    %488 = vector.shape_cast %487 : vector<8xf32> to vector<8x1xf32>
    %489 = vector.broadcast %488 : vector<8x1xf32> to vector<8x8xf32>
    %490 = arith.subf %486, %489 : vector<8x8xf32>
    %491 = math.exp %490 : vector<8x8xf32>
    %cst_190 = arith.constant dense<0.000000e+00> : vector<8xf32>
    %492 = vector.multi_reduction <add>, %491, %cst_190 [1] : vector<8x8xf32> to vector<8xf32>
    %493 = vector.shape_cast %492 : vector<8xf32> to vector<8x1xf32>
    %494 = tpu.reciprocal %493 {approx = true} : vector<8x1xf32> -> vector<8x1xf32>
    %495 = vector.broadcast %494 : vector<8x1xf32> to vector<8x8xf32>
    %496 = arith.mulf %491, %495 : vector<8x8xf32>
    %497 = vector.extract_strided_slice %356 {offsets = [0, 80], sizes = [8, 16], strides = [1, 1]} : vector<8x128xf32> to vector<8x16xf32>
    %cst_191 = arith.constant dense<0.000000e+00> : vector<8x16xf32>
    %498 = tpu.matmul %496, %497, %cst_191 {dimension_numbers = #tpu.dot_dimension_numbers<[1], [0], [0], [1], [0, 0, 1, 1], [], []>} : vector<8x8xf32>, vector<8x16xf32>, vector<8x16xf32> -> vector<8x16xf32>
    %499 = vector.extract_strided_slice %358 {offsets = [0, 6], sizes = [8, 1], strides = [1, 1]} : vector<8x8xf32> to vector<8x1xf32>
    %500 = vector.extract_strided_slice %360 {offsets = [6, 0], sizes = [1, 8], strides = [1, 1]} : vector<8x8xf32> to vector<1x8xf32>
    %501 = vector.broadcast %499 : vector<8x1xf32> to vector<8x8xf32>
    %502 = vector.broadcast %500 : vector<1x8xf32> to vector<8x8xf32>
    %503 = arith.addf %501, %502 : vector<8x8xf32>
    %cst_192 = arith.constant 0.000000e+00 : f32
    %504 = vector.broadcast %cst_192 : f32 to vector<8x8xf32>
    %505 = arith.cmpf ogt, %503, %504 : vector<8x8xf32>
    %cst_193 = arith.constant 2.000000e-01 : f32
    %506 = vector.broadcast %cst_193 : f32 to vector<8x8xf32>
    %507 = arith.mulf %506, %503 : vector<8x8xf32>
    %508 = arith.select %505, %503, %507 : vector<8x8xi1>, vector<8x8xf32>
    %509 = arith.addf %508, %354 : vector<8x8xf32>
    %cst_194 = arith.constant dense<0xFF800000> : vector<8xf32>
    %510 = vector.multi_reduction <maximumf>, %509, %cst_194 [1] : vector<8x8xf32> to vector<8xf32>
    %511 = vector.shape_cast %510 : vector<8xf32> to vector<8x1xf32>
    %512 = vector.broadcast %511 : vector<8x1xf32> to vector<8x8xf32>
    %513 = arith.subf %509, %512 : vector<8x8xf32>
    %514 = math.exp %513 : vector<8x8xf32>
    %cst_195 = arith.constant dense<0.000000e+00> : vector<8xf32>
    %515 = vector.multi_reduction <add>, %514, %cst_195 [1] : vector<8x8xf32> to vector<8xf32>
    %516 = vector.shape_cast %515 : vector<8xf32> to vector<8x1xf32>
    %517 = tpu.reciprocal %516 {approx = true} : vector<8x1xf32> -> vector<8x1xf32>
    %518 = vector.broadcast %517 : vector<8x1xf32> to vector<8x8xf32>
    %519 = arith.mulf %514, %518 : vector<8x8xf32>
    %520 = vector.extract_strided_slice %356 {offsets = [0, 96], sizes = [8, 16], strides = [1, 1]} : vector<8x128xf32> to vector<8x16xf32>
    %cst_196 = arith.constant dense<0.000000e+00> : vector<8x16xf32>
    %521 = tpu.matmul %519, %520, %cst_196 {dimension_numbers = #tpu.dot_dimension_numbers<[1], [0], [0], [1], [0, 0, 1, 1], [], []>} : vector<8x8xf32>, vector<8x16xf32>, vector<8x16xf32> -> vector<8x16xf32>
    %522 = vector.extract_strided_slice %358 {offsets = [0, 7], sizes = [8, 1], strides = [1, 1]} : vector<8x8xf32> to vector<8x1xf32>
    %523 = vector.extract_strided_slice %360 {offsets = [7, 0], sizes = [1, 8], strides = [1, 1]} : vector<8x8xf32> to vector<1x8xf32>
    %524 = vector.broadcast %522 : vector<8x1xf32> to vector<8x8xf32>
    %525 = vector.broadcast %523 : vector<1x8xf32> to vector<8x8xf32>
    %526 = arith.addf %524, %525 : vector<8x8xf32>
    %cst_197 = arith.constant 0.000000e+00 : f32
    %527 = vector.broadcast %cst_197 : f32 to vector<8x8xf32>
    %528 = arith.cmpf ogt, %526, %527 : vector<8x8xf32>
    %cst_198 = arith.constant 2.000000e-01 : f32
    %529 = vector.broadcast %cst_198 : f32 to vector<8x8xf32>
    %530 = arith.mulf %529, %526 : vector<8x8xf32>
    %531 = arith.select %528, %526, %530 : vector<8x8xi1>, vector<8x8xf32>
    %532 = arith.addf %531, %354 : vector<8x8xf32>
    %cst_199 = arith.constant dense<0xFF800000> : vector<8xf32>
    %533 = vector.multi_reduction <maximumf>, %532, %cst_199 [1] : vector<8x8xf32> to vector<8xf32>
    %534 = vector.shape_cast %533 : vector<8xf32> to vector<8x1xf32>
    %535 = vector.broadcast %534 : vector<8x1xf32> to vector<8x8xf32>
    %536 = arith.subf %532, %535 : vector<8x8xf32>
    %537 = math.exp %536 : vector<8x8xf32>
    %cst_200 = arith.constant dense<0.000000e+00> : vector<8xf32>
    %538 = vector.multi_reduction <add>, %537, %cst_200 [1] : vector<8x8xf32> to vector<8xf32>
    %539 = vector.shape_cast %538 : vector<8xf32> to vector<8x1xf32>
    %540 = tpu.reciprocal %539 {approx = true} : vector<8x1xf32> -> vector<8x1xf32>
    %541 = vector.broadcast %540 : vector<8x1xf32> to vector<8x8xf32>
    %542 = arith.mulf %537, %541 : vector<8x8xf32>
    %543 = vector.extract_strided_slice %356 {offsets = [0, 112], sizes = [8, 16], strides = [1, 1]} : vector<8x128xf32> to vector<8x16xf32>
    %cst_201 = arith.constant dense<0.000000e+00> : vector<8x16xf32>
    %544 = tpu.matmul %542, %543, %cst_201 {dimension_numbers = #tpu.dot_dimension_numbers<[1], [0], [0], [1], [0, 0, 1, 1], [], []>} : vector<8x8xf32>, vector<8x16xf32>, vector<8x16xf32> -> vector<8x16xf32>
    %545 = tpu.concatenate %383, %406, %429, %452, %475, %498, %521, %544 in 1 : vector<8x16xf32>, vector<8x16xf32>, vector<8x16xf32>, vector<8x16xf32>, vector<8x16xf32>, vector<8x16xf32>, vector<8x16xf32>, vector<8x16xf32> -> vector<8x128xf32>
    %c0_202 = arith.constant 0 : index
    %c0_203 = arith.constant 0 : index
    %546 = vector.load %arg21[%c0_202, %c0_203] : memref<1x128xf32, #tpu.memory_space<vmem>>, vector<1x128xf32>
    %547 = vector.broadcast %546 : vector<1x128xf32> to vector<8x128xf32>
    %548 = arith.addf %545, %547 : vector<8x128xf32>
    %cst_204 = arith.constant 0.000000e+00 : f32
    %549 = vector.broadcast %cst_204 : f32 to vector<8x128xf32>
    %550 = arith.cmpf ogt, %548, %549 : vector<8x128xf32>
    %cst_205 = arith.constant 0.000000e+00 : f32
    %551 = vector.broadcast %cst_205 : f32 to vector<8x128xf32>
    %552 = arith.minimumf %548, %551 : vector<8x128xf32>
    %553 = math.exp %552 : vector<8x128xf32>
    %cst_206 = arith.constant 1.000000e+00 : f32
    %554 = vector.broadcast %cst_206 : f32 to vector<8x128xf32>
    %555 = arith.subf %553, %554 : vector<8x128xf32>
    %556 = arith.select %550, %548, %555 : vector<8x128xi1>, vector<8x128xf32>
    %c0_207 = arith.constant 0 : index
    %c0_208 = arith.constant 0 : index
    %557 = vector.load %arg22[%c0_207, %c0_208] : memref<128x64xf32, #tpu.memory_space<vmem>>, vector<128x64xf32>
    %cst_209 = arith.constant dense<0.000000e+00> : vector<8x64xf32>
    %558 = tpu.matmul %556, %557, %cst_209 {dimension_numbers = #tpu.dot_dimension_numbers<[1], [0], [0], [1], [0, 0, 1, 1], [], []>} : vector<8x128xf32>, vector<128x64xf32>, vector<8x64xf32> -> vector<8x64xf32>
    %c0_210 = arith.constant 0 : index
    %c0_211 = arith.constant 0 : index
    %559 = vector.load %arg24[%c0_210, %c0_211] : memref<8x64xf32, #tpu.memory_space<vmem>>, vector<8x64xf32>
    %cst_212 = arith.constant dense<0.000000e+00> : vector<8x8xf32>
    %560 = tpu.matmul %558, %559, %cst_212 {dimension_numbers = #tpu.dot_dimension_numbers<[1], [1], [0], [0], [0, 0, 1, 0], [], []>} : vector<8x64xf32>, vector<8x64xf32>, vector<8x8xf32> -> vector<8x8xf32>
    %c0_213 = arith.constant 0 : index
    %c0_214 = arith.constant 0 : index
    %561 = vector.load %arg23[%c0_213, %c0_214] : memref<8x64xf32, #tpu.memory_space<vmem>>, vector<8x64xf32>
    %cst_215 = arith.constant dense<0.000000e+00> : vector<8x8xf32>
    %562 = tpu.matmul %561, %558, %cst_215 {dimension_numbers = #tpu.dot_dimension_numbers<[1], [1], [0], [0], [0, 0, 1, 0], [], []>} : vector<8x64xf32>, vector<8x64xf32>, vector<8x8xf32> -> vector<8x8xf32>
    %563 = vector.extract_strided_slice %560 {offsets = [0, 0], sizes = [8, 1], strides = [1, 1]} : vector<8x8xf32> to vector<8x1xf32>
    %564 = vector.extract_strided_slice %562 {offsets = [0, 0], sizes = [1, 8], strides = [1, 1]} : vector<8x8xf32> to vector<1x8xf32>
    %565 = vector.broadcast %563 : vector<8x1xf32> to vector<8x8xf32>
    %566 = vector.broadcast %564 : vector<1x8xf32> to vector<8x8xf32>
    %567 = arith.addf %565, %566 : vector<8x8xf32>
    %cst_216 = arith.constant 0.000000e+00 : f32
    %568 = vector.broadcast %cst_216 : f32 to vector<8x8xf32>
    %569 = arith.cmpf ogt, %567, %568 : vector<8x8xf32>
    %cst_217 = arith.constant 2.000000e-01 : f32
    %570 = vector.broadcast %cst_217 : f32 to vector<8x8xf32>
    %571 = arith.mulf %570, %567 : vector<8x8xf32>
    %572 = arith.select %569, %567, %571 : vector<8x8xi1>, vector<8x8xf32>
    %573 = arith.addf %572, %354 : vector<8x8xf32>
    %cst_218 = arith.constant dense<0xFF800000> : vector<8xf32>
    %574 = vector.multi_reduction <maximumf>, %573, %cst_218 [1] : vector<8x8xf32> to vector<8xf32>
    %575 = vector.shape_cast %574 : vector<8xf32> to vector<8x1xf32>
    %576 = vector.broadcast %575 : vector<8x1xf32> to vector<8x8xf32>
    %577 = arith.subf %573, %576 : vector<8x8xf32>
    %578 = math.exp %577 : vector<8x8xf32>
    %cst_219 = arith.constant dense<0.000000e+00> : vector<8xf32>
    %579 = vector.multi_reduction <add>, %578, %cst_219 [1] : vector<8x8xf32> to vector<8xf32>
    %580 = vector.shape_cast %579 : vector<8xf32> to vector<8x1xf32>
    %581 = tpu.reciprocal %580 {approx = true} : vector<8x1xf32> -> vector<8x1xf32>
    %582 = vector.broadcast %581 : vector<8x1xf32> to vector<8x8xf32>
    %583 = arith.mulf %578, %582 : vector<8x8xf32>
    %584 = vector.extract_strided_slice %558 {offsets = [0, 0], sizes = [8, 8], strides = [1, 1]} : vector<8x64xf32> to vector<8x8xf32>
    %cst_220 = arith.constant dense<0.000000e+00> : vector<8x8xf32>
    %585 = tpu.matmul %583, %584, %cst_220 {dimension_numbers = #tpu.dot_dimension_numbers<[1], [0], [0], [1], [0, 0, 1, 1], [], []>} : vector<8x8xf32>, vector<8x8xf32>, vector<8x8xf32> -> vector<8x8xf32>
    %586 = vector.extract_strided_slice %560 {offsets = [0, 1], sizes = [8, 1], strides = [1, 1]} : vector<8x8xf32> to vector<8x1xf32>
    %587 = vector.extract_strided_slice %562 {offsets = [1, 0], sizes = [1, 8], strides = [1, 1]} : vector<8x8xf32> to vector<1x8xf32>
    %588 = vector.broadcast %586 : vector<8x1xf32> to vector<8x8xf32>
    %589 = vector.broadcast %587 : vector<1x8xf32> to vector<8x8xf32>
    %590 = arith.addf %588, %589 : vector<8x8xf32>
    %cst_221 = arith.constant 0.000000e+00 : f32
    %591 = vector.broadcast %cst_221 : f32 to vector<8x8xf32>
    %592 = arith.cmpf ogt, %590, %591 : vector<8x8xf32>
    %cst_222 = arith.constant 2.000000e-01 : f32
    %593 = vector.broadcast %cst_222 : f32 to vector<8x8xf32>
    %594 = arith.mulf %593, %590 : vector<8x8xf32>
    %595 = arith.select %592, %590, %594 : vector<8x8xi1>, vector<8x8xf32>
    %596 = arith.addf %595, %354 : vector<8x8xf32>
    %cst_223 = arith.constant dense<0xFF800000> : vector<8xf32>
    %597 = vector.multi_reduction <maximumf>, %596, %cst_223 [1] : vector<8x8xf32> to vector<8xf32>
    %598 = vector.shape_cast %597 : vector<8xf32> to vector<8x1xf32>
    %599 = vector.broadcast %598 : vector<8x1xf32> to vector<8x8xf32>
    %600 = arith.subf %596, %599 : vector<8x8xf32>
    %601 = math.exp %600 : vector<8x8xf32>
    %cst_224 = arith.constant dense<0.000000e+00> : vector<8xf32>
    %602 = vector.multi_reduction <add>, %601, %cst_224 [1] : vector<8x8xf32> to vector<8xf32>
    %603 = vector.shape_cast %602 : vector<8xf32> to vector<8x1xf32>
    %604 = tpu.reciprocal %603 {approx = true} : vector<8x1xf32> -> vector<8x1xf32>
    %605 = vector.broadcast %604 : vector<8x1xf32> to vector<8x8xf32>
    %606 = arith.mulf %601, %605 : vector<8x8xf32>
    %607 = vector.extract_strided_slice %558 {offsets = [0, 8], sizes = [8, 8], strides = [1, 1]} : vector<8x64xf32> to vector<8x8xf32>
    %cst_225 = arith.constant dense<0.000000e+00> : vector<8x8xf32>
    %608 = tpu.matmul %606, %607, %cst_225 {dimension_numbers = #tpu.dot_dimension_numbers<[1], [0], [0], [1], [0, 0, 1, 1], [], []>} : vector<8x8xf32>, vector<8x8xf32>, vector<8x8xf32> -> vector<8x8xf32>
    %609 = vector.extract_strided_slice %560 {offsets = [0, 2], sizes = [8, 1], strides = [1, 1]} : vector<8x8xf32> to vector<8x1xf32>
    %610 = vector.extract_strided_slice %562 {offsets = [2, 0], sizes = [1, 8], strides = [1, 1]} : vector<8x8xf32> to vector<1x8xf32>
    %611 = vector.broadcast %609 : vector<8x1xf32> to vector<8x8xf32>
    %612 = vector.broadcast %610 : vector<1x8xf32> to vector<8x8xf32>
    %613 = arith.addf %611, %612 : vector<8x8xf32>
    %cst_226 = arith.constant 0.000000e+00 : f32
    %614 = vector.broadcast %cst_226 : f32 to vector<8x8xf32>
    %615 = arith.cmpf ogt, %613, %614 : vector<8x8xf32>
    %cst_227 = arith.constant 2.000000e-01 : f32
    %616 = vector.broadcast %cst_227 : f32 to vector<8x8xf32>
    %617 = arith.mulf %616, %613 : vector<8x8xf32>
    %618 = arith.select %615, %613, %617 : vector<8x8xi1>, vector<8x8xf32>
    %619 = arith.addf %618, %354 : vector<8x8xf32>
    %cst_228 = arith.constant dense<0xFF800000> : vector<8xf32>
    %620 = vector.multi_reduction <maximumf>, %619, %cst_228 [1] : vector<8x8xf32> to vector<8xf32>
    %621 = vector.shape_cast %620 : vector<8xf32> to vector<8x1xf32>
    %622 = vector.broadcast %621 : vector<8x1xf32> to vector<8x8xf32>
    %623 = arith.subf %619, %622 : vector<8x8xf32>
    %624 = math.exp %623 : vector<8x8xf32>
    %cst_229 = arith.constant dense<0.000000e+00> : vector<8xf32>
    %625 = vector.multi_reduction <add>, %624, %cst_229 [1] : vector<8x8xf32> to vector<8xf32>
    %626 = vector.shape_cast %625 : vector<8xf32> to vector<8x1xf32>
    %627 = tpu.reciprocal %626 {approx = true} : vector<8x1xf32> -> vector<8x1xf32>
    %628 = vector.broadcast %627 : vector<8x1xf32> to vector<8x8xf32>
    %629 = arith.mulf %624, %628 : vector<8x8xf32>
    %630 = vector.extract_strided_slice %558 {offsets = [0, 16], sizes = [8, 8], strides = [1, 1]} : vector<8x64xf32> to vector<8x8xf32>
    %cst_230 = arith.constant dense<0.000000e+00> : vector<8x8xf32>
    %631 = tpu.matmul %629, %630, %cst_230 {dimension_numbers = #tpu.dot_dimension_numbers<[1], [0], [0], [1], [0, 0, 1, 1], [], []>} : vector<8x8xf32>, vector<8x8xf32>, vector<8x8xf32> -> vector<8x8xf32>
    %632 = vector.extract_strided_slice %560 {offsets = [0, 3], sizes = [8, 1], strides = [1, 1]} : vector<8x8xf32> to vector<8x1xf32>
    %633 = vector.extract_strided_slice %562 {offsets = [3, 0], sizes = [1, 8], strides = [1, 1]} : vector<8x8xf32> to vector<1x8xf32>
    %634 = vector.broadcast %632 : vector<8x1xf32> to vector<8x8xf32>
    %635 = vector.broadcast %633 : vector<1x8xf32> to vector<8x8xf32>
    %636 = arith.addf %634, %635 : vector<8x8xf32>
    %cst_231 = arith.constant 0.000000e+00 : f32
    %637 = vector.broadcast %cst_231 : f32 to vector<8x8xf32>
    %638 = arith.cmpf ogt, %636, %637 : vector<8x8xf32>
    %cst_232 = arith.constant 2.000000e-01 : f32
    %639 = vector.broadcast %cst_232 : f32 to vector<8x8xf32>
    %640 = arith.mulf %639, %636 : vector<8x8xf32>
    %641 = arith.select %638, %636, %640 : vector<8x8xi1>, vector<8x8xf32>
    %642 = arith.addf %641, %354 : vector<8x8xf32>
    %cst_233 = arith.constant dense<0xFF800000> : vector<8xf32>
    %643 = vector.multi_reduction <maximumf>, %642, %cst_233 [1] : vector<8x8xf32> to vector<8xf32>
    %644 = vector.shape_cast %643 : vector<8xf32> to vector<8x1xf32>
    %645 = vector.broadcast %644 : vector<8x1xf32> to vector<8x8xf32>
    %646 = arith.subf %642, %645 : vector<8x8xf32>
    %647 = math.exp %646 : vector<8x8xf32>
    %cst_234 = arith.constant dense<0.000000e+00> : vector<8xf32>
    %648 = vector.multi_reduction <add>, %647, %cst_234 [1] : vector<8x8xf32> to vector<8xf32>
    %649 = vector.shape_cast %648 : vector<8xf32> to vector<8x1xf32>
    %650 = tpu.reciprocal %649 {approx = true} : vector<8x1xf32> -> vector<8x1xf32>
    %651 = vector.broadcast %650 : vector<8x1xf32> to vector<8x8xf32>
    %652 = arith.mulf %647, %651 : vector<8x8xf32>
    %653 = vector.extract_strided_slice %558 {offsets = [0, 24], sizes = [8, 8], strides = [1, 1]} : vector<8x64xf32> to vector<8x8xf32>
    %cst_235 = arith.constant dense<0.000000e+00> : vector<8x8xf32>
    %654 = tpu.matmul %652, %653, %cst_235 {dimension_numbers = #tpu.dot_dimension_numbers<[1], [0], [0], [1], [0, 0, 1, 1], [], []>} : vector<8x8xf32>, vector<8x8xf32>, vector<8x8xf32> -> vector<8x8xf32>
    %655 = vector.extract_strided_slice %560 {offsets = [0, 4], sizes = [8, 1], strides = [1, 1]} : vector<8x8xf32> to vector<8x1xf32>
    %656 = vector.extract_strided_slice %562 {offsets = [4, 0], sizes = [1, 8], strides = [1, 1]} : vector<8x8xf32> to vector<1x8xf32>
    %657 = vector.broadcast %655 : vector<8x1xf32> to vector<8x8xf32>
    %658 = vector.broadcast %656 : vector<1x8xf32> to vector<8x8xf32>
    %659 = arith.addf %657, %658 : vector<8x8xf32>
    %cst_236 = arith.constant 0.000000e+00 : f32
    %660 = vector.broadcast %cst_236 : f32 to vector<8x8xf32>
    %661 = arith.cmpf ogt, %659, %660 : vector<8x8xf32>
    %cst_237 = arith.constant 2.000000e-01 : f32
    %662 = vector.broadcast %cst_237 : f32 to vector<8x8xf32>
    %663 = arith.mulf %662, %659 : vector<8x8xf32>
    %664 = arith.select %661, %659, %663 : vector<8x8xi1>, vector<8x8xf32>
    %665 = arith.addf %664, %354 : vector<8x8xf32>
    %cst_238 = arith.constant dense<0xFF800000> : vector<8xf32>
    %666 = vector.multi_reduction <maximumf>, %665, %cst_238 [1] : vector<8x8xf32> to vector<8xf32>
    %667 = vector.shape_cast %666 : vector<8xf32> to vector<8x1xf32>
    %668 = vector.broadcast %667 : vector<8x1xf32> to vector<8x8xf32>
    %669 = arith.subf %665, %668 : vector<8x8xf32>
    %670 = math.exp %669 : vector<8x8xf32>
    %cst_239 = arith.constant dense<0.000000e+00> : vector<8xf32>
    %671 = vector.multi_reduction <add>, %670, %cst_239 [1] : vector<8x8xf32> to vector<8xf32>
    %672 = vector.shape_cast %671 : vector<8xf32> to vector<8x1xf32>
    %673 = tpu.reciprocal %672 {approx = true} : vector<8x1xf32> -> vector<8x1xf32>
    %674 = vector.broadcast %673 : vector<8x1xf32> to vector<8x8xf32>
    %675 = arith.mulf %670, %674 : vector<8x8xf32>
    %676 = vector.extract_strided_slice %558 {offsets = [0, 32], sizes = [8, 8], strides = [1, 1]} : vector<8x64xf32> to vector<8x8xf32>
    %cst_240 = arith.constant dense<0.000000e+00> : vector<8x8xf32>
    %677 = tpu.matmul %675, %676, %cst_240 {dimension_numbers = #tpu.dot_dimension_numbers<[1], [0], [0], [1], [0, 0, 1, 1], [], []>} : vector<8x8xf32>, vector<8x8xf32>, vector<8x8xf32> -> vector<8x8xf32>
    %678 = vector.extract_strided_slice %560 {offsets = [0, 5], sizes = [8, 1], strides = [1, 1]} : vector<8x8xf32> to vector<8x1xf32>
    %679 = vector.extract_strided_slice %562 {offsets = [5, 0], sizes = [1, 8], strides = [1, 1]} : vector<8x8xf32> to vector<1x8xf32>
    %680 = vector.broadcast %678 : vector<8x1xf32> to vector<8x8xf32>
    %681 = vector.broadcast %679 : vector<1x8xf32> to vector<8x8xf32>
    %682 = arith.addf %680, %681 : vector<8x8xf32>
    %cst_241 = arith.constant 0.000000e+00 : f32
    %683 = vector.broadcast %cst_241 : f32 to vector<8x8xf32>
    %684 = arith.cmpf ogt, %682, %683 : vector<8x8xf32>
    %cst_242 = arith.constant 2.000000e-01 : f32
    %685 = vector.broadcast %cst_242 : f32 to vector<8x8xf32>
    %686 = arith.mulf %685, %682 : vector<8x8xf32>
    %687 = arith.select %684, %682, %686 : vector<8x8xi1>, vector<8x8xf32>
    %688 = arith.addf %687, %354 : vector<8x8xf32>
    %cst_243 = arith.constant dense<0xFF800000> : vector<8xf32>
    %689 = vector.multi_reduction <maximumf>, %688, %cst_243 [1] : vector<8x8xf32> to vector<8xf32>
    %690 = vector.shape_cast %689 : vector<8xf32> to vector<8x1xf32>
    %691 = vector.broadcast %690 : vector<8x1xf32> to vector<8x8xf32>
    %692 = arith.subf %688, %691 : vector<8x8xf32>
    %693 = math.exp %692 : vector<8x8xf32>
    %cst_244 = arith.constant dense<0.000000e+00> : vector<8xf32>
    %694 = vector.multi_reduction <add>, %693, %cst_244 [1] : vector<8x8xf32> to vector<8xf32>
    %695 = vector.shape_cast %694 : vector<8xf32> to vector<8x1xf32>
    %696 = tpu.reciprocal %695 {approx = true} : vector<8x1xf32> -> vector<8x1xf32>
    %697 = vector.broadcast %696 : vector<8x1xf32> to vector<8x8xf32>
    %698 = arith.mulf %693, %697 : vector<8x8xf32>
    %699 = vector.extract_strided_slice %558 {offsets = [0, 40], sizes = [8, 8], strides = [1, 1]} : vector<8x64xf32> to vector<8x8xf32>
    %cst_245 = arith.constant dense<0.000000e+00> : vector<8x8xf32>
    %700 = tpu.matmul %698, %699, %cst_245 {dimension_numbers = #tpu.dot_dimension_numbers<[1], [0], [0], [1], [0, 0, 1, 1], [], []>} : vector<8x8xf32>, vector<8x8xf32>, vector<8x8xf32> -> vector<8x8xf32>
    %701 = vector.extract_strided_slice %560 {offsets = [0, 6], sizes = [8, 1], strides = [1, 1]} : vector<8x8xf32> to vector<8x1xf32>
    %702 = vector.extract_strided_slice %562 {offsets = [6, 0], sizes = [1, 8], strides = [1, 1]} : vector<8x8xf32> to vector<1x8xf32>
    %703 = vector.broadcast %701 : vector<8x1xf32> to vector<8x8xf32>
    %704 = vector.broadcast %702 : vector<1x8xf32> to vector<8x8xf32>
    %705 = arith.addf %703, %704 : vector<8x8xf32>
    %cst_246 = arith.constant 0.000000e+00 : f32
    %706 = vector.broadcast %cst_246 : f32 to vector<8x8xf32>
    %707 = arith.cmpf ogt, %705, %706 : vector<8x8xf32>
    %cst_247 = arith.constant 2.000000e-01 : f32
    %708 = vector.broadcast %cst_247 : f32 to vector<8x8xf32>
    %709 = arith.mulf %708, %705 : vector<8x8xf32>
    %710 = arith.select %707, %705, %709 : vector<8x8xi1>, vector<8x8xf32>
    %711 = arith.addf %710, %354 : vector<8x8xf32>
    %cst_248 = arith.constant dense<0xFF800000> : vector<8xf32>
    %712 = vector.multi_reduction <maximumf>, %711, %cst_248 [1] : vector<8x8xf32> to vector<8xf32>
    %713 = vector.shape_cast %712 : vector<8xf32> to vector<8x1xf32>
    %714 = vector.broadcast %713 : vector<8x1xf32> to vector<8x8xf32>
    %715 = arith.subf %711, %714 : vector<8x8xf32>
    %716 = math.exp %715 : vector<8x8xf32>
    %cst_249 = arith.constant dense<0.000000e+00> : vector<8xf32>
    %717 = vector.multi_reduction <add>, %716, %cst_249 [1] : vector<8x8xf32> to vector<8xf32>
    %718 = vector.shape_cast %717 : vector<8xf32> to vector<8x1xf32>
    %719 = tpu.reciprocal %718 {approx = true} : vector<8x1xf32> -> vector<8x1xf32>
    %720 = vector.broadcast %719 : vector<8x1xf32> to vector<8x8xf32>
    %721 = arith.mulf %716, %720 : vector<8x8xf32>
    %722 = vector.extract_strided_slice %558 {offsets = [0, 48], sizes = [8, 8], strides = [1, 1]} : vector<8x64xf32> to vector<8x8xf32>
    %cst_250 = arith.constant dense<0.000000e+00> : vector<8x8xf32>
    %723 = tpu.matmul %721, %722, %cst_250 {dimension_numbers = #tpu.dot_dimension_numbers<[1], [0], [0], [1], [0, 0, 1, 1], [], []>} : vector<8x8xf32>, vector<8x8xf32>, vector<8x8xf32> -> vector<8x8xf32>
    %724 = vector.extract_strided_slice %560 {offsets = [0, 7], sizes = [8, 1], strides = [1, 1]} : vector<8x8xf32> to vector<8x1xf32>
    %725 = vector.extract_strided_slice %562 {offsets = [7, 0], sizes = [1, 8], strides = [1, 1]} : vector<8x8xf32> to vector<1x8xf32>
    %726 = vector.broadcast %724 : vector<8x1xf32> to vector<8x8xf32>
    %727 = vector.broadcast %725 : vector<1x8xf32> to vector<8x8xf32>
    %728 = arith.addf %726, %727 : vector<8x8xf32>
    %cst_251 = arith.constant 0.000000e+00 : f32
    %729 = vector.broadcast %cst_251 : f32 to vector<8x8xf32>
    %730 = arith.cmpf ogt, %728, %729 : vector<8x8xf32>
    %cst_252 = arith.constant 2.000000e-01 : f32
    %731 = vector.broadcast %cst_252 : f32 to vector<8x8xf32>
    %732 = arith.mulf %731, %728 : vector<8x8xf32>
    %733 = arith.select %730, %728, %732 : vector<8x8xi1>, vector<8x8xf32>
    %734 = arith.addf %733, %354 : vector<8x8xf32>
    %cst_253 = arith.constant dense<0xFF800000> : vector<8xf32>
    %735 = vector.multi_reduction <maximumf>, %734, %cst_253 [1] : vector<8x8xf32> to vector<8xf32>
    %736 = vector.shape_cast %735 : vector<8xf32> to vector<8x1xf32>
    %737 = vector.broadcast %736 : vector<8x1xf32> to vector<8x8xf32>
    %738 = arith.subf %734, %737 : vector<8x8xf32>
    %739 = math.exp %738 : vector<8x8xf32>
    %cst_254 = arith.constant dense<0.000000e+00> : vector<8xf32>
    %740 = vector.multi_reduction <add>, %739, %cst_254 [1] : vector<8x8xf32> to vector<8xf32>
    %741 = vector.shape_cast %740 : vector<8xf32> to vector<8x1xf32>
    %742 = tpu.reciprocal %741 {approx = true} : vector<8x1xf32> -> vector<8x1xf32>
    %743 = vector.broadcast %742 : vector<8x1xf32> to vector<8x8xf32>
    %744 = arith.mulf %739, %743 : vector<8x8xf32>
    %745 = vector.extract_strided_slice %558 {offsets = [0, 56], sizes = [8, 8], strides = [1, 1]} : vector<8x64xf32> to vector<8x8xf32>
    %cst_255 = arith.constant dense<0.000000e+00> : vector<8x8xf32>
    %746 = tpu.matmul %744, %745, %cst_255 {dimension_numbers = #tpu.dot_dimension_numbers<[1], [0], [0], [1], [0, 0, 1, 1], [], []>} : vector<8x8xf32>, vector<8x8xf32>, vector<8x8xf32> -> vector<8x8xf32>
    %747 = tpu.concatenate %585, %608, %631, %654, %677, %700, %723, %746 in 1 : vector<8x8xf32>, vector<8x8xf32>, vector<8x8xf32>, vector<8x8xf32>, vector<8x8xf32>, vector<8x8xf32>, vector<8x8xf32>, vector<8x8xf32> -> vector<8x64xf32>
    %c0_256 = arith.constant 0 : index
    %c0_257 = arith.constant 0 : index
    %748 = vector.load %arg25[%c0_256, %c0_257] : memref<1x64xf32, #tpu.memory_space<vmem>>, vector<1x64xf32>
    %749 = vector.broadcast %748 : vector<1x64xf32> to vector<8x64xf32>
    %750 = arith.addf %747, %749 : vector<8x64xf32>
    %cst_258 = arith.constant 0.000000e+00 : f32
    %751 = vector.broadcast %cst_258 : f32 to vector<8x64xf32>
    %752 = arith.cmpf ogt, %750, %751 : vector<8x64xf32>
    %cst_259 = arith.constant 0.000000e+00 : f32
    %753 = vector.broadcast %cst_259 : f32 to vector<8x64xf32>
    %754 = arith.minimumf %750, %753 : vector<8x64xf32>
    %755 = math.exp %754 : vector<8x64xf32>
    %cst_260 = arith.constant 1.000000e+00 : f32
    %756 = vector.broadcast %cst_260 : f32 to vector<8x64xf32>
    %757 = arith.subf %755, %756 : vector<8x64xf32>
    %758 = arith.select %752, %750, %757 : vector<8x64xi1>, vector<8x64xf32>
    %c0_261 = arith.constant 0 : index
    %c0_262 = arith.constant 0 : index
    %759 = vector.load %arg26[%c0_261, %c0_262] : memref<64x4xf32, #tpu.memory_space<vmem>>, vector<64x4xf32>
    %cst_263 = arith.constant dense<0.000000e+00> : vector<8x4xf32>
    %760 = tpu.matmul %758, %759, %cst_263 {dimension_numbers = #tpu.dot_dimension_numbers<[1], [0], [0], [1], [0, 0, 1, 1], [], []>} : vector<8x64xf32>, vector<64x4xf32>, vector<8x4xf32> -> vector<8x4xf32>
    %c0_264 = arith.constant 0 : index
    %c0_265 = arith.constant 0 : index
    %761 = vector.load %arg28[%c0_264, %c0_265] : memref<1x4xf32, #tpu.memory_space<vmem>>, vector<1x4xf32>
    %cst_266 = arith.constant dense<0.000000e+00> : vector<8x1xf32>
    %762 = tpu.matmul %760, %761, %cst_266 {dimension_numbers = #tpu.dot_dimension_numbers<[1], [1], [0], [0], [0, 0, 1, 0], [], []>} : vector<8x4xf32>, vector<1x4xf32>, vector<8x1xf32> -> vector<8x1xf32>
    %c0_267 = arith.constant 0 : index
    %c0_268 = arith.constant 0 : index
    %763 = vector.load %arg27[%c0_267, %c0_268] : memref<1x4xf32, #tpu.memory_space<vmem>>, vector<1x4xf32>
    %cst_269 = arith.constant dense<0.000000e+00> : vector<1x8xf32>
    %764 = tpu.matmul %763, %760, %cst_269 {dimension_numbers = #tpu.dot_dimension_numbers<[1], [1], [0], [0], [0, 0, 1, 0], [], []>} : vector<1x4xf32>, vector<8x4xf32>, vector<1x8xf32> -> vector<1x8xf32>
    %765 = vector.broadcast %762 : vector<8x1xf32> to vector<8x8xf32>
    %766 = vector.broadcast %764 : vector<1x8xf32> to vector<8x8xf32>
    %767 = arith.addf %765, %766 : vector<8x8xf32>
    %cst_270 = arith.constant 0.000000e+00 : f32
    %768 = vector.broadcast %cst_270 : f32 to vector<8x8xf32>
    %769 = arith.cmpf ogt, %767, %768 : vector<8x8xf32>
    %cst_271 = arith.constant 2.000000e-01 : f32
    %770 = vector.broadcast %cst_271 : f32 to vector<8x8xf32>
    %771 = arith.mulf %770, %767 : vector<8x8xf32>
    %772 = arith.select %769, %767, %771 : vector<8x8xi1>, vector<8x8xf32>
    %773 = arith.addf %772, %354 : vector<8x8xf32>
    %cst_272 = arith.constant dense<0xFF800000> : vector<8xf32>
    %774 = vector.multi_reduction <maximumf>, %773, %cst_272 [1] : vector<8x8xf32> to vector<8xf32>
    %775 = vector.shape_cast %774 : vector<8xf32> to vector<8x1xf32>
    %776 = vector.broadcast %775 : vector<8x1xf32> to vector<8x8xf32>
    %777 = arith.subf %773, %776 : vector<8x8xf32>
    %778 = math.exp %777 : vector<8x8xf32>
    %cst_273 = arith.constant dense<0.000000e+00> : vector<8xf32>
    %779 = vector.multi_reduction <add>, %778, %cst_273 [1] : vector<8x8xf32> to vector<8xf32>
    %780 = vector.shape_cast %779 : vector<8xf32> to vector<8x1xf32>
    %781 = tpu.reciprocal %780 {approx = true} : vector<8x1xf32> -> vector<8x1xf32>
    %782 = vector.broadcast %781 : vector<8x1xf32> to vector<8x8xf32>
    %783 = arith.mulf %778, %782 : vector<8x8xf32>
    %cst_274 = arith.constant dense<0.000000e+00> : vector<8x4xf32>
    %784 = tpu.matmul %783, %760, %cst_274 {dimension_numbers = #tpu.dot_dimension_numbers<[1], [0], [0], [1], [0, 0, 1, 1], [], []>} : vector<8x8xf32>, vector<8x4xf32>, vector<8x4xf32> -> vector<8x4xf32>
    %c0_275 = arith.constant 0 : index
    %c0_276 = arith.constant 0 : index
    %785 = vector.load %arg29[%c0_275, %c0_276] : memref<1x4xf32, #tpu.memory_space<vmem>>, vector<1x4xf32>
    %786 = vector.broadcast %785 : vector<1x4xf32> to vector<8x4xf32>
    %787 = arith.addf %784, %786 : vector<8x4xf32>
    %c0_277 = arith.constant 0 : index
    %c0_278 = arith.constant 0 : index
    %788 = vector.load %arg30[%c0_277, %c0_278] : memref<2x8xf32, #tpu.memory_space<vmem>>, vector<2x8xf32>
    %cst_279 = arith.constant dense<0.000000e+00> : vector<2x4xf32>
    %789 = tpu.matmul %788, %787, %cst_279 {dimension_numbers = #tpu.dot_dimension_numbers<[1], [0], [0], [1], [0, 0, 1, 1], [], []>} : vector<2x8xf32>, vector<8x4xf32>, vector<2x4xf32> -> vector<2x4xf32>
    %cst_280 = arith.constant 0.000000e+00 : f32
    %790 = vector.broadcast %cst_280 : f32 to vector<2x124xf32>
    %791 = tpu.concatenate %789, %790 in 1 : vector<2x4xf32>, vector<2x124xf32> -> vector<2x128xf32>
    %c0_281 = arith.constant 0 : index
    %c0_282 = arith.constant 0 : index
    %792 = vector.load %arg31[%c0_281, %c0_282] : memref<2x128xf32, #tpu.memory_space<vmem>>, vector<2x128xf32>
    tpu.vector_store %arg31[%c0_281, %c0_282], %791 {strides = array<i32>} : memref<2x128xf32, #tpu.memory_space<vmem>>, vector<2x128xf32>,
    return
  }
  func.func @transform_0(%arg0: i32) -> (i32, i32) {
    %c0_i32 = arith.constant 0 : i32
    %c0_i32_0 = arith.constant 0 : i32
    %c0_i32_1 = arith.constant 0 : i32
    return %c0_i32, %c0_i32_0 : i32, i32
  }
  func.func @transform_1(%arg0: i32) -> (i32, i32) {
    %c0_i32 = arith.constant 0 : i32
    %c0_i32_0 = arith.constant 0 : i32
    %c0_i32_1 = arith.constant 0 : i32
    return %c0_i32, %c0_i32_0 : i32, i32
  }
  func.func @transform_2(%arg0: i32) -> (i32, i32) {
    %c0_i32 = arith.constant 0 : i32
    %c0_i32_0 = arith.constant 0 : i32
    %c0_i32_1 = arith.constant 0 : i32
    return %c0_i32, %c0_i32_0 : i32, i32
  }
  func.func @transform_3(%arg0: i32) -> (i32, i32) {
    %c0_i32 = arith.constant 0 : i32
    %c0_i32_0 = arith.constant 0 : i32
    %c0_i32_1 = arith.constant 0 : i32
    return %c0_i32, %c0_i32_0 : i32, i32
  }
  func.func @transform_4(%arg0: i32) -> (i32, i32, i32) {
    %c0_i32 = arith.constant 0 : i32
    %c0_i32_0 = arith.constant 0 : i32
    %c0_i32_1 = arith.constant 0 : i32
    %c0_i32_2 = arith.constant 0 : i32
    return %c0_i32, %c0_i32_0, %c0_i32_1 : i32, i32, i32
  }
  func.func @transform_5(%arg0: i32) -> (i32, i32, i32) {
    %c0_i32 = arith.constant 0 : i32
    %c0_i32_0 = arith.constant 0 : i32
    %c0_i32_1 = arith.constant 0 : i32
    %c0_i32_2 = arith.constant 0 : i32
    return %c0_i32, %c0_i32_0, %c0_i32_1 : i32, i32, i32
  }
  func.func @transform_6(%arg0: i32) -> (i32, i32, i32) {
    %c0_i32 = arith.constant 0 : i32
    %c0_i32_0 = arith.constant 0 : i32
    %c0_i32_1 = arith.constant 0 : i32
    %c0_i32_2 = arith.constant 0 : i32
    return %c0_i32, %c0_i32_0, %c0_i32_1 : i32, i32, i32
  }
  func.func @transform_7(%arg0: i32) -> (i32, i32, i32) {
    %c0_i32 = arith.constant 0 : i32
    %c0_i32_0 = arith.constant 0 : i32
    %c0_i32_1 = arith.constant 0 : i32
    %c0_i32_2 = arith.constant 0 : i32
    return %c0_i32, %c0_i32_0, %c0_i32_1 : i32, i32, i32
  }
  func.func @transform_8(%arg0: i32) -> (i32, i32, i32) {
    %c0_i32 = arith.constant 0 : i32
    %c0_i32_0 = arith.constant 0 : i32
    %c0_i32_1 = arith.constant 0 : i32
    %c0_i32_2 = arith.constant 0 : i32
    return %c0_i32, %c0_i32_0, %c0_i32_1 : i32, i32, i32
  }
  func.func @transform_9(%arg0: i32) -> (i32, i32, i32) {
    %c0_i32 = arith.constant 0 : i32
    %c0_i32_0 = arith.constant 0 : i32
    %c0_i32_1 = arith.constant 0 : i32
    %c0_i32_2 = arith.constant 0 : i32
    return %c0_i32, %c0_i32_0, %c0_i32_1 : i32, i32, i32
  }
  func.func @transform_10(%arg0: i32) -> (i32, i32, i32) {
    %c0_i32 = arith.constant 0 : i32
    %c0_i32_0 = arith.constant 0 : i32
    %c0_i32_1 = arith.constant 0 : i32
    %c0_i32_2 = arith.constant 0 : i32
    return %c0_i32, %c0_i32_0, %c0_i32_1 : i32, i32, i32
  }
  func.func @transform_11(%arg0: i32) -> (i32, i32, i32) {
    %c0_i32 = arith.constant 0 : i32
    %c0_i32_0 = arith.constant 0 : i32
    %c0_i32_1 = arith.constant 0 : i32
    %c0_i32_2 = arith.constant 0 : i32
    return %c0_i32, %c0_i32_0, %c0_i32_1 : i32, i32, i32
  }
  func.func @transform_12(%arg0: i32) -> (i32, i32, i32) {
    %c0_i32 = arith.constant 0 : i32
    %c0_i32_0 = arith.constant 0 : i32
    %c0_i32_1 = arith.constant 0 : i32
    %c0_i32_2 = arith.constant 0 : i32
    return %c0_i32, %c0_i32_0, %c0_i32_1 : i32, i32, i32
  }
  func.func @transform_13(%arg0: i32) -> (i32, i32, i32) {
    %c0_i32 = arith.constant 0 : i32
    %c0_i32_0 = arith.constant 0 : i32
    %c0_i32_1 = arith.constant 0 : i32
    %c0_i32_2 = arith.constant 0 : i32
    return %c0_i32, %c0_i32_0, %c0_i32_1 : i32, i32, i32
  }
  func.func @transform_14(%arg0: i32) -> (i32, i32, i32) {
    %c0_i32 = arith.constant 0 : i32
    %c0_i32_0 = arith.constant 0 : i32
    %c0_i32_1 = arith.constant 0 : i32
    %c0_i32_2 = arith.constant 0 : i32
    return %c0_i32, %c0_i32_0, %c0_i32_1 : i32, i32, i32
  }
  func.func @transform_15(%arg0: i32) -> (i32, i32, i32) {
    %c0_i32 = arith.constant 0 : i32
    %c0_i32_0 = arith.constant 0 : i32
    %c0_i32_1 = arith.constant 0 : i32
    %c0_i32_2 = arith.constant 0 : i32
    return %c0_i32, %c0_i32_0, %c0_i32_1 : i32, i32, i32
  }
  func.func @transform_16(%arg0: i32) -> (i32, i32) {
    %c0_i32 = arith.constant 0 : i32
    %c0_i32_0 = arith.constant 0 : i32
    %c0_i32_1 = arith.constant 0 : i32
    return %c0_i32, %c0_i32_0 : i32, i32
  }
  func.func @transform_17(%arg0: i32) -> (i32, i32) {
    %c0_i32 = arith.constant 0 : i32
    %c0_i32_0 = arith.constant 0 : i32
    %c0_i32_1 = arith.constant 0 : i32
    return %c0_i32, %c0_i32_0 : i32, i32
  }
  func.func @transform_18(%arg0: i32) -> (i32, i32) {
    %c0_i32 = arith.constant 0 : i32
    %c0_i32_0 = arith.constant 0 : i32
    %c0_i32_1 = arith.constant 0 : i32
    return %c0_i32, %c0_i32_0 : i32, i32
  }
  func.func @transform_19(%arg0: i32) -> (i32, i32) {
    %c0_i32 = arith.constant 0 : i32
    %c0_i32_0 = arith.constant 0 : i32
    %c0_i32_1 = arith.constant 0 : i32
    return %c0_i32, %c0_i32_0 : i32, i32
  }
  func.func @transform_20(%arg0: i32) -> (i32, i32) {
    %c0_i32 = arith.constant 0 : i32
    %c0_i32_0 = arith.constant 0 : i32
    %c0_i32_1 = arith.constant 0 : i32
    return %c0_i32, %c0_i32_0 : i32, i32
  }
  func.func @transform_21(%arg0: i32) -> (i32, i32) {
    %c0_i32 = arith.constant 0 : i32
    %c0_i32_0 = arith.constant 0 : i32
    %c0_i32_1 = arith.constant 0 : i32
    return %c0_i32, %c0_i32_0 : i32, i32
  }
  func.func @transform_22(%arg0: i32) -> (i32, i32) {
    %c0_i32 = arith.constant 0 : i32
    %c0_i32_0 = arith.constant 0 : i32
    %c0_i32_1 = arith.constant 0 : i32
    return %c0_i32, %c0_i32_0 : i32, i32
  }
  func.func @transform_23(%arg0: i32) -> (i32, i32) {
    %c0_i32 = arith.constant 0 : i32
    %c0_i32_0 = arith.constant 0 : i32
    %c0_i32_1 = arith.constant 0 : i32
    return %c0_i32, %c0_i32_0 : i32, i32
  }
  func.func @transform_24(%arg0: i32) -> (i32, i32) {
    %c0_i32 = arith.constant 0 : i32
    %c0_i32_0 = arith.constant 0 : i32
    %c0_i32_1 = arith.constant 0 : i32
    return %c0_i32, %c0_i32_0 : i32, i32
  }
  func.func @transform_25(%arg0: i32) -> (i32, i32) {
    %c0_i32 = arith.constant 0 : i32
    %c0_i32_0 = arith.constant 0 : i32
    %c0_i32_1 = arith.constant 0 : i32
    return %c0_i32, %c0_i32_0 : i32, i32
  }
  func.func @transform_26(%arg0: i32) -> (i32, i32) {
    %c0_i32 = arith.constant 0 : i32
    %c0_i32_0 = arith.constant 0 : i32
    %c0_i32_1 = arith.constant 0 : i32
    return %c0_i32, %c0_i32_0 : i32, i32
  }
  func.func @transform_27(%arg0: i32) -> (i32, i32) {
    %c0_i32 = arith.constant 0 : i32
    %c0_i32_0 = arith.constant 0 : i32
    %c0_i32_1 = arith.constant 0 : i32
    return %c0_i32, %c0_i32_0 : i32, i32
  }
  func.func @transform_28(%arg0: i32) -> (i32, i32) {
    %c0_i32 = arith.constant 0 : i32
    %c0_i32_0 = arith.constant 0 : i32
    %c0_i32_1 = arith.constant 0 : i32
    return %c0_i32, %c0_i32_0 : i32, i32
  }
  func.func @transform_29(%arg0: i32) -> (i32, i32) {
    %c0_i32 = arith.constant 0 : i32
    %c0_i32_0 = arith.constant 0 : i32
    %c0_i32_1 = arith.constant 0 : i32
    return %c0_i32, %c0_i32_0 : i32, i32
  }
  func.func @transform_30(%arg0: i32) -> (i32, i32) {
    %c0_i32 = arith.constant 0 : i32
    %c0_i32_0 = arith.constant 0 : i32
    %c0_i32_1 = arith.constant 0 : i32
    return %c0_i32, %c0_i32_0 : i32, i32
  }
}

</mosaic_0001>

<bundles_post_ra>
// kernel: _lambda_.1
= control target key start
LH: loop header
LB: loop body
LE: loop exit
PB: predicated region body
PF: predicated region fallthrough
CT: control target
= control target key end

     0   :  { %s10432_s6 = smov 1   ;;  %s10433_s10 = smov 2   ;;  %s13147_s0 = inlined_call_operand.smem [shape: u32[31], index: -1, kind: input, shape index: {}] }
   0x1   :  { %s10496_s5 = sld [smem:[%s13147_s0]]   ;;  %s10434_s14 = smov 3  }
   0x2   :  { %s10501_s9 = sld [smem:[%s13147_s0 + %s10432_s6]]   ;;  %s10435_s18 = smov 4  }
   0x3   :  { %s10506_s13 = sld [smem:[%s13147_s0 + %s10433_s10]]   ;;  %s10436_s22 = smov 5  }
   0x4   :  { %s10511_s17 = sld [smem:[%s13147_s0 + %s10434_s14]]   ;;  %s10437_s26 = smov 6  }
   0x5   :  { %s10516_s21 = sld [smem:[%s13147_s0 + %s10435_s18]]   ;;  %s10438_s30 = smov 7  }
   0x6   :  { %s10521_s25 = sld [smem:[%s13147_s0 + %s10436_s22]]   ;;  %s10439_s4 = smov 8  }
   0x7   :  { %s10526_s29 = sld [smem:[%s13147_s0 + %s10437_s26]]   ;;  %s10440_s10 = smov 9  }
   0x8   :  { %s10531_s3 = sld [smem:[%s13147_s0 + %s10438_s30]]   ;;  %s10441_s15 = smov 10  }
   0x9   :  { %s10536_s8 = sld [smem:[%s13147_s0 + %s10439_s4]]   ;;  %s10442_s20 = smov 11  }
   0xa   :  { %s10541_s14 = sld [smem:[%s13147_s0 + %s10440_s10]]   ;;  %s10443_s26 = smov 12  }
   0xb   :  { %s10546_s19 = sld [smem:[%s13147_s0 + %s10441_s15]]   ;;  %s10444_s1 = smov 13  }
   0xc   :  { %s10551_s24 = sld [smem:[%s13147_s0 + %s10442_s20]]   ;;  %s10445_s7 = smov 14  }
   0xd   :  { %s10556_s30 = sld [smem:[%s13147_s0 + %s10443_s26]]   ;;  %s10446_s15 = smov 15  }
   0xe   :  { %s10561_s6 = sld [smem:[%s13147_s0 + %s10444_s1]]   ;;  %s10447_s22 = smov 16  }
   0xf   :  { %s10566_s12 = sld [smem:[%s13147_s0 + %s10445_s7]]   ;;  %s10448_s28 = smov 17  }
  0x10   :  { %s10571_s20 = sld [smem:[%s13147_s0 + %s10446_s15]]   ;;  %s10449_s7 = smov 18  }
  0x11   :  { %s10576_s27 = sld [smem:[%s13147_s0 + %s10447_s22]]   ;;  %s10450_s15 = smov 19  }
  0x12   :  { %s10581_s4 = sld [smem:[%s13147_s0 + %s10448_s28]]   ;;  %s10451_s22 = smov 20  }
  0x13   :  { %s10452_s28 = smov 21  }
  0x15   :  { %13154 = sst [smem:[#allocation5_spill]] %s10566_s12 }
  0x16   :  { %13155 = sst [smem:[#allocation6_spill]] %s10571_s20 }
  0x17   :  { %13156 = sst [smem:[#allocation7_spill]] %s10576_s27 }
  0x18   :  { %13157 = sst [smem:[#allocation8_spill]] %s10581_s4 }
  0x19   :  { %s10586_s12 = sld [smem:[%s13147_s0 + %s10449_s7]]   ;;  %s10453_s7 = smov 22  }
  0x1a   :  { %s10591_s20 = sld [smem:[%s13147_s0 + %s10450_s15]]   ;;  %s10454_s15 = smov 23  }
  0x1b   :  { %s10596_s27 = sld [smem:[%s13147_s0 + %s10451_s22]]   ;;  %s10455_s22 = smov 24  }
  0x1c   :  { %s10601_s4 = sld [smem:[%s13147_s0 + %s10452_s28]]   ;;  %s10456_s28 = smov 25  }
  0x1f   :  { %13158 = sst [smem:[#allocation9_spill]] %s10586_s12 }
  0x20   :  { %13159 = sst [smem:[#allocation10_spill]] %s10591_s20 }
  0x21   :  { %13160 = sst [smem:[#allocation11_spill]] %s10596_s27 }
  0x22   :  { %13161 = sst [smem:[#allocation12_spill]] %s10601_s4 }
  0x23   :  { %s10606_s12 = sld [smem:[%s13147_s0 + %s10453_s7]]   ;;  %s10457_s7 = smov 26  }
  0x24   :  { %s10611_s20 = sld [smem:[%s13147_s0 + %s10454_s15]]   ;;  %s10458_s15 = smov 27  }
  0x25   :  { %s10616_s27 = sld [smem:[%s13147_s0 + %s10455_s22]]   ;;  %s10459_s22 = smov 28  }
  0x26   :  { %s10621_s4 = sld [smem:[%s13147_s0 + %s10456_s28]]   ;;  %s10460_s28 = smov 29  }
  0x29   :  { %13162 = sst [smem:[#allocation13_spill]] %s10606_s12 }
  0x2a   :  { %13163 = sst [smem:[#allocation14_spill]] %s10611_s20 }
  0x2b   :  { %13164 = sst [smem:[#allocation15_spill]] %s10616_s27 }
  0x2c   :  { %13165 = sst [smem:[#allocation16_spill]] %s10621_s4 }
  0x2d   :  { %s10626_s12 = sld [smem:[%s13147_s0 + %s10457_s7]]   ;;  %s10461_s7 = smov 30  }
  0x2e   :  { %s10631_s20 = sld [smem:[%s13147_s0 + %s10458_s15]]  }
  0x2f   :  { %s10636_s27 = sld [smem:[%s13147_s0 + %s10459_s22]]  }
  0x30   :  { %s10641_s4 = sld [smem:[%s13147_s0 + %s10460_s28]]  }
  0x33   :  { %13166 = sst [smem:[#allocation17_spill]] %s10626_s12 }
  0x34   :  { %s10646_s12 = sld [smem:[%s13147_s0 + %s10461_s7]]  }
  0x35   :  { %v127_v0 = vld [vmem:[%s10496_s5] sm:$0xff]  ;;  %vm137_vm0 = vcmask 261120   ;;  %v129_v1 = vld [vmem:[%s10496_s5 + $0x10] sm:$0xff]  ;;  %v128_v2 = vld [vmem:[%s10496_s5 + $0x8] sm:$0xff] }
  0x36   :  { %v138_v3 = vsel %vm137_vm0, %v127_v0, 0.0  ;;  %v144_v4 = vsel %vm137_vm0, %v129_v1, 0.0  ;;  %v130_v5 = vld [vmem:[%s10496_s5 + $0x18] sm:$0xff]  ;;  %v141_v6 = vsel %vm137_vm0, %v128_v2, 0.0 }
  0x37   :  { %139 = vadd.xlane.f32.xlu0 %v138_v3  ;;  %145 = vadd.xlane.f32.xlu1 %v144_v4  ;;  %v147_v7 = vsel %vm137_vm0, %v130_v5, 0.0 }
  0x38   :  { %66 = vsyncpa [#allocation3], 0  ;;  %v131_v8 = vld [vmem:[%s10496_s5 + $0x20] sm:$0xff]  ;;  %v132_v9 = vld [vmem:[%s10496_s5 + $0x28] sm:$0xff]  ;;  %vm443_vm1 = vcmask 64512   ;;  %s10462_s0 = smov 96  }
  0x39   :  { %v150_v10 = vsel %vm137_vm0, %v131_v8, 0.0  ;;  %v153_v11 = vsel %vm137_vm0, %v132_v9, 0.0  ;;  %v133_v12 = vld [vmem:[%s10496_s5 + $0x30] sm:$0xff]  ;;  %v134_v13 = vld [vmem:[%s10496_s5 + $0x38] sm:$0xff]  ;;  %v280_v58 = vld [vmem:[%s10516_s21 + $0x8] sm:$0xff]  ;;  %s10463_s5 = smov 64  }
  0x3a   :  { %v156_v14 = vsel %vm137_vm0, %v133_v12, 0.0  ;;  %v159_v15 = vsel %vm137_vm0, %v134_v13, 0.0  ;;  %v282_v56 = vld [vmem:[%s10516_s21 + $0x18] sm:$0xff]  ;;  %v281_v57 = vld [vmem:[%s10516_s21 + $0x10] sm:$0xff]  ;;  %v279_v59 = vld [vmem:[%s10516_s21] sm:$0xff]  ;;  %vm581_vm2 = vcmask 523264  }
  0x3b   :  { %142 = vadd.xlane.f32.xlu0 %v141_v6  ;;  %148 = vadd.xlane.f32.xlu1 %v147_v7  ;;  %s10466_s15 = smov 56   ;;  %s10467_s16 = smov 80   ;;  %vm2157_vm3 = vcmask 130048   ;;  %vm2166_vm4 = vcmask 195584   ;;  %vm10477_vm5 = vmmov 0   ;;  %vm6769_vm15 = vcmask 392192  }
  0x3c   :  { %9050 = vmatprep.subr.mxu0 %v282_v56  ;;  %s10468_s18 = smov 112   ;;  %s10469_s22 = smov 48  }
  0x3d   :  { %9051 = vmatpush3.msra.mxu0 %v282_v56  ;;  %v8270_v56 = vld [vmem:[%s10521_s25] ss:$0 sm:$0xff]  ;;  %s10470_s23 = smov 72   ;;  %s10471_s26 = smov 104  }
  0x3e   :  { %9052 = vmatprep.subr.mxu0 %v281_v57  ;;  %s10472_s28 = smov 40   ;;  %s10473_s1 = smov 8  }
  0x3f   :  { %151 = vadd.xlane.f32.xlu0 %v150_v10  ;;  %154 = vadd.xlane.f32.xlu1 %v153_v11  ;;  %s10474_s2 = smov 16   ;;  %s10475_s7 = smov 24  }
  0x40   :  { %9053 = vmatpush3.msra.mxu0 %v281_v57  ;;  %s13167_s10 = sld [smem:[#allocation5_spill]] }
  0x41   :  { %9054 = vmatprep.subr.mxu0 %v280_v58  ;;  %s13178_s11 = sld [smem:[#allocation15_spill]] }
  0x42   :  { %9055 = vmatpush3.msra.mxu0 %v280_v58 }
  0x43   :  { %157 = vadd.xlane.f32.xlu0 %v156_v14  ;;  %160 = vadd.xlane.f32.xlu1 %v159_v15 }
  0x44   :  { %9056 = vmatprep.subr.mxu0 %v279_v59 }
  0x45   :  { %9057 = vmatpush3.msra.mxu0 %v279_v59 }
  0xc0   :  { %v140_v16 = vpop.xlane.xlu0 %139  ;;  %v146_v17 = vpop.xlane.xlu1 %145 }
  0xc1   :  { %v163_v18 = vmul.f32 0.03125, %v140_v16  ;;  %v165_v19 = vmul.f32 0.03125, %v146_v17 }
  0xc3   :  { %v10664_v20 = vsub.f32 %v127_v0, %v163_v18  ;;  %v10666_v21 = vsub.f32 %v129_v1, %v165_v19 }
  0xc4   :  { %v143_v22 = vpop.xlane.xlu0 %142  ;;  %v149_v23 = vpop.xlane.xlu1 %148 }
  0xc5   :  { %v164_v24 = vmul.f32 0.03125, %v143_v22  ;;  %v166_v25 = vmul.f32 0.03125, %v149_v23  ;;  %v179_v26 = vmul.f32 %v10664_v20, %v10664_v20  ;;  %v181_v27 = vmul.f32 %v10666_v21, %v10666_v21  ;;  %v8268_v22 = vld [vmem:[%s10506_s13] ss:$0 sm:$0xff]  ;;  %s10464_s13 = smov 88  }
  0xc7   :  { %v10672_v28 = vsub.f32 %v128_v2, %v164_v24  ;;  %v10674_v29 = vsub.f32 %v130_v5, %v166_v25  ;;  %v187_v30 = vsel %vm137_vm0, %v179_v26, 0.0  ;;  %v193_v33 = vsel %vm137_vm0, %v181_v27, 0.0  ;;  %v8269_v25 = vld [vmem:[%s10511_s17] ss:$0 sm:$0xff]  ;;  %s10465_s17 = smov 120  }
  0xc8   :  { %188 = vadd.xlane.f32.xlu0 %v187_v30  ;;  %v152_v31 = vpop.xlane.xlu0 %151  ;;  %v155_v32 = vpop.xlane.xlu1 %154 }
  0xc9   :  { %v167_v34 = vmul.f32 0.03125, %v152_v31  ;;  %v168_v35 = vmul.f32 0.03125, %v155_v32  ;;  %v180_v36 = vmul.f32 %v10672_v28, %v10672_v28  ;;  %v182_v37 = vmul.f32 %v10674_v29, %v10674_v29 }
  0xcb   :  { %v10682_v38 = vsub.f32 %v131_v8, %v167_v34  ;;  %v10684_v39 = vsub.f32 %v132_v9, %v168_v35  ;;  %v190_v40 = vsel %vm137_vm0, %v180_v36, 0.0  ;;  %v196_v43 = vsel %vm137_vm0, %v182_v37, 0.0 }
  0xcc   :  { %194 = vadd.xlane.f32.xlu0 %v193_v33  ;;  %191 = vadd.xlane.f32.xlu1 %v190_v40  ;;  %v158_v41 = vpop.xlane.xlu0 %157  ;;  %v161_v42 = vpop.xlane.xlu1 %160 }
  0xcd   :  { %v169_v44 = vmul.f32 0.03125, %v158_v41  ;;  %v170_v45 = vmul.f32 0.03125, %v161_v42  ;;  %v183_v46 = vmul.f32 %v10682_v38, %v10682_v38  ;;  %v184_v47 = vmul.f32 %v10684_v39, %v10684_v39 }
  0xcf   :  { %v10692_v48 = vsub.f32 %v133_v12, %v169_v44  ;;  %v10694_v49 = vsub.f32 %v134_v13, %v170_v45  ;;  %v199_v50 = vsel %vm137_vm0, %v183_v46, 0.0  ;;  %v202_v51 = vsel %vm137_vm0, %v184_v47, 0.0 }
  0xd0   :  { %197 = vadd.xlane.f32.xlu1 %v196_v43  ;;  %200 = vadd.xlane.f32.xlu0 %v199_v50 }
  0xd1   :  { %v185_v52 = vmul.f32 %v10692_v48, %v10692_v48  ;;  %v186_v53 = vmul.f32 %v10694_v49, %v10694_v49 }
  0xd3   :  { %v205_v54 = vsel %vm137_vm0, %v185_v52, 0.0  ;;  %v208_v55 = vsel %vm137_vm0, %v186_v53, 0.0 }
  0xd4   :  { %203 = vadd.xlane.f32.xlu1 %v202_v51  ;;  %206 = vadd.xlane.f32.xlu0 %v205_v54 }
  0xd8   :  { %209 = vadd.xlane.f32.xlu1 %v208_v55 }
 0x151   :  { %v189_v60 = vpop.xlane.xlu0 %188 }
 0x152   :  { %v211_v61 = vmul.f32 0.03125, %v189_v60 }
 0x154   :  { %v219_v62 = vadd.f32 1e-12, %v211_v61 }
 0x155   :  { %v192_v63 = vpop.xlane.xlu1 %191  ;;  %v195_v0 = vpop.xlane.xlu0 %194 }
 0x156   :  { %9945 = vrsqrt.f32 %v219_v62  ;;  %v212_v1 = vmul.f32 0.03125, %v192_v63  ;;  %v213_v2 = vmul.f32 0.03125, %v195_v0 }
 0x158   :  { %v220_v3 = vadd.f32 1e-12, %v212_v1  ;;  %v221_v4 = vadd.f32 1e-12, %v213_v2 }
 0x159   :  { %v198_v5 = vpop.xlane.xlu1 %197  ;;  %v201_v6 = vpop.xlane.xlu0 %200 }
 0x15a   :  { %9947 = vrsqrt.f32 %v220_v3  ;;  %v214_v7 = vmul.f32 0.03125, %v198_v5  ;;  %v215_v8 = vmul.f32 0.03125, %v201_v6 }
 0x15b   :  { %9949 = vrsqrt.f32 %v221_v4 }
 0x15c   :  { %v222_v9 = vadd.f32 1e-12, %v214_v7  ;;  %v223_v10 = vadd.f32 1e-12, %v215_v8 }
 0x15d   :  { %v204_v11 = vpop.xlane.xlu1 %203  ;;  %v207_v12 = vpop.xlane.xlu0 %206 }
 0x15e   :  { %9951 = vrsqrt.f32 %v222_v9  ;;  %v216_v13 = vmul.f32 0.03125, %v204_v11  ;;  %v217_v14 = vmul.f32 0.03125, %v207_v12 }
 0x15f   :  { %9953 = vrsqrt.f32 %v223_v10 }
 0x160   :  { %v224_v15 = vadd.f32 1e-12, %v216_v13  ;;  %v225_v16 = vadd.f32 1e-12, %v217_v14 }
 0x161   :  { %v210_v17 = vpop.xlane.xlu1 %209 }
 0x162   :  { %9955 = vrsqrt.f32 %v224_v15  ;;  %v218_v18 = vmul.f32 0.03125, %v210_v17 }
 0x163   :  { %v9946_v19 = vpop.eup %9945  ;;  %9957 = vrsqrt.f32 %v225_v16 }
 0x164   :  { %v226_v23 = vadd.f32 1e-12, %v218_v18  ;;  %v235_v24 = vmul.f32 %v9946_v19, %v10664_v20 }
 0x166   :  { %9959 = vrsqrt.f32 %v226_v23  ;;  %v249_v26 = vmul.f32 %v8268_v22, %v235_v24 }
 0x167   :  { %v9948_v27 = vpop.eup %9947 }
 0x168   :  { %v9950_v30 = vpop.eup %9949  ;;  %v10711_v31 = vadd.f32 %v8269_v25, %v249_v26  ;;  %v236_v32 = vmul.f32 %v9948_v27, %v10672_v28  ;;  %v10840_v26 = vld [vmem:[%s10501_s9 + $0x8] sm:$0xff] }
 0x169   :  { %v237_v33 = vmul.f32 %v9950_v30, %v10666_v21  ;;  %v10843_v30 = vld [vmem:[%s10501_s9] sm:$0xff] }
 0x16a   :  { %9058 = vmatprep.mubr.msk.f32.mxu0 %vm137_vm0, %v10711_v31  ;;  %v250_v34 = vmul.f32 %v8268_v22, %v236_v32 }
 0x16b   :  { %v9952_v35 = vpop.eup %9951  ;;  %v251_v36 = vmul.f32 %v8268_v22, %v237_v33 }
 0x16c   :  { %v9954_v37 = vpop.eup %9953  ;;  %v10717_v40 = vadd.f32 %v8269_v25, %v250_v34  ;;  %v238_v20 = vmul.f32 %v9952_v35, %v10674_v29  ;;  %v10847_v34 = vld [vmem:[%s10501_s9 + $0x18] sm:$0xff] }
 0x16d   :  { %v10720_v41 = vadd.f32 %v8269_v25, %v251_v36  ;;  %v239_v42 = vmul.f32 %v9954_v37, %v10682_v38 }
 0x16e   :  { %9059 = vmatmul.mubr.msk.f32.vlgmr.msra.gmra.mxu0 %vm137_vm0, %v10717_v40  ;;  %v252_v28 = vmul.f32 %v8268_v22, %v238_v20 }
 0x16f   :  { %v9956_v21 = vpop.eup %9955  ;;  %9061 = vmatprep.mubr.msk.f32.mxu0 %vm137_vm0, %v10720_v41  ;;  %v253_v43 = vmul.f32 %v8268_v22, %v239_v42 }
 0x170   :  { %v9958_v44 = vpop.eup %9957  ;;  %v10727_v45 = vadd.f32 %v8269_v25, %v252_v28  ;;  %v240_v46 = vmul.f32 %v9956_v21, %v10684_v39  ;;  %v10854_v21 = vld [vmem:[%s10501_s9 + $0x10] sm:$0xff] }
 0x171   :  { %v10730_v47 = vadd.f32 %v8269_v25, %v253_v43  ;;  %v241_v29 = vmul.f32 %v9958_v44, %v10692_v48  ;;  %v10857_v43 = vld [vmem:[%s10501_s9 + $0x28] sm:$0xff] }
 0x172   :  { %9062 = vmatmul.mubr.msk.f32.gmra.mxu0 %vm137_vm0, %v10727_v45  ;;  %v254_v38 = vmul.f32 %v8268_v22, %v240_v46 }
 0x173   :  { %v9960_v50 = vpop.eup %9959  ;;  %9064 = vmatprep.mubr.msk.f32.mxu0 %vm137_vm0, %v10730_v47  ;;  %v255_v51 = vmul.f32 %v8268_v22, %v241_v29 }
 0x174   :  { %v10737_v52 = vadd.f32 %v8269_v25, %v254_v38  ;;  %v242_v53 = vmul.f32 %v9960_v50, %v10694_v49 }
 0x175   :  { %v10740_v54 = vadd.f32 %v8269_v25, %v255_v51  ;;  %v10863_v51 = vld [vmem:[%s10501_s9 + $0x20] sm:$0xff] }
 0x176   :  { %9065 = vmatmul.mubr.msk.f32.gmra.mxu0 %vm137_vm0, %v10737_v52  ;;  %v256_v39 = vmul.f32 %v8268_v22, %v242_v53  ;;  %v10866_v53 = vld [vmem:[%s10501_s9 + $0x38] sm:$0xff] }
 0x177   :  { %9067 = vmatprep.mubr.msk.f32.mxu0 %vm137_vm0, %v10740_v54 }
 0x178   :  { %v10746_v48 = vadd.f32 %v8269_v25, %v256_v39 }
 0x17a   :  { %9068 = vmatmul.mubr.msk.f32.gmra.mxu0 %vm137_vm0, %v10746_v48 }
 0x22e   :  { %v9060_v55 = vpop.f32.mrf.mxu0 }
 0x22f   :  { %v10769_v4 = vadd.f32 %v9060_v55, %v8270_v56 }
 0x230   :  { %v380_v57 = vpop.f32.mrf.mxu0 }
 0x231   :  { %v10751_v58 = vadd.f32 %v8270_v56, %v380_v57 }
 0x232   :  { %v9063_v49 = vpop.f32.mrf.mxu0 }
 0x233   :  { %9086 = vmatprep.mubr.msk.f32.mxu1 %vm443_vm1, %v10751_v58  ;;  %v10761_v2 = vadd.f32 %v9063_v49, %v8270_v56 }
 0x234   :  { %v390_v59 = vpop.f32.mrf.mxu0 }
 0x235   :  { %v10779_v6 = vadd.f32 %v8270_v56, %v390_v59 }
 0x236   :  { %v9066_v60 = vpop.f32.mrf.mxu0 }
 0x237   :  { %v10765_v3 = vadd.f32 %v9066_v60, %v8270_v56  ;;  %v10873_v60 = vld [vmem:[%s10501_s9 + $0x30] sm:$0xff] }
 0x238   :  { %v400_v61 = vpop.f32.mrf.mxu0 }
 0x239   :  { %v10773_v5 = vadd.f32 %v8270_v56, %v400_v61 }
 0x23a   :  { %v9069_v62 = vpop.f32.mrf.mxu0 }
 0x23b   :  { %v10755_v63 = vadd.f32 %v9069_v62, %v8270_v56 }
 0x23c   :  { %v410_v0 = vpop.f32.mrf.mxu0 }
 0x23d   :  { %v10757_v1 = vadd.f32 %v8270_v56, %v410_v0  ;;  %441 = vrot.lane.b32.xlu0 %v10755_v63, %s10462_s0 }
 0x23f   :  { %439 = vrot.lane.b32.xlu1 %v10757_v1, %s10462_s0 }
 0x241   :  { %433 = vrot.lane.b32.xlu0 %v10761_v2, %s10462_s0 }
 0x243   :  { %437 = vrot.lane.b32.xlu1 %v10765_v3, %s10462_s0 }
 0x245   :  { %429 = vrot.lane.b32.xlu0 %v10769_v4, %s10462_s0 }
 0x247   :  { %435 = vrot.lane.b32.xlu1 %v10773_v5, %s10462_s0 }
 0x249   :  { %684 = vrot.lane.b32.xlu0 %v10755_v63, %s10463_s5 }
 0x24b   :  { %431 = vrot.lane.b32.xlu1 %v10779_v6, %s10462_s0 }
 0x24d   :  { %676 = vrot.lane.b32.xlu0 %v10761_v2, %s10463_s5 }
 0x24f   :  { %427 = vrot.lane.b32.xlu1 %v10751_v58, %s10462_s0 }
 0x251   :  { %672 = vrot.lane.b32.xlu0 %v10769_v4, %s10463_s5 }
 0x253   :  { %680 = vrot.lane.b32.xlu1 %v10765_v3, %s10463_s5 }
 0x255   :  { %853 = vrot.lane.b32.xlu0 %v10755_v63, %s10464_s13 }
 0x257   :  { %678 = vrot.lane.b32.xlu1 %v10773_v5, %s10463_s5 }
 0x25b   :  { %674 = vrot.lane.b32.xlu1 %v10779_v6, %s10463_s5 }
 0x25f   :  { %670 = vrot.lane.b32.xlu1 %v10751_v58, %s10463_s5 }
 0x263   :  { %682 = vrot.lane.b32.xlu1 %v10757_v1, %s10463_s5 }
 0x267   :  { %851 = vrot.lane.b32.xlu1 %v10757_v1, %s10464_s13 }
 0x2af   :  { %v442_v7 = vpop.permute.xlu0 %441 }
 0x2b0   :  { %9070 = vmatprep.subr.msk.mxu1 %vm443_vm1, %v442_v7 }
 0x2b1   :  { %9071 = vmatpush3.xpose.msk.msra.mxu1 %vm443_vm1, %v442_v7  ;;  %v440_v8 = vpop.permute.xlu1 %439 }
 0x2b2   :  { %9072 = vmatprep.subr.msk.mxu1 %vm443_vm1, %v440_v8 }
 0x2b3   :  { %v434_v9 = vpop.permute.xlu0 %433 }
 0x2b5   :  { %9073 = vmatpush3.xpose.msk.msra.mxu1 %vm443_vm1, %v440_v8  ;;  %v438_v10 = vpop.permute.xlu1 %437 }
 0x2b6   :  { %9074 = vmatprep.subr.msk.mxu1 %vm443_vm1, %v438_v10 }
 0x2b7   :  { %v430_v11 = vpop.permute.xlu0 %429 }
 0x2b9   :  { %9075 = vmatpush3.xpose.msk.msra.mxu1 %vm443_vm1, %v438_v10  ;;  %v436_v12 = vpop.permute.xlu1 %435 }
 0x2ba   :  { %9076 = vmatprep.subr.msk.mxu1 %vm443_vm1, %v436_v12 }
 0x2bb   :  { %v685_v13 = vpop.permute.xlu0 %684 }
 0x2bc   :  { %9098 = vmatprep.subr.mxu0 %v685_v13 }
 0x2bd   :  { %9077 = vmatpush3.xpose.msk.msra.mxu1 %vm443_vm1, %v436_v12  ;;  %9099 = vmatpush3.msra.mxu0 %v685_v13  ;;  %v432_v14 = vpop.permute.xlu1 %431 }
 0x2be   :  { %9078 = vmatprep.subr.msk.mxu1 %vm443_vm1, %v434_v9 }
 0x2bf   :  { %v677_v23 = vpop.permute.xlu0 %676 }
 0x2c1   :  { %9079 = vmatpush3.xpose.msk.msra.mxu1 %vm443_vm1, %v434_v9  ;;  %v428_v15 = vpop.permute.xlu1 %427 }
 0x2c2   :  { %9080 = vmatprep.subr.msk.mxu1 %vm443_vm1, %v432_v14 }
 0x2c3   :  { %v673_v24 = vpop.permute.xlu0 %672 }
 0x2c5   :  { %9081 = vmatpush3.xpose.msk.msra.mxu1 %vm443_vm1, %v432_v14  ;;  %v681_v16 = vpop.permute.xlu1 %680 }
 0x2c6   :  { %9082 = vmatprep.subr.msk.mxu1 %vm443_vm1, %v430_v11 }
 0x2c7   :  { %v10835_v25 = vpop.permute.xlu0 %853 }
 0x2c9   :  { %9083 = vmatpush3.xpose.msk.msra.mxu1 %vm443_vm1, %v430_v11  ;;  %v679_v17 = vpop.permute.xlu1 %678 }
 0x2ca   :  { %9084 = vmatprep.subr.msk.mxu1 %vm443_vm1, %v428_v15 }
 0x2cd   :  { %9085 = vmatpush3.xpose.msk.msra.mxu1 %vm443_vm1, %v428_v15  ;;  %v675_v18 = vpop.permute.xlu1 %674 }
 0x2d0   :  { %9087 = vmatmul.mubr.msk.f32.vlgmr.msra.gmra.mxu1 %vm443_vm1, %v10769_v4 }
 0x2d1   :  { %9089 = vmatprep.mubr.msk.f32.mxu1 %vm443_vm1, %v10779_v6  ;;  %v671_v19 = vpop.permute.xlu1 %670 }
 0x2d4   :  { %9090 = vmatmul.mubr.msk.f32.gmra.mxu1 %vm443_vm1, %v10761_v2 }
 0x2d5   :  { %9092 = vmatprep.mubr.msk.f32.mxu1 %vm443_vm1, %v10773_v5  ;;  %v683_v22 = vpop.permute.xlu1 %682 }
 0x2d6   :  { %9100 = vmatprep.subr.mxu0 %v683_v22 }
 0x2d7   :  { %9101 = vmatpush3.msra.mxu0 %v683_v22 }
 0x2d8   :  { %9093 = vmatmul.mubr.msk.f32.gmra.mxu1 %vm443_vm1, %v10765_v3  ;;  %9102 = vmatprep.subr.mxu0 %v681_v16 }
 0x2d9   :  { %9095 = vmatprep.mubr.msk.f32.mxu1 %vm443_vm1, %v10757_v1  ;;  %9103 = vmatpush3.msra.mxu0 %v681_v16  ;;  %v10883_v8 = vpop.permute.xlu1 %851 }
 0x2da   :  { %9104 = vmatprep.subr.mxu0 %v679_v17 }
 0x2db   :  { %9105 = vmatpush3.msra.mxu0 %v679_v17 }
 0x2dc   :  { %9096 = vmatmul.mubr.msk.f32.gmra.mxu1 %vm443_vm1, %v10755_v63  ;;  %9106 = vmatprep.subr.mxu0 %v677_v23 }
 0x2dd   :  { %9107 = vmatpush3.msra.mxu0 %v677_v23 }
 0x2de   :  { %9108 = vmatprep.subr.mxu0 %v675_v18 }
 0x2df   :  { %9109 = vmatpush3.msra.mxu0 %v675_v18 }
 0x2e0   :  { %9110 = vmatprep.subr.mxu0 %v673_v24 }
 0x2e1   :  { %9111 = vmatpush3.msra.mxu0 %v673_v24 }
 0x2e2   :  { %9112 = vmatprep.subr.mxu0 %v671_v19 }
 0x2e3   :  { %9113 = vmatpush3.msra.mxu0 %v671_v19 }
 0x2e4   :  { %9126 = vmatprep.subr.msk.mxu0 %vm443_vm1, %v10835_v25 }
 0x390   :  { %v9088_v27 = vpop.f32.mrf.mxu1 }
 0x391   :  { %v548_v32 = vadd.f32 %v9088_v27, %v10840_v26 }
 0x392   :  { %v542_v33 = vpop.f32.mrf.mxu1 }
 0x393   :  { %v543_v35 = vadd.f32 %v542_v33, %v10843_v30  ;;  %v585_v36 = vsel %vm581_vm2, %v548_v32, -inf }
 0x394   :  { %586 = vmax.xlane.f32.xlu1 %v585_v36  ;;  %v9091_v37 = vpop.f32.mrf.mxu1 }
 0x395   :  { %v558_v20 = vadd.f32 %v9091_v37, %v10847_v34  ;;  %v582_v42 = vsel %vm581_vm2, %v543_v35, -inf }
 0x396   :  { %v552_v28 = vpop.f32.mrf.mxu1  ;;  %583 = vmax.xlane.f32.xlu0 %v582_v42 }
 0x397   :  { %v553_v46 = vadd.f32 %v552_v28, %v10854_v21  ;;  %v591_v38 = vsel %vm581_vm2, %v558_v20, -inf }
 0x398   :  { %v9094_v44 = vpop.f32.mrf.mxu1 }
 0x399   :  { %v568_v29 = vadd.f32 %v9094_v44, %v10857_v43  ;;  %v588_v49 = vsel %vm581_vm2, %v553_v46, -inf }
 0x39a   :  { %v562_v50 = vpop.f32.mrf.mxu1  ;;  %592 = vmax.xlane.f32.xlu0 %v591_v38 }
 0x39b   :  { %v597_v39 = vsel %vm581_vm2, %v568_v29, -inf  ;;  %v563_v56 = vadd.f32 %v562_v50, %v10863_v51 }
 0x39c   :  { %598 = vmax.xlane.f32.xlu1 %v597_v39  ;;  %v9097_v55 = vpop.f32.mrf.mxu1 }
 0x39d   :  { %v578_v57 = vadd.f32 %v9097_v55, %v10866_v53  ;;  %v594_v0 = vsel %vm581_vm2, %v563_v56, -inf }
 0x39e   :  { %v572_v59 = vpop.f32.mrf.mxu1  ;;  %589 = vmax.xlane.f32.xlu0 %v588_v49 }
 0x39f   :  { %v603_v61 = vsel %vm581_vm2, %v578_v57, -inf  ;;  %v573_v62 = vadd.f32 %v572_v59, %v10873_v60 }
 0x3a0   :  { %604 = vmax.xlane.f32.xlu1 %v603_v61 }
 0x3a1   :  { %v600_v7 = vsel %vm581_vm2, %v573_v62, -inf }
 0x3a2   :  { %595 = vmax.xlane.f32.xlu0 %v594_v0 }
 0x3a6   :  { %601 = vmax.xlane.f32.xlu0 %v600_v7 }
 0x3b1   :  { %847 = vrot.lane.b32.xlu1 %v10773_v5, %s10464_s13 }
 0x3bc   :  { %849 = vrot.lane.b32.xlu0 %v10765_v3, %s10464_s13 }
 0x41d   :  { %v587_v9 = vpop.xlane.xlu1 %586 }
 0x41e   :  { %v607_v10 = vsub.f32 %v548_v32, %v587_v9 }
 0x41f   :  { %v584_v11 = vpop.xlane.xlu0 %583 }
 0x420   :  { %v616_v12 = vmul.f32 1.442695, %v607_v10  ;;  %v606_v13 = vsub.f32 %v543_v35, %v584_v11 }
 0x422   :  { %9961 = vpow2.f32 %v616_v12  ;;  %v614_v14 = vmul.f32 1.442695, %v606_v13 }
 0x423   :  { %v593_v19 = vpop.xlane.xlu0 %592 }
 0x424   :  { %9963 = vpow2.f32 %v614_v14  ;;  %v609_v24 = vsub.f32 %v558_v20, %v593_v19 }
 0x425   :  { %v599_v23 = vpop.xlane.xlu1 %598 }
 0x426   :  { %v620_v33 = vmul.f32 1.442695, %v609_v24  ;;  %v611_v35 = vsub.f32 %v568_v29, %v599_v23 }
 0x427   :  { %v590_v22 = vpop.xlane.xlu0 %589 }
 0x428   :  { %v608_v32 = vsub.f32 %v553_v46, %v590_v22  ;;  %9965 = vpow2.f32 %v620_v33  ;;  %v624_v44 = vmul.f32 1.442695, %v611_v35 }
 0x429   :  { %v605_v36 = vpop.xlane.xlu1 %604 }
 0x42a   :  { %v618_v37 = vmul.f32 1.442695, %v608_v32  ;;  %v613_v38 = vsub.f32 %v578_v57, %v605_v36 }
 0x42b   :  { %v596_v27 = vpop.xlane.xlu0 %595 }
 0x42c   :  { %v610_v42 = vsub.f32 %v563_v56, %v596_v27  ;;  %9967 = vpow2.f32 %v618_v37  ;;  %v628_v55 = vmul.f32 1.442695, %v613_v38 }
 0x42d   :  { %9969 = vpow2.f32 %v624_v44  ;;  %v848_v11 = vpop.permute.xlu1 %847 }
 0x42e   :  { %v622_v50 = vmul.f32 1.442695, %v610_v42 }
 0x42f   :  { %v10885_v15 = vpop.eup %9961  ;;  %v602_v28 = vpop.xlane.xlu0 %601 }
 0x430   :  { %v633_v16 = vsel %vm581_vm2, %v10885_v15, 0.0  ;;  %v612_v39 = vsub.f32 %v573_v62, %v602_v28  ;;  %9971 = vpow2.f32 %v622_v50 }
 0x431   :  { %v10889_v17 = vpop.eup %9963  ;;  %634 = vadd.xlane.f32.xlu1 %v633_v16  ;;  %9973 = vpow2.f32 %v628_v55 }
 0x432   :  { %v630_v18 = vsel %vm581_vm2, %v10889_v17, 0.0  ;;  %v626_v49 = vmul.f32 1.442695, %v612_v39 }
 0x433   :  { %631 = vadd.xlane.f32.xlu0 %v630_v18  ;;  %v850_v12 = vpop.permute.xlu0 %849 }
 0x434   :  { %9975 = vpow2.f32 %v626_v49 }
 0x435   :  { %v10897_v20 = vpop.eup %9965 }
 0x436   :  { %v639_v29 = vsel %vm581_vm2, %v10897_v20, 0.0 }
 0x439   :  { %v10899_v46 = vpop.eup %9967 }
 0x43a   :  { %v10903_v56 = vpop.eup %9969  ;;  %v636_v57 = vsel %vm581_vm2, %v10899_v46, 0.0 }
 0x43b   :  { %v645_v61 = vsel %vm581_vm2, %v10903_v56, 0.0 }
 0x43d   :  { %v10907_v59 = vpop.eup %9971 }
 0x43e   :  { %v10911_v62 = vpop.eup %9973  ;;  %v642_v0 = vsel %vm581_vm2, %v10907_v59, 0.0 }
 0x43f   :  { %v651_v9 = vsel %vm581_vm2, %v10911_v62, 0.0 }
 0x441   :  { %v10915_v7 = vpop.eup %9975 }
 0x442   :  { %843 = vrot.lane.b32.xlu1 %v10779_v6, %s10464_s13  ;;  %v648_v10 = vsel %vm581_vm2, %v10915_v7, 0.0 }
 0x449   :  { %845 = vrot.lane.b32.xlu0 %v10761_v2, %s10464_s13 }
 0x466   :  { %640 = vadd.xlane.f32.xlu1 %v639_v29 }
 0x468   :  { %637 = vadd.xlane.f32.xlu0 %v636_v57 }
 0x46a   :  { %646 = vadd.xlane.f32.xlu1 %v645_v61 }
 0x46c   :  { %643 = vadd.xlane.f32.xlu0 %v642_v0 }
 0x46e   :  { %652 = vadd.xlane.f32.xlu1 %v651_v9 }
 0x470   :  { %649 = vadd.xlane.f32.xlu0 %v648_v10 }
 0x47f   :  { %839 = vrot.lane.b32.xlu1 %v10751_v58, %s10464_s13 }
 0x483   :  { %825 = vrot.lane.b32.xlu1 %v10769_v4, %s10465_s17 }
 0x486   :  { %841 = vrot.lane.b32.xlu0 %v10769_v4, %s10464_s13 }
 0x487   :  { %829 = vrot.lane.b32.xlu1 %v10761_v2, %s10465_s17 }
 0x48a   :  { %823 = vrot.lane.b32.xlu0 %v10751_v58, %s10465_s17 }
 0x48b   :  { %833 = vrot.lane.b32.xlu1 %v10765_v3, %s10465_s17 }
 0x48e   :  { %827 = vrot.lane.b32.xlu0 %v10779_v6, %s10465_s17 }
 0x48f   :  { %837 = vrot.lane.b32.xlu1 %v10755_v63, %s10465_s17 }
 0x492   :  { %831 = vrot.lane.b32.xlu0 %v10773_v5, %s10465_s17 }
 0x493   :  { %1092 = vrot.lane.b32.xlu1 %v10757_v1, %s10466_s15 }
 0x496   :  { %835 = vrot.lane.b32.xlu0 %v10757_v1, %s10465_s17 }
 0x497   :  { %1090 = vrot.lane.b32.xlu1 %v10765_v3, %s10466_s15 }
 0x49a   :  { %1094 = vrot.lane.b32.xlu0 %v10755_v63, %s10466_s15 }
 0x49b   :  { %1088 = vrot.lane.b32.xlu1 %v10773_v5, %s10466_s15 }
 0x49e   :  { %1086 = vrot.lane.b32.xlu0 %v10761_v2, %s10466_s15 }
 0x49f   :  { %1084 = vrot.lane.b32.xlu1 %v10779_v6, %s10466_s15 }
 0x4a2   :  { %1082 = vrot.lane.b32.xlu0 %v10769_v4, %s10466_s15 }
 0x4a3   :  { %1080 = vrot.lane.b32.xlu1 %v10751_v58, %s10466_s15 }
 0x4a6   :  { %1263 = vrot.lane.b32.xlu0 %v10755_v63, %s10467_s16 }
 0x4a7   :  { %1261 = vrot.lane.b32.xlu1 %v10757_v1, %s10467_s16 }
 0x4ba   :  { %v635_v13 = vpop.xlane.xlu1 %634 }
 0x4bb   :  { %9977 = vrcp.f32 %v635_v13 }
 0x4bc   :  { %v632_v14 = vpop.xlane.xlu0 %631 }
 0x4bd   :  { %9979 = vrcp.f32 %v632_v14 }
 0x4c8   :  { %v9978_v16 = vpop.eup %9977 }
 0x4c9   :  { %v663_v22 = vmul.f32 %v9978_v16, %v10885_v15  ;;  %v846_v15 = vpop.permute.xlu0 %845 }
 0x4ca   :  { %v9980_v18 = vpop.eup %9979 }
 0x4cb   :  { %v662_v19 = vmul.f32 %v9980_v18, %v10889_v17  ;;  %v844_v17 = vpop.permute.xlu1 %843 }
 0x4cd   :  { %9114 = vmatprep.mubr.msk.f32.mxu0 %vm581_vm2, %v662_v19 }
 0x4ce   :  { %9115 = vmatmul.mubr.msk.f32.vlgmr.msra.gmra.mxu0 %vm581_vm2, %v663_v22 }
 0x4cf   :  { %9127 = vmatpush3.xpose.msk.msra.mxu0 %vm443_vm1, %v10835_v25 }
 0x4d0   :  { %9128 = vmatprep.subr.msk.mxu0 %vm443_vm1, %v10883_v8 }
 0x4d3   :  { %9129 = vmatpush3.xpose.msk.msra.mxu0 %vm443_vm1, %v10883_v8 }
 0x4d4   :  { %9130 = vmatprep.subr.msk.mxu0 %vm443_vm1, %v850_v12 }
 0x4d7   :  { %9131 = vmatpush3.xpose.msk.msra.mxu0 %vm443_vm1, %v850_v12 }
 0x4d8   :  { %9132 = vmatprep.subr.msk.mxu0 %vm443_vm1, %v848_v11 }
 0x4db   :  { %9133 = vmatpush3.xpose.msk.msra.mxu0 %vm443_vm1, %v848_v11 }
 0x4dc   :  { %9134 = vmatprep.subr.msk.mxu0 %vm443_vm1, %v846_v15 }
 0x4df   :  { %9135 = vmatpush3.xpose.msk.msra.mxu0 %vm443_vm1, %v846_v15 }
 0x4e0   :  { %9136 = vmatprep.subr.msk.mxu0 %vm443_vm1, %v844_v17 }
 0x4e3   :  { %9137 = vmatpush3.xpose.msk.msra.mxu0 %vm443_vm1, %v844_v17 }
 0x4ef   :  { %v641_v25 = vpop.xlane.xlu1 %640 }
 0x4f0   :  { %9981 = vrcp.f32 %v641_v25 }
 0x4f1   :  { %v638_v8 = vpop.xlane.xlu0 %637 }
 0x4f2   :  { %9983 = vrcp.f32 %v638_v8 }
 0x4f3   :  { %v647_v23 = vpop.xlane.xlu1 %646 }
 0x4f4   :  { %9985 = vrcp.f32 %v647_v23 }
 0x4f5   :  { %v644_v24 = vpop.xlane.xlu0 %643 }
 0x4f6   :  { %9987 = vrcp.f32 %v644_v24 }
 0x4f7   :  { %v653_v27 = vpop.xlane.xlu1 %652 }
 0x4f8   :  { %9989 = vrcp.f32 %v653_v27 }
 0x4f9   :  { %v650_v32 = vpop.xlane.xlu0 %649 }
 0x4fa   :  { %9991 = vrcp.f32 %v650_v32 }
 0x4fb   :  { %v840_v33 = vpop.permute.xlu1 %839 }
 0x4fd   :  { %v842_v35 = vpop.permute.xlu0 %841  ;;  %v9982_v36 = vpop.eup %9981 }
 0x4fe   :  { %9138 = vmatprep.subr.msk.mxu0 %vm443_vm1, %v842_v35  ;;  %v665_v38 = vmul.f32 %v9982_v36, %v10897_v20 }
 0x4ff   :  { %v9984_v37 = vpop.eup %9983  ;;  %9139 = vmatpush3.xpose.msk.msra.mxu0 %vm443_vm1, %v842_v35  ;;  %v826_v42 = vpop.permute.xlu1 %825 }
 0x500   :  { %9140 = vmatprep.subr.msk.mxu0 %vm443_vm1, %v840_v33  ;;  %v664_v28 = vmul.f32 %v9984_v37, %v10899_v46 }
 0x501   :  { %v824_v44 = vpop.permute.xlu0 %823  ;;  %v9986_v50 = vpop.eup %9985 }
 0x502   :  { %9117 = vmatprep.mubr.msk.f32.mxu0 %vm581_vm2, %v664_v28  ;;  %v667_v57 = vmul.f32 %v9986_v50, %v10903_v56 }
 0x503   :  { %v9988_v39 = vpop.eup %9987  ;;  %9118 = vmatmul.mubr.msk.f32.gmra.mxu0 %vm581_vm2, %v665_v38  ;;  %v830_v55 = vpop.permute.xlu1 %829 }
 0x504   :  { %9141 = vmatpush3.xpose.msk.msra.mxu0 %vm443_vm1, %v840_v33  ;;  %v666_v49 = vmul.f32 %v9988_v39, %v10907_v59 }
 0x505   :  { %v828_v29 = vpop.permute.xlu0 %827  ;;  %v9990_v61 = vpop.eup %9989 }
 0x506   :  { %9120 = vmatprep.mubr.msk.f32.mxu0 %vm581_vm2, %v666_v49  ;;  %v669_v10 = vmul.f32 %v9990_v61, %v10911_v62 }
 0x507   :  { %v9992_v46 = vpop.eup %9991  ;;  %9121 = vmatmul.mubr.msk.f32.gmra.mxu0 %vm581_vm2, %v667_v57  ;;  %v834_v20 = vpop.permute.xlu1 %833 }
 0x508   :  { %v668_v0 = vmul.f32 %v9992_v46, %v10915_v7 }
 0x509   :  { %v832_v9 = vpop.permute.xlu0 %831 }
 0x50a   :  { %9123 = vmatprep.mubr.msk.f32.mxu0 %vm581_vm2, %v668_v0 }
 0x50b   :  { %9124 = vmatmul.mubr.msk.f32.gmra.mxu0 %vm581_vm2, %v669_v10  ;;  %v838_v59 = vpop.permute.xlu1 %837 }
 0x50c   :  { %9142 = vmatprep.mubr.msk.f32.mxu0 %vm443_vm1, %v824_v44 }
 0x50d   :  { %v836_v56 = vpop.permute.xlu0 %835 }
 0x50f   :  { %9143 = vmatmul.mubr.msk.f32.vlgmr.msra.gmra.mxu0 %vm443_vm1, %v826_v42  ;;  %v1093_v11 = vpop.permute.xlu1 %1092 }
 0x510   :  { %9145 = vmatprep.mubr.msk.f32.mxu0 %vm443_vm1, %v828_v29 }
 0x511   :  { %v1095_v12 = vpop.permute.xlu0 %1094 }
 0x512   :  { %9154 = vmatprep.subr.mxu1 %v1095_v12 }
 0x513   :  { %9146 = vmatmul.mubr.msk.f32.gmra.mxu0 %vm443_vm1, %v830_v55  ;;  %9155 = vmatpush3.msra.mxu1 %v1095_v12  ;;  %v1091_v7 = vpop.permute.xlu1 %1090 }
 0x514   :  { %9148 = vmatprep.mubr.msk.f32.mxu0 %vm443_vm1, %v832_v9  ;;  %9156 = vmatprep.subr.mxu1 %v1093_v11 }
 0x515   :  { %v1087_v62 = vpop.permute.xlu0 %1086  ;;  %9157 = vmatpush3.msra.mxu1 %v1093_v11 }
 0x516   :  { %9158 = vmatprep.subr.mxu1 %v1091_v7 }
 0x517   :  { %9149 = vmatmul.mubr.msk.f32.gmra.mxu0 %vm443_vm1, %v834_v20  ;;  %9159 = vmatpush3.msra.mxu1 %v1091_v7  ;;  %v1089_v13 = vpop.permute.xlu1 %1088 }
 0x518   :  { %9151 = vmatprep.mubr.msk.f32.mxu0 %vm443_vm1, %v836_v56  ;;  %9160 = vmatprep.subr.mxu1 %v1089_v13 }
 0x519   :  { %9161 = vmatpush3.msra.mxu1 %v1089_v13  ;;  %v1083_v14 = vpop.permute.xlu0 %1082 }
 0x51a   :  { %9162 = vmatprep.subr.mxu1 %v1087_v62 }
 0x51b   :  { %9152 = vmatmul.mubr.msk.f32.gmra.mxu0 %vm443_vm1, %v838_v59  ;;  %9163 = vmatpush3.msra.mxu1 %v1087_v62  ;;  %v1085_v16 = vpop.permute.xlu1 %1084 }
 0x51c   :  { %9164 = vmatprep.subr.mxu1 %v1085_v16 }
 0x51d   :  { %9165 = vmatpush3.msra.mxu1 %v1085_v16  ;;  %v11003_v19 = vpop.permute.xlu0 %1263 }
 0x51e   :  { %9166 = vmatprep.subr.mxu1 %v1083_v14 }
 0x51f   :  { %9167 = vmatpush3.msra.mxu1 %v1083_v14  ;;  %v1081_v18 = vpop.permute.xlu1 %1080 }
 0x520   :  { %9168 = vmatprep.subr.mxu1 %v1081_v18 }
 0x521   :  { %9169 = vmatpush3.msra.mxu1 %v1081_v18 }
 0x522   :  { %9182 = vmatprep.subr.msk.mxu1 %vm443_vm1, %v11003_v19 }
 0x523   :  { %v11043_v12 = vpop.permute.xlu1 %1261 }
 0x58e   :  { %v11007_v22 = vpop.f32.mrf.mxu0 }
 0x590   :  { %v11009_v15 = vpop.f32.mrf.mxu0 }
 0x5c3   :  { %v11011_v17 = vpop.f32.mrf.mxu0 }
 0x5c5   :  { %v11013_v25 = vpop.f32.mrf.mxu0 }
 0x5c7   :  { %v11015_v8 = vpop.f32.mrf.mxu0 }
 0x5c9   :  { %v11017_v23 = vpop.f32.mrf.mxu0 }
 0x5cb   :  { %v11019_v24 = vpop.f32.mrf.mxu0 }
 0x5cd   :  { %v11021_v27 = vpop.f32.mrf.mxu0 }
 0x5cf   :  { %v9144_v32 = vpop.f32.mrf.mxu0 }
 0x5d0   :  { %v959_v33 = vadd.f32 %v9144_v32, %v10840_v26 }
 0x5d1   :  { %v953_v35 = vpop.f32.mrf.mxu0 }
 0x5d2   :  { %v954_v36 = vadd.f32 %v953_v35, %v10843_v30  ;;  %v995_v37 = vsel %vm581_vm2, %v959_v33, -inf }
 0x5d3   :  { %996 = vmax.xlane.f32.xlu1 %v995_v37  ;;  %v9147_v42 = vpop.f32.mrf.mxu0 }
 0x5d4   :  { %v969_v28 = vadd.f32 %v9147_v42, %v10847_v34  ;;  %v992_v44 = vsel %vm581_vm2, %v954_v36, -inf }
 0x5d5   :  { %993 = vmax.xlane.f32.xlu0 %v992_v44  ;;  %v963_v38 = vpop.f32.mrf.mxu0 }
 0x5d6   :  { %v964_v39 = vadd.f32 %v963_v38, %v10854_v21  ;;  %v1001_v49 = vsel %vm581_vm2, %v969_v28, -inf }
 0x5d7   :  { %v9150_v50 = vpop.f32.mrf.mxu0 }
 0x5d8   :  { %v979_v55 = vadd.f32 %v9150_v50, %v10857_v43  ;;  %v998_v0 = vsel %vm581_vm2, %v964_v39, -inf }
 0x5d9   :  { %1002 = vmax.xlane.f32.xlu0 %v1001_v49  ;;  %v973_v29 = vpop.f32.mrf.mxu0 }
 0x5da   :  { %v1007_v57 = vsel %vm581_vm2, %v979_v55, -inf  ;;  %v974_v46 = vadd.f32 %v973_v29, %v10863_v51 }
 0x5db   :  { %1008 = vmax.xlane.f32.xlu1 %v1007_v57  ;;  %v9153_v61 = vpop.f32.mrf.mxu0 }
 0x5dc   :  { %v989_v20 = vadd.f32 %v9153_v61, %v10866_v53  ;;  %v1004_v56 = vsel %vm581_vm2, %v974_v46, -inf }
 0x5dd   :  { %999 = vmax.xlane.f32.xlu0 %v998_v0  ;;  %v983_v9 = vpop.f32.mrf.mxu0 }
 0x5de   :  { %v1013_v10 = vsel %vm581_vm2, %v989_v20, -inf  ;;  %v984_v59 = vadd.f32 %v983_v9, %v10873_v60 }
 0x5df   :  { %1014 = vmax.xlane.f32.xlu1 %v1013_v10 }
 0x5e0   :  { %v1010_v11 = vsel %vm581_vm2, %v984_v59, -inf }
 0x5e1   :  { %1005 = vmax.xlane.f32.xlu0 %v1004_v56 }
 0x5e5   :  { %1011 = vmax.xlane.f32.xlu0 %v1010_v11 }
 0x5f0   :  { %1257 = vrot.lane.b32.xlu1 %v10773_v5, %s10467_s16 }
 0x5fb   :  { %1259 = vrot.lane.b32.xlu0 %v10765_v3, %s10467_s16 }
 0x65c   :  { %v997_v7 = vpop.xlane.xlu1 %996 }
 0x65d   :  { %v1017_v62 = vsub.f32 %v959_v33, %v997_v7 }
 0x65e   :  { %v994_v13 = vpop.xlane.xlu0 %993 }
 0x65f   :  { %v1026_v14 = vmul.f32 1.442695, %v1017_v62  ;;  %v1016_v16 = vsub.f32 %v954_v36, %v994_v13 }
 0x661   :  { %9993 = vpow2.f32 %v1026_v14  ;;  %v1024_v18 = vmul.f32 1.442695, %v1016_v16 }
 0x662   :  { %v1003_v44 = vpop.xlane.xlu0 %1002 }
 0x663   :  { %9995 = vpow2.f32 %v1024_v18  ;;  %v1019_v38 = vsub.f32 %v969_v28, %v1003_v44 }
 0x664   :  { %v1009_v36 = vpop.xlane.xlu1 %1008 }
 0x665   :  { %v1030_v29 = vmul.f32 1.442695, %v1019_v38  ;;  %v1021_v57 = vsub.f32 %v979_v55, %v1009_v36 }
 0x666   :  { %v1000_v33 = vpop.xlane.xlu0 %999 }
 0x667   :  { %v1018_v49 = vsub.f32 %v964_v39, %v1000_v33  ;;  %9997 = vpow2.f32 %v1030_v29  ;;  %v1034_v56 = vmul.f32 1.442695, %v1021_v57 }
 0x668   :  { %v1015_v61 = vpop.xlane.xlu1 %1014 }
 0x669   :  { %v1028_v0 = vmul.f32 1.442695, %v1018_v49  ;;  %v1023_v11 = vsub.f32 %v989_v20, %v1015_v61 }
 0x66a   :  { %v1006_v50 = vpop.xlane.xlu0 %1005 }
 0x66b   :  { %v1020_v9 = vsub.f32 %v974_v46, %v1006_v50  ;;  %9999 = vpow2.f32 %v1028_v0  ;;  %v1038_v13 = vmul.f32 1.442695, %v1023_v11 }
 0x66c   :  { %10001 = vpow2.f32 %v1034_v56  ;;  %v1258_v36 = vpop.permute.xlu1 %1257 }
 0x66d   :  { %v1032_v7 = vmul.f32 1.442695, %v1020_v9 }
 0x66e   :  { %v11045_v32 = vpop.eup %9993  ;;  %v1012_v10 = vpop.xlane.xlu0 %1011 }
 0x66f   :  { %v1043_v35 = vsel %vm581_vm2, %v11045_v32, 0.0  ;;  %v1022_v62 = vsub.f32 %v984_v59, %v1012_v10  ;;  %10003 = vpow2.f32 %v1032_v7 }
 0x670   :  { %v11049_v37 = vpop.eup %9995  ;;  %1044 = vadd.xlane.f32.xlu1 %v1043_v35  ;;  %10005 = vpow2.f32 %v1038_v13 }
 0x671   :  { %v1040_v42 = vsel %vm581_vm2, %v11049_v37, 0.0  ;;  %v1036_v14 = vmul.f32 1.442695, %v1022_v62 }
 0x672   :  { %1041 = vadd.xlane.f32.xlu0 %v1040_v42  ;;  %v1260_v38 = vpop.permute.xlu0 %1259 }
 0x673   :  { %10007 = vpow2.f32 %v1036_v14 }
 0x674   :  { %v11057_v28 = vpop.eup %9997 }
 0x675   :  { %v1049_v55 = vsel %vm581_vm2, %v11057_v28, 0.0 }
 0x678   :  { %v11059_v39 = vpop.eup %9999 }
 0x679   :  { %v11063_v46 = vpop.eup %10001  ;;  %v1046_v20 = vsel %vm581_vm2, %v11059_v39, 0.0 }
 0x67a   :  { %v1055_v16 = vsel %vm581_vm2, %v11063_v46, 0.0 }
 0x67c   :  { %v11067_v59 = vpop.eup %10003 }
 0x67d   :  { %v11071_v18 = vpop.eup %10005  ;;  %v1052_v35 = vsel %vm581_vm2, %v11067_v59, 0.0 }
 0x67e   :  { %v1061_v44 = vsel %vm581_vm2, %v11071_v18, 0.0 }
 0x680   :  { %v11075_v42 = vpop.eup %10007 }
 0x681   :  { %1253 = vrot.lane.b32.xlu1 %v10779_v6, %s10467_s16  ;;  %v1058_v33 = vsel %vm581_vm2, %v11075_v42, 0.0 }
 0x688   :  { %1255 = vrot.lane.b32.xlu0 %v10761_v2, %s10467_s16 }
 0x6a5   :  { %1050 = vadd.xlane.f32.xlu1 %v1049_v55 }
 0x6a7   :  { %1047 = vadd.xlane.f32.xlu0 %v1046_v20 }
 0x6a9   :  { %1056 = vadd.xlane.f32.xlu1 %v1055_v16 }
 0x6ab   :  { %1053 = vadd.xlane.f32.xlu0 %v1052_v35 }
 0x6ad   :  { %1062 = vadd.xlane.f32.xlu1 %v1061_v44 }
 0x6af   :  { %1059 = vadd.xlane.f32.xlu0 %v1058_v33 }
 0x6be   :  { %1249 = vrot.lane.b32.xlu1 %v10751_v58, %s10467_s16 }
 0x6c2   :  { %1235 = vrot.lane.b32.xlu1 %v10769_v4, %s10468_s18 }
 0x6c5   :  { %1251 = vrot.lane.b32.xlu0 %v10769_v4, %s10467_s16 }
 0x6c6   :  { %1239 = vrot.lane.b32.xlu1 %v10761_v2, %s10468_s18 }
 0x6c9   :  { %1233 = vrot.lane.b32.xlu0 %v10751_v58, %s10468_s18 }
 0x6ca   :  { %1243 = vrot.lane.b32.xlu1 %v10765_v3, %s10468_s18 }
 0x6cd   :  { %1237 = vrot.lane.b32.xlu0 %v10779_v6, %s10468_s18 }
 0x6ce   :  { %1247 = vrot.lane.b32.xlu1 %v10755_v63, %s10468_s18 }
 0x6d1   :  { %1241 = vrot.lane.b32.xlu0 %v10773_v5, %s10468_s18 }
 0x6d2   :  { %1502 = vrot.lane.b32.xlu1 %v10757_v1, %s10469_s22 }
 0x6d5   :  { %1245 = vrot.lane.b32.xlu0 %v10757_v1, %s10468_s18 }
 0x6d6   :  { %1500 = vrot.lane.b32.xlu1 %v10765_v3, %s10469_s22 }
 0x6d9   :  { %1504 = vrot.lane.b32.xlu0 %v10755_v63, %s10469_s22 }
 0x6da   :  { %1498 = vrot.lane.b32.xlu1 %v10773_v5, %s10469_s22 }
 0x6dd   :  { %1496 = vrot.lane.b32.xlu0 %v10761_v2, %s10469_s22 }
 0x6de   :  { %1494 = vrot.lane.b32.xlu1 %v10779_v6, %s10469_s22 }
 0x6e1   :  { %1492 = vrot.lane.b32.xlu0 %v10769_v4, %s10469_s22 }
 0x6e2   :  { %1490 = vrot.lane.b32.xlu1 %v10751_v58, %s10469_s22 }
 0x6e5   :  { %1673 = vrot.lane.b32.xlu0 %v10755_v63, %s10470_s23 }
 0x6e6   :  { %1671 = vrot.lane.b32.xlu1 %v10757_v1, %s10470_s23 }
 0x6f9   :  { %v1045_v50 = vpop.xlane.xlu1 %1044 }
 0x6fa   :  { %10009 = vrcp.f32 %v1045_v50 }
 0x6fb   :  { %v1042_v49 = vpop.xlane.xlu0 %1041 }
 0x6fc   :  { %10011 = vrcp.f32 %v1042_v49 }
 0x707   :  { %v10010_v29 = vpop.eup %10009 }
 0x708   :  { %v1073_v0 = vmul.f32 %v10010_v29, %v11045_v32  ;;  %v1256_v32 = vpop.permute.xlu0 %1255 }
 0x709   :  { %v10012_v57 = vpop.eup %10011 }
 0x70a   :  { %v1072_v61 = vmul.f32 %v10012_v57, %v11049_v37  ;;  %v1254_v37 = vpop.permute.xlu1 %1253 }
 0x70c   :  { %9170 = vmatprep.mubr.msk.f32.mxu1 %vm581_vm2, %v1072_v61 }
 0x70d   :  { %9171 = vmatmul.mubr.msk.f32.vlgmr.msra.gmra.mxu1 %vm581_vm2, %v1073_v0 }
 0x70e   :  { %9183 = vmatpush3.xpose.msk.msra.mxu1 %vm443_vm1, %v11003_v19 }
 0x70f   :  { %9184 = vmatprep.subr.msk.mxu1 %vm443_vm1, %v11043_v12 }
 0x712   :  { %9185 = vmatpush3.xpose.msk.msra.mxu1 %vm443_vm1, %v11043_v12 }
 0x713   :  { %9186 = vmatprep.subr.msk.mxu1 %vm443_vm1, %v1260_v38 }
 0x716   :  { %9187 = vmatpush3.xpose.msk.msra.mxu1 %vm443_vm1, %v1260_v38 }
 0x717   :  { %9188 = vmatprep.subr.msk.mxu1 %vm443_vm1, %v1258_v36 }
 0x71a   :  { %9189 = vmatpush3.xpose.msk.msra.mxu1 %vm443_vm1, %v1258_v36 }
 0x71b   :  { %9190 = vmatprep.subr.msk.mxu1 %vm443_vm1, %v1256_v32 }
 0x71e   :  { %9191 = vmatpush3.xpose.msk.msra.mxu1 %vm443_vm1, %v1256_v32 }
 0x71f   :  { %9192 = vmatprep.subr.msk.mxu1 %vm443_vm1, %v1254_v37 }
 0x722   :  { %9193 = vmatpush3.xpose.msk.msra.mxu1 %vm443_vm1, %v1254_v37 }
 0x72e   :  { %v1051_v19 = vpop.xlane.xlu1 %1050 }
 0x72f   :  { %10013 = vrcp.f32 %v1051_v19 }
 0x730   :  { %v1048_v12 = vpop.xlane.xlu0 %1047 }
 0x731   :  { %10015 = vrcp.f32 %v1048_v12 }
 0x732   :  { %v1057_v9 = vpop.xlane.xlu1 %1056 }
 0x733   :  { %10017 = vrcp.f32 %v1057_v9 }
 0x734   :  { %v1054_v10 = vpop.xlane.xlu0 %1053 }
 0x735   :  { %10019 = vrcp.f32 %v1054_v10 }
 0x736   :  { %v1063_v56 = vpop.xlane.xlu1 %1062 }
 0x737   :  { %10021 = vrcp.f32 %v1063_v56 }
 0x738   :  { %v1060_v11 = vpop.xlane.xlu0 %1059 }
 0x739   :  { %10023 = vrcp.f32 %v1060_v11 }
 0x73a   :  { %v1250_v7 = vpop.permute.xlu1 %1249 }
 0x73c   :  { %v1252_v62 = vpop.permute.xlu0 %1251  ;;  %v10014_v13 = vpop.eup %10013 }
 0x73d   :  { %9194 = vmatprep.subr.msk.mxu1 %vm443_vm1, %v1252_v62  ;;  %v1075_v35 = vmul.f32 %v10014_v13, %v11057_v28 }
 0x73e   :  { %v10016_v14 = vpop.eup %10015  ;;  %9195 = vmatpush3.xpose.msk.msra.mxu1 %vm443_vm1, %v1252_v62  ;;  %v1236_v55 = vpop.permute.xlu1 %1235 }
 0x73f   :  { %9196 = vmatprep.subr.msk.mxu1 %vm443_vm1, %v1250_v7  ;;  %v1074_v20 = vmul.f32 %v10016_v14, %v11059_v39 }
 0x740   :  { %v1234_v16 = vpop.permute.xlu0 %1233  ;;  %v10018_v44 = vpop.eup %10017 }
 0x741   :  { %9173 = vmatprep.mubr.msk.f32.mxu1 %vm581_vm2, %v1074_v20  ;;  %v1077_v49 = vmul.f32 %v10018_v44, %v11063_v46 }
 0x742   :  { %v10020_v33 = vpop.eup %10019  ;;  %9174 = vmatmul.mubr.msk.f32.gmra.mxu1 %vm581_vm2, %v1075_v35  ;;  %v1240_v36 = vpop.permute.xlu1 %1239 }
 0x743   :  { %9197 = vmatpush3.xpose.msk.msra.mxu1 %vm443_vm1, %v1250_v7  ;;  %v1076_v38 = vmul.f32 %v10020_v33, %v11067_v59 }
 0x744   :  { %v1238_v50 = vpop.permute.xlu0 %1237  ;;  %v10022_v29 = vpop.eup %10021 }
 0x745   :  { %9176 = vmatprep.mubr.msk.f32.mxu1 %vm581_vm2, %v1076_v38  ;;  %v1079_v0 = vmul.f32 %v10022_v29, %v11071_v18 }
 0x746   :  { %v10024_v39 = vpop.eup %10023  ;;  %9177 = vmatmul.mubr.msk.f32.gmra.mxu1 %vm581_vm2, %v1077_v49  ;;  %v1244_v28 = vpop.permute.xlu1 %1243 }
 0x747   :  { %v1078_v57 = vmul.f32 %v10024_v39, %v11075_v42 }
 0x748   :  { %v1242_v61 = vpop.permute.xlu0 %1241 }
 0x749   :  { %9179 = vmatprep.mubr.msk.f32.mxu1 %vm581_vm2, %v1078_v57 }
 0x74a   :  { %9180 = vmatmul.mubr.msk.f32.gmra.mxu1 %vm581_vm2, %v1079_v0  ;;  %v1248_v59 = vpop.permute.xlu1 %1247 }
 0x74b   :  { %9198 = vmatprep.mubr.msk.f32.mxu1 %vm443_vm1, %v1234_v16 }
 0x74c   :  { %v1246_v46 = vpop.permute.xlu0 %1245 }
 0x74e   :  { %9199 = vmatmul.mubr.msk.f32.vlgmr.msra.gmra.mxu1 %vm443_vm1, %v1236_v55  ;;  %v1503_v32 = vpop.permute.xlu1 %1502 }
 0x74f   :  { %9201 = vmatprep.mubr.msk.f32.mxu1 %vm443_vm1, %v1238_v50 }
 0x750   :  { %v1505_v37 = vpop.permute.xlu0 %1504 }
 0x751   :  { %9210 = vmatprep.subr.mxu0 %v1505_v37 }
 0x752   :  { %9202 = vmatmul.mubr.msk.f32.gmra.mxu1 %vm443_vm1, %v1240_v36  ;;  %9211 = vmatpush3.msra.mxu0 %v1505_v37  ;;  %v1501_v42 = vpop.permute.xlu1 %1500 }
 0x753   :  { %9204 = vmatprep.mubr.msk.f32.mxu1 %vm443_vm1, %v1242_v61  ;;  %9212 = vmatprep.subr.mxu0 %v1503_v32 }
 0x754   :  { %v1497_v18 = vpop.permute.xlu0 %1496  ;;  %9213 = vmatpush3.msra.mxu0 %v1503_v32 }
 0x755   :  { %9214 = vmatprep.subr.mxu0 %v1501_v42 }
 0x756   :  { %9205 = vmatmul.mubr.msk.f32.gmra.mxu1 %vm443_vm1, %v1244_v28  ;;  %9215 = vmatpush3.msra.mxu0 %v1501_v42  ;;  %v1499_v19 = vpop.permute.xlu1 %1498 }
 0x757   :  { %9207 = vmatprep.mubr.msk.f32.mxu1 %vm443_vm1, %v1246_v46  ;;  %9216 = vmatprep.subr.mxu0 %v1499_v19 }
 0x758   :  { %9217 = vmatpush3.msra.mxu0 %v1499_v19  ;;  %v1493_v12 = vpop.permute.xlu0 %1492 }
 0x759   :  { %9218 = vmatprep.subr.mxu0 %v1497_v18 }
 0x75a   :  { %9208 = vmatmul.mubr.msk.f32.gmra.mxu1 %vm443_vm1, %v1248_v59  ;;  %9219 = vmatpush3.msra.mxu0 %v1497_v18  ;;  %v1495_v9 = vpop.permute.xlu1 %1494 }
 0x75b   :  { %9220 = vmatprep.subr.mxu0 %v1495_v9 }
 0x75c   :  { %9221 = vmatpush3.msra.mxu0 %v1495_v9  ;;  %v11163_v56 = vpop.permute.xlu0 %1673 }
 0x75d   :  { %9222 = vmatprep.subr.mxu0 %v1493_v12 }
 0x75e   :  { %9223 = vmatpush3.msra.mxu0 %v1493_v12  ;;  %v1491_v10 = vpop.permute.xlu1 %1490 }
 0x75f   :  { %9224 = vmatprep.subr.mxu0 %v1491_v10 }
 0x760   :  { %9225 = vmatpush3.msra.mxu0 %v1491_v10 }
 0x761   :  { %9238 = vmatprep.subr.msk.mxu0 %vm443_vm1, %v11163_v56 }
 0x7cd   :  { %v11167_v11 = vpop.f32.mrf.mxu1 }
 0x7cf   :  { %v11169_v7 = vpop.f32.mrf.mxu1 }
 0x802   :  { %v11171_v62 = vpop.f32.mrf.mxu1 }
 0x804   :  { %v11173_v13 = vpop.f32.mrf.mxu1 }
 0x806   :  { %v11175_v14 = vpop.f32.mrf.mxu1 }
 0x808   :  { %v11177_v55 = vpop.f32.mrf.mxu1 }
 0x80a   :  { %v11179_v20 = vpop.f32.mrf.mxu1 }
 0x80c   :  { %v11181_v16 = vpop.f32.mrf.mxu1 }
 0x80e   :  { %v9200_v35 = vpop.f32.mrf.mxu1 }
 0x80f   :  { %v1369_v44 = vadd.f32 %v9200_v35, %v10840_v26 }
 0x810   :  { %v1363_v33 = vpop.f32.mrf.mxu1 }
 0x811   :  { %v1364_v36 = vadd.f32 %v1363_v33, %v10843_v30  ;;  %v1405_v38 = vsel %vm581_vm2, %v1369_v44, -inf }
 0x812   :  { %1406 = vmax.xlane.f32.xlu1 %v1405_v38  ;;  %v9203_v50 = vpop.f32.mrf.mxu1 }
 0x813   :  { %v1379_v49 = vadd.f32 %v9203_v50, %v10847_v34  ;;  %v1402_v29 = vsel %vm581_vm2, %v1364_v36, -inf }
 0x814   :  { %1403 = vmax.xlane.f32.xlu0 %v1402_v29  ;;  %v1373_v39 = vpop.f32.mrf.mxu1 }
 0x815   :  { %v1374_v57 = vadd.f32 %v1373_v39, %v10854_v21  ;;  %v1411_v26 = vsel %vm581_vm2, %v1379_v49, -inf }
 0x816   :  { %v9206_v28 = vpop.f32.mrf.mxu1 }
 0x817   :  { %v1389_v61 = vadd.f32 %v9206_v28, %v10857_v43  ;;  %v1408_v32 = vsel %vm581_vm2, %v1374_v57, -inf }
 0x818   :  { %1412 = vmax.xlane.f32.xlu0 %v1411_v26  ;;  %v1383_v0 = vpop.f32.mrf.mxu1 }
 0x819   :  { %v1417_v30 = vsel %vm581_vm2, %v1389_v61, -inf  ;;  %v1384_v46 = vadd.f32 %v1383_v0, %v10863_v51  ;;  %v11203_v51 = vpop.permute.xlu1 %1671 }
 0x81a   :  { %1418 = vmax.xlane.f32.xlu1 %v1417_v30  ;;  %v9209_v59 = vpop.f32.mrf.mxu1 }
 0x81b   :  { %v1399_v34 = vadd.f32 %v9209_v59, %v10866_v53  ;;  %v1414_v42 = vsel %vm581_vm2, %v1384_v46, -inf }
 0x81c   :  { %1409 = vmax.xlane.f32.xlu0 %v1408_v32  ;;  %v1393_v37 = vpop.f32.mrf.mxu1 }
 0x81d   :  { %v1423_v21 = vsel %vm581_vm2, %v1399_v34, -inf  ;;  %v1394_v43 = vadd.f32 %v1393_v37, %v10873_v60 }
 0x81e   :  { %1424 = vmax.xlane.f32.xlu1 %v1423_v21 }
 0x81f   :  { %v1420_v18 = vsel %vm581_vm2, %v1394_v43, -inf }
 0x820   :  { %1415 = vmax.xlane.f32.xlu0 %v1414_v42 }
 0x824   :  { %1421 = vmax.xlane.f32.xlu0 %v1420_v18 }
 0x82f   :  { %1667 = vrot.lane.b32.xlu1 %v10773_v5, %s10470_s23 }
 0x83a   :  { %1669 = vrot.lane.b32.xlu0 %v10765_v3, %s10470_s23 }
 0x89b   :  { %v1407_v53 = vpop.xlane.xlu1 %1406 }
 0x89c   :  { %v1427_v19 = vsub.f32 %v1369_v44, %v1407_v53 }
 0x89d   :  { %v1404_v12 = vpop.xlane.xlu0 %1403 }
 0x89e   :  { %v1436_v9 = vmul.f32 1.442695, %v1427_v19  ;;  %v1426_v10 = vsub.f32 %v1364_v36, %v1404_v12 }
 0x8a0   :  { %10025 = vpow2.f32 %v1436_v9  ;;  %v1434_v60 = vmul.f32 1.442695, %v1426_v10 }
 0x8a1   :  { %v1413_v29 = vpop.xlane.xlu0 %1412 }
 0x8a2   :  { %10027 = vpow2.f32 %v1434_v60  ;;  %v1429_v39 = vsub.f32 %v1379_v49, %v1413_v29 }
 0x8a3   :  { %v1419_v36 = vpop.xlane.xlu1 %1418 }
 0x8a4   :  { %v1440_v0 = vmul.f32 1.442695, %v1429_v39  ;;  %v1431_v30 = vsub.f32 %v1389_v61, %v1419_v36 }
 0x8a5   :  { %v1410_v44 = vpop.xlane.xlu0 %1409 }
 0x8a6   :  { %v1428_v26 = vsub.f32 %v1374_v57, %v1410_v44  ;;  %10029 = vpow2.f32 %v1440_v0  ;;  %v1444_v42 = vmul.f32 1.442695, %v1431_v30 }
 0x8a7   :  { %v1425_v59 = vpop.xlane.xlu1 %1424 }
 0x8a8   :  { %v1438_v32 = vmul.f32 1.442695, %v1428_v26  ;;  %v1433_v18 = vsub.f32 %v1399_v34, %v1425_v59 }
 0x8a9   :  { %v1416_v28 = vpop.xlane.xlu0 %1415 }
 0x8aa   :  { %v1430_v37 = vsub.f32 %v1384_v46, %v1416_v28  ;;  %10031 = vpow2.f32 %v1438_v32  ;;  %v1448_v12 = vmul.f32 1.442695, %v1433_v18 }
 0x8ab   :  { %10033 = vpow2.f32 %v1444_v42  ;;  %v1668_v36 = vpop.permute.xlu1 %1667 }
 0x8ac   :  { %v1442_v53 = vmul.f32 1.442695, %v1430_v37 }
 0x8ad   :  { %v11205_v35 = vpop.eup %10025  ;;  %v1422_v21 = vpop.xlane.xlu0 %1421 }
 0x8ae   :  { %v1453_v33 = vsel %vm581_vm2, %v11205_v35, 0.0  ;;  %v1432_v19 = vsub.f32 %v1394_v43, %v1422_v21  ;;  %10035 = vpow2.f32 %v1442_v53 }
 0x8af   :  { %v11209_v38 = vpop.eup %10027  ;;  %1454 = vadd.xlane.f32.xlu1 %v1453_v33  ;;  %10037 = vpow2.f32 %v1448_v12 }
 0x8b0   :  { %v1450_v50 = vsel %vm581_vm2, %v11209_v38, 0.0  ;;  %v1446_v9 = vmul.f32 1.442695, %v1432_v19 }
 0x8b1   :  { %1451 = vadd.xlane.f32.xlu0 %v1450_v50  ;;  %v1670_v39 = vpop.permute.xlu0 %1669 }
 0x8b2   :  { %10039 = vpow2.f32 %v1446_v9 }
 0x8b3   :  { %v11217_v49 = vpop.eup %10029 }
 0x8b4   :  { %v1459_v61 = vsel %vm581_vm2, %v11217_v49, 0.0 }
 0x8b7   :  { %v11219_v57 = vpop.eup %10031 }
 0x8b8   :  { %v11223_v46 = vpop.eup %10033  ;;  %v1456_v34 = vsel %vm581_vm2, %v11219_v57, 0.0 }
 0x8b9   :  { %v1465_v10 = vsel %vm581_vm2, %v11223_v46, 0.0 }
 0x8bb   :  { %v11227_v43 = vpop.eup %10035 }
 0x8bc   :  { %v11231_v60 = vpop.eup %10037  ;;  %v1462_v33 = vsel %vm581_vm2, %v11227_v43, 0.0 }
 0x8bd   :  { %v1471_v29 = vsel %vm581_vm2, %v11231_v60, 0.0 }
 0x8bf   :  { %v11235_v50 = vpop.eup %10039 }
 0x8c0   :  { %1663 = vrot.lane.b32.xlu1 %v10779_v6, %s10470_s23  ;;  %v1468_v44 = vsel %vm581_vm2, %v11235_v50, 0.0 }
 0x8c7   :  { %1665 = vrot.lane.b32.xlu0 %v10761_v2, %s10470_s23 }
 0x8e4   :  { %1460 = vadd.xlane.f32.xlu1 %v1459_v61 }
 0x8e6   :  { %1457 = vadd.xlane.f32.xlu0 %v1456_v34 }
 0x8e8   :  { %1466 = vadd.xlane.f32.xlu1 %v1465_v10 }
 0x8ea   :  { %1463 = vadd.xlane.f32.xlu0 %v1462_v33 }
 0x8ec   :  { %1472 = vadd.xlane.f32.xlu1 %v1471_v29 }
 0x8ee   :  { %1469 = vadd.xlane.f32.xlu0 %v1468_v44 }
 0x8fd   :  { %1659 = vrot.lane.b32.xlu1 %v10751_v58, %s10470_s23 }
 0x901   :  { %1645 = vrot.lane.b32.xlu1 %v10769_v4, %s10471_s26 }
 0x904   :  { %1661 = vrot.lane.b32.xlu0 %v10769_v4, %s10470_s23 }
 0x905   :  { %1649 = vrot.lane.b32.xlu1 %v10761_v2, %s10471_s26 }
 0x908   :  { %1643 = vrot.lane.b32.xlu0 %v10751_v58, %s10471_s26 }
 0x909   :  { %1653 = vrot.lane.b32.xlu1 %v10765_v3, %s10471_s26 }
 0x90c   :  { %1647 = vrot.lane.b32.xlu0 %v10779_v6, %s10471_s26 }
 0x90d   :  { %1657 = vrot.lane.b32.xlu1 %v10755_v63, %s10471_s26 }
 0x910   :  { %1651 = vrot.lane.b32.xlu0 %v10773_v5, %s10471_s26 }
 0x914   :  { %1655 = vrot.lane.b32.xlu0 %v10757_v1, %s10471_s26 }
 0x938   :  { %v1455_v28 = vpop.xlane.xlu1 %1454 }
 0x939   :  { %10041 = vrcp.f32 %v1455_v28 }
 0x93a   :  { %v1452_v26 = vpop.xlane.xlu0 %1451 }
 0x93b   :  { %10043 = vrcp.f32 %v1452_v26 }
 0x946   :  { %v10042_v0 = vpop.eup %10041 }
 0x947   :  { %v1483_v32 = vmul.f32 %v10042_v0, %v11205_v35  ;;  %v1666_v35 = vpop.permute.xlu0 %1665 }
 0x948   :  { %v10044_v30 = vpop.eup %10043 }
 0x949   :  { %v1482_v59 = vmul.f32 %v10044_v30, %v11209_v38  ;;  %v1664_v38 = vpop.permute.xlu1 %1663 }
 0x94b   :  { %9226 = vmatprep.mubr.msk.f32.mxu0 %vm581_vm2, %v1482_v59 }
 0x94c   :  { %9227 = vmatmul.mubr.msk.f32.vlgmr.msra.gmra.mxu0 %vm581_vm2, %v1483_v32 }
 0x94d   :  { %9239 = vmatpush3.xpose.msk.msra.mxu0 %vm443_vm1, %v11163_v56 }
 0x94e   :  { %9240 = vmatprep.subr.msk.mxu0 %vm443_vm1, %v11203_v51 }
 0x951   :  { %9241 = vmatpush3.xpose.msk.msra.mxu0 %vm443_vm1, %v11203_v51 }
 0x952   :  { %9242 = vmatprep.subr.msk.mxu0 %vm443_vm1, %v1670_v39 }
 0x955   :  { %9243 = vmatpush3.xpose.msk.msra.mxu0 %vm443_vm1, %v1670_v39 }
 0x956   :  { %9244 = vmatprep.subr.msk.mxu0 %vm443_vm1, %v1668_v36 }
 0x959   :  { %9245 = vmatpush3.xpose.msk.msra.mxu0 %vm443_vm1, %v1668_v36 }
 0x95a   :  { %9246 = vmatprep.subr.msk.mxu0 %vm443_vm1, %v1666_v35 }
 0x95d   :  { %9247 = vmatpush3.xpose.msk.msra.mxu0 %vm443_vm1, %v1666_v35 }
 0x95e   :  { %9248 = vmatprep.subr.msk.mxu0 %vm443_vm1, %v1664_v38 }
 0x961   :  { %9249 = vmatpush3.xpose.msk.msra.mxu0 %vm443_vm1, %v1664_v38 }
 0x96d   :  { %v1461_v56 = vpop.xlane.xlu1 %1460 }
 0x96e   :  { %10045 = vrcp.f32 %v1461_v56 }
 0x96f   :  { %v1458_v51 = vpop.xlane.xlu0 %1457 }
 0x970   :  { %10047 = vrcp.f32 %v1458_v51 }
 0x971   :  { %v1467_v37 = vpop.xlane.xlu1 %1466 }
 0x972   :  { %10049 = vrcp.f32 %v1467_v37 }
 0x973   :  { %v1464_v21 = vpop.xlane.xlu0 %1463 }
 0x974   :  { %10051 = vrcp.f32 %v1464_v21 }
 0x975   :  { %v1473_v42 = vpop.xlane.xlu1 %1472 }
 0x976   :  { %10053 = vrcp.f32 %v1473_v42 }
 0x977   :  { %v1470_v18 = vpop.xlane.xlu0 %1469 }
 0x978   :  { %10055 = vrcp.f32 %v1470_v18  ;;  %v10385_v18 = vld [vmem:[%s10501_s9 + $0x8] sm:$0xff] }
 0x979   :  { %v1660_v9 = vpop.permute.xlu1 %1659 }
 0x97b   :  { %v1662_v53 = vpop.permute.xlu0 %1661  ;;  %v10046_v19 = vpop.eup %10045 }
 0x97c   :  { %9250 = vmatprep.subr.msk.mxu0 %vm443_vm1, %v1662_v53  ;;  %v1485_v34 = vmul.f32 %v10046_v19, %v11217_v49 }
 0x97d   :  { %v10048_v12 = vpop.eup %10047  ;;  %9251 = vmatpush3.xpose.msk.msra.mxu0 %vm443_vm1, %v1662_v53  ;;  %v1646_v49 = vpop.permute.xlu1 %1645 }
 0x97e   :  { %9252 = vmatprep.subr.msk.mxu0 %vm443_vm1, %v1660_v9  ;;  %v1484_v61 = vmul.f32 %v10048_v12, %v11219_v57  ;;  %v10386_v12 = vld [vmem:[%s10501_s9] sm:$0xff] }
 0x97f   :  { %v10050_v10 = vpop.eup %10049  ;;  %v1644_v44 = vpop.permute.xlu0 %1643 }
 0x980   :  { %9229 = vmatprep.mubr.msk.f32.mxu0 %vm581_vm2, %v1484_v61  ;;  %v1487_v36 = vmul.f32 %v10050_v10, %v11223_v46  ;;  %v10387_v10 = vld [vmem:[%s10501_s9 + $0x18] sm:$0xff] }
 0x981   :  { %v10052_v33 = vpop.eup %10051  ;;  %9230 = vmatmul.mubr.msk.f32.gmra.mxu0 %vm581_vm2, %v1485_v34 }
 0x982   :  { %9253 = vmatpush3.xpose.msk.msra.mxu0 %vm443_vm1, %v1660_v9  ;;  %v1486_v29 = vmul.f32 %v10052_v33, %v11227_v43  ;;  %v1650_v43 = vpop.permute.xlu1 %1649 }
 0x983   :  { %v10054_v39 = vpop.eup %10053  ;;  %v1648_v0 = vpop.permute.xlu0 %1647 }
 0x984   :  { %9232 = vmatprep.mubr.msk.f32.mxu0 %vm581_vm2, %v1486_v29  ;;  %v1489_v26 = vmul.f32 %v10054_v39, %v11231_v60  ;;  %v10388_v39 = vld [vmem:[%s10501_s9 + $0x10] sm:$0xff] }
 0x985   :  { %v10056_v28 = vpop.eup %10055  ;;  %9233 = vmatmul.mubr.msk.f32.gmra.mxu0 %vm581_vm2, %v1487_v36 }
 0x986   :  { %v1488_v57 = vmul.f32 %v10056_v28, %v11235_v50  ;;  %v1654_v30 = vpop.permute.xlu1 %1653 }
 0x987   :  { %v1652_v46 = vpop.permute.xlu0 %1651 }
 0x988   :  { %9235 = vmatprep.mubr.msk.f32.mxu0 %vm581_vm2, %v1488_v57 }
 0x989   :  { %9236 = vmatmul.mubr.msk.f32.gmra.mxu0 %vm581_vm2, %v1489_v26 }
 0x98a   :  { %9254 = vmatprep.mubr.msk.f32.mxu0 %vm443_vm1, %v1644_v44  ;;  %v1658_v50 = vpop.permute.xlu1 %1657 }
 0x98b   :  { %v1656_v60 = vpop.permute.xlu0 %1655 }
 0x98d   :  { %9255 = vmatmul.mubr.msk.f32.vlgmr.msra.gmra.mxu0 %vm443_vm1, %v1646_v49  ;;  %v10389_v49 = vld [vmem:[%s10501_s9 + $0x28] sm:$0xff] }
 0x98e   :  { %9257 = vmatprep.mubr.msk.f32.mxu0 %vm443_vm1, %v1648_v0 }
 0x991   :  { %9258 = vmatmul.mubr.msk.f32.gmra.mxu0 %vm443_vm1, %v1650_v43 }
 0x992   :  { %9260 = vmatprep.mubr.msk.f32.mxu0 %vm443_vm1, %v1652_v46 }
 0x995   :  { %9261 = vmatmul.mubr.msk.f32.gmra.mxu0 %vm443_vm1, %v1654_v30  ;;  %v10390_v30 = vld [vmem:[%s10501_s9 + $0x20] sm:$0xff] }
 0x996   :  { %9263 = vmatprep.mubr.msk.f32.mxu0 %vm443_vm1, %v1656_v60 }
 0x999   :  { %9264 = vmatmul.mubr.msk.f32.gmra.mxu0 %vm443_vm1, %v1658_v50  ;;  %v10391_v50 = vld [vmem:[%s10501_s9 + $0x38] sm:$0xff] }
 0xa0c   :  { %v11303_v59 = vpop.f32.mrf.mxu0 }
 0xa0e   :  { %v11305_v32 = vpop.f32.mrf.mxu0 }
 0xa41   :  { %v11307_v35 = vpop.f32.mrf.mxu0 }
 0xa43   :  { %v11309_v38 = vpop.f32.mrf.mxu0 }
 0xa45   :  { %v11311_v56 = vpop.f32.mrf.mxu0 }
 0xa47   :  { %v11313_v51 = vpop.f32.mrf.mxu0 }
 0xa49   :  { %v11315_v37 = vpop.f32.mrf.mxu0 }
 0xa4b   :  { %v11317_v21 = vpop.f32.mrf.mxu0 }
 0xa4d   :  { %v9256_v42 = vpop.f32.mrf.mxu0 }
 0xa4e   :  { %v1779_v53 = vadd.f32 %v10385_v18, %v9256_v42 }
 0xa4f   :  { %v1773_v19 = vpop.f32.mrf.mxu0 }
 0xa50   :  { %v1774_v9 = vadd.f32 %v10386_v12, %v1773_v19  ;;  %v1815_v61 = vsel %vm581_vm2, %v1779_v53, -inf }
 0xa51   :  { %1816 = vmax.xlane.f32.xlu1 %v1815_v61  ;;  %v9259_v34 = vpop.f32.mrf.mxu0  ;;  %v10392_v61 = vld [vmem:[%s10501_s9 + $0x30] sm:$0xff] }
 0xa52   :  { %v1789_v33 = vadd.f32 %v10387_v10, %v9259_v34  ;;  %v1812_v29 = vsel %vm581_vm2, %v1774_v9, -inf }
 0xa53   :  { %1813 = vmax.xlane.f32.xlu0 %v1812_v29  ;;  %v1783_v44 = vpop.f32.mrf.mxu0 }
 0xa54   :  { %v1784_v28 = vadd.f32 %v10388_v39, %v1783_v44  ;;  %v1821_v26 = vsel %vm581_vm2, %v1789_v33, -inf }
 0xa55   :  { %v9262_v36 = vpop.f32.mrf.mxu0 }
 0xa56   :  { %v1799_v57 = vadd.f32 %v10389_v49, %v9262_v36  ;;  %v1818_v18 = vsel %vm581_vm2, %v1784_v28, -inf }
 0xa57   :  { %1822 = vmax.xlane.f32.xlu0 %v1821_v26  ;;  %v1793_v0 = vpop.f32.mrf.mxu0 }
 0xa58   :  { %v1827_v43 = vsel %vm581_vm2, %v1799_v57, -inf  ;;  %v1794_v60 = vadd.f32 %v10390_v30, %v1793_v0 }
 0xa59   :  { %1828 = vmax.xlane.f32.xlu1 %v1827_v43  ;;  %v9265_v46 = vpop.f32.mrf.mxu0 }
 0xa5a   :  { %v1809_v42 = vadd.f32 %v10391_v50, %v9265_v46  ;;  %v1824_v10 = vsel %vm581_vm2, %v1794_v60, -inf }
 0xa5b   :  { %1819 = vmax.xlane.f32.xlu0 %v1818_v18  ;;  %v1803_v19 = vpop.f32.mrf.mxu0 }
 0xa5c   :  { %v1833_v12 = vsel %vm581_vm2, %v1809_v42, -inf  ;;  %v1804_v34 = vadd.f32 %v10392_v61, %v1803_v19 }
 0xa5d   :  { %1834 = vmax.xlane.f32.xlu1 %v1833_v12 }
 0xa5e   :  { %v1830_v29 = vsel %vm581_vm2, %v1804_v34, -inf }
 0xa5f   :  { %1825 = vmax.xlane.f32.xlu0 %v1824_v10 }
 0xa63   :  { %1831 = vmax.xlane.f32.xlu0 %v1830_v29 }
 0xa6e   :  { %1912 = vrot.lane.b32.xlu1 %v10757_v1, %s10472_s28 }
 0xa72   :  { %1910 = vrot.lane.b32.xlu1 %v10765_v3, %s10472_s28 }
 0xa76   :  { %1908 = vrot.lane.b32.xlu1 %v10773_v5, %s10472_s28 }
 0xa79   :  { %1914 = vrot.lane.b32.xlu0 %v10755_v63, %s10472_s28 }
 0xa7a   :  { %1904 = vrot.lane.b32.xlu1 %v10779_v6, %s10472_s28 }
 0xa7d   :  { %1906 = vrot.lane.b32.xlu0 %v10761_v2, %s10472_s28 }
 0xada   :  { %v1817_v44 = vpop.xlane.xlu1 %1816 }
 0xadb   :  { %v1837_v36 = vsub.f32 %v1779_v53, %v1817_v44 }
 0xadc   :  { %v1814_v39 = vpop.xlane.xlu0 %1813 }
 0xadd   :  { %v1846_v49 = vmul.f32 1.442695, %v1837_v36  ;;  %v1836_v1 = vsub.f32 %v1774_v9, %v1814_v39 }
 0xadf   :  { %10057 = vpow2.f32 %v1846_v49  ;;  %v1844_v26 = vmul.f32 1.442695, %v1836_v1 }
 0xae0   :  { %v1823_v3 = vpop.xlane.xlu0 %1822 }
 0xae1   :  { %10059 = vpow2.f32 %v1844_v26  ;;  %v1839_v0 = vsub.f32 %v1789_v33, %v1823_v3 }
 0xae2   :  { %v1829_v5 = vpop.xlane.xlu1 %1828 }
 0xae3   :  { %v1850_v43 = vmul.f32 1.442695, %v1839_v0  ;;  %v1841_v46 = vsub.f32 %v1799_v57, %v1829_v5 }
 0xae4   :  { %v1820_v63 = vpop.xlane.xlu0 %1819 }
 0xae5   :  { %10061 = vpow2.f32 %v1850_v43  ;;  %v1854_v30 = vmul.f32 1.442695, %v1841_v46  ;;  %v1838_v6 = vsub.f32 %v1784_v28, %v1820_v63 }
 0xae6   :  { %v1835_v50 = vpop.xlane.xlu1 %1834 }
 0xae7   :  { %10063 = vpow2.f32 %v1854_v30  ;;  %v1848_v2 = vmul.f32 1.442695, %v1838_v6  ;;  %v1843_v18 = vsub.f32 %v1809_v42, %v1835_v50 }
 0xae8   :  { %v1826_v53 = vpop.xlane.xlu0 %1825 }
 0xae9   :  { %10065 = vpow2.f32 %v1848_v2  ;;  %v1858_v19 = vmul.f32 1.442695, %v1843_v18  ;;  %v1840_v9 = vsub.f32 %v1794_v60, %v1826_v53 }
 0xaea   :  { %v1913_v12 = vpop.permute.xlu1 %1912 }
 0xaeb   :  { %v1852_v61 = vmul.f32 1.442695, %v1840_v9  ;;  %10067 = vpow2.f32 %v1858_v19 }
 0xaec   :  { %v11347_v10 = vpop.eup %10057  ;;  %v1832_v33 = vpop.xlane.xlu0 %1831 }
 0xaed   :  { %10069 = vpow2.f32 %v1852_v61  ;;  %v1842_v57 = vsub.f32 %v1804_v34, %v1832_v33  ;;  %v1863_v29 = vsel %vm581_vm2, %v11347_v10, 0.0 }
 0xaee   :  { %v11351_v28 = vpop.eup %10059  ;;  %1864 = vadd.xlane.f32.xlu1 %v1863_v29  ;;  %v1911_v42 = vpop.permute.xlu1 %1910  ;;  %v2177_v29 = vld [vmem:[%s10526_s29 + $0x10] sm:$0xff] }
 0xaef   :  { %v1856_v44 = vmul.f32 1.442695, %v1842_v57  ;;  %v1860_v36 = vsel %vm581_vm2, %v11351_v28, 0.0  ;;  %v2178_v57 = vld [vmem:[%s10526_s29 + $0x18] sm:$0xff] }
 0xaf0   :  { %1861 = vadd.xlane.f32.xlu0 %v1860_v36  ;;  %v1915_v60 = vpop.permute.xlu0 %1914 }
 0xaf1   :  { %10071 = vpow2.f32 %v1856_v44  ;;  %9266 = vmatprep.subr.mxu1 %v1915_v60  ;;  %v2175_v44 = vld [vmem:[%s10526_s29] sm:$0xff] }
 0xaf2   :  { %v11355_v39 = vpop.eup %10061  ;;  %9267 = vmatpush3.msra.mxu1 %v1915_v60  ;;  %v1909_v1 = vpop.permute.xlu1 %1908 }
 0xaf3   :  { %9268 = vmatprep.subr.mxu1 %v1913_v12  ;;  %v1869_v34 = vsel %vm581_vm2, %v11355_v39, 0.0 }
 0xaf4   :  { %v11359_v49 = vpop.eup %10063  ;;  %1870 = vadd.xlane.f32.xlu1 %v1869_v34  ;;  %9269 = vmatpush3.msra.mxu1 %v1913_v12  ;;  %v1907_v43 = vpop.permute.xlu0 %1906 }
 0xaf5   :  { %9270 = vmatprep.subr.mxu1 %v1911_v42  ;;  %v1875_v0 = vsel %vm581_vm2, %v11359_v49, 0.0 }
 0xaf6   :  { %v11361_v26 = vpop.eup %10065  ;;  %9271 = vmatpush3.msra.mxu1 %v1911_v42  ;;  %v1905_v63 = vpop.permute.xlu1 %1904 }
 0xaf7   :  { %9272 = vmatprep.subr.mxu1 %v1909_v1  ;;  %v1866_v3 = vsel %vm581_vm2, %v11361_v26, 0.0 }
 0xaf8   :  { %1867 = vadd.xlane.f32.xlu0 %v1866_v3  ;;  %1876 = vadd.xlane.f32.xlu1 %v1875_v0  ;;  %v11367_v5 = vpop.eup %10067 }
 0xaf9   :  { %9273 = vmatpush3.msra.mxu1 %v1909_v1  ;;  %v1881_v6 = vsel %vm581_vm2, %v11367_v5, 0.0 }
 0xafa   :  { %v11369_v46 = vpop.eup %10069  ;;  %9274 = vmatprep.subr.mxu1 %v1907_v43 }
 0xafb   :  { %9275 = vmatpush3.msra.mxu1 %v1907_v43  ;;  %v1872_v30 = vsel %vm581_vm2, %v11369_v46, 0.0 }
 0xafc   :  { %9276 = vmatprep.subr.mxu1 %v1905_v63  ;;  %1873 = vadd.xlane.f32.xlu0 %v1872_v30 }
 0xafd   :  { %1882 = vadd.xlane.f32.xlu1 %v1881_v6  ;;  %9277 = vmatpush3.msra.mxu1 %v1905_v63 }
 0xafe   :  { %v11375_v50 = vpop.eup %10071 }
 0xaff   :  { %v1878_v2 = vsel %vm581_vm2, %v11375_v50, 0.0 }
 0xb00   :  { %1879 = vadd.xlane.f32.xlu0 %v1878_v2 }
 0xb0e   :  { %1900 = vrot.lane.b32.xlu1 %v10751_v58, %s10472_s28 }
 0xb12   :  { %2063 = vrot.lane.b32.xlu1 %v11167_v11, %s10473_s1 }
 0xb16   :  { %2095 = vrot.lane.b32.xlu1 %v11303_v59, %s10474_s2  ;;  %1902 = vrot.lane.b32.xlu0 %v10769_v4, %s10472_s28 }
 0xb1a   :  { %2067 = vrot.lane.b32.xlu1 %v11171_v62, %s10473_s1  ;;  %2061 = vrot.lane.b32.xlu0 %v11169_v7, %s10473_s1 }
 0xb1e   :  { %2099 = vrot.lane.b32.xlu1 %v11307_v35, %s10474_s2  ;;  %2093 = vrot.lane.b32.xlu0 %v11305_v32, %s10474_s2 }
 0xb22   :  { %2071 = vrot.lane.b32.xlu1 %v11175_v14, %s10473_s1  ;;  %2065 = vrot.lane.b32.xlu0 %v11173_v13, %s10473_s1 }
 0xb26   :  { %2103 = vrot.lane.b32.xlu1 %v11311_v56, %s10474_s2  ;;  %2097 = vrot.lane.b32.xlu0 %v11309_v38, %s10474_s2 }
 0xb2a   :  { %2075 = vrot.lane.b32.xlu1 %v11179_v20, %s10473_s1  ;;  %2069 = vrot.lane.b32.xlu0 %v11177_v55, %s10473_s1 }
 0xb2e   :  { %2107 = vrot.lane.b32.xlu1 %v11315_v37, %s10474_s2  ;;  %2101 = vrot.lane.b32.xlu0 %v11313_v51, %s10474_s2 }
 0xb32   :  { %2073 = vrot.lane.b32.xlu0 %v11181_v16, %s10473_s1 }
 0xb36   :  { %2105 = vrot.lane.b32.xlu0 %v11317_v21, %s10474_s2 }
 0xb77   :  { %v1865_v58 = vpop.xlane.xlu1 %1864 }
 0xb79   :  { %v1862_v4 = vpop.xlane.xlu0 %1861 }
 0xb7a   :  { %10073 = vrcp.f32 %v1862_v4 }
 0xb7b   :  { %10075 = vrcp.f32 %v1865_v58 }
 0xb7d   :  { %v1871_v11 = vpop.xlane.xlu1 %1870 }
 0xb81   :  { %v1868_v7 = vpop.xlane.xlu0 %1867  ;;  %v1877_v62 = vpop.xlane.xlu1 %1876 }
 0xb82   :  { %10077 = vrcp.f32 %v1868_v7 }
 0xb83   :  { %10079 = vrcp.f32 %v1871_v11 }
 0xb85   :  { %v1874_v13 = vpop.xlane.xlu0 %1873 }
 0xb86   :  { %10081 = vrcp.f32 %v1874_v13  ;;  %v1883_v20 = vpop.xlane.xlu1 %1882 }
 0xb87   :  { %v10074_v14 = vpop.eup %10073  ;;  %10083 = vrcp.f32 %v1877_v62 }
 0xb88   :  { %v1892_v55 = vmul.f32 %v10074_v14, %v11351_v28  ;;  %v10076_v59 = vpop.eup %10075  ;;  %v2176_v28 = vld [vmem:[%s10526_s29 + $0x8] sm:$0xff] }
 0xb89   :  { %v1880_v16 = vpop.xlane.xlu0 %1879  ;;  %v1893_v56 = vmul.f32 %v10076_v59, %v11347_v10 }
 0xb8a   :  { %10085 = vrcp.f32 %v1880_v16  ;;  %9282 = vmatprep.mubr.msk.f32.mxu1 %vm581_vm2, %v1892_v55  ;;  %v1901_v38 = vpop.permute.xlu1 %1900 }
 0xb8b   :  { %10087 = vrcp.f32 %v1883_v20 }
 0xb8d   :  { %v1903_v32 = vpop.permute.xlu0 %1902 }
 0xb8e   :  { %9278 = vmatprep.subr.mxu1 %v1903_v32  ;;  %v2064_v3 = vpop.permute.xlu1 %2063 }
 0xb8f   :  { %v10078_v35 = vpop.eup %10077  ;;  %9279 = vmatpush3.msra.mxu1 %v1903_v32  ;;  %v2150_v20 = vsel %vm443_vm1, %v11007_v22, %v2064_v3 }
 0xb90   :  { %9280 = vmatprep.subr.mxu1 %v1901_v38  ;;  %v1894_v51 = vmul.f32 %v10078_v35, %v11361_v26  ;;  %v10080_v37 = vpop.eup %10079 }
 0xb91   :  { %9281 = vmatpush3.msra.mxu1 %v1901_v38  ;;  %v1895_v18 = vmul.f32 %v10080_v37, %v11355_v39  ;;  %v2062_v0 = vpop.permute.xlu0 %2061 }
 0xb92   :  { %9283 = vmatmul.mubr.msk.f32.vlgmr.msra.gmra.mxu1 %vm581_vm2, %v1893_v56  ;;  %9294 = vmatprep.subr.mxu1 %v2178_v57  ;;  %v2149_v55 = vsel %vm443_vm1, %v11009_v15, %v2062_v0 }
 0xb93   :  { %v10082_v21 = vpop.eup %10081  ;;  %9285 = vmatprep.mubr.msk.f32.mxu1 %vm581_vm2, %v1894_v51  ;;  %9295 = vmatpush3.msra.mxu1 %v2178_v57 }
 0xb94   :  { %v1896_v53 = vmul.f32 %v10082_v21, %v11369_v46  ;;  %v10084_v19 = vpop.eup %10083  ;;  %9296 = vmatprep.subr.mxu1 %v2177_v29 }
 0xb95   :  { %v1897_v12 = vmul.f32 %v10084_v19, %v11359_v49  ;;  %9297 = vmatpush3.msra.mxu1 %v2177_v29  ;;  %v2094_v43 = vpop.permute.xlu0 %2093 }
 0xb96   :  { %9286 = vmatmul.mubr.msk.f32.gmra.mxu1 %vm581_vm2, %v1895_v18  ;;  %9298 = vmatprep.subr.mxu1 %v2176_v28  ;;  %v2158_v16 = vsel %vm2157_vm3, %v2149_v55, %v2094_v43 }
 0xb97   :  { %v10086_v9 = vpop.eup %10085  ;;  %9288 = vmatprep.mubr.msk.f32.mxu1 %vm581_vm2, %v1896_v53  ;;  %9299 = vmatpush3.msra.mxu1 %v2176_v28 }
 0xb98   :  { %v1898_v61 = vmul.f32 %v10086_v9, %v11375_v50  ;;  %v10088_v10 = vpop.eup %10087  ;;  %9300 = vmatprep.subr.mxu1 %v2175_v44 }
 0xb99   :  { %v1899_v33 = vmul.f32 %v10088_v10, %v11367_v5  ;;  %9301 = vmatpush3.msra.mxu1 %v2175_v44  ;;  %v2096_v5 = vpop.permute.xlu1 %2095  ;;  %v2066_v63 = vpop.permute.xlu0 %2065 }
 0xb9a   :  { %9289 = vmatmul.mubr.msk.f32.gmra.mxu1 %vm581_vm2, %v1897_v12  ;;  %v2159_v32 = vsel %vm2157_vm3, %v2150_v20, %v2096_v5  ;;  %v2151_v51 = vsel %vm443_vm1, %v11013_v25, %v2066_v63 }
 0xb9b   :  { %9291 = vmatprep.mubr.msk.f32.mxu1 %vm581_vm2, %v1898_v61 }
 0xb9d   :  { %v2068_v46 = vpop.permute.xlu1 %2067  ;;  %v2098_v6 = vpop.permute.xlu0 %2097 }
 0xb9e   :  { %9292 = vmatmul.mubr.msk.f32.gmra.mxu1 %vm581_vm2, %v1899_v33  ;;  %v2152_v22 = vsel %vm443_vm1, %v11011_v17, %v2068_v46  ;;  %v2160_v15 = vsel %vm2157_vm3, %v2151_v51, %v2098_v6 }
 0xba1   :  { %v2100_v30 = vpop.permute.xlu1 %2099  ;;  %v2070_v2 = vpop.permute.xlu0 %2069 }
 0xba2   :  { %v2161_v21 = vsel %vm2157_vm3, %v2152_v22, %v2100_v30  ;;  %v2153_v25 = vsel %vm443_vm1, %v11017_v23, %v2070_v2 }
 0xba5   :  { %v2072_v50 = vpop.permute.xlu1 %2071  ;;  %v2102_v4 = vpop.permute.xlu0 %2101 }
 0xba6   :  { %v2154_v17 = vsel %vm443_vm1, %v11015_v8, %v2072_v50  ;;  %v2162_v9 = vsel %vm2157_vm3, %v2153_v25, %v2102_v4 }
 0xba9   :  { %v2104_v58 = vpop.permute.xlu1 %2103  ;;  %v2074_v7 = vpop.permute.xlu0 %2073 }
 0xbaa   :  { %v2163_v61 = vsel %vm2157_vm3, %v2154_v17, %v2104_v58  ;;  %v2155_v23 = vsel %vm443_vm1, %v11021_v27, %v2074_v7  ;;  %v8375_v27 = vld [vmem:[%s10531_s3] ss:$0 sm:$0xff] }
 0xbad   :  { %v2076_v11 = vpop.permute.xlu1 %2075  ;;  %v2106_v13 = vpop.permute.xlu0 %2105 }
 0xbae   :  { %v2156_v8 = vsel %vm443_vm1, %v11019_v24, %v2076_v11  ;;  %v2164_v29 = vsel %vm2157_vm3, %v2155_v23, %v2106_v13 }
 0xbb1   :  { %v2108_v62 = vpop.permute.xlu1 %2107 }
 0xbb2   :  { %v2165_v44 = vsel %vm2157_vm3, %v2156_v8, %v2108_v62 }
 0xc52   :  { %v9284_v42 = vpop.f32.mrf.mxu1 }
 0xc53   :  { %2127 = vrot.lane.b32.xlu1 %v9284_v42, %s10475_s7 }
 0xc54   :  { %v2014_v36 = vpop.f32.mrf.mxu1 }
 0xc55   :  { %2125 = vrot.lane.b32.xlu0 %v2014_v36, %s10475_s7 }
 0xc56   :  { %v9287_v60 = vpop.f32.mrf.mxu1 }
 0xc57   :  { %2131 = vrot.lane.b32.xlu1 %v9287_v60, %s10475_s7 }
 0xc58   :  { %v2024_v39 = vpop.f32.mrf.mxu1 }
 0xc59   :  { %2129 = vrot.lane.b32.xlu0 %v2024_v39, %s10475_s7 }
 0xc5a   :  { %v9290_v34 = vpop.f32.mrf.mxu1 }
 0xc5b   :  { %2135 = vrot.lane.b32.xlu1 %v9290_v34, %s10475_s7 }
 0xc5c   :  { %v2034_v49 = vpop.f32.mrf.mxu1 }
 0xc5d   :  { %2133 = vrot.lane.b32.xlu0 %v2034_v49, %s10475_s7 }
 0xc5e   :  { %v9293_v1 = vpop.f32.mrf.mxu1 }
 0xc5f   :  { %2139 = vrot.lane.b32.xlu1 %v9293_v1, %s10475_s7 }
 0xc60   :  { %v2044_v26 = vpop.f32.mrf.mxu1 }
 0xc61   :  { %2137 = vrot.lane.b32.xlu0 %v2044_v26, %s10475_s7 }
 0xcc5   :  { %v2128_v14 = vpop.permute.xlu1 %2127 }
 0xcc6   :  { %v2168_v38 = vsel %vm2166_vm4, %v2159_v32, %v2128_v14 }
 0xcc7   :  { %v2126_v59 = vpop.permute.xlu0 %2125 }
 0xcc8   :  { %v2167_v35 = vsel %vm2166_vm4, %v2158_v16, %v2126_v59 }
 0xcc9   :  { %9302 = vmatprep.mubr.msk.f32.mxu1 %vm137_vm0, %v2167_v35  ;;  %v2132_v56 = vpop.permute.xlu1 %2131 }
 0xcca   :  { %9303 = vmatmul.mubr.msk.f32.vlgmr.msra.gmra.mxu1 %vm137_vm0, %v2168_v38  ;;  %v2170_v53 = vsel %vm2166_vm4, %v2161_v21, %v2132_v56 }
 0xccb   :  { %v2130_v37 = vpop.permute.xlu0 %2129 }
 0xccc   :  { %v2169_v18 = vsel %vm2166_vm4, %v2160_v15, %v2130_v37 }
 0xccd   :  { %9305 = vmatprep.mubr.msk.f32.mxu1 %vm137_vm0, %v2169_v18  ;;  %v2136_v19 = vpop.permute.xlu1 %2135 }
 0xcce   :  { %9306 = vmatmul.mubr.msk.f32.gmra.mxu1 %vm137_vm0, %v2170_v53  ;;  %v2172_v33 = vsel %vm2166_vm4, %v2163_v61, %v2136_v19 }
 0xccf   :  { %v2134_v12 = vpop.permute.xlu0 %2133 }
 0xcd0   :  { %v2171_v10 = vsel %vm2166_vm4, %v2162_v9, %v2134_v12 }
 0xcd1   :  { %9308 = vmatprep.mubr.msk.f32.mxu1 %vm137_vm0, %v2171_v10  ;;  %v2140_v57 = vpop.permute.xlu1 %2139 }
 0xcd2   :  { %9309 = vmatmul.mubr.msk.f32.gmra.mxu1 %vm137_vm0, %v2172_v33  ;;  %v2174_v36 = vsel %vm2166_vm4, %v2165_v44, %v2140_v57 }
 0xcd3   :  { %v2138_v28 = vpop.permute.xlu0 %2137 }
 0xcd4   :  { %v2173_v42 = vsel %vm2166_vm4, %v2164_v29, %v2138_v28 }
 0xcd5   :  { %9311 = vmatprep.mubr.msk.f32.mxu1 %vm137_vm0, %v2173_v42 }
 0xcd6   :  { %9312 = vmatmul.mubr.msk.f32.gmra.mxu1 %vm137_vm0, %v2174_v36 }
 0xd8a   :  { %v9304_v60 = vpop.f32.mrf.mxu1 }
 0xd8b   :  { %v2282_v39 = vadd.f32 %v9304_v60, %v8375_v27 }
 0xd8c   :  { %v2276_v34 = vpop.f32.mrf.mxu1 }
 0xd8d   :  { %v2316_v49 = vadd.f32 %v2282_v39, %v10717_v40  ;;  %v2277_v24 = vadd.f32 %v8375_v27, %v2276_v34 }
 0xd8e   :  { %v9307_v1 = vpop.f32.mrf.mxu1 }
 0xd8f   :  { %v2315_v26 = vadd.f32 %v2277_v24, %v10711_v31  ;;  %v2292_v3 = vadd.f32 %v9307_v1, %v8375_v27  ;;  %v2328_v0 = vsel %vm137_vm0, %v2316_v49, 0.0 }
 0xd90   :  { %2329 = vadd.xlane.f32.xlu1 %v2328_v0  ;;  %v2286_v5 = vpop.f32.mrf.mxu1  ;;  %v2460_v0 = vld [vmem:[%s10546_s19 + $0x18] sm:$0xff] }
 0xd91   :  { %v2318_v43 = vadd.f32 %v2292_v3, %v10727_v45  ;;  %v2287_v46 = vadd.f32 %v8375_v27, %v2286_v5  ;;  %v2325_v63 = vsel %vm137_vm0, %v2315_v26, 0.0  ;;  %9314 = vmatprep.subr.mxu0 %v2460_v0  ;;  %v2459_v5 = vld [vmem:[%s10546_s19 + $0x10] sm:$0xff] }
 0xd92   :  { %2326 = vadd.xlane.f32.xlu0 %v2325_v63  ;;  %v9310_v30 = vpop.f32.mrf.mxu1  ;;  %9315 = vmatpush3.msra.mxu0 %v2460_v0  ;;  %v2674_v0 = vld [vmem:[%s10556_s30 + $0x28] sm:$0xff] }
 0xd93   :  { %v2302_v6 = vadd.f32 %v9310_v30, %v8375_v27  ;;  %v2317_v40 = vadd.f32 %v2287_v46, %v10720_v41  ;;  %v2334_v31 = vsel %vm137_vm0, %v2318_v43, 0.0  ;;  %9316 = vmatprep.subr.mxu0 %v2459_v5  ;;  %v2457_v46 = vld [vmem:[%s10546_s19] sm:$0xff] }
 0xd94   :  { %v2296_v50 = vpop.f32.mrf.mxu1  ;;  %9317 = vmatpush3.msra.mxu0 %v2459_v5  ;;  %v2673_v5 = vld [vmem:[%s10556_s30 + $0x20] sm:$0xff] }
 0xd95   :  { %v2320_v2 = vadd.f32 %v2302_v6, %v10737_v52  ;;  %v2297_v58 = vadd.f32 %v8375_v27, %v2296_v50  ;;  %v2331_v55 = vsel %vm137_vm0, %v2317_v40, 0.0 }
 0xd96   :  { %2335 = vadd.xlane.f32.xlu0 %v2334_v31  ;;  %v9313_v4 = vpop.f32.mrf.mxu1 }
 0xd97   :  { %v2312_v11 = vadd.f32 %v9313_v4, %v8375_v27  ;;  %v2340_v7 = vsel %vm137_vm0, %v2320_v2, 0.0  ;;  %v2319_v62 = vadd.f32 %v2297_v58, %v10730_v47 }
 0xd98   :  { %2341 = vadd.xlane.f32.xlu1 %v2340_v7  ;;  %v2306_v45 = vpop.f32.mrf.mxu1 }
 0xd99   :  { %v2322_v13 = vadd.f32 %v2312_v11, %v10746_v48  ;;  %v2307_v14 = vadd.f32 %v8375_v27, %v2306_v45  ;;  %v2337_v20 = vsel %vm137_vm0, %v2319_v62, 0.0 }
 0xd9a   :  { %2332 = vadd.xlane.f32.xlu0 %v2331_v55 }
 0xd9b   :  { %v2346_v41 = vsel %vm137_vm0, %v2322_v13, 0.0  ;;  %v2321_v52 = vadd.f32 %v2307_v14, %v10740_v54 }
 0xd9c   :  { %2347 = vadd.xlane.f32.xlu1 %v2346_v41 }
 0xd9d   :  { %v2343_v16 = vsel %vm137_vm0, %v2321_v52, 0.0 }
 0xd9e   :  { %2338 = vadd.xlane.f32.xlu0 %v2337_v20 }
 0xda2   :  { %2344 = vadd.xlane.f32.xlu0 %v2343_v16 }
 0xe19   :  { %v2330_v59 = vpop.xlane.xlu1 %2329 }
 0xe1a   :  { %v2350_v32 = vmul.f32 0.03125, %v2330_v59 }
 0xe1b   :  { %v2327_v47 = vpop.xlane.xlu0 %2326 }
 0xe1c   :  { %v11500_v35 = vsub.f32 %v2316_v49, %v2350_v32  ;;  %v2349_v48 = vmul.f32 0.03125, %v2327_v47 }
 0xe1e   :  { %v11502_v38 = vsub.f32 %v2315_v26, %v2349_v48  ;;  %v2366_v56 = vmul.f32 %v11500_v35, %v11500_v35  ;;  %v8384_v48 = vld [vmem:[%s10536_s8] ss:$0 sm:$0xff] }
 0xe1f   :  { %v2336_v51 = vpop.xlane.xlu0 %2335 }
 0xe20   :  { %v2352_v22 = vmul.f32 0.03125, %v2336_v51  ;;  %v2376_v54 = vsel %vm137_vm0, %v2366_v56, 0.0  ;;  %v2365_v15 = vmul.f32 %v11502_v38, %v11502_v38 }
 0xe21   :  { %2377 = vadd.xlane.f32.xlu1 %v2376_v54  ;;  %v2342_v37 = vpop.xlane.xlu1 %2341 }
 0xe22   :  { %v11509_v21 = vsub.f32 %v2318_v43, %v2352_v22  ;;  %v2354_v18 = vmul.f32 0.03125, %v2342_v37  ;;  %v2373_v53 = vsel %vm137_vm0, %v2365_v15, 0.0  ;;  %v2458_v43 = vld [vmem:[%s10546_s19 + $0x8] sm:$0xff] }
 0xe23   :  { %v2333_v19 = vpop.xlane.xlu0 %2332  ;;  %2374 = vadd.xlane.f32.xlu0 %v2373_v53  ;;  %9318 = vmatprep.subr.mxu0 %v2458_v43 }
 0xe24   :  { %v11512_v25 = vsub.f32 %v2320_v2, %v2354_v18  ;;  %v2351_v17 = vmul.f32 0.03125, %v2333_v19  ;;  %v2368_v9 = vmul.f32 %v11509_v21, %v11509_v21  ;;  %9319 = vmatpush3.msra.mxu0 %v2458_v43  ;;  %v8385_v18 = vld [vmem:[%s10541_s14] ss:$0 sm:$0xff]  ;;  %v2672_v43 = vld [vmem:[%s10556_s30 + $0x18] sm:$0xff] }
 0xe25   :  { %v2348_v12 = vpop.xlane.xlu1 %2347  ;;  %9320 = vmatprep.subr.mxu0 %v2457_v46 }
 0xe26   :  { %v11516_v61 = vsub.f32 %v2317_v40, %v2351_v17  ;;  %v2356_v10 = vmul.f32 0.03125, %v2348_v12  ;;  %v2382_v33 = vsel %vm137_vm0, %v2368_v9, 0.0  ;;  %v2370_v23 = vmul.f32 %v11512_v25, %v11512_v25  ;;  %9321 = vmatpush3.msra.mxu0 %v2457_v46  ;;  %v2671_v46 = vld [vmem:[%s10556_s30 + $0x10] sm:$0xff] }
 0xe27   :  { %v2339_v57 = vpop.xlane.xlu0 %2338  ;;  %2383 = vadd.xlane.f32.xlu1 %v2382_v33 }
 0xe28   :  { %v11521_v8 = vsub.f32 %v2322_v13, %v2356_v10  ;;  %v2353_v29 = vmul.f32 0.03125, %v2339_v57  ;;  %v2367_v28 = vmul.f32 %v11516_v61, %v11516_v61  ;;  %v2388_v36 = vsel %vm137_vm0, %v2370_v23, 0.0 }
 0xe2a   :  { %v11525_v44 = vsub.f32 %v2319_v62, %v2353_v29  ;;  %v2379_v42 = vsel %vm137_vm0, %v2367_v28, 0.0  ;;  %v2372_v27 = vmul.f32 %v11521_v8, %v11521_v8 }
 0xe2b   :  { %2380 = vadd.xlane.f32.xlu0 %v2379_v42  ;;  %v2345_v60 = vpop.xlane.xlu0 %2344  ;;  %2389 = vadd.xlane.f32.xlu1 %v2388_v36 }
 0xe2c   :  { %v2355_v39 = vmul.f32 0.03125, %v2345_v60  ;;  %v2369_v34 = vmul.f32 %v11525_v44, %v11525_v44  ;;  %v2394_v1 = vsel %vm137_vm0, %v2372_v27, 0.0 }
 0xe2e   :  { %v11533_v49 = vsub.f32 %v2321_v52, %v2355_v39  ;;  %v2385_v24 = vsel %vm137_vm0, %v2369_v34, 0.0 }
 0xe2f   :  { %2386 = vadd.xlane.f32.xlu0 %v2385_v24  ;;  %2395 = vadd.xlane.f32.xlu1 %v2394_v1 }
 0xe30   :  { %v2371_v26 = vmul.f32 %v11533_v49, %v11533_v49 }
 0xe32   :  { %v2391_v3 = vsel %vm137_vm0, %v2371_v26, 0.0 }
 0xe33   :  { %2392 = vadd.xlane.f32.xlu0 %v2391_v3  ;;  %v2675_v3 = vld [vmem:[%s10556_s30 + $0x30] sm:$0xff] }
 0xeaa   :  { %v2378_v63 = vpop.xlane.xlu1 %2377 }
 0xeab   :  { %v2398_v30 = vmul.f32 0.03125, %v2378_v63  ;;  %v2670_v63 = vld [vmem:[%s10556_s30 + $0x8] sm:$0xff] }
 0xeac   :  { %v2375_v6 = vpop.xlane.xlu0 %2374 }
 0xead   :  { %v2406_v50 = vadd.f32 1e-12, %v2398_v30  ;;  %v2397_v40 = vmul.f32 0.03125, %v2375_v6  ;;  %v2669_v30 = vld [vmem:[%s10556_s30] sm:$0xff] }
 0xeae   :  { %v8386_v6 = vld [vmem:[%s10551_s24] ss:$0 sm:$0xff] }
 0xeaf   :  { %10089 = vrsqrt.f32 %v2406_v50  ;;  %v2405_v2 = vadd.f32 1e-12, %v2397_v40 }
 0xeb0   :  { %v2384_v58 = vpop.xlane.xlu1 %2383 }
 0xeb1   :  { %10091 = vrsqrt.f32 %v2405_v2  ;;  %v2400_v31 = vmul.f32 0.03125, %v2384_v58 }
 0xeb3   :  { %v2408_v4 = vadd.f32 1e-12, %v2400_v31 }
 0xeb4   :  { %v2381_v11 = vpop.xlane.xlu0 %2380  ;;  %v2390_v7 = vpop.xlane.xlu1 %2389 }
 0xeb5   :  { %10093 = vrsqrt.f32 %v2408_v4  ;;  %v2399_v45 = vmul.f32 0.03125, %v2381_v11  ;;  %v2402_v62 = vmul.f32 0.03125, %v2390_v7 }
 0xeb7   :  { %v2407_v13 = vadd.f32 1e-12, %v2399_v45  ;;  %v2410_v14 = vadd.f32 1e-12, %v2402_v62 }
 0xeb8   :  { %v2387_v55 = vpop.xlane.xlu0 %2386  ;;  %v2396_v41 = vpop.xlane.xlu1 %2395 }
 0xeb9   :  { %10095 = vrsqrt.f32 %v2407_v13  ;;  %v2401_v52 = vmul.f32 0.03125, %v2387_v55  ;;  %v2404_v20 = vmul.f32 0.03125, %v2396_v41 }
 0xeba   :  { %10097 = vrsqrt.f32 %v2410_v14 }
 0xebb   :  { %v2409_v16 = vadd.f32 1e-12, %v2401_v52  ;;  %v2412_v59 = vadd.f32 1e-12, %v2404_v20 }
 0xebc   :  { %v10090_v32 = vpop.eup %10089  ;;  %v2393_v47 = vpop.xlane.xlu0 %2392 }
 0xebd   :  { %v2422_v56 = vmul.f32 %v10090_v32, %v11500_v35  ;;  %10099 = vrsqrt.f32 %v2409_v16  ;;  %v2403_v51 = vmul.f32 0.03125, %v2393_v47 }
 0xebe   :  { %v10092_v22 = vpop.eup %10091  ;;  %10101 = vrsqrt.f32 %v2412_v59 }
 0xebf   :  { %v2411_v54 = vadd.f32 1e-12, %v2403_v51  ;;  %v2421_v15 = vmul.f32 %v10092_v22, %v11502_v38  ;;  %v2436_v37 = vmul.f32 %v8384_v48, %v2422_v56 }
 0xec1   :  { %10103 = vrsqrt.f32 %v2411_v54  ;;  %v2435_v53 = vmul.f32 %v8384_v48, %v2421_v15  ;;  %v11550_v9 = vadd.f32 %v8385_v18, %v2436_v37 }
 0xec2   :  { %v10094_v19 = vpop.eup %10093 }
 0xec3   :  { %v11548_v17 = vadd.f32 %v8385_v18, %v2435_v53  ;;  %v2424_v12 = vmul.f32 %v10094_v19, %v11509_v21 }
 0xec5   :  { %9322 = vmatprep.mubr.msk.f32.mxu0 %vm137_vm0, %v11548_v17  ;;  %v2438_v33 = vmul.f32 %v8384_v48, %v2424_v12 }
 0xec6   :  { %v10096_v35 = vpop.eup %10095  ;;  %9323 = vmatmul.mubr.msk.f32.vlgmr.msra.gmra.mxu0 %vm137_vm0, %v11550_v9 }
 0xec7   :  { %v10098_v10 = vpop.eup %10097  ;;  %v2423_v38 = vmul.f32 %v10096_v35, %v11516_v61  ;;  %v11562_v36 = vadd.f32 %v8385_v18, %v2438_v33 }
 0xec8   :  { %v2426_v23 = vmul.f32 %v10098_v10, %v11512_v25 }
 0xec9   :  { %v2437_v57 = vmul.f32 %v8384_v48, %v2423_v38 }
 0xeca   :  { %v10100_v29 = vpop.eup %10099  ;;  %v2440_v27 = vmul.f32 %v8384_v48, %v2426_v23 }
 0xecb   :  { %v10102_v28 = vpop.eup %10101  ;;  %v11559_v42 = vadd.f32 %v8385_v18, %v2437_v57  ;;  %v2425_v21 = vmul.f32 %v10100_v29, %v11525_v44 }
 0xecc   :  { %v2428_v60 = vmul.f32 %v10102_v28, %v11521_v8  ;;  %v11572_v44 = vadd.f32 %v8385_v18, %v2440_v27 }
 0xecd   :  { %9325 = vmatprep.mubr.msk.f32.mxu0 %vm137_vm0, %v11559_v42  ;;  %v2439_v61 = vmul.f32 %v8384_v48, %v2425_v21 }
 0xece   :  { %v10104_v39 = vpop.eup %10103  ;;  %9326 = vmatmul.mubr.msk.f32.gmra.mxu0 %vm137_vm0, %v11562_v36  ;;  %v2442_v24 = vmul.f32 %v8384_v48, %v2428_v60 }
 0xecf   :  { %v11569_v25 = vadd.f32 %v8385_v18, %v2439_v61  ;;  %v2427_v34 = vmul.f32 %v10104_v39, %v11533_v49  ;;  %v2676_v49 = vld [vmem:[%s10556_s30 + $0x38] sm:$0xff] }
 0xed0   :  { %v11580_v26 = vadd.f32 %v8385_v18, %v2442_v24  ;;  %9334 = vmatprep.subr.mxu1 %v2676_v49 }
 0xed1   :  { %9328 = vmatprep.mubr.msk.f32.mxu0 %vm137_vm0, %v11569_v25  ;;  %v2441_v8 = vmul.f32 %v8384_v48, %v2427_v34  ;;  %9335 = vmatpush3.msra.mxu1 %v2676_v49 }
 0xed2   :  { %9329 = vmatmul.mubr.msk.f32.gmra.mxu0 %vm137_vm0, %v11572_v44  ;;  %9336 = vmatprep.subr.mxu1 %v2675_v3 }
 0xed3   :  { %v11578_v1 = vadd.f32 %v8385_v18, %v2441_v8  ;;  %9337 = vmatpush3.msra.mxu1 %v2675_v3 }
 0xed4   :  { %9338 = vmatprep.subr.mxu1 %v2674_v0 }
 0xed5   :  { %9331 = vmatprep.mubr.msk.f32.mxu0 %vm137_vm0, %v11578_v1  ;;  %9339 = vmatpush3.msra.mxu1 %v2674_v0 }
 0xed6   :  { %9332 = vmatmul.mubr.msk.f32.gmra.mxu0 %vm137_vm0, %v11580_v26  ;;  %9340 = vmatprep.subr.mxu1 %v2673_v5 }
 0xed7   :  { %9341 = vmatpush3.msra.mxu1 %v2673_v5 }
 0xed8   :  { %9342 = vmatprep.subr.mxu1 %v2672_v43 }
 0xed9   :  { %9343 = vmatpush3.msra.mxu1 %v2672_v43 }
 0xeda   :  { %9344 = vmatprep.subr.mxu1 %v2671_v46 }
 0xedb   :  { %9345 = vmatpush3.msra.mxu1 %v2671_v46 }
 0xedc   :  { %9346 = vmatprep.subr.mxu1 %v2670_v63 }
 0xedd   :  { %9347 = vmatpush3.msra.mxu1 %v2670_v63 }
 0xede   :  { %9348 = vmatprep.subr.mxu1 %v2669_v30 }
 0xedf   :  { %9349 = vmatpush3.msra.mxu1 %v2669_v30 }
 0xf86   :  { %v9324_v50 = vpop.f32.mrf.mxu0 }
 0xf87   :  { %v11595_v40 = vadd.f32 %v9324_v50, %v8386_v6 }
 0xf88   :  { %v2558_v2 = vpop.f32.mrf.mxu0 }
 0xf89   :  { %v2598_v58 = vmul.f32 %v11595_v40, %v11595_v40  ;;  %v11599_v31 = vadd.f32 %v8386_v6, %v2558_v2 }
 0xf8b   :  { %v2606_v4 = vmul.f32 %v2598_v58, %v11595_v40  ;;  %v2597_v11 = vmul.f32 %v11599_v31, %v11599_v31 }
 0xf8d   :  { %v2614_v7 = vmul.f32 0.044715, %v2606_v4  ;;  %v2605_v45 = vmul.f32 %v2597_v11, %v11599_v31 }
 0xf8e   :  { %v9327_v62 = vpop.f32.mrf.mxu0 }
 0xf8f   :  { %v2622_v13 = vadd.f32 %v2614_v7, %v11595_v40  ;;  %v2613_v14 = vmul.f32 0.044715, %v2605_v45  ;;  %v11606_v55 = vadd.f32 %v9327_v62, %v8386_v6 }
 0xf90   :  { %v2568_v41 = vpop.f32.mrf.mxu0 }
 0xf91   :  { %v2630_v52 = vmul.f32 0.7978846, %v2622_v13  ;;  %v2621_v20 = vadd.f32 %v2613_v14, %v11599_v31  ;;  %v2600_v16 = vmul.f32 %v11606_v55, %v11606_v55  ;;  %v11611_v59 = vadd.f32 %v8386_v6, %v2568_v41 }
 0xf92   :  { %v9330_v32 = vpop.f32.mrf.mxu0 }
 0xf93   :  { %10105 = vtanh.f32 %v2630_v52  ;;  %v2629_v47 = vmul.f32 0.7978846, %v2621_v20  ;;  %v2608_v48 = vmul.f32 %v2600_v16, %v11606_v55  ;;  %v2599_v56 = vmul.f32 %v11611_v59, %v11611_v59 }
 0xf94   :  { %v11616_v51 = vadd.f32 %v9330_v32, %v8386_v6  ;;  %v2578_v22 = vpop.f32.mrf.mxu0 }
 0xf95   :  { %10107 = vtanh.f32 %v2629_v47  ;;  %v2616_v54 = vmul.f32 0.044715, %v2608_v48  ;;  %v2607_v15 = vmul.f32 %v2599_v56, %v11611_v59  ;;  %v11619_v37 = vadd.f32 %v8386_v6, %v2578_v22 }
 0xf96   :  { %v2602_v18 = vmul.f32 %v11616_v51, %v11616_v51  ;;  %v9333_v53 = vpop.f32.mrf.mxu0 }
 0xf97   :  { %v2624_v19 = vadd.f32 %v2616_v54, %v11606_v55  ;;  %v2615_v12 = vmul.f32 0.044715, %v2607_v15  ;;  %v2601_v35 = vmul.f32 %v11619_v37, %v11619_v37  ;;  %v11626_v10 = vadd.f32 %v9333_v53, %v8386_v6 }
 0xf98   :  { %v2610_v38 = vmul.f32 %v2602_v18, %v11616_v51  ;;  %v2588_v33 = vpop.f32.mrf.mxu0 }
 0xf99   :  { %v2632_v23 = vmul.f32 0.7978846, %v2624_v19  ;;  %v2623_v57 = vadd.f32 %v2615_v12, %v11611_v59  ;;  %v2609_v29 = vmul.f32 %v2601_v35, %v11619_v37  ;;  %v2604_v28 = vmul.f32 %v11626_v10, %v11626_v10 }
 0xf9a   :  { %v2618_v21 = vmul.f32 0.044715, %v2610_v38  ;;  %v2589_v27 = vadd.f32 %v8386_v6, %v2588_v33 }
 0xf9b   :  { %10109 = vtanh.f32 %v2632_v23  ;;  %v2631_v60 = vmul.f32 0.7978846, %v2623_v57  ;;  %v2617_v61 = vmul.f32 0.044715, %v2609_v29  ;;  %v2612_v39 = vmul.f32 %v2604_v28, %v11626_v10  ;;  %v8395_v23 = vld [vmem:[%s10561_s6] ss:$0 sm:$0xff] }
 0xf9c   :  { %v2626_v34 = vadd.f32 %v2618_v21, %v11616_v51  ;;  %v2603_v24 = vmul.f32 %v2589_v27, %v2589_v27 }
 0xf9d   :  { %10111 = vtanh.f32 %v2631_v60  ;;  %v2625_v8 = vadd.f32 %v2617_v61, %v11619_v37  ;;  %v2620_v49 = vmul.f32 0.044715, %v2612_v39 }
 0xf9e   :  { %v2634_v3 = vmul.f32 0.7978846, %v2626_v34  ;;  %v2611_v0 = vmul.f32 %v2603_v24, %v2589_v27 }
 0xf9f   :  { %v2633_v5 = vmul.f32 0.7978846, %v2625_v8  ;;  %v2628_v43 = vadd.f32 %v2620_v49, %v11626_v10 }
 0xfa0   :  { %v10106_v46 = vpop.eup %10105  ;;  %10113 = vtanh.f32 %v2634_v3  ;;  %v2619_v63 = vmul.f32 0.044715, %v2611_v0 }
 0xfa1   :  { %v2646_v30 = vadd.f32 1.0, %v10106_v46  ;;  %10115 = vtanh.f32 %v2633_v5  ;;  %v2636_v6 = vmul.f32 0.7978846, %v2628_v43 }
 0xfa2   :  { %v10108_v50 = vpop.eup %10107  ;;  %v2627_v2 = vadd.f32 %v2619_v63, %v2589_v27 }
 0xfa3   :  { %10117 = vtanh.f32 %v2636_v6  ;;  %v2645_v58 = vadd.f32 1.0, %v10108_v50  ;;  %v2654_v4 = vmul.f32 0.5, %v2646_v30 }
 0xfa4   :  { %v2635_v11 = vmul.f32 0.7978846, %v2627_v2 }
 0xfa5   :  { %v2653_v7 = vmul.f32 0.5, %v2645_v58  ;;  %v2662_v13 = vmul.f32 %v2654_v4, %v11595_v40 }
 0xfa6   :  { %10119 = vtanh.f32 %v2635_v11 }
 0xfa7   :  { %v2661_v45 = vmul.f32 %v2653_v7, %v11599_v31 }
 0xfa8   :  { %v10110_v62 = vpop.eup %10109 }
 0xfa9   :  { %9350 = vmatprep.mubr.msk.f32.mxu1 %vm581_vm2, %v2661_v45  ;;  %v2648_v14 = vadd.f32 1.0, %v10110_v62 }
 0xfaa   :  { %v10112_v41 = vpop.eup %10111  ;;  %9351 = vmatmul.mubr.msk.f32.vlgmr.msra.gmra.mxu1 %vm581_vm2, %v2662_v13 }
 0xfab   :  { %v2647_v52 = vadd.f32 1.0, %v10112_v41  ;;  %v2656_v20 = vmul.f32 0.5, %v2648_v14 }
 0xfad   :  { %v10114_v16 = vpop.eup %10113  ;;  %v2655_v32 = vmul.f32 0.5, %v2647_v52  ;;  %v2664_v31 = vmul.f32 %v2656_v20, %v11606_v55 }
 0xfae   :  { %v10116_v47 = vpop.eup %10115  ;;  %v2650_v48 = vadd.f32 1.0, %v10114_v16 }
 0xfaf   :  { %v2663_v56 = vmul.f32 %v2655_v32, %v11611_v59  ;;  %v2649_v22 = vadd.f32 1.0, %v10116_v47 }
 0xfb0   :  { %v10118_v54 = vpop.eup %10117  ;;  %v2658_v15 = vmul.f32 0.5, %v2650_v48 }
 0xfb1   :  { %9353 = vmatprep.mubr.msk.f32.mxu1 %vm581_vm2, %v2663_v56  ;;  %v2657_v40 = vmul.f32 0.5, %v2649_v22  ;;  %v2652_v18 = vadd.f32 1.0, %v10118_v54 }
 0xfb2   :  { %9354 = vmatmul.mubr.msk.f32.gmra.mxu1 %vm581_vm2, %v2664_v31  ;;  %v2666_v12 = vmul.f32 %v2658_v15, %v11616_v51 }
 0xfb3   :  { %v10120_v53 = vpop.eup %10119  ;;  %v2665_v19 = vmul.f32 %v2657_v40, %v11619_v37  ;;  %v2660_v59 = vmul.f32 0.5, %v2652_v18 }
 0xfb4   :  { %v2651_v35 = vadd.f32 1.0, %v10120_v53 }
 0xfb5   :  { %9356 = vmatprep.mubr.msk.f32.mxu1 %vm581_vm2, %v2665_v19  ;;  %v2668_v33 = vmul.f32 %v2660_v59, %v11626_v10 }
 0xfb6   :  { %9357 = vmatmul.mubr.msk.f32.gmra.mxu1 %vm581_vm2, %v2666_v12  ;;  %v2659_v55 = vmul.f32 0.5, %v2651_v35 }
 0xfb8   :  { %v2667_v38 = vmul.f32 %v2659_v55, %v2589_v27 }
 0xfba   :  { %9359 = vmatprep.mubr.msk.f32.mxu1 %vm581_vm2, %v2667_v38 }
 0xfbb   :  { %9360 = vmatmul.mubr.msk.f32.gmra.mxu1 %vm581_vm2, %v2668_v33 }
0x106a   :  { %v9352_v57 = vpop.f32.mrf.mxu1 }
0x106b   :  { %v2780_v29 = vadd.f32 %v9352_v57, %v8395_v23 }
0x106c   :  { %v2774_v37 = vpop.f32.mrf.mxu1 }
0x106d   :  { %v2814_v51 = vadd.f32 %v2780_v29, %v11550_v9  ;;  %v2775_v28 = vadd.f32 %v8395_v23, %v2774_v37 }
0x106f   :  { %v2813_v21 = vadd.f32 %v2775_v28, %v11548_v17  ;;  %v2826_v60 = vsel %vm137_vm0, %v2814_v51, 0.0 }
0x1070   :  { %2827 = vadd.xlane.f32.xlu1 %v2826_v60 }
0x1071   :  { %v2823_v27 = vsel %vm137_vm0, %v2813_v21, 0.0 }
0x1072   :  { %2824 = vadd.xlane.f32.xlu0 %v2823_v27  ;;  %v9355_v10 = vpop.f32.mrf.mxu1 }
0x1073   :  { %v2790_v61 = vadd.f32 %v9355_v10, %v8395_v23  ;;  %v8409_v10 = vld [vmem:[%s10516_s21 + $0x38] sm:$0xff] }
0x1074   :  { %v2784_v39 = vpop.f32.mrf.mxu1  ;;  %9362 = vmatprep.subr.mxu0 %v8409_v10 }
0x1075   :  { %v2816_v34 = vadd.f32 %v2790_v61, %v11562_v36  ;;  %v2785_v24 = vadd.f32 %v8395_v23, %v2784_v39  ;;  %9363 = vmatpush3.msra.mxu0 %v8409_v10  ;;  %v8408_v61 = vld [vmem:[%s10516_s21 + $0x30] sm:$0xff]  ;;  %v8407_v39 = vld [vmem:[%s10516_s21 + $0x28] sm:$0xff] }
0x1076   :  { %v9358_v8 = vpop.f32.mrf.mxu1  ;;  %9364 = vmatprep.subr.mxu0 %v8408_v61 }
0x1077   :  { %v2815_v49 = vadd.f32 %v2785_v24, %v11559_v42  ;;  %v2800_v3 = vadd.f32 %v9358_v8, %v8395_v23  ;;  %v2832_v9 = vsel %vm137_vm0, %v2816_v34, 0.0  ;;  %9365 = vmatpush3.msra.mxu0 %v8408_v61 }
0x1078   :  { %2833 = vadd.xlane.f32.xlu1 %v2832_v9  ;;  %v2794_v17 = vpop.f32.mrf.mxu1  ;;  %9366 = vmatprep.subr.mxu0 %v8407_v39 }
0x1079   :  { %v2818_v0 = vadd.f32 %v2800_v3, %v11572_v44  ;;  %v2795_v5 = vadd.f32 %v8395_v23, %v2794_v17  ;;  %v2829_v43 = vsel %vm137_vm0, %v2815_v49, 0.0  ;;  %9367 = vmatpush3.msra.mxu0 %v8407_v39 }
0x107a   :  { %2830 = vadd.xlane.f32.xlu0 %v2829_v43 }
0x107b   :  { %v2817_v46 = vadd.f32 %v2795_v5, %v11569_v25  ;;  %v9361_v63 = vpop.f32.mrf.mxu1  ;;  %v2838_v36 = vsel %vm137_vm0, %v2818_v0, 0.0 }
0x107c   :  { %v2810_v30 = vadd.f32 %v9361_v63, %v8395_v23  ;;  %2839 = vadd.xlane.f32.xlu1 %v2838_v36 }
0x107d   :  { %v2804_v6 = vpop.f32.mrf.mxu1  ;;  %v2835_v42 = vsel %vm137_vm0, %v2817_v46, 0.0 }
0x107e   :  { %v2820_v50 = vadd.f32 %v2810_v30, %v11580_v26  ;;  %v2805_v2 = vadd.f32 %v8395_v23, %v2804_v6  ;;  %2836 = vadd.xlane.f32.xlu0 %v2835_v42 }
0x1080   :  { %v2819_v44 = vadd.f32 %v2805_v2, %v11578_v1  ;;  %v2844_v58 = vsel %vm137_vm0, %v2820_v50, 0.0 }
0x1081   :  { %2845 = vadd.xlane.f32.xlu1 %v2844_v58 }
0x1082   :  { %v2841_v4 = vsel %vm137_vm0, %v2819_v44, 0.0 }
0x1083   :  { %2842 = vadd.xlane.f32.xlu0 %v2841_v4 }
0x10f9   :  { %v2828_v25 = vpop.xlane.xlu1 %2827 }
0x10fa   :  { %v2848_v11 = vmul.f32 0.03125, %v2828_v25 }
0x10fb   :  { %v2825_v7 = vpop.xlane.xlu0 %2824 }
0x10fc   :  { %v11669_v45 = vsub.f32 %v2814_v51, %v2848_v11  ;;  %v2847_v62 = vmul.f32 0.03125, %v2825_v7  ;;  %v8404_v11 = vld [vmem:[%s13167_s10] ss:$0 sm:$0xff] }
0x10fe   :  { %v11671_v13 = vsub.f32 %v2813_v21, %v2847_v62  ;;  %v2864_v26 = vmul.f32 %v11669_v45, %v11669_v45 }
0x1100   :  { %v2874_v14 = vsel %vm137_vm0, %v2864_v26, 0.0  ;;  %v2863_v1 = vmul.f32 %v11671_v13, %v11671_v13 }
0x1101   :  { %2875 = vadd.xlane.f32.xlu1 %v2874_v14  ;;  %v2834_v41 = vpop.xlane.xlu1 %2833 }
0x1102   :  { %v2850_v52 = vmul.f32 0.03125, %v2834_v41  ;;  %v2871_v20 = vsel %vm137_vm0, %v2863_v1, 0.0 }
0x1103   :  { %v2831_v16 = vpop.xlane.xlu0 %2830  ;;  %2872 = vadd.xlane.f32.xlu0 %v2871_v20 }
0x1104   :  { %v11679_v32 = vsub.f32 %v2816_v34, %v2850_v52  ;;  %v2849_v47 = vmul.f32 0.03125, %v2831_v16  ;;  %v8406_v34 = vld [vmem:[%s10516_s21 + $0x20] sm:$0xff]  ;;  %s13168_s21 = sld [smem:[#allocation6_spill]] }
0x1105   :  { %v2840_v48 = vpop.xlane.xlu1 %2839  ;;  %9368 = vmatprep.subr.mxu0 %v8406_v34 }
0x1106   :  { %v11681_v56 = vsub.f32 %v2815_v49, %v2849_v47  ;;  %v2852_v22 = vmul.f32 0.03125, %v2840_v48  ;;  %v2866_v54 = vmul.f32 %v11679_v32, %v11679_v32  ;;  %9369 = vmatpush3.msra.mxu0 %v8406_v34 }
0x1107   :  { %v2837_v31 = vpop.xlane.xlu0 %2836 }
0x1108   :  { %v11685_v15 = vsub.f32 %v2818_v0, %v2852_v22  ;;  %v2851_v40 = vmul.f32 0.03125, %v2837_v31  ;;  %v2880_v18 = vsel %vm137_vm0, %v2866_v54, 0.0  ;;  %v2865_v53 = vmul.f32 %v11681_v56, %v11681_v56 }
0x1109   :  { %2881 = vadd.xlane.f32.xlu1 %v2880_v18 }
0x110a   :  { %v11690_v19 = vsub.f32 %v2817_v46, %v2851_v40  ;;  %v2846_v12 = vpop.xlane.xlu1 %2845  ;;  %v2877_v35 = vsel %vm137_vm0, %v2865_v53, 0.0  ;;  %v2868_v59 = vmul.f32 %v11685_v15, %v11685_v15  ;;  %v8405_v16 = vld [vmem:[%s13168_s21] ss:$0 sm:$0xff] }
0x110b   :  { %v2854_v55 = vmul.f32 0.03125, %v2846_v12  ;;  %2878 = vadd.xlane.f32.xlu0 %v2877_v35 }
0x110c   :  { %v2843_v38 = vpop.xlane.xlu0 %2842  ;;  %v2886_v33 = vsel %vm137_vm0, %v2868_v59, 0.0  ;;  %v2867_v23 = vmul.f32 %v11690_v19, %v11690_v19 }
0x110d   :  { %v11698_v57 = vsub.f32 %v2820_v50, %v2854_v55  ;;  %v2853_v29 = vmul.f32 0.03125, %v2843_v38  ;;  %2887 = vadd.xlane.f32.xlu1 %v2886_v33 }
0x110e   :  { %v2883_v37 = vsel %vm137_vm0, %v2867_v23, 0.0 }
0x110f   :  { %v11701_v51 = vsub.f32 %v2819_v44, %v2853_v29  ;;  %2884 = vadd.xlane.f32.xlu0 %v2883_v37  ;;  %v2870_v28 = vmul.f32 %v11698_v57, %v11698_v57 }
0x1111   :  { %v2892_v21 = vsel %vm137_vm0, %v2870_v28, 0.0  ;;  %v2869_v60 = vmul.f32 %v11701_v51, %v11701_v51 }
0x1112   :  { %2893 = vadd.xlane.f32.xlu1 %v2892_v21 }
0x1113   :  { %v2889_v27 = vsel %vm137_vm0, %v2869_v60, 0.0 }
0x1114   :  { %2890 = vadd.xlane.f32.xlu0 %v2889_v27 }
0x118a   :  { %v2876_v24 = vpop.xlane.xlu1 %2875 }
0x118b   :  { %v2896_v8 = vmul.f32 0.03125, %v2876_v24 }
0x118c   :  { %v2873_v49 = vpop.xlane.xlu0 %2872 }
0x118d   :  { %v2904_v3 = vadd.f32 1e-12, %v2896_v8  ;;  %v2895_v9 = vmul.f32 0.03125, %v2873_v49 }
0x118f   :  { %10121 = vrsqrt.f32 %v2904_v3  ;;  %v2903_v17 = vadd.f32 1e-12, %v2895_v9 }
0x1191   :  { %10123 = vrsqrt.f32 %v2903_v17 }
0x1192   :  { %v2882_v0 = vpop.xlane.xlu1 %2881 }
0x1193   :  { %v2898_v5 = vmul.f32 0.03125, %v2882_v0 }
0x1194   :  { %v2879_v43 = vpop.xlane.xlu0 %2878 }
0x1195   :  { %v2906_v46 = vadd.f32 1e-12, %v2898_v5  ;;  %v2897_v63 = vmul.f32 0.03125, %v2879_v43 }
0x1196   :  { %v2888_v36 = vpop.xlane.xlu1 %2887 }
0x1197   :  { %10125 = vrsqrt.f32 %v2906_v46  ;;  %v2905_v30 = vadd.f32 1e-12, %v2897_v63  ;;  %v2900_v6 = vmul.f32 0.03125, %v2888_v36 }
0x1198   :  { %v2885_v42 = vpop.xlane.xlu0 %2884 }
0x1199   :  { %10127 = vrsqrt.f32 %v2905_v30  ;;  %v2908_v50 = vadd.f32 1e-12, %v2900_v6  ;;  %v2899_v2 = vmul.f32 0.03125, %v2885_v42 }
0x119b   :  { %10129 = vrsqrt.f32 %v2908_v50  ;;  %v2907_v44 = vadd.f32 1e-12, %v2899_v2  ;;  %v2894_v58 = vpop.xlane.xlu1 %2893 }
0x119c   :  { %v10122_v4 = vpop.eup %10121  ;;  %v2902_v25 = vmul.f32 0.03125, %v2894_v58 }
0x119d   :  { %v2920_v7 = vmul.f32 %v10122_v4, %v11669_v45  ;;  %10131 = vrsqrt.f32 %v2907_v44  ;;  %v2891_v62 = vpop.xlane.xlu0 %2890 }
0x119e   :  { %v10124_v26 = vpop.eup %10123  ;;  %v2910_v14 = vadd.f32 1e-12, %v2902_v25  ;;  %v2901_v1 = vmul.f32 0.03125, %v2891_v62 }
0x119f   :  { %v2919_v41 = vmul.f32 %v10124_v26, %v11671_v13  ;;  %v2934_v52 = vmul.f32 %v8404_v11, %v2920_v7 }
0x11a0   :  { %10133 = vrsqrt.f32 %v2910_v14  ;;  %v2909_v20 = vadd.f32 1e-12, %v2901_v1 }
0x11a1   :  { %v2933_v47 = vmul.f32 %v8404_v11, %v2919_v41  ;;  %v11719_v54 = vadd.f32 %v8405_v16, %v2934_v52 }
0x11a2   :  { %10135 = vrsqrt.f32 %v2909_v20  ;;  %v11845_v20 = vld [vmem:[%s10501_s9 + $0x8] sm:$0xff] }
0x11a3   :  { %v11717_v48 = vadd.f32 %v8405_v16, %v2933_v47 }
0x11a4   :  { %v10126_v22 = vpop.eup %10125 }
0x11a5   :  { %9370 = vmatprep.mubr.msk.f32.mxu0 %vm137_vm0, %v11717_v48  ;;  %v2922_v45 = vmul.f32 %v10126_v22, %v11679_v32  ;;  %v11849_v22 = vld [vmem:[%s10501_s9] sm:$0xff] }
0x11a6   :  { %v10128_v31 = vpop.eup %10127  ;;  %9371 = vmatmul.mubr.msk.f32.vlgmr.msra.gmra.mxu0 %vm137_vm0, %v11719_v54 }
0x11a7   :  { %v2921_v13 = vmul.f32 %v10128_v31, %v11681_v56  ;;  %v2936_v18 = vmul.f32 %v8404_v11, %v2922_v45 }
0x11a8   :  { %v10130_v40 = vpop.eup %10129 }
0x11a9   :  { %v2935_v53 = vmul.f32 %v8404_v11, %v2921_v13  ;;  %v2924_v12 = vmul.f32 %v10130_v40, %v11685_v15  ;;  %v11731_v38 = vadd.f32 %v8405_v16, %v2936_v18  ;;  %v11854_v40 = vld [vmem:[%s10501_s9 + $0x18] sm:$0xff] }
0x11aa   :  { %v10132_v35 = vpop.eup %10131 }
0x11ab   :  { %v11728_v59 = vadd.f32 %v8405_v16, %v2935_v53  ;;  %v2923_v55 = vmul.f32 %v10132_v35, %v11690_v19  ;;  %v2938_v33 = vmul.f32 %v8404_v11, %v2924_v12 }
0x11ad   :  { %v10134_v32 = vpop.eup %10133  ;;  %9373 = vmatprep.mubr.msk.f32.mxu0 %vm137_vm0, %v11728_v59  ;;  %v2937_v23 = vmul.f32 %v8404_v11, %v2923_v55  ;;  %v11740_v37 = vadd.f32 %v8405_v16, %v2938_v33  ;;  %v11859_v55 = vld [vmem:[%s10501_s9 + $0x10] sm:$0xff] }
0x11ae   :  { %9374 = vmatmul.mubr.msk.f32.gmra.mxu0 %vm137_vm0, %v11731_v38  ;;  %v2926_v56 = vmul.f32 %v10134_v32, %v11698_v57  ;;  %v11863_v32 = vld [vmem:[%s10501_s9 + $0x28] sm:$0xff] }
0x11af   :  { %v10136_v15 = vpop.eup %10135  ;;  %v11738_v29 = vadd.f32 %v8405_v16, %v2937_v23 }
0x11b0   :  { %v2925_v19 = vmul.f32 %v10136_v15, %v11701_v51  ;;  %v2940_v28 = vmul.f32 %v8404_v11, %v2926_v56  ;;  %v8411_v51 = vld [vmem:[%s10521_s25 + $0x1] ss:$0 sm:$0xff]  ;;  %s13170_s25 = sld [smem:[#allocation10_spill]] }
0x11b1   :  { %9376 = vmatprep.mubr.msk.f32.mxu0 %vm137_vm0, %v11738_v29 }
0x11b2   :  { %9377 = vmatmul.mubr.msk.f32.gmra.mxu0 %vm137_vm0, %v11740_v37  ;;  %v2939_v21 = vmul.f32 %v8404_v11, %v2925_v19  ;;  %v11749_v27 = vadd.f32 %v8405_v16, %v2940_v28 }
0x11b4   :  { %v11747_v60 = vadd.f32 %v8405_v16, %v2939_v21  ;;  %v11869_v21 = vld [vmem:[%s10501_s9 + $0x20] sm:$0xff] }
0x11b6   :  { %9379 = vmatprep.mubr.msk.f32.mxu0 %vm137_vm0, %v11747_v60 }
0x11b7   :  { %9380 = vmatmul.mubr.msk.f32.gmra.mxu0 %vm137_vm0, %v11749_v27 }
0x1266   :  { %v9372_v57 = vpop.f32.mrf.mxu0 }
0x1267   :  { %v11774_v43 = vadd.f32 %v9372_v57, %v8411_v51 }
0x1268   :  { %v3058_v10 = vpop.f32.mrf.mxu0 }
0x1269   :  { %v11756_v61 = vadd.f32 %v8411_v51, %v3058_v10 }
0x126b   :  { %9398 = vmatprep.mubr.msk.f32.mxu1 %vm443_vm1, %v11756_v61 }
0x126e   :  { %v9375_v39 = vpop.f32.mrf.mxu0 }
0x126f   :  { %v11766_v0 = vadd.f32 %v9375_v39, %v8411_v51 }
0x1270   :  { %v3068_v34 = vpop.f32.mrf.mxu0 }
0x1271   :  { %v11784_v63 = vadd.f32 %v8411_v51, %v3068_v34 }
0x1272   :  { %v9378_v24 = vpop.f32.mrf.mxu0 }
0x1273   :  { %v11770_v5 = vadd.f32 %v9378_v24, %v8411_v51 }
0x1274   :  { %v3078_v8 = vpop.f32.mrf.mxu0 }
0x1275   :  { %v11778_v46 = vadd.f32 %v8411_v51, %v3078_v8  ;;  %v11879_v8 = vld [vmem:[%s10501_s9 + $0x30] sm:$0xff] }
0x1277   :  { %v9381_v49 = vpop.f32.mrf.mxu0 }
0x1278   :  { %v11760_v3 = vadd.f32 %v9381_v49, %v8411_v51 }
0x1279   :  { %v3088_v9 = vpop.f32.mrf.mxu0 }
0x127a   :  { %v11762_v17 = vadd.f32 %v8411_v51, %v3088_v9  ;;  %3119 = vrot.lane.b32.xlu0 %v11760_v3, %s10462_s0  ;;  %v11873_v51 = vld [vmem:[%s10501_s9 + $0x38] sm:$0xff] }
0x127c   :  { %3117 = vrot.lane.b32.xlu1 %v11762_v17, %s10462_s0 }
0x127e   :  { %3111 = vrot.lane.b32.xlu0 %v11766_v0, %s10462_s0 }
0x1280   :  { %3115 = vrot.lane.b32.xlu1 %v11770_v5, %s10462_s0 }
0x1282   :  { %3107 = vrot.lane.b32.xlu0 %v11774_v43, %s10462_s0 }
0x1284   :  { %3113 = vrot.lane.b32.xlu1 %v11778_v46, %s10462_s0 }
0x1286   :  { %3360 = vrot.lane.b32.xlu0 %v11760_v3, %s10463_s5 }
0x1288   :  { %3109 = vrot.lane.b32.xlu1 %v11784_v63, %s10462_s0 }
0x128a   :  { %3352 = vrot.lane.b32.xlu0 %v11766_v0, %s10463_s5 }
0x128c   :  { %3105 = vrot.lane.b32.xlu1 %v11756_v61, %s10462_s0 }
0x128e   :  { %3348 = vrot.lane.b32.xlu0 %v11774_v43, %s10463_s5 }
0x1290   :  { %3356 = vrot.lane.b32.xlu1 %v11770_v5, %s10463_s5 }
0x1292   :  { %3529 = vrot.lane.b32.xlu0 %v11760_v3, %s10464_s13 }
0x1294   :  { %3354 = vrot.lane.b32.xlu1 %v11778_v46, %s10463_s5 }
0x1298   :  { %3350 = vrot.lane.b32.xlu1 %v11784_v63, %s10463_s5 }
0x129c   :  { %3346 = vrot.lane.b32.xlu1 %v11756_v61, %s10463_s5 }
0x12a0   :  { %3358 = vrot.lane.b32.xlu1 %v11762_v17, %s10463_s5 }
0x12a4   :  { %3527 = vrot.lane.b32.xlu1 %v11762_v17, %s10464_s13 }
0x12ec   :  { %v3120_v36 = vpop.permute.xlu0 %3119 }
0x12ed   :  { %9382 = vmatprep.subr.msk.mxu1 %vm443_vm1, %v3120_v36 }
0x12ee   :  { %9383 = vmatpush3.xpose.msk.msra.mxu1 %vm443_vm1, %v3120_v36  ;;  %v3118_v30 = vpop.permute.xlu1 %3117 }
0x12ef   :  { %9384 = vmatprep.subr.msk.mxu1 %vm443_vm1, %v3118_v30 }
0x12f0   :  { %v3112_v6 = vpop.permute.xlu0 %3111 }
0x12f2   :  { %9385 = vmatpush3.xpose.msk.msra.mxu1 %vm443_vm1, %v3118_v30  ;;  %v3116_v42 = vpop.permute.xlu1 %3115 }
0x12f3   :  { %9386 = vmatprep.subr.msk.mxu1 %vm443_vm1, %v3116_v42 }
0x12f4   :  { %v3108_v50 = vpop.permute.xlu0 %3107 }
0x12f6   :  { %9387 = vmatpush3.xpose.msk.msra.mxu1 %vm443_vm1, %v3116_v42  ;;  %v3114_v2 = vpop.permute.xlu1 %3113 }
0x12f7   :  { %9388 = vmatprep.subr.msk.mxu1 %vm443_vm1, %v3114_v2 }
0x12f8   :  { %v3361_v44 = vpop.permute.xlu0 %3360 }
0x12f9   :  { %9410 = vmatprep.subr.mxu0 %v3361_v44 }
0x12fa   :  { %9389 = vmatpush3.xpose.msk.msra.mxu1 %vm443_vm1, %v3114_v2  ;;  %9411 = vmatpush3.msra.mxu0 %v3361_v44  ;;  %v3110_v58 = vpop.permute.xlu1 %3109 }
0x12fb   :  { %9390 = vmatprep.subr.msk.mxu1 %vm443_vm1, %v3112_v6 }
0x12fc   :  { %v3353_v14 = vpop.permute.xlu0 %3352 }
0x12fe   :  { %9391 = vmatpush3.xpose.msk.msra.mxu1 %vm443_vm1, %v3112_v6  ;;  %v3106_v4 = vpop.permute.xlu1 %3105 }
0x12ff   :  { %9392 = vmatprep.subr.msk.mxu1 %vm443_vm1, %v3110_v58 }
0x1300   :  { %v3349_v1 = vpop.permute.xlu0 %3348 }
0x1302   :  { %9393 = vmatpush3.xpose.msk.msra.mxu1 %vm443_vm1, %v3110_v58  ;;  %v3357_v25 = vpop.permute.xlu1 %3356 }
0x1303   :  { %9394 = vmatprep.subr.msk.mxu1 %vm443_vm1, %v3108_v50 }
0x1304   :  { %v11840_v41 = vpop.permute.xlu0 %3529 }
0x1306   :  { %9395 = vmatpush3.xpose.msk.msra.mxu1 %vm443_vm1, %v3108_v50  ;;  %v3355_v11 = vpop.permute.xlu1 %3354 }
0x1307   :  { %9396 = vmatprep.subr.msk.mxu1 %vm443_vm1, %v3106_v4 }
0x130a   :  { %9397 = vmatpush3.xpose.msk.msra.mxu1 %vm443_vm1, %v3106_v4  ;;  %v3351_v7 = vpop.permute.xlu1 %3350 }
0x130d   :  { %9399 = vmatmul.mubr.msk.f32.vlgmr.msra.gmra.mxu1 %vm443_vm1, %v11774_v43 }
0x130e   :  { %9401 = vmatprep.mubr.msk.f32.mxu1 %vm443_vm1, %v11784_v63  ;;  %v3347_v62 = vpop.permute.xlu1 %3346 }
0x1311   :  { %9402 = vmatmul.mubr.msk.f32.gmra.mxu1 %vm443_vm1, %v11766_v0 }
0x1312   :  { %9404 = vmatprep.mubr.msk.f32.mxu1 %vm443_vm1, %v11778_v46  ;;  %v3359_v26 = vpop.permute.xlu1 %3358 }
0x1313   :  { %9412 = vmatprep.subr.mxu0 %v3359_v26 }
0x1314   :  { %9413 = vmatpush3.msra.mxu0 %v3359_v26 }
0x1315   :  { %9405 = vmatmul.mubr.msk.f32.gmra.mxu1 %vm443_vm1, %v11770_v5  ;;  %9414 = vmatprep.subr.mxu0 %v3357_v25 }
0x1316   :  { %9407 = vmatprep.mubr.msk.f32.mxu1 %vm443_vm1, %v11762_v17  ;;  %9415 = vmatpush3.msra.mxu0 %v3357_v25  ;;  %v11888_v30 = vpop.permute.xlu1 %3527 }
0x1317   :  { %9416 = vmatprep.subr.mxu0 %v3355_v11 }
0x1318   :  { %9417 = vmatpush3.msra.mxu0 %v3355_v11 }
0x1319   :  { %9408 = vmatmul.mubr.msk.f32.gmra.mxu1 %vm443_vm1, %v11760_v3  ;;  %9418 = vmatprep.subr.mxu0 %v3353_v14 }
0x131a   :  { %9419 = vmatpush3.msra.mxu0 %v3353_v14 }
0x131b   :  { %9420 = vmatprep.subr.mxu0 %v3351_v7 }
0x131c   :  { %9421 = vmatpush3.msra.mxu0 %v3351_v7 }
0x131d   :  { %9422 = vmatprep.subr.mxu0 %v3349_v1 }
0x131e   :  { %9423 = vmatpush3.msra.mxu0 %v3349_v1 }
0x131f   :  { %9424 = vmatprep.subr.mxu0 %v3347_v62 }
0x1320   :  { %9425 = vmatpush3.msra.mxu0 %v3347_v62 }
0x1321   :  { %9438 = vmatprep.subr.msk.mxu0 %vm443_vm1, %v11840_v41 }
0x13cd   :  { %v9400_v52 = vpop.f32.mrf.mxu1 }
0x13ce   :  { %v3225_v16 = vadd.f32 %v11845_v20, %v9400_v52 }
0x13cf   :  { %v3219_v47 = vpop.f32.mrf.mxu1 }
0x13d0   :  { %v3220_v45 = vadd.f32 %v11849_v22, %v3219_v47  ;;  %v3261_v31 = vsel %vm581_vm2, %v3225_v16, -inf }
0x13d1   :  { %3262 = vmax.xlane.f32.xlu1 %v3261_v31  ;;  %v9403_v13 = vpop.f32.mrf.mxu1 }
0x13d2   :  { %v3235_v18 = vadd.f32 %v11854_v40, %v9403_v13  ;;  %v3258_v53 = vsel %vm581_vm2, %v3220_v45, -inf }
0x13d3   :  { %v3229_v12 = vpop.f32.mrf.mxu1  ;;  %3259 = vmax.xlane.f32.xlu0 %v3258_v53 }
0x13d4   :  { %v3230_v33 = vadd.f32 %v11859_v55, %v3229_v12  ;;  %v3267_v56 = vsel %vm581_vm2, %v3235_v18, -inf }
0x13d5   :  { %v9406_v35 = vpop.f32.mrf.mxu1 }
0x13d6   :  { %v3245_v23 = vadd.f32 %v11863_v32, %v9406_v35  ;;  %v3264_v39 = vsel %vm581_vm2, %v3230_v33, -inf }
0x13d7   :  { %v3239_v15 = vpop.f32.mrf.mxu1  ;;  %3268 = vmax.xlane.f32.xlu0 %v3267_v56 }
0x13d8   :  { %v3273_v19 = vsel %vm581_vm2, %v3245_v23, -inf  ;;  %v3240_v57 = vadd.f32 %v11869_v21, %v3239_v15 }
0x13d9   :  { %3274 = vmax.xlane.f32.xlu1 %v3273_v19  ;;  %v9409_v28 = vpop.f32.mrf.mxu1 }
0x13da   :  { %v3255_v10 = vadd.f32 %v11873_v51, %v9409_v28  ;;  %v3270_v9 = vsel %vm581_vm2, %v3240_v57, -inf }
0x13db   :  { %v3249_v34 = vpop.f32.mrf.mxu1  ;;  %3265 = vmax.xlane.f32.xlu0 %v3264_v39 }
0x13dc   :  { %v3279_v24 = vsel %vm581_vm2, %v3255_v10, -inf  ;;  %v3250_v49 = vadd.f32 %v11879_v8, %v3249_v34 }
0x13dd   :  { %3280 = vmax.xlane.f32.xlu1 %v3279_v24 }
0x13de   :  { %v3276_v36 = vsel %vm581_vm2, %v3250_v49, -inf }
0x13df   :  { %3271 = vmax.xlane.f32.xlu0 %v3270_v9 }
0x13e3   :  { %3277 = vmax.xlane.f32.xlu0 %v3276_v36 }
0x13ee   :  { %3523 = vrot.lane.b32.xlu1 %v11778_v46, %s10464_s13 }
0x13f9   :  { %3525 = vrot.lane.b32.xlu0 %v11770_v5, %s10464_s13 }
0x145a   :  { %v3263_v6 = vpop.xlane.xlu1 %3262 }
0x145b   :  { %v3283_v42 = vsub.f32 %v3225_v16, %v3263_v6 }
0x145c   :  { %v3260_v50 = vpop.xlane.xlu0 %3259 }
0x145d   :  { %v3292_v2 = vmul.f32 1.442695, %v3283_v42  ;;  %v3282_v44 = vsub.f32 %v3220_v45, %v3260_v50 }
0x145f   :  { %10137 = vpow2.f32 %v3292_v2  ;;  %v3290_v58 = vmul.f32 1.442695, %v3282_v44 }
0x1460   :  { %v3269_v62 = vpop.xlane.xlu0 %3268 }
0x1461   :  { %10139 = vpow2.f32 %v3290_v58  ;;  %v3285_v1 = vsub.f32 %v3235_v18, %v3269_v62 }
0x1462   :  { %v3275_v14 = vpop.xlane.xlu1 %3274 }
0x1463   :  { %v3296_v47 = vmul.f32 1.442695, %v3285_v1  ;;  %v3287_v45 = vsub.f32 %v3245_v23, %v3275_v14 }
0x1464   :  { %v3266_v26 = vpop.xlane.xlu0 %3265 }
0x1465   :  { %v3284_v16 = vsub.f32 %v3230_v33, %v3266_v26  ;;  %10141 = vpow2.f32 %v3296_v47  ;;  %v3300_v35 = vmul.f32 1.442695, %v3287_v45 }
0x1466   :  { %v3281_v31 = vpop.xlane.xlu1 %3280 }
0x1467   :  { %v3294_v13 = vmul.f32 1.442695, %v3284_v16  ;;  %v3289_v56 = vsub.f32 %v3255_v10, %v3281_v31 }
0x1468   :  { %v3272_v52 = vpop.xlane.xlu0 %3271 }
0x1469   :  { %v3286_v53 = vsub.f32 %v3240_v57, %v3272_v52  ;;  %10143 = vpow2.f32 %v3294_v13  ;;  %v3304_v28 = vmul.f32 1.442695, %v3289_v56 }
0x146a   :  { %10145 = vpow2.f32 %v3300_v35  ;;  %v3524_v50 = vpop.permute.xlu1 %3523 }
0x146b   :  { %v3298_v15 = vmul.f32 1.442695, %v3286_v53 }
0x146c   :  { %v11890_v4 = vpop.eup %10137  ;;  %v3278_v12 = vpop.xlane.xlu0 %3277 }
0x146d   :  { %v3309_v25 = vsel %vm581_vm2, %v11890_v4, 0.0  ;;  %v3288_v19 = vsub.f32 %v3250_v49, %v3278_v12  ;;  %10147 = vpow2.f32 %v3298_v15 }
0x146e   :  { %v11894_v11 = vpop.eup %10139  ;;  %3310 = vadd.xlane.f32.xlu1 %v3309_v25  ;;  %10149 = vpow2.f32 %v3304_v28 }
0x146f   :  { %v3306_v7 = vsel %vm581_vm2, %v11894_v11, 0.0  ;;  %v3302_v39 = vmul.f32 1.442695, %v3288_v19 }
0x1470   :  { %3307 = vadd.xlane.f32.xlu0 %v3306_v7  ;;  %v3526_v2 = vpop.permute.xlu0 %3525 }
0x1471   :  { %10151 = vpow2.f32 %v3302_v39 }
0x1472   :  { %v11902_v18 = vpop.eup %10141 }
0x1473   :  { %v3315_v23 = vsel %vm581_vm2, %v11902_v18, 0.0 }
0x1476   :  { %v11904_v33 = vpop.eup %10143 }
0x1477   :  { %v11908_v57 = vpop.eup %10145  ;;  %v3312_v10 = vsel %vm581_vm2, %v11904_v33, 0.0 }
0x1478   :  { %v3321_v24 = vsel %vm581_vm2, %v11908_v57, 0.0 }
0x147a   :  { %v11912_v34 = vpop.eup %10147 }
0x147b   :  { %v11916_v49 = vpop.eup %10149  ;;  %v3318_v9 = vsel %vm581_vm2, %v11912_v34, 0.0 }
0x147c   :  { %v3327_v6 = vsel %vm581_vm2, %v11916_v49, 0.0 }
0x147e   :  { %v11920_v36 = vpop.eup %10151 }
0x147f   :  { %3519 = vrot.lane.b32.xlu1 %v11784_v63, %s10464_s13  ;;  %v3324_v42 = vsel %vm581_vm2, %v11920_v36, 0.0 }
0x1486   :  { %3521 = vrot.lane.b32.xlu0 %v11766_v0, %s10464_s13 }
0x14a3   :  { %3316 = vadd.xlane.f32.xlu1 %v3315_v23 }
0x14a5   :  { %3313 = vadd.xlane.f32.xlu0 %v3312_v10 }
0x14a7   :  { %3322 = vadd.xlane.f32.xlu1 %v3321_v24 }
0x14a9   :  { %3319 = vadd.xlane.f32.xlu0 %v3318_v9 }
0x14ab   :  { %3328 = vadd.xlane.f32.xlu1 %v3327_v6 }
0x14ad   :  { %3325 = vadd.xlane.f32.xlu0 %v3324_v42 }
0x14bc   :  { %3515 = vrot.lane.b32.xlu1 %v11756_v61, %s10464_s13 }
0x14c0   :  { %3501 = vrot.lane.b32.xlu1 %v11774_v43, %s10465_s17 }
0x14c3   :  { %3517 = vrot.lane.b32.xlu0 %v11774_v43, %s10464_s13 }
0x14c4   :  { %3505 = vrot.lane.b32.xlu1 %v11766_v0, %s10465_s17 }
0x14c7   :  { %3499 = vrot.lane.b32.xlu0 %v11756_v61, %s10465_s17 }
0x14c8   :  { %3509 = vrot.lane.b32.xlu1 %v11770_v5, %s10465_s17 }
0x14cb   :  { %3503 = vrot.lane.b32.xlu0 %v11784_v63, %s10465_s17 }
0x14cc   :  { %3513 = vrot.lane.b32.xlu1 %v11760_v3, %s10465_s17 }
0x14cf   :  { %3507 = vrot.lane.b32.xlu0 %v11778_v46, %s10465_s17 }
0x14d0   :  { %3768 = vrot.lane.b32.xlu1 %v11762_v17, %s10466_s15 }
0x14d3   :  { %3511 = vrot.lane.b32.xlu0 %v11762_v17, %s10465_s17 }
0x14d4   :  { %3766 = vrot.lane.b32.xlu1 %v11770_v5, %s10466_s15 }
0x14d7   :  { %3770 = vrot.lane.b32.xlu0 %v11760_v3, %s10466_s15 }
0x14d8   :  { %3764 = vrot.lane.b32.xlu1 %v11778_v46, %s10466_s15 }
0x14db   :  { %3762 = vrot.lane.b32.xlu0 %v11766_v0, %s10466_s15 }
0x14dc   :  { %3760 = vrot.lane.b32.xlu1 %v11784_v63, %s10466_s15 }
0x14df   :  { %3758 = vrot.lane.b32.xlu0 %v11774_v43, %s10466_s15 }
0x14e0   :  { %3756 = vrot.lane.b32.xlu1 %v11756_v61, %s10466_s15 }
0x14e3   :  { %3939 = vrot.lane.b32.xlu0 %v11760_v3, %s10467_s16 }
0x14e4   :  { %3937 = vrot.lane.b32.xlu1 %v11762_v17, %s10467_s16 }
0x14f7   :  { %v3311_v44 = vpop.xlane.xlu1 %3310 }
0x14f8   :  { %10153 = vrcp.f32 %v3311_v44 }
0x14f9   :  { %v3308_v58 = vpop.xlane.xlu0 %3307 }
0x14fa   :  { %10155 = vrcp.f32 %v3308_v58 }
0x1505   :  { %v10154_v25 = vpop.eup %10153 }
0x1506   :  { %v3339_v26 = vmul.f32 %v10154_v25, %v11890_v4  ;;  %v3522_v4 = vpop.permute.xlu0 %3521 }
0x1507   :  { %v10156_v7 = vpop.eup %10155 }
0x1508   :  { %v3338_v62 = vmul.f32 %v10156_v7, %v11894_v11  ;;  %v3520_v11 = vpop.permute.xlu1 %3519 }
0x150a   :  { %9426 = vmatprep.mubr.msk.f32.mxu0 %vm581_vm2, %v3338_v62 }
0x150b   :  { %9427 = vmatmul.mubr.msk.f32.vlgmr.msra.gmra.mxu0 %vm581_vm2, %v3339_v26 }
0x150c   :  { %9439 = vmatpush3.xpose.msk.msra.mxu0 %vm443_vm1, %v11840_v41 }
0x150d   :  { %9440 = vmatprep.subr.msk.mxu0 %vm443_vm1, %v11888_v30 }
0x1510   :  { %9441 = vmatpush3.xpose.msk.msra.mxu0 %vm443_vm1, %v11888_v30 }
0x1511   :  { %9442 = vmatprep.subr.msk.mxu0 %vm443_vm1, %v3526_v2 }
0x1514   :  { %9443 = vmatpush3.xpose.msk.msra.mxu0 %vm443_vm1, %v3526_v2 }
0x1515   :  { %9444 = vmatprep.subr.msk.mxu0 %vm443_vm1, %v3524_v50 }
0x1518   :  { %9445 = vmatpush3.xpose.msk.msra.mxu0 %vm443_vm1, %v3524_v50 }
0x1519   :  { %9446 = vmatprep.subr.msk.mxu0 %vm443_vm1, %v3522_v4 }
0x151c   :  { %9447 = vmatpush3.xpose.msk.msra.mxu0 %vm443_vm1, %v3522_v4 }
0x151d   :  { %9448 = vmatprep.subr.msk.mxu0 %vm443_vm1, %v3520_v11 }
0x1520   :  { %9449 = vmatpush3.xpose.msk.msra.mxu0 %vm443_vm1, %v3520_v11 }
0x152c   :  { %v3317_v41 = vpop.xlane.xlu1 %3316 }
0x152d   :  { %10157 = vrcp.f32 %v3317_v41 }
0x152e   :  { %v3314_v30 = vpop.xlane.xlu0 %3313 }
0x152f   :  { %10159 = vrcp.f32 %v3314_v30 }
0x1530   :  { %v3323_v14 = vpop.xlane.xlu1 %3322 }
0x1531   :  { %10161 = vrcp.f32 %v3323_v14 }
0x1532   :  { %v3320_v1 = vpop.xlane.xlu0 %3319 }
0x1533   :  { %10163 = vrcp.f32 %v3320_v1 }
0x1534   :  { %v3329_v52 = vpop.xlane.xlu1 %3328 }
0x1535   :  { %10165 = vrcp.f32 %v3329_v52 }
0x1536   :  { %v3326_v16 = vpop.xlane.xlu0 %3325 }
0x1537   :  { %10167 = vrcp.f32 %v3326_v16 }
0x1538   :  { %v3516_v47 = vpop.permute.xlu1 %3515 }
0x153a   :  { %v3518_v45 = vpop.permute.xlu0 %3517  ;;  %v10158_v31 = vpop.eup %10157 }
0x153b   :  { %9450 = vmatprep.subr.msk.mxu0 %vm443_vm1, %v3518_v45  ;;  %v3341_v56 = vmul.f32 %v10158_v31, %v11902_v18 }
0x153c   :  { %v10160_v13 = vpop.eup %10159  ;;  %9451 = vmatpush3.xpose.msk.msra.mxu0 %vm443_vm1, %v3518_v45  ;;  %v3502_v53 = vpop.permute.xlu1 %3501 }
0x153d   :  { %9452 = vmatprep.subr.msk.mxu0 %vm443_vm1, %v3516_v47  ;;  %v3340_v12 = vmul.f32 %v10160_v13, %v11904_v33 }
0x153e   :  { %v3500_v35 = vpop.permute.xlu0 %3499  ;;  %v10162_v15 = vpop.eup %10161 }
0x153f   :  { %9429 = vmatprep.mubr.msk.f32.mxu0 %vm581_vm2, %v3340_v12  ;;  %v3343_v10 = vmul.f32 %v10162_v15, %v11908_v57 }
0x1540   :  { %v10164_v19 = vpop.eup %10163  ;;  %9430 = vmatmul.mubr.msk.f32.gmra.mxu0 %vm581_vm2, %v3341_v56  ;;  %v3506_v28 = vpop.permute.xlu1 %3505 }
0x1541   :  { %9453 = vmatpush3.xpose.msk.msra.mxu0 %vm443_vm1, %v3516_v47  ;;  %v3342_v39 = vmul.f32 %v10164_v19, %v11912_v34 }
0x1542   :  { %v3504_v23 = vpop.permute.xlu0 %3503  ;;  %v10166_v24 = vpop.eup %10165 }
0x1543   :  { %9432 = vmatprep.mubr.msk.f32.mxu0 %vm581_vm2, %v3342_v39  ;;  %v3345_v42 = vmul.f32 %v10166_v24, %v11916_v49 }
0x1544   :  { %v10168_v33 = vpop.eup %10167  ;;  %9433 = vmatmul.mubr.msk.f32.gmra.mxu0 %vm581_vm2, %v3343_v10  ;;  %v3510_v18 = vpop.permute.xlu1 %3509 }
0x1545   :  { %v3344_v9 = vmul.f32 %v10168_v33, %v11920_v36 }
0x1546   :  { %v3508_v6 = vpop.permute.xlu0 %3507 }
0x1547   :  { %9435 = vmatprep.mubr.msk.f32.mxu0 %vm581_vm2, %v3344_v9 }
0x1548   :  { %9436 = vmatmul.mubr.msk.f32.gmra.mxu0 %vm581_vm2, %v3345_v42  ;;  %v3514_v34 = vpop.permute.xlu1 %3513 }
0x1549   :  { %9454 = vmatprep.mubr.msk.f32.mxu0 %vm443_vm1, %v3500_v35 }
0x154a   :  { %v3512_v57 = vpop.permute.xlu0 %3511 }
0x154c   :  { %9455 = vmatmul.mubr.msk.f32.vlgmr.msra.gmra.mxu0 %vm443_vm1, %v3502_v53  ;;  %v3769_v50 = vpop.permute.xlu1 %3768 }
0x154d   :  { %9457 = vmatprep.mubr.msk.f32.mxu0 %vm443_vm1, %v3504_v23 }
0x154e   :  { %v3771_v2 = vpop.permute.xlu0 %3770 }
0x154f   :  { %9466 = vmatprep.subr.mxu1 %v3771_v2 }
0x1550   :  { %9458 = vmatmul.mubr.msk.f32.gmra.mxu0 %vm443_vm1, %v3506_v28  ;;  %9467 = vmatpush3.msra.mxu1 %v3771_v2  ;;  %v3767_v36 = vpop.permute.xlu1 %3766 }
0x1551   :  { %9460 = vmatprep.mubr.msk.f32.mxu0 %vm443_vm1, %v3508_v6  ;;  %9468 = vmatprep.subr.mxu1 %v3769_v50 }
0x1552   :  { %v3763_v49 = vpop.permute.xlu0 %3762  ;;  %9469 = vmatpush3.msra.mxu1 %v3769_v50 }
0x1553   :  { %9470 = vmatprep.subr.mxu1 %v3767_v36 }
0x1554   :  { %9461 = vmatmul.mubr.msk.f32.gmra.mxu0 %vm443_vm1, %v3510_v18  ;;  %9471 = vmatpush3.msra.mxu1 %v3767_v36  ;;  %v3765_v44 = vpop.permute.xlu1 %3764 }
0x1555   :  { %9463 = vmatprep.mubr.msk.f32.mxu0 %vm443_vm1, %v3512_v57  ;;  %9472 = vmatprep.subr.mxu1 %v3765_v44 }
0x1556   :  { %9473 = vmatpush3.msra.mxu1 %v3765_v44  ;;  %v3759_v58 = vpop.permute.xlu0 %3758 }
0x1557   :  { %9474 = vmatprep.subr.mxu1 %v3763_v49 }
0x1558   :  { %9464 = vmatmul.mubr.msk.f32.gmra.mxu0 %vm443_vm1, %v3514_v34  ;;  %9475 = vmatpush3.msra.mxu1 %v3763_v49  ;;  %v3761_v25 = vpop.permute.xlu1 %3760 }
0x1559   :  { %9476 = vmatprep.subr.mxu1 %v3761_v25 }
0x155a   :  { %9477 = vmatpush3.msra.mxu1 %v3761_v25  ;;  %v12008_v62 = vpop.permute.xlu0 %3939 }
0x155b   :  { %9478 = vmatprep.subr.mxu1 %v3759_v58 }
0x155c   :  { %9479 = vmatpush3.msra.mxu1 %v3759_v58  ;;  %v3757_v7 = vpop.permute.xlu1 %3756 }
0x155d   :  { %9480 = vmatprep.subr.mxu1 %v3757_v7 }
0x155e   :  { %9481 = vmatpush3.msra.mxu1 %v3757_v7 }
0x155f   :  { %9494 = vmatprep.subr.msk.mxu1 %vm443_vm1, %v12008_v62 }
0x1560   :  { %v12048_v2 = vpop.permute.xlu1 %3937 }
0x15cb   :  { %v12012_v26 = vpop.f32.mrf.mxu0 }
0x15cd   :  { %v12014_v4 = vpop.f32.mrf.mxu0 }
0x1600   :  { %v12016_v11 = vpop.f32.mrf.mxu0 }
0x1602   :  { %v12018_v41 = vpop.f32.mrf.mxu0 }
0x1604   :  { %v12020_v30 = vpop.f32.mrf.mxu0 }
0x1606   :  { %v12022_v14 = vpop.f32.mrf.mxu0 }
0x1608   :  { %v12024_v1 = vpop.f32.mrf.mxu0 }
0x160a   :  { %v12026_v52 = vpop.f32.mrf.mxu0 }
0x160c   :  { %v9456_v16 = vpop.f32.mrf.mxu0 }
0x160d   :  { %v3635_v47 = vadd.f32 %v11845_v20, %v9456_v16 }
0x160e   :  { %v3629_v45 = vpop.f32.mrf.mxu0 }
0x160f   :  { %v3630_v31 = vadd.f32 %v11849_v22, %v3629_v45  ;;  %v3671_v13 = vsel %vm581_vm2, %v3635_v47, -inf }
0x1610   :  { %3672 = vmax.xlane.f32.xlu1 %v3671_v13  ;;  %v9459_v53 = vpop.f32.mrf.mxu0 }
0x1611   :  { %v3645_v12 = vadd.f32 %v11854_v40, %v9459_v53  ;;  %v3668_v35 = vsel %vm581_vm2, %v3630_v31, -inf }
0x1612   :  { %3669 = vmax.xlane.f32.xlu0 %v3668_v35  ;;  %v3639_v56 = vpop.f32.mrf.mxu0 }
0x1613   :  { %v3640_v19 = vadd.f32 %v11859_v55, %v3639_v56  ;;  %v3677_v39 = vsel %vm581_vm2, %v3645_v12, -inf }
0x1614   :  { %v9462_v15 = vpop.f32.mrf.mxu0 }
0x1615   :  { %v3655_v28 = vadd.f32 %v11863_v32, %v9462_v15  ;;  %v3674_v9 = vsel %vm581_vm2, %v3640_v19, -inf }
0x1616   :  { %3678 = vmax.xlane.f32.xlu0 %v3677_v39  ;;  %v3649_v23 = vpop.f32.mrf.mxu0 }
0x1617   :  { %v3683_v10 = vsel %vm581_vm2, %v3655_v28, -inf  ;;  %v3650_v33 = vadd.f32 %v11869_v21, %v3649_v23 }
0x1618   :  { %3684 = vmax.xlane.f32.xlu1 %v3683_v10  ;;  %v9465_v24 = vpop.f32.mrf.mxu0 }
0x1619   :  { %v3665_v18 = vadd.f32 %v11873_v51, %v9465_v24  ;;  %v3680_v57 = vsel %vm581_vm2, %v3650_v33, -inf }
0x161a   :  { %3675 = vmax.xlane.f32.xlu0 %v3674_v9  ;;  %v3659_v6 = vpop.f32.mrf.mxu0 }
0x161b   :  { %v3689_v42 = vsel %vm581_vm2, %v3665_v18, -inf  ;;  %v3660_v34 = vadd.f32 %v11879_v8, %v3659_v6 }
0x161c   :  { %3690 = vmax.xlane.f32.xlu1 %v3689_v42 }
0x161d   :  { %v3686_v50 = vsel %vm581_vm2, %v3660_v34, -inf }
0x161e   :  { %3681 = vmax.xlane.f32.xlu0 %v3680_v57 }
0x1622   :  { %3687 = vmax.xlane.f32.xlu0 %v3686_v50 }
0x162d   :  { %3933 = vrot.lane.b32.xlu1 %v11778_v46, %s10467_s16 }
0x1638   :  { %3935 = vrot.lane.b32.xlu0 %v11770_v5, %s10467_s16 }
0x1699   :  { %v3673_v36 = vpop.xlane.xlu1 %3672 }
0x169a   :  { %v3693_v49 = vsub.f32 %v3635_v47, %v3673_v36 }
0x169b   :  { %v3670_v44 = vpop.xlane.xlu0 %3669 }
0x169c   :  { %v3702_v58 = vmul.f32 1.442695, %v3693_v49  ;;  %v3692_v25 = vsub.f32 %v3630_v31, %v3670_v44 }
0x169e   :  { %10169 = vpow2.f32 %v3702_v58  ;;  %v3700_v7 = vmul.f32 1.442695, %v3692_v25 }
0x169f   :  { %v3679_v35 = vpop.xlane.xlu0 %3678 }
0x16a0   :  { %10171 = vpow2.f32 %v3700_v7  ;;  %v3695_v56 = vsub.f32 %v3645_v12, %v3679_v35 }
0x16a1   :  { %v3685_v31 = vpop.xlane.xlu1 %3684 }
0x16a2   :  { %v3706_v23 = vmul.f32 1.442695, %v3695_v56  ;;  %v3697_v10 = vsub.f32 %v3655_v28, %v3685_v31 }
0x16a3   :  { %v3676_v47 = vpop.xlane.xlu0 %3675 }
0x16a4   :  { %v3694_v39 = vsub.f32 %v3640_v19, %v3676_v47  ;;  %10173 = vpow2.f32 %v3706_v23  ;;  %v3710_v57 = vmul.f32 1.442695, %v3697_v10 }
0x16a5   :  { %v3691_v24 = vpop.xlane.xlu1 %3690 }
0x16a6   :  { %v3704_v9 = vmul.f32 1.442695, %v3694_v39  ;;  %v3699_v50 = vsub.f32 %v3665_v18, %v3691_v24 }
0x16a7   :  { %v3682_v15 = vpop.xlane.xlu0 %3681 }
0x16a8   :  { %v3696_v6 = vsub.f32 %v3650_v33, %v3682_v15  ;;  %10175 = vpow2.f32 %v3704_v9  ;;  %v3714_v44 = vmul.f32 1.442695, %v3699_v50 }
0x16a9   :  { %10177 = vpow2.f32 %v3710_v57  ;;  %v3934_v31 = vpop.permute.xlu1 %3933 }
0x16aa   :  { %v3708_v36 = vmul.f32 1.442695, %v3696_v6 }
0x16ab   :  { %v12050_v16 = vpop.eup %10169  ;;  %v3688_v42 = vpop.xlane.xlu0 %3687 }
0x16ac   :  { %v3719_v45 = vsel %vm581_vm2, %v12050_v16, 0.0  ;;  %v3698_v49 = vsub.f32 %v3660_v34, %v3688_v42  ;;  %10179 = vpow2.f32 %v3708_v36 }
0x16ad   :  { %v12054_v13 = vpop.eup %10171  ;;  %3720 = vadd.xlane.f32.xlu1 %v3719_v45  ;;  %10181 = vpow2.f32 %v3714_v44 }
0x16ae   :  { %v3716_v53 = vsel %vm581_vm2, %v12054_v13, 0.0  ;;  %v3712_v58 = vmul.f32 1.442695, %v3698_v49 }
0x16af   :  { %3717 = vadd.xlane.f32.xlu0 %v3716_v53  ;;  %v3936_v56 = vpop.permute.xlu0 %3935 }
0x16b0   :  { %10183 = vpow2.f32 %v3712_v58 }
0x16b1   :  { %v12062_v12 = vpop.eup %10173 }
0x16b2   :  { %v3725_v28 = vsel %vm581_vm2, %v12062_v12, 0.0 }
0x16b5   :  { %v12064_v19 = vpop.eup %10175 }
0x16b6   :  { %v12068_v33 = vpop.eup %10177  ;;  %v3722_v18 = vsel %vm581_vm2, %v12064_v19, 0.0 }
0x16b7   :  { %v3731_v25 = vsel %vm581_vm2, %v12068_v33, 0.0 }
0x16b9   :  { %v12072_v34 = vpop.eup %10179 }
0x16ba   :  { %v12076_v7 = vpop.eup %10181  ;;  %v3728_v45 = vsel %vm581_vm2, %v12072_v34, 0.0 }
0x16bb   :  { %v3737_v35 = vsel %vm581_vm2, %v12076_v7, 0.0 }
0x16bd   :  { %v12080_v53 = vpop.eup %10183 }
0x16be   :  { %3929 = vrot.lane.b32.xlu1 %v11784_v63, %s10467_s16  ;;  %v3734_v47 = vsel %vm581_vm2, %v12080_v53, 0.0 }
0x16c5   :  { %3931 = vrot.lane.b32.xlu0 %v11766_v0, %s10467_s16 }
0x16e2   :  { %3726 = vadd.xlane.f32.xlu1 %v3725_v28 }
0x16e4   :  { %3723 = vadd.xlane.f32.xlu0 %v3722_v18 }
0x16e6   :  { %3732 = vadd.xlane.f32.xlu1 %v3731_v25 }
0x16e8   :  { %3729 = vadd.xlane.f32.xlu0 %v3728_v45 }
0x16ea   :  { %3738 = vadd.xlane.f32.xlu1 %v3737_v35 }
0x16ec   :  { %3735 = vadd.xlane.f32.xlu0 %v3734_v47 }
0x16fb   :  { %3925 = vrot.lane.b32.xlu1 %v11756_v61, %s10467_s16 }
0x16ff   :  { %3911 = vrot.lane.b32.xlu1 %v11774_v43, %s10468_s18 }
0x1702   :  { %3927 = vrot.lane.b32.xlu0 %v11774_v43, %s10467_s16 }
0x1703   :  { %3915 = vrot.lane.b32.xlu1 %v11766_v0, %s10468_s18 }
0x1706   :  { %3909 = vrot.lane.b32.xlu0 %v11756_v61, %s10468_s18 }
0x1707   :  { %3919 = vrot.lane.b32.xlu1 %v11770_v5, %s10468_s18 }
0x170a   :  { %3913 = vrot.lane.b32.xlu0 %v11784_v63, %s10468_s18 }
0x170b   :  { %3923 = vrot.lane.b32.xlu1 %v11760_v3, %s10468_s18 }
0x170e   :  { %3917 = vrot.lane.b32.xlu0 %v11778_v46, %s10468_s18 }
0x170f   :  { %4178 = vrot.lane.b32.xlu1 %v11762_v17, %s10469_s22 }
0x1712   :  { %3921 = vrot.lane.b32.xlu0 %v11762_v17, %s10468_s18 }
0x1713   :  { %4176 = vrot.lane.b32.xlu1 %v11770_v5, %s10469_s22 }
0x1716   :  { %4180 = vrot.lane.b32.xlu0 %v11760_v3, %s10469_s22 }
0x1717   :  { %4174 = vrot.lane.b32.xlu1 %v11778_v46, %s10469_s22 }
0x171a   :  { %4172 = vrot.lane.b32.xlu0 %v11766_v0, %s10469_s22 }
0x171b   :  { %4170 = vrot.lane.b32.xlu1 %v11784_v63, %s10469_s22 }
0x171e   :  { %4168 = vrot.lane.b32.xlu0 %v11774_v43, %s10469_s22 }
0x171f   :  { %4166 = vrot.lane.b32.xlu1 %v11756_v61, %s10469_s22 }
0x1722   :  { %4349 = vrot.lane.b32.xlu0 %v11760_v3, %s10470_s23 }
0x1723   :  { %4347 = vrot.lane.b32.xlu1 %v11762_v17, %s10470_s23 }
0x1736   :  { %v3721_v15 = vpop.xlane.xlu1 %3720 }
0x1737   :  { %10185 = vrcp.f32 %v3721_v15 }
0x1738   :  { %v3718_v39 = vpop.xlane.xlu0 %3717 }
0x1739   :  { %10187 = vrcp.f32 %v3718_v39 }
0x1744   :  { %v10186_v23 = vpop.eup %10185 }
0x1745   :  { %v3749_v9 = vmul.f32 %v10186_v23, %v12050_v16  ;;  %v3932_v16 = vpop.permute.xlu0 %3931 }
0x1746   :  { %v10188_v10 = vpop.eup %10187 }
0x1747   :  { %v3748_v24 = vmul.f32 %v10188_v10, %v12054_v13  ;;  %v3930_v13 = vpop.permute.xlu1 %3929 }
0x1749   :  { %9482 = vmatprep.mubr.msk.f32.mxu1 %vm581_vm2, %v3748_v24 }
0x174a   :  { %9483 = vmatmul.mubr.msk.f32.vlgmr.msra.gmra.mxu1 %vm581_vm2, %v3749_v9 }
0x174b   :  { %9495 = vmatpush3.xpose.msk.msra.mxu1 %vm443_vm1, %v12008_v62 }
0x174c   :  { %9496 = vmatprep.subr.msk.mxu1 %vm443_vm1, %v12048_v2 }
0x174f   :  { %9497 = vmatpush3.xpose.msk.msra.mxu1 %vm443_vm1, %v12048_v2 }
0x1750   :  { %9498 = vmatprep.subr.msk.mxu1 %vm443_vm1, %v3936_v56 }
0x1753   :  { %9499 = vmatpush3.xpose.msk.msra.mxu1 %vm443_vm1, %v3936_v56 }
0x1754   :  { %9500 = vmatprep.subr.msk.mxu1 %vm443_vm1, %v3934_v31 }
0x1757   :  { %9501 = vmatpush3.xpose.msk.msra.mxu1 %vm443_vm1, %v3934_v31 }
0x1758   :  { %9502 = vmatprep.subr.msk.mxu1 %vm443_vm1, %v3932_v16 }
0x175b   :  { %9503 = vmatpush3.xpose.msk.msra.mxu1 %vm443_vm1, %v3932_v16 }
0x175c   :  { %9504 = vmatprep.subr.msk.mxu1 %vm443_vm1, %v3930_v13 }
0x175f   :  { %9505 = vmatpush3.xpose.msk.msra.mxu1 %vm443_vm1, %v3930_v13 }
0x176b   :  { %v3727_v62 = vpop.xlane.xlu1 %3726 }
0x176c   :  { %10189 = vrcp.f32 %v3727_v62 }
0x176d   :  { %v3724_v2 = vpop.xlane.xlu0 %3723 }
0x176e   :  { %10191 = vrcp.f32 %v3724_v2 }
0x176f   :  { %v3733_v6 = vpop.xlane.xlu1 %3732 }
0x1770   :  { %10193 = vrcp.f32 %v3733_v6 }
0x1771   :  { %v3730_v42 = vpop.xlane.xlu0 %3729 }
0x1772   :  { %10195 = vrcp.f32 %v3730_v42 }
0x1773   :  { %v3739_v57 = vpop.xlane.xlu1 %3738 }
0x1774   :  { %10197 = vrcp.f32 %v3739_v57 }
0x1775   :  { %v3736_v50 = vpop.xlane.xlu0 %3735 }
0x1776   :  { %10199 = vrcp.f32 %v3736_v50 }
0x1777   :  { %v3926_v36 = vpop.permute.xlu1 %3925 }
0x1779   :  { %v3928_v49 = vpop.permute.xlu0 %3927  ;;  %v10190_v44 = vpop.eup %10189 }
0x177a   :  { %9506 = vmatprep.subr.msk.mxu1 %vm443_vm1, %v3928_v49  ;;  %v3751_v45 = vmul.f32 %v10190_v44, %v12062_v12 }
0x177b   :  { %v10192_v58 = vpop.eup %10191  ;;  %9507 = vmatpush3.xpose.msk.msra.mxu1 %vm443_vm1, %v3928_v49  ;;  %v3912_v28 = vpop.permute.xlu1 %3911 }
0x177c   :  { %9508 = vmatprep.subr.msk.mxu1 %vm443_vm1, %v3926_v36  ;;  %v3750_v18 = vmul.f32 %v10192_v58, %v12064_v19 }
0x177d   :  { %v3910_v25 = vpop.permute.xlu0 %3909  ;;  %v10194_v35 = vpop.eup %10193 }
0x177e   :  { %9485 = vmatprep.mubr.msk.f32.mxu1 %vm581_vm2, %v3750_v18  ;;  %v3753_v39 = vmul.f32 %v10194_v35, %v12068_v33 }
0x177f   :  { %v10196_v47 = vpop.eup %10195  ;;  %9486 = vmatmul.mubr.msk.f32.gmra.mxu1 %vm581_vm2, %v3751_v45  ;;  %v3916_v31 = vpop.permute.xlu1 %3915 }
0x1780   :  { %9509 = vmatpush3.xpose.msk.msra.mxu1 %vm443_vm1, %v3926_v36  ;;  %v3752_v56 = vmul.f32 %v10196_v47, %v12072_v34 }
0x1781   :  { %v3914_v15 = vpop.permute.xlu0 %3913  ;;  %v10198_v23 = vpop.eup %10197 }
0x1782   :  { %9488 = vmatprep.mubr.msk.f32.mxu1 %vm581_vm2, %v3752_v56  ;;  %v3755_v9 = vmul.f32 %v10198_v23, %v12076_v7 }
0x1783   :  { %v10200_v19 = vpop.eup %10199  ;;  %9489 = vmatmul.mubr.msk.f32.gmra.mxu1 %vm581_vm2, %v3753_v39  ;;  %v3920_v12 = vpop.permute.xlu1 %3919 }
0x1784   :  { %v3754_v10 = vmul.f32 %v10200_v19, %v12080_v53 }
0x1785   :  { %v3918_v24 = vpop.permute.xlu0 %3917 }
0x1786   :  { %9491 = vmatprep.mubr.msk.f32.mxu1 %vm581_vm2, %v3754_v10 }
0x1787   :  { %9492 = vmatmul.mubr.msk.f32.gmra.mxu1 %vm581_vm2, %v3755_v9  ;;  %v3924_v34 = vpop.permute.xlu1 %3923 }
0x1788   :  { %9510 = vmatprep.mubr.msk.f32.mxu1 %vm443_vm1, %v3910_v25 }
0x1789   :  { %v3922_v33 = vpop.permute.xlu0 %3921 }
0x178b   :  { %9511 = vmatmul.mubr.msk.f32.vlgmr.msra.gmra.mxu1 %vm443_vm1, %v3912_v28  ;;  %v4179_v16 = vpop.permute.xlu1 %4178 }
0x178c   :  { %9513 = vmatprep.mubr.msk.f32.mxu1 %vm443_vm1, %v3914_v15 }
0x178d   :  { %v4181_v13 = vpop.permute.xlu0 %4180 }
0x178e   :  { %9522 = vmatprep.subr.mxu0 %v4181_v13 }
0x178f   :  { %9514 = vmatmul.mubr.msk.f32.gmra.mxu1 %vm443_vm1, %v3916_v31  ;;  %9523 = vmatpush3.msra.mxu0 %v4181_v13  ;;  %v4177_v53 = vpop.permute.xlu1 %4176 }
0x1790   :  { %9516 = vmatprep.mubr.msk.f32.mxu1 %vm443_vm1, %v3918_v24  ;;  %9524 = vmatprep.subr.mxu0 %v4179_v16 }
0x1791   :  { %v4173_v7 = vpop.permute.xlu0 %4172  ;;  %9525 = vmatpush3.msra.mxu0 %v4179_v16 }
0x1792   :  { %9526 = vmatprep.subr.mxu0 %v4177_v53 }
0x1793   :  { %9517 = vmatmul.mubr.msk.f32.gmra.mxu1 %vm443_vm1, %v3920_v12  ;;  %9527 = vmatpush3.msra.mxu0 %v4177_v53  ;;  %v4175_v62 = vpop.permute.xlu1 %4174 }
0x1794   :  { %9519 = vmatprep.mubr.msk.f32.mxu1 %vm443_vm1, %v3922_v33  ;;  %9528 = vmatprep.subr.mxu0 %v4175_v62 }
0x1795   :  { %9529 = vmatpush3.msra.mxu0 %v4175_v62  ;;  %v4169_v2 = vpop.permute.xlu0 %4168 }
0x1796   :  { %9530 = vmatprep.subr.mxu0 %v4173_v7 }
0x1797   :  { %9520 = vmatmul.mubr.msk.f32.gmra.mxu1 %vm443_vm1, %v3924_v34  ;;  %9531 = vmatpush3.msra.mxu0 %v4173_v7  ;;  %v4171_v6 = vpop.permute.xlu1 %4170 }
0x1798   :  { %9532 = vmatprep.subr.mxu0 %v4171_v6 }
0x1799   :  { %9533 = vmatpush3.msra.mxu0 %v4171_v6  ;;  %v12168_v57 = vpop.permute.xlu0 %4349 }
0x179a   :  { %9534 = vmatprep.subr.mxu0 %v4169_v2 }
0x179b   :  { %9535 = vmatpush3.msra.mxu0 %v4169_v2  ;;  %v4167_v42 = vpop.permute.xlu1 %4166 }
0x179c   :  { %9536 = vmatprep.subr.mxu0 %v4167_v42 }
0x179d   :  { %9537 = vmatpush3.msra.mxu0 %v4167_v42 }
0x179e   :  { %9550 = vmatprep.subr.msk.mxu0 %vm443_vm1, %v12168_v57 }
0x180a   :  { %v12172_v50 = vpop.f32.mrf.mxu1 }
0x180c   :  { %v12174_v36 = vpop.f32.mrf.mxu1 }
0x183f   :  { %v12176_v49 = vpop.f32.mrf.mxu1 }
0x1841   :  { %v12178_v44 = vpop.f32.mrf.mxu1 }
0x1843   :  { %v12180_v58 = vpop.f32.mrf.mxu1 }
0x1845   :  { %v12182_v28 = vpop.f32.mrf.mxu1 }
0x1847   :  { %v12184_v18 = vpop.f32.mrf.mxu1 }
0x1849   :  { %v12186_v25 = vpop.f32.mrf.mxu1 }
0x184b   :  { %v9512_v45 = vpop.f32.mrf.mxu1 }
0x184c   :  { %v4045_v35 = vadd.f32 %v11845_v20, %v9512_v45 }
0x184d   :  { %v4039_v47 = vpop.f32.mrf.mxu1 }
0x184e   :  { %v4040_v31 = vadd.f32 %v11849_v22, %v4039_v47  ;;  %v4081_v56 = vsel %vm581_vm2, %v4045_v35, -inf }
0x184f   :  { %4082 = vmax.xlane.f32.xlu1 %v4081_v56  ;;  %v9515_v15 = vpop.f32.mrf.mxu1 }
0x1850   :  { %v4055_v39 = vadd.f32 %v11854_v40, %v9515_v15  ;;  %v4078_v23 = vsel %vm581_vm2, %v4040_v31, -inf }
0x1851   :  { %4079 = vmax.xlane.f32.xlu0 %v4078_v23  ;;  %v4049_v19 = vpop.f32.mrf.mxu1 }
0x1852   :  { %v4050_v10 = vadd.f32 %v11859_v55, %v4049_v19  ;;  %v4087_v20 = vsel %vm581_vm2, %v4055_v39, -inf }
0x1853   :  { %v9518_v12 = vpop.f32.mrf.mxu1 }
0x1854   :  { %v4065_v24 = vadd.f32 %v11863_v32, %v9518_v12  ;;  %v4084_v16 = vsel %vm581_vm2, %v4050_v10, -inf }
0x1855   :  { %4088 = vmax.xlane.f32.xlu0 %v4087_v20  ;;  %v4059_v9 = vpop.f32.mrf.mxu1 }
0x1856   :  { %v4093_v22 = vsel %vm581_vm2, %v4065_v24, -inf  ;;  %v4060_v33 = vadd.f32 %v11869_v21, %v4059_v9  ;;  %v12208_v21 = vpop.permute.xlu1 %4347 }
0x1857   :  { %4094 = vmax.xlane.f32.xlu1 %v4093_v22  ;;  %v9521_v34 = vpop.f32.mrf.mxu1 }
0x1858   :  { %v4075_v40 = vadd.f32 %v11873_v51, %v9521_v34  ;;  %v4090_v53 = vsel %vm581_vm2, %v4060_v33, -inf }
0x1859   :  { %4085 = vmax.xlane.f32.xlu0 %v4084_v16  ;;  %v4069_v13 = vpop.f32.mrf.mxu1 }
0x185a   :  { %v4099_v55 = vsel %vm581_vm2, %v4075_v40, -inf  ;;  %v4070_v32 = vadd.f32 %v11879_v8, %v4069_v13 }
0x185b   :  { %4100 = vmax.xlane.f32.xlu1 %v4099_v55 }
0x185c   :  { %v4096_v7 = vsel %vm581_vm2, %v4070_v32, -inf }
0x185d   :  { %4091 = vmax.xlane.f32.xlu0 %v4090_v53 }
0x1861   :  { %4097 = vmax.xlane.f32.xlu0 %v4096_v7 }
0x186c   :  { %4343 = vrot.lane.b32.xlu1 %v11778_v46, %s10470_s23 }
0x1877   :  { %4345 = vrot.lane.b32.xlu0 %v11770_v5, %s10470_s23 }
0x18d8   :  { %v4083_v51 = vpop.xlane.xlu1 %4082 }
0x18d9   :  { %v4103_v62 = vsub.f32 %v4045_v35, %v4083_v51 }
0x18da   :  { %v4080_v2 = vpop.xlane.xlu0 %4079 }
0x18db   :  { %v4112_v6 = vmul.f32 1.442695, %v4103_v62  ;;  %v4102_v42 = vsub.f32 %v4040_v31, %v4080_v2 }
0x18dd   :  { %10201 = vpow2.f32 %v4112_v6  ;;  %v4110_v8 = vmul.f32 1.442695, %v4102_v42 }
0x18de   :  { %v4089_v23 = vpop.xlane.xlu0 %4088 }
0x18df   :  { %10203 = vpow2.f32 %v4110_v8  ;;  %v4105_v19 = vsub.f32 %v4055_v39, %v4089_v23 }
0x18e0   :  { %v4095_v31 = vpop.xlane.xlu1 %4094 }
0x18e1   :  { %v4116_v9 = vmul.f32 1.442695, %v4105_v19  ;;  %v4107_v22 = vsub.f32 %v4065_v24, %v4095_v31 }
0x18e2   :  { %v4086_v35 = vpop.xlane.xlu0 %4085 }
0x18e3   :  { %v4104_v20 = vsub.f32 %v4050_v10, %v4086_v35  ;;  %10205 = vpow2.f32 %v4116_v9  ;;  %v4120_v53 = vmul.f32 1.442695, %v4107_v22 }
0x18e4   :  { %v4101_v34 = vpop.xlane.xlu1 %4100 }
0x18e5   :  { %v4114_v16 = vmul.f32 1.442695, %v4104_v20  ;;  %v4109_v7 = vsub.f32 %v4075_v40, %v4101_v34 }
0x18e6   :  { %v4092_v12 = vpop.xlane.xlu0 %4091 }
0x18e7   :  { %v4106_v13 = vsub.f32 %v4060_v33, %v4092_v12  ;;  %10207 = vpow2.f32 %v4114_v16  ;;  %v4124_v2 = vmul.f32 1.442695, %v4109_v7 }
0x18e8   :  { %10209 = vpow2.f32 %v4120_v53  ;;  %v4344_v31 = vpop.permute.xlu1 %4343 }
0x18e9   :  { %v4118_v51 = vmul.f32 1.442695, %v4106_v13 }
0x18ea   :  { %v12210_v45 = vpop.eup %10201  ;;  %v4098_v55 = vpop.xlane.xlu0 %4097 }
0x18eb   :  { %v4129_v47 = vsel %vm581_vm2, %v12210_v45, 0.0  ;;  %v4108_v62 = vsub.f32 %v4070_v32, %v4098_v55  ;;  %10211 = vpow2.f32 %v4118_v51 }
0x18ec   :  { %v12214_v56 = vpop.eup %10203  ;;  %4130 = vadd.xlane.f32.xlu1 %v4129_v47  ;;  %10213 = vpow2.f32 %v4124_v2 }
0x18ed   :  { %v4126_v15 = vsel %vm581_vm2, %v12214_v56, 0.0  ;;  %v4122_v6 = vmul.f32 1.442695, %v4108_v62 }
0x18ee   :  { %4127 = vadd.xlane.f32.xlu0 %v4126_v15  ;;  %v4346_v19 = vpop.permute.xlu0 %4345 }
0x18ef   :  { %10215 = vpow2.f32 %v4122_v6 }
0x18f0   :  { %v12222_v39 = vpop.eup %10205 }
0x18f1   :  { %v4135_v24 = vsel %vm581_vm2, %v12222_v39, 0.0 }
0x18f4   :  { %v12224_v10 = vpop.eup %10207 }
0x18f5   :  { %v12228_v33 = vpop.eup %10209  ;;  %v4132_v40 = vsel %vm581_vm2, %v12224_v10, 0.0 }
0x18f6   :  { %v4141_v42 = vsel %vm581_vm2, %v12228_v33, 0.0 }
0x18f8   :  { %v12232_v32 = vpop.eup %10211 }
0x18f9   :  { %v12236_v8 = vpop.eup %10213  ;;  %v4138_v47 = vsel %vm581_vm2, %v12232_v32, 0.0 }
0x18fa   :  { %v4147_v23 = vsel %vm581_vm2, %v12236_v8, 0.0 }
0x18fc   :  { %v12240_v15 = vpop.eup %10215 }
0x18fd   :  { %4339 = vrot.lane.b32.xlu1 %v11784_v63, %s10470_s23  ;;  %v4144_v35 = vsel %vm581_vm2, %v12240_v15, 0.0 }
0x1904   :  { %4341 = vrot.lane.b32.xlu0 %v11766_v0, %s10470_s23 }
0x1921   :  { %4136 = vadd.xlane.f32.xlu1 %v4135_v24 }
0x1923   :  { %4133 = vadd.xlane.f32.xlu0 %v4132_v40 }
0x1925   :  { %4142 = vadd.xlane.f32.xlu1 %v4141_v42 }
0x1927   :  { %4139 = vadd.xlane.f32.xlu0 %v4138_v47 }
0x1929   :  { %4148 = vadd.xlane.f32.xlu1 %v4147_v23 }
0x192b   :  { %4145 = vadd.xlane.f32.xlu0 %v4144_v35 }
0x193a   :  { %4335 = vrot.lane.b32.xlu1 %v11756_v61, %s10470_s23 }
0x193e   :  { %4321 = vrot.lane.b32.xlu1 %v11774_v43, %s10471_s26 }
0x1941   :  { %4337 = vrot.lane.b32.xlu0 %v11774_v43, %s10470_s23 }
0x1942   :  { %4325 = vrot.lane.b32.xlu1 %v11766_v0, %s10471_s26 }
0x1945   :  { %4319 = vrot.lane.b32.xlu0 %v11756_v61, %s10471_s26 }
0x1946   :  { %4329 = vrot.lane.b32.xlu1 %v11770_v5, %s10471_s26 }
0x1949   :  { %4323 = vrot.lane.b32.xlu0 %v11784_v63, %s10471_s26 }
0x194a   :  { %4333 = vrot.lane.b32.xlu1 %v11760_v3, %s10471_s26 }
0x194d   :  { %4327 = vrot.lane.b32.xlu0 %v11778_v46, %s10471_s26 }
0x1951   :  { %4331 = vrot.lane.b32.xlu0 %v11762_v17, %s10471_s26 }
0x1975   :  { %v4131_v12 = vpop.xlane.xlu1 %4130 }
0x1976   :  { %10217 = vrcp.f32 %v4131_v12 }
0x1977   :  { %v4128_v20 = vpop.xlane.xlu0 %4127 }
0x1978   :  { %10219 = vrcp.f32 %v4128_v20 }
0x1983   :  { %v10218_v9 = vpop.eup %10217 }
0x1984   :  { %v4159_v16 = vmul.f32 %v10218_v9, %v12210_v45  ;;  %v4342_v45 = vpop.permute.xlu0 %4341 }
0x1985   :  { %v10220_v22 = vpop.eup %10219 }
0x1986   :  { %v4158_v34 = vmul.f32 %v10220_v22, %v12214_v56  ;;  %v4340_v56 = vpop.permute.xlu1 %4339 }
0x1988   :  { %9538 = vmatprep.mubr.msk.f32.mxu0 %vm581_vm2, %v4158_v34 }
0x1989   :  { %9539 = vmatmul.mubr.msk.f32.vlgmr.msra.gmra.mxu0 %vm581_vm2, %v4159_v16 }
0x198a   :  { %9551 = vmatpush3.xpose.msk.msra.mxu0 %vm443_vm1, %v12168_v57 }
0x198b   :  { %9552 = vmatprep.subr.msk.mxu0 %vm443_vm1, %v12208_v21 }
0x198e   :  { %9553 = vmatpush3.xpose.msk.msra.mxu0 %vm443_vm1, %v12208_v21 }
0x198f   :  { %9554 = vmatprep.subr.msk.mxu0 %vm443_vm1, %v4346_v19 }
0x1992   :  { %9555 = vmatpush3.xpose.msk.msra.mxu0 %vm443_vm1, %v4346_v19 }
0x1993   :  { %9556 = vmatprep.subr.msk.mxu0 %vm443_vm1, %v4344_v31 }
0x1996   :  { %9557 = vmatpush3.xpose.msk.msra.mxu0 %vm443_vm1, %v4344_v31 }
0x1997   :  { %9558 = vmatprep.subr.msk.mxu0 %vm443_vm1, %v4342_v45 }
0x199a   :  { %9559 = vmatpush3.xpose.msk.msra.mxu0 %vm443_vm1, %v4342_v45 }
0x199b   :  { %9560 = vmatprep.subr.msk.mxu0 %vm443_vm1, %v4340_v56 }
0x199e   :  { %9561 = vmatpush3.xpose.msk.msra.mxu0 %vm443_vm1, %v4340_v56 }
0x19aa   :  { %v4137_v57 = vpop.xlane.xlu1 %4136 }
0x19ab   :  { %10221 = vrcp.f32 %v4137_v57 }
0x19ac   :  { %v4134_v21 = vpop.xlane.xlu0 %4133 }
0x19ad   :  { %10223 = vrcp.f32 %v4134_v21 }
0x19ae   :  { %v4143_v13 = vpop.xlane.xlu1 %4142 }
0x19af   :  { %10225 = vrcp.f32 %v4143_v13 }
0x19b0   :  { %v4140_v55 = vpop.xlane.xlu0 %4139 }
0x19b1   :  { %10227 = vrcp.f32 %v4140_v55 }
0x19b2   :  { %v4149_v53 = vpop.xlane.xlu1 %4148 }
0x19b3   :  { %10229 = vrcp.f32 %v4149_v53 }
0x19b4   :  { %v4146_v7 = vpop.xlane.xlu0 %4145 }
0x19b5   :  { %10231 = vrcp.f32 %v4146_v7  ;;  %v10401_v7 = vld [vmem:[%s10501_s9 + $0x8] sm:$0xff] }
0x19b6   :  { %v4336_v6 = vpop.permute.xlu1 %4335 }
0x19b8   :  { %v4338_v51 = vpop.permute.xlu0 %4337  ;;  %v10222_v62 = vpop.eup %10221 }
0x19b9   :  { %9562 = vmatprep.subr.msk.mxu0 %vm443_vm1, %v4338_v51  ;;  %v4161_v40 = vmul.f32 %v10222_v62, %v12222_v39 }
0x19ba   :  { %v10224_v2 = vpop.eup %10223  ;;  %9563 = vmatpush3.xpose.msk.msra.mxu0 %vm443_vm1, %v4338_v51  ;;  %v4322_v39 = vpop.permute.xlu1 %4321 }
0x19bb   :  { %9564 = vmatprep.subr.msk.mxu0 %vm443_vm1, %v4336_v6  ;;  %v4160_v24 = vmul.f32 %v10224_v2, %v12224_v10  ;;  %v10402_v2 = vld [vmem:[%s10501_s9] sm:$0xff] }
0x19bc   :  { %v10226_v42 = vpop.eup %10225  ;;  %v4320_v35 = vpop.permute.xlu0 %4319 }
0x19bd   :  { %9541 = vmatprep.mubr.msk.f32.mxu0 %vm581_vm2, %v4160_v24  ;;  %v4163_v31 = vmul.f32 %v10226_v42, %v12228_v33  ;;  %v10403_v42 = vld [vmem:[%s10501_s9 + $0x18] sm:$0xff] }
0x19be   :  { %v10228_v47 = vpop.eup %10227  ;;  %9542 = vmatmul.mubr.msk.f32.gmra.mxu0 %vm581_vm2, %v4161_v40 }
0x19bf   :  { %9565 = vmatpush3.xpose.msk.msra.mxu0 %vm443_vm1, %v4336_v6  ;;  %v4162_v23 = vmul.f32 %v10228_v47, %v12232_v32  ;;  %v4326_v32 = vpop.permute.xlu1 %4325 }
0x19c0   :  { %v10230_v19 = vpop.eup %10229  ;;  %v4324_v9 = vpop.permute.xlu0 %4323 }
0x19c1   :  { %9544 = vmatprep.mubr.msk.f32.mxu0 %vm581_vm2, %v4162_v23  ;;  %v4165_v20 = vmul.f32 %v10230_v19, %v12236_v8  ;;  %v10404_v19 = vld [vmem:[%s10501_s9 + $0x10] sm:$0xff] }
0x19c2   :  { %v10232_v12 = vpop.eup %10231  ;;  %9545 = vmatmul.mubr.msk.f32.gmra.mxu0 %vm581_vm2, %v4163_v31 }
0x19c3   :  { %v4164_v10 = vmul.f32 %v10232_v12, %v12240_v15  ;;  %v4330_v22 = vpop.permute.xlu1 %4329 }
0x19c4   :  { %v4328_v33 = vpop.permute.xlu0 %4327 }
0x19c5   :  { %9547 = vmatprep.mubr.msk.f32.mxu0 %vm581_vm2, %v4164_v10 }
0x19c6   :  { %9548 = vmatmul.mubr.msk.f32.gmra.mxu0 %vm581_vm2, %v4165_v20 }
0x19c7   :  { %9566 = vmatprep.mubr.msk.f32.mxu0 %vm443_vm1, %v4320_v35  ;;  %v4334_v15 = vpop.permute.xlu1 %4333 }
0x19c8   :  { %v4332_v8 = vpop.permute.xlu0 %4331 }
0x19ca   :  { %9567 = vmatmul.mubr.msk.f32.vlgmr.msra.gmra.mxu0 %vm443_vm1, %v4322_v39  ;;  %v10405_v39 = vld [vmem:[%s10501_s9 + $0x28] sm:$0xff] }
0x19cb   :  { %9569 = vmatprep.mubr.msk.f32.mxu0 %vm443_vm1, %v4324_v9 }
0x19ce   :  { %9570 = vmatmul.mubr.msk.f32.gmra.mxu0 %vm443_vm1, %v4326_v32 }
0x19cf   :  { %9572 = vmatprep.mubr.msk.f32.mxu0 %vm443_vm1, %v4328_v33 }
0x19d2   :  { %9573 = vmatmul.mubr.msk.f32.gmra.mxu0 %vm443_vm1, %v4330_v22  ;;  %v10406_v22 = vld [vmem:[%s10501_s9 + $0x20] sm:$0xff] }
0x19d3   :  { %9575 = vmatprep.mubr.msk.f32.mxu0 %vm443_vm1, %v4332_v8 }
0x19d6   :  { %9576 = vmatmul.mubr.msk.f32.gmra.mxu0 %vm443_vm1, %v4334_v15  ;;  %v10407_v15 = vld [vmem:[%s10501_s9 + $0x38] sm:$0xff] }
0x1a49   :  { %v12308_v34 = vpop.f32.mrf.mxu0 }
0x1a4b   :  { %v12310_v16 = vpop.f32.mrf.mxu0 }
0x1a7e   :  { %v12312_v45 = vpop.f32.mrf.mxu0 }
0x1a80   :  { %v12314_v56 = vpop.f32.mrf.mxu0 }
0x1a82   :  { %v12316_v57 = vpop.f32.mrf.mxu0 }
0x1a84   :  { %v12318_v21 = vpop.f32.mrf.mxu0 }
0x1a86   :  { %v12320_v13 = vpop.f32.mrf.mxu0 }
0x1a88   :  { %v12322_v55 = vpop.f32.mrf.mxu0 }
0x1a8a   :  { %v9568_v53 = vpop.f32.mrf.mxu0 }
0x1a8b   :  { %v4455_v51 = vadd.f32 %v10401_v7, %v9568_v53 }
0x1a8c   :  { %v4449_v62 = vpop.f32.mrf.mxu0 }
0x1a8d   :  { %v4450_v6 = vadd.f32 %v10402_v2, %v4449_v62  ;;  %v4491_v24 = vsel %vm581_vm2, %v4455_v51, -inf }
0x1a8e   :  { %4492 = vmax.xlane.f32.xlu1 %v4491_v24  ;;  %v9571_v40 = vpop.f32.mrf.mxu0  ;;  %v10408_v24 = vld [vmem:[%s10501_s9 + $0x30] sm:$0xff]  ;;  %s13169_s9 = sld [smem:[#allocation8_spill]] }
0x1a8f   :  { %v4465_v47 = vadd.f32 %v10403_v42, %v9571_v40  ;;  %v4488_v23 = vsel %vm581_vm2, %v4450_v6, -inf }
0x1a90   :  { %4489 = vmax.xlane.f32.xlu0 %v4488_v23  ;;  %v4459_v35 = vpop.f32.mrf.mxu0 }
0x1a91   :  { %v4460_v12 = vadd.f32 %v10404_v19, %v4459_v35  ;;  %v4497_v20 = vsel %vm581_vm2, %v4465_v47, -inf }
0x1a92   :  { %v9574_v31 = vpop.f32.mrf.mxu0 }
0x1a93   :  { %v4475_v10 = vadd.f32 %v10405_v39, %v9574_v31  ;;  %v4494_v7 = vsel %vm581_vm2, %v4460_v12, -inf }
0x1a94   :  { %4498 = vmax.xlane.f32.xlu0 %v4497_v20  ;;  %v4469_v9 = vpop.f32.mrf.mxu0 }
0x1a95   :  { %v4503_v32 = vsel %vm581_vm2, %v4475_v10, -inf  ;;  %v4470_v8 = vadd.f32 %v10406_v22, %v4469_v9 }
0x1a96   :  { %4504 = vmax.xlane.f32.xlu1 %v4503_v32  ;;  %v9577_v33 = vpop.f32.mrf.mxu0 }
0x1a97   :  { %v4485_v53 = vadd.f32 %v10407_v15, %v9577_v33  ;;  %v4500_v42 = vsel %vm581_vm2, %v4470_v8, -inf }
0x1a98   :  { %4495 = vmax.xlane.f32.xlu0 %v4494_v7  ;;  %v4479_v62 = vpop.f32.mrf.mxu0 }
0x1a99   :  { %v4509_v2 = vsel %vm581_vm2, %v4485_v53, -inf  ;;  %v4480_v40 = vadd.f32 %v10408_v24, %v4479_v62 }
0x1a9a   :  { %4510 = vmax.xlane.f32.xlu1 %v4509_v2 }
0x1a9b   :  { %v4506_v23 = vsel %vm581_vm2, %v4480_v40, -inf }
0x1a9c   :  { %4501 = vmax.xlane.f32.xlu0 %v4500_v42 }
0x1aa0   :  { %4507 = vmax.xlane.f32.xlu0 %v4506_v23 }
0x1aab   :  { %4588 = vrot.lane.b32.xlu1 %v11762_v17, %s10472_s28 }
0x1aaf   :  { %4586 = vrot.lane.b32.xlu1 %v11770_v5, %s10472_s28 }
0x1ab3   :  { %4584 = vrot.lane.b32.xlu1 %v11778_v46, %s10472_s28 }
0x1ab6   :  { %4590 = vrot.lane.b32.xlu0 %v11760_v3, %s10472_s28 }
0x1ab7   :  { %4580 = vrot.lane.b32.xlu1 %v11784_v63, %s10472_s28 }
0x1aba   :  { %4582 = vrot.lane.b32.xlu0 %v11766_v0, %s10472_s28 }
0x1b17   :  { %v4493_v35 = vpop.xlane.xlu1 %4492 }
0x1b18   :  { %v4513_v31 = vsub.f32 %v4455_v51, %v4493_v35 }
0x1b19   :  { %v4490_v19 = vpop.xlane.xlu0 %4489 }
0x1b1a   :  { %v4522_v39 = vmul.f32 1.442695, %v4513_v31  ;;  %v4512_v17 = vsub.f32 %v4450_v6, %v4490_v19 }
0x1b1c   :  { %10233 = vpow2.f32 %v4522_v39  ;;  %v4520_v20 = vmul.f32 1.442695, %v4512_v17 }
0x1b1d   :  { %v4499_v5 = vpop.xlane.xlu0 %4498 }
0x1b1e   :  { %10235 = vpow2.f32 %v4520_v20  ;;  %v4515_v9 = vsub.f32 %v4465_v47, %v4499_v5 }
0x1b1f   :  { %v4505_v46 = vpop.xlane.xlu1 %4504 }
0x1b20   :  { %v4526_v32 = vmul.f32 1.442695, %v4515_v9  ;;  %v4517_v33 = vsub.f32 %v4475_v10, %v4505_v46 }
0x1b21   :  { %v4496_v3 = vpop.xlane.xlu0 %4495 }
0x1b22   :  { %10237 = vpow2.f32 %v4526_v32  ;;  %v4530_v22 = vmul.f32 1.442695, %v4517_v33  ;;  %v4514_v63 = vsub.f32 %v4460_v12, %v4496_v3 }
0x1b23   :  { %v4511_v15 = vpop.xlane.xlu1 %4510 }
0x1b24   :  { %10239 = vpow2.f32 %v4530_v22  ;;  %v4524_v0 = vmul.f32 1.442695, %v4514_v63  ;;  %v4519_v7 = vsub.f32 %v4485_v53, %v4511_v15 }
0x1b25   :  { %v4502_v51 = vpop.xlane.xlu0 %4501 }
0x1b26   :  { %10241 = vpow2.f32 %v4524_v0  ;;  %v4534_v62 = vmul.f32 1.442695, %v4519_v7  ;;  %v4516_v6 = vsub.f32 %v4470_v8, %v4502_v51 }
0x1b27   :  { %v4589_v2 = vpop.permute.xlu1 %4588 }
0x1b28   :  { %v4528_v24 = vmul.f32 1.442695, %v4516_v6  ;;  %10243 = vpow2.f32 %v4534_v62 }
0x1b29   :  { %v12352_v42 = vpop.eup %10233  ;;  %v4508_v47 = vpop.xlane.xlu0 %4507 }
0x1b2a   :  { %10245 = vpow2.f32 %v4528_v24  ;;  %v4518_v10 = vsub.f32 %v4480_v40, %v4508_v47  ;;  %v4539_v23 = vsel %vm581_vm2, %v12352_v42, 0.0 }
0x1b2b   :  { %v12356_v12 = vpop.eup %10235  ;;  %4540 = vadd.xlane.f32.xlu1 %v4539_v23  ;;  %v4587_v53 = vpop.permute.xlu1 %4586  ;;  %v8518_v23 = vld [vmem:[%s10526_s29 + $0x30] sm:$0xff] }
0x1b2c   :  { %v4532_v35 = vmul.f32 1.442695, %v4518_v10  ;;  %v4536_v31 = vsel %vm581_vm2, %v12356_v12, 0.0  ;;  %v8519_v10 = vld [vmem:[%s10526_s29 + $0x38] sm:$0xff] }
0x1b2d   :  { %4537 = vadd.xlane.f32.xlu0 %v4536_v31  ;;  %v4591_v8 = vpop.permute.xlu0 %4590 }
0x1b2e   :  { %10247 = vpow2.f32 %v4532_v35  ;;  %9578 = vmatprep.subr.mxu1 %v4591_v8  ;;  %v8516_v35 = vld [vmem:[%s10526_s29 + $0x20] sm:$0xff] }
0x1b2f   :  { %v12360_v19 = vpop.eup %10237  ;;  %9579 = vmatpush3.msra.mxu1 %v4591_v8  ;;  %v4585_v17 = vpop.permute.xlu1 %4584 }
0x1b30   :  { %9580 = vmatprep.subr.mxu1 %v4589_v2  ;;  %v4545_v40 = vsel %vm581_vm2, %v12360_v19, 0.0 }
0x1b31   :  { %v12364_v39 = vpop.eup %10239  ;;  %4546 = vadd.xlane.f32.xlu1 %v4545_v40  ;;  %9581 = vmatpush3.msra.mxu1 %v4589_v2  ;;  %v4583_v32 = vpop.permute.xlu0 %4582 }
0x1b32   :  { %9582 = vmatprep.subr.mxu1 %v4587_v53  ;;  %v4551_v9 = vsel %vm581_vm2, %v12364_v39, 0.0 }
0x1b33   :  { %v12366_v20 = vpop.eup %10241  ;;  %9583 = vmatpush3.msra.mxu1 %v4587_v53  ;;  %v4581_v3 = vpop.permute.xlu1 %4580 }
0x1b34   :  { %9584 = vmatprep.subr.mxu1 %v4585_v17  ;;  %v4542_v5 = vsel %vm581_vm2, %v12366_v20, 0.0 }
0x1b35   :  { %4543 = vadd.xlane.f32.xlu0 %v4542_v5  ;;  %4552 = vadd.xlane.f32.xlu1 %v4551_v9  ;;  %v12372_v46 = vpop.eup %10243 }
0x1b36   :  { %9585 = vmatpush3.msra.mxu1 %v4585_v17  ;;  %v4557_v63 = vsel %vm581_vm2, %v12372_v46, 0.0 }
0x1b37   :  { %v12374_v33 = vpop.eup %10245  ;;  %9586 = vmatprep.subr.mxu1 %v4583_v32 }
0x1b38   :  { %9587 = vmatpush3.msra.mxu1 %v4583_v32  ;;  %v4548_v22 = vsel %vm581_vm2, %v12374_v33, 0.0 }
0x1b39   :  { %9588 = vmatprep.subr.mxu1 %v4581_v3  ;;  %4549 = vadd.xlane.f32.xlu0 %v4548_v22 }
0x1b3a   :  { %4558 = vadd.xlane.f32.xlu1 %v4557_v63  ;;  %9589 = vmatpush3.msra.mxu1 %v4581_v3 }
0x1b3b   :  { %v10248_v15 = vpop.eup %10247 }
0x1b3c   :  { %v4554_v0 = vsel %vm581_vm2, %v10248_v15, 0.0 }
0x1b3d   :  { %4555 = vadd.xlane.f32.xlu0 %v4554_v0 }
0x1b4b   :  { %4576 = vrot.lane.b32.xlu1 %v11756_v61, %s10472_s28 }
0x1b4f   :  { %4739 = vrot.lane.b32.xlu1 %v12172_v50, %s10473_s1 }
0x1b53   :  { %4771 = vrot.lane.b32.xlu1 %v12308_v34, %s10474_s2  ;;  %4578 = vrot.lane.b32.xlu0 %v11774_v43, %s10472_s28 }
0x1b57   :  { %4743 = vrot.lane.b32.xlu1 %v12176_v49, %s10473_s1  ;;  %4737 = vrot.lane.b32.xlu0 %v12174_v36, %s10473_s1 }
0x1b5b   :  { %4775 = vrot.lane.b32.xlu1 %v12312_v45, %s10474_s2  ;;  %4769 = vrot.lane.b32.xlu0 %v12310_v16, %s10474_s2 }
0x1b5f   :  { %4747 = vrot.lane.b32.xlu1 %v12180_v58, %s10473_s1  ;;  %4741 = vrot.lane.b32.xlu0 %v12178_v44, %s10473_s1 }
0x1b63   :  { %4779 = vrot.lane.b32.xlu1 %v12316_v57, %s10474_s2  ;;  %4773 = vrot.lane.b32.xlu0 %v12314_v56, %s10474_s2 }
0x1b67   :  { %4751 = vrot.lane.b32.xlu1 %v12184_v18, %s10473_s1  ;;  %4745 = vrot.lane.b32.xlu0 %v12182_v28, %s10473_s1 }
0x1b6b   :  { %4783 = vrot.lane.b32.xlu1 %v12320_v13, %s10474_s2  ;;  %4777 = vrot.lane.b32.xlu0 %v12318_v21, %s10474_s2 }
0x1b6f   :  { %4749 = vrot.lane.b32.xlu0 %v12186_v25, %s10473_s1 }
0x1b73   :  { %4781 = vrot.lane.b32.xlu0 %v12322_v55, %s10474_s2 }
0x1bb4   :  { %v4541_v61 = vpop.xlane.xlu1 %4540 }
0x1bb6   :  { %v4538_v43 = vpop.xlane.xlu0 %4537 }
0x1bb7   :  { %10249 = vrcp.f32 %v4538_v43 }
0x1bb8   :  { %10251 = vrcp.f32 %v4541_v61 }
0x1bba   :  { %v4547_v50 = vpop.xlane.xlu1 %4546 }
0x1bbe   :  { %v4544_v36 = vpop.xlane.xlu0 %4543  ;;  %v4553_v49 = vpop.xlane.xlu1 %4552 }
0x1bbf   :  { %10253 = vrcp.f32 %v4544_v36 }
0x1bc0   :  { %10255 = vrcp.f32 %v4547_v50 }
0x1bc2   :  { %v4550_v44 = vpop.xlane.xlu0 %4549 }
0x1bc3   :  { %10257 = vrcp.f32 %v4550_v44  ;;  %v4559_v18 = vpop.xlane.xlu1 %4558 }
0x1bc4   :  { %v10250_v58 = vpop.eup %10249  ;;  %10259 = vrcp.f32 %v4553_v49 }
0x1bc5   :  { %v4568_v28 = vmul.f32 %v10250_v58, %v12356_v12  ;;  %v10252_v34 = vpop.eup %10251  ;;  %v8517_v12 = vld [vmem:[%s10526_s29 + $0x28] sm:$0xff]  ;;  %s13171_s29 = sld [smem:[#allocation9_spill]] }
0x1bc6   :  { %v4556_v25 = vpop.xlane.xlu0 %4555  ;;  %v4569_v57 = vmul.f32 %v10252_v34, %v12352_v42 }
0x1bc7   :  { %10261 = vrcp.f32 %v4556_v25  ;;  %9594 = vmatprep.mubr.msk.f32.mxu1 %vm581_vm2, %v4568_v28  ;;  %v4577_v56 = vpop.permute.xlu1 %4576 }
0x1bc8   :  { %10263 = vrcp.f32 %v4559_v18 }
0x1bca   :  { %v4579_v16 = vpop.permute.xlu0 %4578 }
0x1bcb   :  { %9590 = vmatprep.subr.mxu1 %v4579_v16  ;;  %v4740_v5 = vpop.permute.xlu1 %4739 }
0x1bcc   :  { %v10254_v45 = vpop.eup %10253  ;;  %9591 = vmatpush3.msra.mxu1 %v4579_v16  ;;  %v4826_v18 = vsel %vm443_vm1, %v12012_v26, %v4740_v5 }
0x1bcd   :  { %9592 = vmatprep.subr.mxu1 %v4577_v56  ;;  %v4570_v21 = vmul.f32 %v10254_v45, %v12366_v20  ;;  %v10256_v13 = vpop.eup %10255 }
0x1bce   :  { %9593 = vmatpush3.msra.mxu1 %v4577_v56  ;;  %v4571_v7 = vmul.f32 %v10256_v13, %v12360_v19  ;;  %v4738_v9 = vpop.permute.xlu0 %4737 }
0x1bcf   :  { %9595 = vmatmul.mubr.msk.f32.vlgmr.msra.gmra.mxu1 %vm581_vm2, %v4569_v57  ;;  %9606 = vmatprep.subr.mxu1 %v8519_v10  ;;  %v4825_v28 = vsel %vm443_vm1, %v12014_v4, %v4738_v9 }
0x1bd0   :  { %v10258_v55 = vpop.eup %10257  ;;  %9597 = vmatprep.mubr.msk.f32.mxu1 %vm581_vm2, %v4570_v21  ;;  %9607 = vmatpush3.msra.mxu1 %v8519_v10 }
0x1bd1   :  { %v4572_v51 = vmul.f32 %v10258_v55, %v12374_v33  ;;  %v10260_v62 = vpop.eup %10259  ;;  %9608 = vmatprep.subr.mxu1 %v8518_v23 }
0x1bd2   :  { %v4573_v2 = vmul.f32 %v10260_v62, %v12364_v39  ;;  %9609 = vmatpush3.msra.mxu1 %v8518_v23  ;;  %v4770_v32 = vpop.permute.xlu0 %4769 }
0x1bd3   :  { %9598 = vmatmul.mubr.msk.f32.gmra.mxu1 %vm581_vm2, %v4571_v7  ;;  %9610 = vmatprep.subr.mxu1 %v8517_v12  ;;  %v4833_v25 = vsel %vm2157_vm3, %v4825_v28, %v4770_v32 }
0x1bd4   :  { %v10262_v6 = vpop.eup %10261  ;;  %9600 = vmatprep.mubr.msk.f32.mxu1 %vm581_vm2, %v4572_v51  ;;  %9611 = vmatpush3.msra.mxu1 %v8517_v12 }
0x1bd5   :  { %v4574_v24 = vmul.f32 %v10262_v6, %v10248_v15  ;;  %v10264_v42 = vpop.eup %10263  ;;  %9612 = vmatprep.subr.mxu1 %v8516_v35 }
0x1bd6   :  { %v4575_v47 = vmul.f32 %v10264_v42, %v12372_v46  ;;  %9613 = vmatpush3.msra.mxu1 %v8516_v35  ;;  %v4772_v46 = vpop.permute.xlu1 %4771  ;;  %v4742_v3 = vpop.permute.xlu0 %4741 }
0x1bd7   :  { %9601 = vmatmul.mubr.msk.f32.gmra.mxu1 %vm581_vm2, %v4573_v2  ;;  %v4834_v16 = vsel %vm2157_vm3, %v4826_v18, %v4772_v46  ;;  %v4827_v21 = vsel %vm443_vm1, %v12018_v41, %v4742_v3 }
0x1bd8   :  { %9603 = vmatprep.mubr.msk.f32.mxu1 %vm581_vm2, %v4574_v24 }
0x1bda   :  { %v4744_v33 = vpop.permute.xlu1 %4743  ;;  %v4774_v63 = vpop.permute.xlu0 %4773 }
0x1bdb   :  { %9604 = vmatmul.mubr.msk.f32.gmra.mxu1 %vm581_vm2, %v4575_v47  ;;  %v4828_v26 = vsel %vm443_vm1, %v12016_v11, %v4744_v33  ;;  %v4835_v4 = vsel %vm2157_vm3, %v4827_v21, %v4774_v63 }
0x1bde   :  { %v4776_v22 = vpop.permute.xlu1 %4775  ;;  %v4746_v0 = vpop.permute.xlu0 %4745 }
0x1bdf   :  { %v4836_v55 = vsel %vm2157_vm3, %v4828_v26, %v4776_v22  ;;  %v4829_v41 = vsel %vm443_vm1, %v12022_v14, %v4746_v0 }
0x1be2   :  { %v4748_v15 = vpop.permute.xlu1 %4747  ;;  %v4778_v43 = vpop.permute.xlu0 %4777 }
0x1be3   :  { %v4830_v11 = vsel %vm443_vm1, %v12020_v30, %v4748_v15  ;;  %v4837_v6 = vsel %vm2157_vm3, %v4829_v41, %v4778_v43 }
0x1be6   :  { %v4780_v61 = vpop.permute.xlu1 %4779  ;;  %v4750_v36 = vpop.permute.xlu0 %4749 }
0x1be7   :  { %v4838_v24 = vsel %vm2157_vm3, %v4830_v11, %v4780_v61  ;;  %v4831_v14 = vsel %vm443_vm1, %v12026_v52, %v4750_v36  ;;  %v8521_v52 = vld [vmem:[%s10531_s3 + $0x1] ss:$0 sm:$0xff]  ;;  %s13172_s3 = sld [smem:[#allocation7_spill]] }
0x1bea   :  { %v4752_v50 = vpop.permute.xlu1 %4751  ;;  %v4782_v44 = vpop.permute.xlu0 %4781 }
0x1beb   :  { %v4832_v30 = vsel %vm443_vm1, %v12024_v1, %v4752_v50  ;;  %v4839_v23 = vsel %vm2157_vm3, %v4831_v14, %v4782_v44 }
0x1bee   :  { %v4784_v49 = vpop.permute.xlu1 %4783 }
0x1bef   :  { %v4840_v35 = vsel %vm2157_vm3, %v4832_v30, %v4784_v49 }
0x1c8f   :  { %v9596_v53 = vpop.f32.mrf.mxu1 }
0x1c90   :  { %4803 = vrot.lane.b32.xlu1 %v9596_v53, %s10475_s7 }
0x1c91   :  { %v4690_v31 = vpop.f32.mrf.mxu1 }
0x1c92   :  { %4801 = vrot.lane.b32.xlu0 %v4690_v31, %s10475_s7 }
0x1c93   :  { %v9599_v8 = vpop.f32.mrf.mxu1 }
0x1c94   :  { %4807 = vrot.lane.b32.xlu1 %v9599_v8, %s10475_s7 }
0x1c95   :  { %v4700_v19 = vpop.f32.mrf.mxu1 }
0x1c96   :  { %4805 = vrot.lane.b32.xlu0 %v4700_v19, %s10475_s7 }
0x1c97   :  { %v9602_v40 = vpop.f32.mrf.mxu1 }
0x1c98   :  { %4811 = vrot.lane.b32.xlu1 %v9602_v40, %s10475_s7 }
0x1c99   :  { %v4710_v39 = vpop.f32.mrf.mxu1 }
0x1c9a   :  { %4809 = vrot.lane.b32.xlu0 %v4710_v39, %s10475_s7 }
0x1c9b   :  { %v9605_v17 = vpop.f32.mrf.mxu1 }
0x1c9c   :  { %4815 = vrot.lane.b32.xlu1 %v9605_v17, %s10475_s7 }
0x1c9d   :  { %v4720_v20 = vpop.f32.mrf.mxu1 }
0x1c9e   :  { %4813 = vrot.lane.b32.xlu0 %v4720_v20, %s10475_s7 }
0x1d02   :  { %v4804_v58 = vpop.permute.xlu1 %4803 }
0x1d03   :  { %v4842_v56 = vsel %vm2166_vm4, %v4834_v16, %v4804_v58 }
0x1d04   :  { %v4802_v34 = vpop.permute.xlu0 %4801 }
0x1d05   :  { %v4841_v45 = vsel %vm2166_vm4, %v4833_v25, %v4802_v34 }
0x1d06   :  { %9614 = vmatprep.mubr.msk.f32.mxu1 %vm137_vm0, %v4841_v45  ;;  %v4808_v57 = vpop.permute.xlu1 %4807 }
0x1d07   :  { %9615 = vmatmul.mubr.msk.f32.vlgmr.msra.gmra.mxu1 %vm137_vm0, %v4842_v56  ;;  %v4844_v51 = vsel %vm2166_vm4, %v4836_v55, %v4808_v57 }
0x1d08   :  { %v4806_v13 = vpop.permute.xlu0 %4805 }
0x1d09   :  { %v4843_v7 = vsel %vm2166_vm4, %v4835_v4, %v4806_v13 }
0x1d0a   :  { %9617 = vmatprep.mubr.msk.f32.mxu1 %vm137_vm0, %v4843_v7  ;;  %v4812_v62 = vpop.permute.xlu1 %4811 }
0x1d0b   :  { %9618 = vmatmul.mubr.msk.f32.gmra.mxu1 %vm137_vm0, %v4844_v51  ;;  %v4846_v47 = vsel %vm2166_vm4, %v4838_v24, %v4812_v62 }
0x1d0c   :  { %v4810_v2 = vpop.permute.xlu0 %4809 }
0x1d0d   :  { %v4845_v42 = vsel %vm2166_vm4, %v4837_v6, %v4810_v2 }
0x1d0e   :  { %9620 = vmatprep.mubr.msk.f32.mxu1 %vm137_vm0, %v4845_v42  ;;  %v4816_v10 = vpop.permute.xlu1 %4815 }
0x1d0f   :  { %9621 = vmatmul.mubr.msk.f32.gmra.mxu1 %vm137_vm0, %v4846_v47  ;;  %v4848_v31 = vsel %vm2166_vm4, %v4840_v35, %v4816_v10 }
0x1d10   :  { %v4814_v12 = vpop.permute.xlu0 %4813 }
0x1d11   :  { %v4847_v53 = vsel %vm2166_vm4, %v4839_v23, %v4814_v12 }
0x1d12   :  { %9623 = vmatprep.mubr.msk.f32.mxu1 %vm137_vm0, %v4847_v53 }
0x1d13   :  { %9624 = vmatmul.mubr.msk.f32.gmra.mxu1 %vm137_vm0, %v4848_v31 }
0x1dc7   :  { %v9616_v8 = vpop.f32.mrf.mxu1 }
0x1dc8   :  { %v4958_v19 = vadd.f32 %v9616_v8, %v8521_v52 }
0x1dc9   :  { %v4952_v40 = vpop.f32.mrf.mxu1 }
0x1dca   :  { %v4992_v39 = vadd.f32 %v4958_v19, %v11719_v54  ;;  %v4953_v1 = vadd.f32 %v8521_v52, %v4952_v40 }
0x1dcb   :  { %v9619_v17 = vpop.f32.mrf.mxu1 }
0x1dcc   :  { %v4991_v20 = vadd.f32 %v4953_v1, %v11717_v48  ;;  %v4968_v5 = vadd.f32 %v9619_v17, %v8521_v52  ;;  %v5006_v9 = vsel %vm137_vm0, %v4992_v39, 0.0 }
0x1dcd   :  { %5007 = vadd.xlane.f32.xlu1 %v5006_v9  ;;  %v4962_v46 = vpop.f32.mrf.mxu1  ;;  %v8537_v9 = vld [vmem:[%s10546_s19 + $0x38] sm:$0xff] }
0x1dce   :  { %v4994_v32 = vadd.f32 %v4968_v5, %v11731_v38  ;;  %v4963_v33 = vadd.f32 %v8521_v52, %v4962_v46  ;;  %v5003_v3 = vsel %vm137_vm0, %v4991_v20, 0.0  ;;  %9626 = vmatprep.subr.mxu0 %v8537_v9  ;;  %v8536_v46 = vld [vmem:[%s10546_s19 + $0x30] sm:$0xff] }
0x1dcf   :  { %5004 = vadd.xlane.f32.xlu0 %v5003_v3  ;;  %v9622_v22 = vpop.f32.mrf.mxu1  ;;  %9627 = vmatpush3.msra.mxu0 %v8537_v9  ;;  %v8553_v9 = vld [vmem:[%s10556_s30 + $0x68] sm:$0xff] }
0x1dd0   :  { %v4978_v63 = vadd.f32 %v9622_v22, %v8521_v52  ;;  %v4993_v54 = vadd.f32 %v4963_v33, %v11728_v59  ;;  %v5012_v48 = vsel %vm137_vm0, %v4994_v32, 0.0  ;;  %9628 = vmatprep.subr.mxu0 %v8536_v46  ;;  %v8534_v33 = vld [vmem:[%s10546_s19 + $0x20] sm:$0xff] }
0x1dd1   :  { %v4972_v15 = vpop.f32.mrf.mxu1  ;;  %9629 = vmatpush3.msra.mxu0 %v8536_v46  ;;  %v8552_v46 = vld [vmem:[%s10556_s30 + $0x60] sm:$0xff] }
0x1dd2   :  { %v4996_v0 = vadd.f32 %v4978_v63, %v11740_v37  ;;  %v4973_v61 = vadd.f32 %v8521_v52, %v4972_v15  ;;  %v5009_v28 = vsel %vm137_vm0, %v4993_v54, 0.0 }
0x1dd3   :  { %5013 = vadd.xlane.f32.xlu0 %v5012_v48  ;;  %v9625_v43 = vpop.f32.mrf.mxu1 }
0x1dd4   :  { %v4988_v50 = vadd.f32 %v9625_v43, %v8521_v52  ;;  %v5018_v36 = vsel %vm137_vm0, %v4996_v0, 0.0  ;;  %v4995_v49 = vadd.f32 %v4973_v61, %v11738_v29 }
0x1dd5   :  { %5019 = vadd.xlane.f32.xlu1 %v5018_v36  ;;  %v4982_v38 = vpop.f32.mrf.mxu1 }
0x1dd6   :  { %v4998_v44 = vadd.f32 %v4988_v50, %v11749_v27  ;;  %v4983_v58 = vadd.f32 %v8521_v52, %v4982_v38  ;;  %v5015_v18 = vsel %vm137_vm0, %v4995_v49, 0.0 }
0x1dd7   :  { %5010 = vadd.xlane.f32.xlu0 %v5009_v28 }
0x1dd8   :  { %v5024_v59 = vsel %vm137_vm0, %v4998_v44, 0.0  ;;  %v4997_v37 = vadd.f32 %v4983_v58, %v11747_v60 }
0x1dd9   :  { %5025 = vadd.xlane.f32.xlu1 %v5024_v59 }
0x1dda   :  { %v5021_v25 = vsel %vm137_vm0, %v4997_v37, 0.0 }
0x1ddb   :  { %5016 = vadd.xlane.f32.xlu0 %v5015_v18 }
0x1ddf   :  { %5022 = vadd.xlane.f32.xlu0 %v5021_v25 }
0x1e56   :  { %v5008_v34 = vpop.xlane.xlu1 %5007 }
0x1e57   :  { %v5028_v16 = vmul.f32 0.03125, %v5008_v34 }
0x1e58   :  { %v5005_v29 = vpop.xlane.xlu0 %5004 }
0x1e59   :  { %v12501_v45 = vsub.f32 %v4992_v39, %v5028_v16  ;;  %v5027_v27 = vmul.f32 0.03125, %v5005_v29 }
0x1e5b   :  { %v12503_v56 = vsub.f32 %v4991_v20, %v5027_v27  ;;  %v5044_v57 = vmul.f32 %v12501_v45, %v12501_v45  ;;  %v8532_v27 = vld [vmem:[%s10536_s8 + $0x1] ss:$0 sm:$0xff]  ;;  %s10486_s8 = smov 32  }
0x1e5c   :  { %v5014_v21 = vpop.xlane.xlu0 %5013 }
0x1e5d   :  { %v5030_v26 = vmul.f32 0.03125, %v5014_v21  ;;  %v5054_v60 = vsel %vm137_vm0, %v5044_v57, 0.0  ;;  %v5043_v4 = vmul.f32 %v12503_v56, %v12503_v56 }
0x1e5e   :  { %5055 = vadd.xlane.f32.xlu1 %v5054_v60  ;;  %v5020_v13 = vpop.xlane.xlu1 %5019 }
0x1e5f   :  { %v12510_v55 = vsub.f32 %v4994_v32, %v5030_v26  ;;  %v5032_v7 = vmul.f32 0.03125, %v5020_v13  ;;  %v5051_v51 = vsel %vm137_vm0, %v5043_v4, 0.0  ;;  %v8535_v32 = vld [vmem:[%s10546_s19 + $0x28] sm:$0xff]  ;;  %s13174_s19 = sld [smem:[#allocation14_spill]] }
0x1e60   :  { %v5011_v62 = vpop.xlane.xlu0 %5010  ;;  %5052 = vadd.xlane.f32.xlu0 %v5051_v51  ;;  %9630 = vmatprep.subr.mxu0 %v8535_v32 }
0x1e61   :  { %v12513_v41 = vsub.f32 %v4996_v0, %v5032_v7  ;;  %v5029_v11 = vmul.f32 0.03125, %v5011_v62  ;;  %v5046_v6 = vmul.f32 %v12510_v55, %v12510_v55  ;;  %9631 = vmatpush3.msra.mxu0 %v8535_v32  ;;  %v8533_v7 = vld [vmem:[%s10541_s14 + $0x1] ss:$0 sm:$0xff]  ;;  %v8551_v32 = vld [vmem:[%s10556_s30 + $0x58] sm:$0xff]  ;;  %s13173_s14 = sld [smem:[#allocation12_spill]] }
0x1e62   :  { %v5026_v2 = vpop.xlane.xlu1 %5025  ;;  %9632 = vmatprep.subr.mxu0 %v8534_v33 }
0x1e63   :  { %v12517_v24 = vsub.f32 %v4993_v54, %v5029_v11  ;;  %v5034_v42 = vmul.f32 0.03125, %v5026_v2  ;;  %v5060_v47 = vsel %vm137_vm0, %v5046_v6, 0.0  ;;  %v5048_v14 = vmul.f32 %v12513_v41, %v12513_v41  ;;  %9633 = vmatpush3.msra.mxu0 %v8534_v33  ;;  %v8550_v33 = vld [vmem:[%s10556_s30 + $0x50] sm:$0xff] }
0x1e64   :  { %v5017_v10 = vpop.xlane.xlu0 %5016  ;;  %5061 = vadd.xlane.f32.xlu1 %v5060_v47 }
0x1e65   :  { %v12522_v30 = vsub.f32 %v4998_v44, %v5034_v42  ;;  %v5031_v23 = vmul.f32 0.03125, %v5017_v10  ;;  %v5045_v12 = vmul.f32 %v12517_v24, %v12517_v24  ;;  %v5066_v31 = vsel %vm137_vm0, %v5048_v14, 0.0 }
0x1e67   :  { %v12526_v35 = vsub.f32 %v4995_v49, %v5031_v23  ;;  %v5057_v53 = vsel %vm137_vm0, %v5045_v12, 0.0  ;;  %v5050_v52 = vmul.f32 %v12522_v30, %v12522_v30 }
0x1e68   :  { %5058 = vadd.xlane.f32.xlu0 %v5057_v53  ;;  %v5023_v8 = vpop.xlane.xlu0 %5022  ;;  %5067 = vadd.xlane.f32.xlu1 %v5066_v31 }
0x1e69   :  { %v5033_v19 = vmul.f32 0.03125, %v5023_v8  ;;  %v5047_v40 = vmul.f32 %v12526_v35, %v12526_v35  ;;  %v5072_v17 = vsel %vm137_vm0, %v5050_v52, 0.0 }
0x1e6b   :  { %v12534_v39 = vsub.f32 %v4997_v37, %v5033_v19  ;;  %v5063_v1 = vsel %vm137_vm0, %v5047_v40, 0.0 }
0x1e6c   :  { %5064 = vadd.xlane.f32.xlu0 %v5063_v1  ;;  %5073 = vadd.xlane.f32.xlu1 %v5072_v17 }
0x1e6d   :  { %v5049_v20 = vmul.f32 %v12534_v39, %v12534_v39 }
0x1e6f   :  { %v5069_v5 = vsel %vm137_vm0, %v5049_v20, 0.0 }
0x1e70   :  { %5070 = vadd.xlane.f32.xlu0 %v5069_v5  ;;  %v8554_v5 = vld [vmem:[%s10556_s30 + $0x70] sm:$0xff] }
0x1ee7   :  { %v5056_v3 = vpop.xlane.xlu1 %5055 }
0x1ee8   :  { %v5076_v22 = vmul.f32 0.03125, %v5056_v3  ;;  %v8549_v3 = vld [vmem:[%s10556_s30 + $0x48] sm:$0xff] }
0x1ee9   :  { %v5053_v63 = vpop.xlane.xlu0 %5052 }
0x1eea   :  { %v5084_v15 = vadd.f32 1e-12, %v5076_v22  ;;  %v5075_v54 = vmul.f32 0.03125, %v5053_v63  ;;  %v8548_v22 = vld [vmem:[%s10556_s30 + $0x40] sm:$0xff] }
0x1eeb   :  { %v8539_v63 = vld [vmem:[%s10551_s24 + $0x1] ss:$0 sm:$0xff]  ;;  %s13175_s24 = sld [smem:[#allocation11_spill]] }
0x1eec   :  { %10265 = vrsqrt.f32 %v5084_v15  ;;  %v5083_v0 = vadd.f32 1e-12, %v5075_v54 }
0x1eed   :  { %v5062_v61 = vpop.xlane.xlu1 %5061 }
0x1eee   :  { %10267 = vrsqrt.f32 %v5083_v0  ;;  %v5078_v48 = vmul.f32 0.03125, %v5062_v61 }
0x1ef0   :  { %v5086_v43 = vadd.f32 1e-12, %v5078_v48 }
0x1ef1   :  { %v5059_v50 = vpop.xlane.xlu0 %5058  ;;  %v5068_v36 = vpop.xlane.xlu1 %5067 }
0x1ef2   :  { %10269 = vrsqrt.f32 %v5086_v43  ;;  %v5077_v38 = vmul.f32 0.03125, %v5059_v50  ;;  %v5080_v49 = vmul.f32 0.03125, %v5068_v36 }
0x1ef4   :  { %v5085_v44 = vadd.f32 1e-12, %v5077_v38  ;;  %v5088_v58 = vadd.f32 1e-12, %v5080_v49 }
0x1ef5   :  { %v5065_v28 = vpop.xlane.xlu0 %5064  ;;  %v5074_v59 = vpop.xlane.xlu1 %5073 }
0x1ef6   :  { %10271 = vrsqrt.f32 %v5085_v44  ;;  %v5079_v37 = vmul.f32 0.03125, %v5065_v28  ;;  %v5082_v18 = vmul.f32 0.03125, %v5074_v59 }
0x1ef7   :  { %10273 = vrsqrt.f32 %v5088_v58 }
0x1ef8   :  { %v5087_v25 = vadd.f32 1e-12, %v5079_v37  ;;  %v5090_v34 = vadd.f32 1e-12, %v5082_v18 }
0x1ef9   :  { %v10266_v16 = vpop.eup %10265  ;;  %v5071_v29 = vpop.xlane.xlu0 %5070 }
0x1efa   :  { %v5100_v57 = vmul.f32 %v10266_v16, %v12501_v45  ;;  %10275 = vrsqrt.f32 %v5087_v25  ;;  %v5081_v21 = vmul.f32 0.03125, %v5071_v29 }
0x1efb   :  { %v10268_v26 = vpop.eup %10267  ;;  %10277 = vrsqrt.f32 %v5090_v34 }
0x1efc   :  { %v5089_v60 = vadd.f32 1e-12, %v5081_v21  ;;  %v5099_v4 = vmul.f32 %v10268_v26, %v12503_v56  ;;  %v5114_v13 = vmul.f32 %v8532_v27, %v5100_v57 }
0x1efe   :  { %10279 = vrsqrt.f32 %v5089_v60  ;;  %v5113_v51 = vmul.f32 %v8532_v27, %v5099_v4  ;;  %v12551_v6 = vadd.f32 %v8533_v7, %v5114_v13 }
0x1eff   :  { %v10270_v62 = vpop.eup %10269 }
0x1f00   :  { %v12549_v11 = vadd.f32 %v8533_v7, %v5113_v51  ;;  %v5102_v2 = vmul.f32 %v10270_v62, %v12510_v55 }
0x1f02   :  { %9634 = vmatprep.mubr.msk.f32.mxu0 %vm137_vm0, %v12549_v11  ;;  %v5116_v47 = vmul.f32 %v8532_v27, %v5102_v2 }
0x1f03   :  { %v10272_v45 = vpop.eup %10271  ;;  %9635 = vmatmul.mubr.msk.f32.vlgmr.msra.gmra.mxu0 %vm137_vm0, %v12551_v6 }
0x1f04   :  { %v10274_v42 = vpop.eup %10273  ;;  %v5101_v56 = vmul.f32 %v10272_v45, %v12517_v24  ;;  %v12563_v31 = vadd.f32 %v8533_v7, %v5116_v47 }
0x1f05   :  { %v5104_v14 = vmul.f32 %v10274_v42, %v12513_v41 }
0x1f06   :  { %v5115_v10 = vmul.f32 %v8532_v27, %v5101_v56 }
0x1f07   :  { %v10276_v23 = vpop.eup %10275  ;;  %v5118_v52 = vmul.f32 %v8532_v27, %v5104_v14 }
0x1f08   :  { %v10278_v12 = vpop.eup %10277  ;;  %v12560_v53 = vadd.f32 %v8533_v7, %v5115_v10  ;;  %v5103_v55 = vmul.f32 %v10276_v23, %v12526_v35 }
0x1f09   :  { %v5106_v8 = vmul.f32 %v10278_v12, %v12522_v30  ;;  %v12573_v35 = vadd.f32 %v8533_v7, %v5118_v52 }
0x1f0a   :  { %9637 = vmatprep.mubr.msk.f32.mxu0 %vm137_vm0, %v12560_v53  ;;  %v5117_v24 = vmul.f32 %v8532_v27, %v5103_v55 }
0x1f0b   :  { %v10280_v19 = vpop.eup %10279  ;;  %9638 = vmatmul.mubr.msk.f32.gmra.mxu0 %vm137_vm0, %v12563_v31  ;;  %v5120_v1 = vmul.f32 %v8532_v27, %v5106_v8 }
0x1f0c   :  { %v12570_v41 = vadd.f32 %v8533_v7, %v5117_v24  ;;  %v5105_v40 = vmul.f32 %v10280_v19, %v12534_v39  ;;  %v8555_v39 = vld [vmem:[%s10556_s30 + $0x78] sm:$0xff]  ;;  %s13176_s30 = sld [smem:[#allocation13_spill]] }
0x1f0d   :  { %v12581_v20 = vadd.f32 %v8533_v7, %v5120_v1  ;;  %9646 = vmatprep.subr.mxu1 %v8555_v39 }
0x1f0e   :  { %9640 = vmatprep.mubr.msk.f32.mxu0 %vm137_vm0, %v12570_v41  ;;  %v5119_v30 = vmul.f32 %v8532_v27, %v5105_v40  ;;  %9647 = vmatpush3.msra.mxu1 %v8555_v39 }
0x1f0f   :  { %9641 = vmatmul.mubr.msk.f32.gmra.mxu0 %vm137_vm0, %v12573_v35  ;;  %9648 = vmatprep.subr.mxu1 %v8554_v5 }
0x1f10   :  { %v12579_v17 = vadd.f32 %v8533_v7, %v5119_v30  ;;  %9649 = vmatpush3.msra.mxu1 %v8554_v5 }
0x1f11   :  { %9650 = vmatprep.subr.mxu1 %v8553_v9 }
0x1f12   :  { %9643 = vmatprep.mubr.msk.f32.mxu0 %vm137_vm0, %v12579_v17  ;;  %9651 = vmatpush3.msra.mxu1 %v8553_v9 }
0x1f13   :  { %9644 = vmatmul.mubr.msk.f32.gmra.mxu0 %vm137_vm0, %v12581_v20  ;;  %9652 = vmatprep.subr.mxu1 %v8552_v46 }
0x1f14   :  { %9653 = vmatpush3.msra.mxu1 %v8552_v46 }
0x1f15   :  { %9654 = vmatprep.subr.mxu1 %v8551_v32 }
0x1f16   :  { %9655 = vmatpush3.msra.mxu1 %v8551_v32 }
0x1f17   :  { %9656 = vmatprep.subr.mxu1 %v8550_v33 }
0x1f18   :  { %9657 = vmatpush3.msra.mxu1 %v8550_v33 }
0x1f19   :  { %9658 = vmatprep.subr.mxu1 %v8549_v3 }
0x1f1a   :  { %9659 = vmatpush3.msra.mxu1 %v8549_v3 }
0x1f1b   :  { %9660 = vmatprep.subr.mxu1 %v8548_v22 }
0x1f1c   :  { %9661 = vmatpush3.msra.mxu1 %v8548_v22 }
0x1fc3   :  { %v9636_v15 = vpop.f32.mrf.mxu0 }
0x1fc4   :  { %v12596_v54 = vadd.f32 %v9636_v15, %v8539_v63 }
0x1fc5   :  { %v5238_v0 = vpop.f32.mrf.mxu0 }
0x1fc6   :  { %v5278_v61 = vmul.f32 %v12596_v54, %v12596_v54  ;;  %v12600_v48 = vadd.f32 %v8539_v63, %v5238_v0 }
0x1fc8   :  { %v5286_v43 = vmul.f32 %v5278_v61, %v12596_v54  ;;  %v5277_v50 = vmul.f32 %v12600_v48, %v12600_v48 }
0x1fca   :  { %v5294_v36 = vmul.f32 0.044715, %v5286_v43  ;;  %v5285_v38 = vmul.f32 %v5277_v50, %v12600_v48 }
0x1fcb   :  { %v9639_v49 = vpop.f32.mrf.mxu0 }
0x1fcc   :  { %v5302_v44 = vadd.f32 %v5294_v36, %v12596_v54  ;;  %v5293_v58 = vmul.f32 0.044715, %v5285_v38  ;;  %v12607_v28 = vadd.f32 %v9639_v49, %v8539_v63 }
0x1fcd   :  { %v5248_v59 = vpop.f32.mrf.mxu0 }
0x1fce   :  { %v5310_v37 = vmul.f32 0.7978846, %v5302_v44  ;;  %v5301_v18 = vadd.f32 %v5293_v58, %v12600_v48  ;;  %v5280_v25 = vmul.f32 %v12607_v28, %v12607_v28  ;;  %v12612_v34 = vadd.f32 %v8539_v63, %v5248_v59 }
0x1fcf   :  { %v9642_v16 = vpop.f32.mrf.mxu0 }
0x1fd0   :  { %10281 = vtanh.f32 %v5310_v37  ;;  %v5309_v29 = vmul.f32 0.7978846, %v5301_v18  ;;  %v5288_v27 = vmul.f32 %v5280_v25, %v12607_v28  ;;  %v5279_v57 = vmul.f32 %v12612_v34, %v12612_v34 }
0x1fd1   :  { %v12617_v21 = vadd.f32 %v9642_v16, %v8539_v63  ;;  %v5258_v26 = vpop.f32.mrf.mxu0 }
0x1fd2   :  { %10283 = vtanh.f32 %v5309_v29  ;;  %v5296_v60 = vmul.f32 0.044715, %v5288_v27  ;;  %v5287_v4 = vmul.f32 %v5279_v57, %v12612_v34  ;;  %v12620_v13 = vadd.f32 %v8539_v63, %v5258_v26 }
0x1fd3   :  { %v5282_v7 = vmul.f32 %v12617_v21, %v12617_v21  ;;  %v9645_v51 = vpop.f32.mrf.mxu0 }
0x1fd4   :  { %v5304_v62 = vadd.f32 %v5296_v60, %v12607_v28  ;;  %v5295_v2 = vmul.f32 0.044715, %v5287_v4  ;;  %v5281_v45 = vmul.f32 %v12620_v13, %v12620_v13  ;;  %v12627_v42 = vadd.f32 %v9645_v51, %v8539_v63 }
0x1fd5   :  { %v5290_v56 = vmul.f32 %v5282_v7, %v12617_v21  ;;  %v5268_v47 = vpop.f32.mrf.mxu0 }
0x1fd6   :  { %v5312_v14 = vmul.f32 0.7978846, %v5304_v62  ;;  %v5303_v10 = vadd.f32 %v5295_v2, %v12612_v34  ;;  %v5289_v23 = vmul.f32 %v5281_v45, %v12620_v13  ;;  %v5284_v12 = vmul.f32 %v12627_v42, %v12627_v42 }
0x1fd7   :  { %v5298_v55 = vmul.f32 0.044715, %v5290_v56  ;;  %v5269_v52 = vadd.f32 %v8539_v63, %v5268_v47 }
0x1fd8   :  { %10285 = vtanh.f32 %v5312_v14  ;;  %v5311_v8 = vmul.f32 0.7978846, %v5303_v10  ;;  %v5297_v24 = vmul.f32 0.044715, %v5289_v23  ;;  %v5292_v19 = vmul.f32 %v5284_v12, %v12627_v42 }
0x1fd9   :  { %v5306_v40 = vadd.f32 %v5298_v55, %v12617_v21  ;;  %v5283_v1 = vmul.f32 %v5269_v52, %v5269_v52  ;;  %v8557_v55 = vld [vmem:[%s10561_s6 + $0x1] ss:$0 sm:$0xff]  ;;  %s13177_s6 = sld [smem:[#allocation16_spill]] }
0x1fda   :  { %10287 = vtanh.f32 %v5311_v8  ;;  %v5305_v30 = vadd.f32 %v5297_v24, %v12620_v13  ;;  %v5300_v39 = vmul.f32 0.044715, %v5292_v19 }
0x1fdb   :  { %v5314_v5 = vmul.f32 0.7978846, %v5306_v40  ;;  %v5291_v9 = vmul.f32 %v5283_v1, %v5269_v52 }
0x1fdc   :  { %v5313_v46 = vmul.f32 0.7978846, %v5305_v30  ;;  %v5308_v32 = vadd.f32 %v5300_v39, %v12627_v42 }
0x1fdd   :  { %v10282_v33 = vpop.eup %10281  ;;  %10289 = vtanh.f32 %v5314_v5  ;;  %v5299_v3 = vmul.f32 0.044715, %v5291_v9 }
0x1fde   :  { %v5326_v22 = vadd.f32 1.0, %v10282_v33  ;;  %10291 = vtanh.f32 %v5313_v46  ;;  %v5316_v63 = vmul.f32 0.7978846, %v5308_v32 }
0x1fdf   :  { %v10284_v15 = vpop.eup %10283  ;;  %v5307_v0 = vadd.f32 %v5299_v3, %v5269_v52 }
0x1fe0   :  { %10293 = vtanh.f32 %v5316_v63  ;;  %v5325_v61 = vadd.f32 1.0, %v10284_v15  ;;  %v5334_v43 = vmul.f32 0.5, %v5326_v22 }
0x1fe1   :  { %v5315_v50 = vmul.f32 0.7978846, %v5307_v0 }
0x1fe2   :  { %v5333_v36 = vmul.f32 0.5, %v5325_v61  ;;  %v5342_v44 = vmul.f32 %v5334_v43, %v12596_v54 }
0x1fe3   :  { %10295 = vtanh.f32 %v5315_v50 }
0x1fe4   :  { %v5341_v38 = vmul.f32 %v5333_v36, %v12600_v48 }
0x1fe5   :  { %v10286_v49 = vpop.eup %10285 }
0x1fe6   :  { %9662 = vmatprep.mubr.msk.f32.mxu1 %vm581_vm2, %v5341_v38  ;;  %v5328_v58 = vadd.f32 1.0, %v10286_v49 }
0x1fe7   :  { %v10288_v59 = vpop.eup %10287  ;;  %9663 = vmatmul.mubr.msk.f32.vlgmr.msra.gmra.mxu1 %vm581_vm2, %v5342_v44 }
0x1fe8   :  { %v5327_v37 = vadd.f32 1.0, %v10288_v59  ;;  %v5336_v18 = vmul.f32 0.5, %v5328_v58 }
0x1fea   :  { %v10290_v25 = vpop.eup %10289  ;;  %v5335_v16 = vmul.f32 0.5, %v5327_v37  ;;  %v5344_v48 = vmul.f32 %v5336_v18, %v12607_v28 }
0x1feb   :  { %v10292_v29 = vpop.eup %10291  ;;  %v5330_v27 = vadd.f32 1.0, %v10290_v25 }
0x1fec   :  { %v5343_v57 = vmul.f32 %v5335_v16, %v12612_v34  ;;  %v5329_v26 = vadd.f32 1.0, %v10292_v29 }
0x1fed   :  { %v10294_v60 = vpop.eup %10293  ;;  %v5338_v4 = vmul.f32 0.5, %v5330_v27 }
0x1fee   :  { %9665 = vmatprep.mubr.msk.f32.mxu1 %vm581_vm2, %v5343_v57  ;;  %v5337_v54 = vmul.f32 0.5, %v5329_v26  ;;  %v5332_v7 = vadd.f32 1.0, %v10294_v60 }
0x1fef   :  { %9666 = vmatmul.mubr.msk.f32.gmra.mxu1 %vm581_vm2, %v5344_v48  ;;  %v5346_v2 = vmul.f32 %v5338_v4, %v12617_v21 }
0x1ff0   :  { %v10296_v51 = vpop.eup %10295  ;;  %v5345_v62 = vmul.f32 %v5337_v54, %v12620_v13  ;;  %v5340_v34 = vmul.f32 0.5, %v5332_v7 }
0x1ff1   :  { %v5331_v45 = vadd.f32 1.0, %v10296_v51 }
0x1ff2   :  { %9668 = vmatprep.mubr.msk.f32.mxu1 %vm581_vm2, %v5345_v62  ;;  %v5348_v47 = vmul.f32 %v5340_v34, %v12627_v42 }
0x1ff3   :  { %9669 = vmatmul.mubr.msk.f32.gmra.mxu1 %vm581_vm2, %v5346_v2  ;;  %v5339_v28 = vmul.f32 0.5, %v5331_v45 }
0x1ff5   :  { %v5347_v56 = vmul.f32 %v5339_v28, %v5269_v52 }
0x1ff7   :  { %9671 = vmatprep.mubr.msk.f32.mxu1 %vm581_vm2, %v5347_v56 }
0x1ff8   :  { %9672 = vmatmul.mubr.msk.f32.gmra.mxu1 %vm581_vm2, %v5348_v47 }
0x20a7   :  { %v9664_v14 = vpop.f32.mrf.mxu1 }
0x20a8   :  { %v5462_v3 = vadd.f32 %v9664_v14, %v8557_v55 }
0x20a9   :  { %v5456_v10 = vpop.f32.mrf.mxu1 }
0x20aa   :  { %v5457_v63 = vadd.f32 %v8557_v55, %v5456_v10  ;;  %v5496_v15 = vadd.f32 %v5462_v3, %v12551_v6 }
0x20af   :  { %v9667_v13 = vpop.f32.mrf.mxu1 }
0x20b0   :  { %v5472_v42 = vadd.f32 %v9667_v13, %v8557_v55 }
0x20b1   :  { %v5466_v23 = vpop.f32.mrf.mxu1 }
0x20b2   :  { %v5467_v46 = vadd.f32 %v8557_v55, %v5466_v23  ;;  %v5498_v22 = vadd.f32 %v5472_v42, %v12563_v31  ;;  %v5510_v31 = vsel %vm137_vm0, %v5496_v15, 0.0 }
0x20b3   :  { %v9670_v21 = vpop.f32.mrf.mxu1 }
0x20b4   :  { %v5482_v24 = vadd.f32 %v9670_v21, %v8557_v55  ;;  %v5516_v0 = vsel %vm137_vm0, %v5498_v22, 0.0 }
0x20b5   :  { %v5476_v12 = vpop.f32.mrf.mxu1 }
0x20b6   :  { %v5477_v1 = vadd.f32 %v8557_v55, %v5476_v12  ;;  %v5500_v39 = vadd.f32 %v5482_v24, %v12573_v35  ;;  %v5497_v35 = vadd.f32 %v5467_v46, %v12560_v53 }
0x20b8   :  { %v9673_v8 = vpop.f32.mrf.mxu1  ;;  %v5499_v32 = vadd.f32 %v5477_v1, %v12570_v41  ;;  %v5495_v41 = vadd.f32 %v5457_v63, %v12549_v11  ;;  %v5513_v61 = vsel %vm137_vm0, %v5497_v35, 0.0 }
0x20b9   :  { %v5492_v19 = vadd.f32 %v9673_v8, %v8557_v55 }
0x20ba   :  { %v5486_v40 = vpop.f32.mrf.mxu1  ;;  %v5507_v43 = vsel %vm137_vm0, %v5495_v41, 0.0 }
0x20bb   :  { %v5502_v52 = vadd.f32 %v5492_v19, %v12581_v20  ;;  %v5487_v30 = vadd.f32 %v8557_v55, %v5486_v40  ;;  %v5522_v20 = vsel %vm137_vm0, %v5500_v39, 0.0  ;;  %v10476_v19 = vmov 0.0  }
0x20bc   :  { %9674 = vmatprep.subr.mxu0 %v10476_v19  ;;  %9704 = vmatprep.subr.mxu1 %v10476_v19 }
0x20bd   :  { %v5501_v5 = vadd.f32 %v5487_v30, %v12579_v17  ;;  %v5528_v9 = vsel %vm137_vm0, %v5502_v52, 0.0  ;;  %v5519_v17 = vsel %vm137_vm0, %v5499_v32, 0.0  ;;  %9690 = vmatprep.mubr.msk.f32.mxu0 %vm10477_vm5, %v10476_v19  ;;  %9706 = vmatprep.mubr.msk.f32.mxu1 %vm10477_vm5, %v10476_v19 }
0x20be   :  { %5529 = vadd.xlane.f32.xlu0 %v5528_v9 }
0x20bf   :  { %v5525_v33 = vsel %vm137_vm0, %v5501_v5, 0.0 }
0x20c0   :  { %5526 = vadd.xlane.f32.xlu1 %v5525_v33 }
0x20c2   :  { %5523 = vadd.xlane.f32.xlu0 %v5522_v20 }
0x20c4   :  { %5520 = vadd.xlane.f32.xlu1 %v5519_v17 }
0x20c6   :  { %5517 = vadd.xlane.f32.xlu0 %v5516_v0 }
0x20c8   :  { %5514 = vadd.xlane.f32.xlu1 %v5513_v61 }
0x20ca   :  { %5511 = vadd.xlane.f32.xlu0 %v5510_v31 }
0x20cc   :  { %5508 = vadd.xlane.f32.xlu1 %v5507_v43 }
0x2147   :  { %v5530_v53 = vpop.xlane.xlu0 %5529 }
0x2148   :  { %v5538_v50 = vmul.f32 0.03125, %v5530_v53 }
0x2149   :  { %v5527_v36 = vpop.xlane.xlu1 %5526 }
0x214a   :  { %v12670_v38 = vsub.f32 %v5502_v52, %v5538_v50  ;;  %v5537_v6 = vmul.f32 0.03125, %v5527_v36  ;;  %v8568_v36 = vld [vmem:[%s13167_s10 + $0x1] ss:$0 sm:$0xff] }
0x214b   :  { %v5524_v49 = vpop.xlane.xlu0 %5523 }
0x214c   :  { %v12672_v44 = vsub.f32 %v5501_v5, %v5537_v6  ;;  %v5536_v58 = vmul.f32 0.03125, %v5524_v49  ;;  %v5554_v11 = vmul.f32 %v12670_v38, %v12670_v38 }
0x214d   :  { %v5521_v59 = vpop.xlane.xlu1 %5520 }
0x214e   :  { %v12676_v37 = vsub.f32 %v5500_v39, %v5536_v58  ;;  %v5535_v18 = vmul.f32 0.03125, %v5521_v59  ;;  %v5576_v25 = vsel %vm137_vm0, %v5554_v11, 0.0  ;;  %v5553_v16 = vmul.f32 %v12672_v44, %v12672_v44  ;;  %v8569_v58 = vld [vmem:[%s13168_s21 + $0x1] ss:$0 sm:$0xff] }
0x214f   :  { %5577 = vadd.xlane.f32.xlu0 %v5576_v25  ;;  %v5518_v29 = vpop.xlane.xlu0 %5517  ;;  %v5639_v25 = vlaneseq }
0x2150   :  { %v12681_v27 = vsub.f32 %v5499_v32, %v5535_v18  ;;  %v5534_v57 = vmul.f32 0.03125, %v5518_v29  ;;  %v5573_v26 = vsel %vm137_vm0, %v5553_v16, 0.0  ;;  %v5552_v60 = vmul.f32 %v12676_v37, %v12676_v37 }
0x2151   :  { %5574 = vadd.xlane.f32.xlu1 %v5573_v26  ;;  %v5515_v48 = vpop.xlane.xlu1 %5514 }
0x2152   :  { %v12686_v4 = vsub.f32 %v5498_v22, %v5534_v57  ;;  %v5533_v54 = vmul.f32 0.03125, %v5515_v48  ;;  %v5570_v7 = vsel %vm137_vm0, %v5552_v60, 0.0  ;;  %v5551_v51 = vmul.f32 %v12681_v27, %v12681_v27 }
0x2153   :  { %5571 = vadd.xlane.f32.xlu0 %v5570_v7  ;;  %v5512_v62 = vpop.xlane.xlu0 %5511 }
0x2154   :  { %v12691_v2 = vsub.f32 %v5497_v35, %v5533_v54  ;;  %v5532_v45 = vmul.f32 0.03125, %v5512_v62  ;;  %v5567_v34 = vsel %vm137_vm0, %v5551_v51, 0.0  ;;  %v5550_v28 = vmul.f32 %v12686_v4, %v12686_v4 }
0x2155   :  { %5568 = vadd.xlane.f32.xlu1 %v5567_v34  ;;  %v5509_v56 = vpop.xlane.xlu1 %5508 }
0x2156   :  { %v12696_v47 = vsub.f32 %v5496_v15, %v5532_v45  ;;  %v5531_v14 = vmul.f32 0.03125, %v5509_v56  ;;  %v5564_v10 = vsel %vm137_vm0, %v5550_v28, 0.0  ;;  %v5549_v13 = vmul.f32 %v12691_v2, %v12691_v2 }
0x2157   :  { %5565 = vadd.xlane.f32.xlu0 %v5564_v10 }
0x2158   :  { %v12701_v23 = vsub.f32 %v5495_v41, %v5531_v14  ;;  %v5561_v21 = vsel %vm137_vm0, %v5549_v13, 0.0  ;;  %v5548_v12 = vmul.f32 %v12696_v47, %v12696_v47 }
0x2159   :  { %5562 = vadd.xlane.f32.xlu1 %v5561_v21 }
0x215a   :  { %v5558_v55 = vsel %vm137_vm0, %v5548_v12, 0.0  ;;  %v5547_v8 = vmul.f32 %v12701_v23, %v12701_v23 }
0x215b   :  { %5559 = vadd.xlane.f32.xlu0 %v5558_v55 }
0x215c   :  { %v5555_v24 = vsel %vm137_vm0, %v5547_v8, 0.0 }
0x215d   :  { %5556 = vadd.xlane.f32.xlu1 %v5555_v24 }
0x21d8   :  { %v5578_v40 = vpop.xlane.xlu0 %5577 }
0x21d9   :  { %v5586_v1 = vmul.f32 0.03125, %v5578_v40 }
0x21da   :  { %v5575_v52 = vpop.xlane.xlu1 %5574 }
0x21db   :  { %v5594_v30 = vadd.f32 1e-12, %v5586_v1  ;;  %v5585_v42 = vmul.f32 0.03125, %v5575_v52  ;;  %v5724_v1 = vld [vmem:[%s13169_s9 + $0x18] sm:$0xff]  ;;  %v5722_v52 = vld [vmem:[%s13169_s9 + $0x8] sm:$0xff] }
0x21dc   :  { %v5572_v39 = vpop.xlane.xlu0 %5571 }
0x21dd   :  { %10297 = vrsqrt.f32 %v5594_v30  ;;  %v5593_v5 = vadd.f32 1e-12, %v5585_v42  ;;  %v5584_v9 = vmul.f32 0.03125, %v5572_v39  ;;  %v5721_v30 = vld [vmem:[%s13169_s9] sm:$0xff] }
0x21de   :  { %v5569_v46 = vpop.xlane.xlu1 %5568  ;;  %v5798_v42 = vld [vmem:[%s13170_s25] sm:$0xff] }
0x21df   :  { %10299 = vrsqrt.f32 %v5593_v5  ;;  %v5592_v32 = vadd.f32 1e-12, %v5584_v9  ;;  %v5583_v33 = vmul.f32 0.03125, %v5569_v46  ;;  %9705 = vmatpush3.xpose.msra.mxu1 %v5798_v42  ;;  %v10478_v9 = vmov 1  }
0x21e0   :  { %v5566_v3 = vpop.xlane.xlu0 %5565  ;;  %9714 = vmatprep.subr.mxu1 %v10476_v19  ;;  %9930 = vset.pattern.permute.xlu1 %v10478_v9  ;;  %v10479_v46 = vmov 0  }
0x21e1   :  { %10301 = vrsqrt.f32 %v5592_v32  ;;  %v5591_v22 = vadd.f32 1e-12, %v5583_v33  ;;  %v5582_v20 = vmul.f32 0.03125, %v5566_v3  ;;  %9929 = vset.pattern.permute.xlu0 %v10479_v46  ;;  %v5869_v33 = vld [vmem:[%s13171_s29] sm:$0xff] }
0x21e2   :  { %v5563_v63 = vpop.xlane.xlu1 %5562 }
0x21e3   :  { %10303 = vrsqrt.f32 %v5591_v22  ;;  %v5590_v35 = vadd.f32 1e-12, %v5582_v20  ;;  %v5581_v17 = vmul.f32 0.03125, %v5563_v63 }
0x21e4   :  { %v5560_v15 = vpop.xlane.xlu0 %5559 }
0x21e5   :  { %10305 = vrsqrt.f32 %v5590_v35  ;;  %v5589_v0 = vadd.f32 1e-12, %v5581_v17  ;;  %v5580_v41 = vmul.f32 0.03125, %v5560_v15  ;;  %v10480_v35 = vmov 2  }
0x21e6   :  { %v5557_v61 = vpop.xlane.xlu1 %5556  ;;  %v10481_v15 = vmov 3  }
0x21e7   :  { %10307 = vrsqrt.f32 %v5589_v0  ;;  %v5588_v31 = vadd.f32 1e-12, %v5580_v41  ;;  %v5579_v43 = vmul.f32 0.03125, %v5557_v61  ;;  %v10482_v0 = vmov 4  }
0x21e8   :  { %v10483_v41 = vmov 5   ;;  %v10484_v61 = vmov 6  }
0x21e9   :  { %10309 = vrsqrt.f32 %v5588_v31  ;;  %v5587_v53 = vadd.f32 1e-12, %v5579_v43  ;;  %v10485_v31 = vmov 7  }
0x21ea   :  { %v10298_v50 = vpop.eup %10297 }
0x21eb   :  { %10311 = vrsqrt.f32 %v5587_v53  ;;  %v5610_v6 = vmul.f32 %v10298_v50, %v12670_v38  ;;  %v12723_v38 = vshrl.u32 %v5639_v25, 7 }
0x21ec   :  { %v10300_v49 = vpop.eup %10299 }
0x21ed   :  { %v5624_v11 = vmul.f32 %v8568_v36, %v5610_v6  ;;  %v5609_v59 = vmul.f32 %v10300_v49, %v12672_v44  ;;  %v5643_v14 = vmul.u32 8, %v12723_v38  ;;  %v6044_v43 = vsub.s32 1, %v12723_v38 }
0x21ee   :  { %v10302_v18 = vpop.eup %10301  ;;  %v12776_v53 = vsub.s32 0, %v12723_v38  ;;  %v6145_v6 = vsub.s32 2, %v12723_v38 }
0x21ef   :  { %v5638_v16 = vadd.f32 %v8569_v58, %v5624_v11  ;;  %v5623_v29 = vmul.f32 %v8568_v36, %v5609_v59  ;;  %v5608_v57 = vmul.f32 %v10302_v18, %v12676_v37 }
0x21f0   :  { %v10304_v26 = vpop.eup %10303 }
0x21f1   :  { %9675 = vmatpush3.msra.mxu0 %v5638_v16  ;;  %v5637_v60 = vadd.f32 %v8569_v58, %v5623_v29  ;;  %v5622_v48 = vmul.f32 %v8568_v36, %v5608_v57  ;;  %v5607_v54 = vmul.f32 %v10304_v26, %v12681_v27  ;;  %v5642_v27 = vand.u32 127, %v5639_v25  ;;  %v12788_v25 = vld [vmem:[%s13172_s3] sm:$0xff] }
0x21f2   :  { %v10306_v7 = vpop.eup %10305  ;;  %9676 = vmatprep.subr.mxu0 %v10476_v19  ;;  %v6245_v16 = vsub.s32 3, %v12723_v38 }
0x21f3   :  { %9677 = vmatpush3.msra.mxu0 %v5637_v60  ;;  %v5636_v51 = vadd.f32 %v8569_v58, %v5622_v48  ;;  %v5621_v44 = vmul.f32 %v8568_v36, %v5607_v54  ;;  %v5606_v62 = vmul.f32 %v10306_v7, %v12686_v4  ;;  %vm5644_vm6 = vcmp.eq.s32.totalorder %v5642_v27, %v5643_v14 }
0x21f4   :  { %v10308_v45 = vpop.eup %10307  ;;  %9678 = vmatprep.subr.mxu0 %v10476_v19  ;;  %v8570_v40 = vsel %vm5644_vm6, 1.0, %v10476_v19  ;;  %vm6772_vm6 = vcmask 654336  }
0x21f5   :  { %9679 = vmatpush3.msra.mxu0 %v5636_v51  ;;  %v5635_v37 = vadd.f32 %v8569_v58, %v5621_v44  ;;  %v5620_v34 = vmul.f32 %v8568_v36, %v5606_v62  ;;  %v5605_v28 = vmul.f32 %v10308_v45, %v12691_v2  ;;  %v6345_v62 = vsub.s32 4, %v12723_v38 }
0x21f6   :  { %v10310_v56 = vpop.eup %10309  ;;  %9680 = vmatprep.subr.mxu0 %v10476_v19 }
0x21f7   :  { %9681 = vmatpush3.msra.mxu0 %v5635_v37  ;;  %v5634_v10 = vadd.f32 %v8569_v58, %v5620_v34  ;;  %v5619_v13 = vmul.f32 %v8568_v36, %v5605_v28  ;;  %v5604_v21 = vmul.f32 %v10310_v56, %v12696_v47 }
0x21f8   :  { %v10312_v4 = vpop.eup %10311  ;;  %9682 = vmatprep.subr.mxu0 %v10476_v19 }
0x21f9   :  { %9683 = vmatpush3.msra.mxu0 %v5634_v10  ;;  %v5633_v12 = vadd.f32 %v8569_v58, %v5619_v13  ;;  %v5618_v55 = vmul.f32 %v8568_v36, %v5604_v21  ;;  %v5603_v2 = vmul.f32 %v10312_v4, %v12701_v23  ;;  %v5723_v23 = vld [vmem:[%s13169_s9 + $0x10] sm:$0xff] }
0x21fa   :  { %9684 = vmatprep.subr.mxu0 %v10476_v19 }
0x21fb   :  { %9685 = vmatpush3.msra.mxu0 %v5633_v12  ;;  %v5632_v8 = vadd.f32 %v8569_v58, %v5618_v55  ;;  %v5617_v24 = vmul.f32 %v8568_v36, %v5603_v2  ;;  %v6445_v55 = vsub.s32 5, %v12723_v38 }
0x21fc   :  { %9686 = vmatprep.subr.mxu0 %v10476_v19 }
0x21fd   :  { %9687 = vmatpush3.msra.mxu0 %v5632_v8  ;;  %v5631_v47 = vadd.f32 %v8569_v58, %v5617_v24 }
0x21fe   :  { %9688 = vmatprep.subr.mxu0 %v10476_v19 }
0x21ff   :  { %9689 = vmatpush3.msra.mxu0 %v5631_v47 }
0x2200   :  { %9691 = vmatmul.mubr.msk.f32.vlgmr.msra.gmra.mxu0 %vm581_vm2, %v8570_v40  ;;  %9693 = vmatprep.subr.mxu0 %v10476_v19 }
0x2201   :  { %9694 = vmatpush3.msra.mxu0 %v5724_v1  ;;  %9701 = vmatprep.mubr.msk.f32.mxu0 %vm10477_vm5, %v10476_v19 }
0x2202   :  { %9695 = vmatprep.subr.mxu0 %v10476_v19 }
0x2203   :  { %9696 = vmatpush3.msra.mxu0 %v5723_v23 }
0x2204   :  { %9697 = vmatprep.subr.mxu0 %v10476_v19 }
0x2205   :  { %9698 = vmatpush3.msra.mxu0 %v5722_v52  ;;  %v6545_v52 = vsub.s32 6, %v12723_v38 }
0x2206   :  { %9699 = vmatprep.subr.mxu0 %v10476_v19 }
0x2207   :  { %9700 = vmatpush3.msra.mxu0 %v5721_v30 }
0x2208   :  { %9709 = vmatprep.subr.mxu0 %v10476_v19 }
0x22c0   :  { %v5716_v39 = vpop.f32.mrf.mxu0 }
0x22c1   :  { %9702 = vmatmul.mubr.msk.f32.vlgmr.msra.gmra.mxu0 %vm137_vm0, %v5716_v39 }
0x22c2   :  { %v9692_v5 = vpop.f32.mrf.mxu0  ;;  %9711 = vmatprep.mubr.msk.f32.mxu0 %vm10477_vm5, %v10476_v19 }
0x2381   :  { %v12754_v32 = vpop.f32.mrf.mxu0 }
0x2382   :  { %9707 = vmatmul.mubr.f32.vlgmr.msra.gmra.mxu1 %v12754_v32  ;;  %9710 = vmatpush3.xpose.msra.mxu0 %v12754_v32 }
0x2383   :  { %9715 = vmatpush3.msra.mxu1 %v12754_v32  ;;  %v9703_v3 = vpop.f32.mrf.mxu0  ;;  %9719 = vmatprep.subr.mxu0 %v10476_v19 }
0x2384   :  { %9716 = vmatprep.mubr.msk.f32.mxu1 %vm10477_vm5, %v10476_v19  ;;  %9724 = vmatprep.subr.mxu1 %v10476_v19  ;;  %v6645_v3 = vsub.s32 7, %v12723_v38 }
0x2385   :  { %9712 = vmatmul.mubr.f32.vlgmr.msra.gmra.mxu0 %v5869_v33 }
0x2386   :  { %9721 = vmatprep.mubr.msk.f32.mxu0 %vm10477_vm5, %v10476_v19 }
0x2442   :  { %v5865_v22 = vpop.f32.mrf.mxu1 }
0x2443   :  { %6039 = vperm.xlu1 %9930, %v5865_v22   ;;  %5942 = vperm.xlu0 %9929, %v5865_v22  }
0x2444   :  { %v9708_v20 = vpop.f32.mrf.mxu1 }
0x2445   :  { %v12766_v63 = vpop.f32.mrf.mxu0 }
0x2446   :  { %v6045_v50 = vrot.slane %v12766_v63, %v6044_v43  ;;  %v5948_v36 = vrot.slane %v12766_v63, %v12776_v53  ;;  %v6146_v18 = vrot.slane %v12766_v63, %v6145_v6  ;;  %v6246_v44 = vrot.slane %v12766_v63, %v6245_v16 }
0x2447   :  { %9931 = vset.pattern.permute.xlu1 %v10480_v35  ;;  %v9713_v17 = vpop.f32.mrf.mxu0  ;;  %9938 = vset.pattern.permute.xlu0 %v10478_v9  ;;  %v6346_v10 = vrot.slane %v12766_v63, %v6345_v62  ;;  %v6446_v40 = vrot.slane %v12766_v63, %v6445_v55  ;;  %v6546_v9 = vrot.slane %v12766_v63, %v6545_v52 }
0x2448   :  { %6140 = vperm.xlu1 %9931, %v5865_v22  }
0x244c   :  { %9932 = vset.pattern.permute.xlu1 %v10481_v15 }
0x244d   :  { %6240 = vperm.xlu1 %9932, %v5865_v22  }
0x2451   :  { %9933 = vset.pattern.permute.xlu1 %v10482_v0 }
0x2452   :  { %6340 = vperm.xlu1 %9933, %v5865_v22  }
0x2456   :  { %9934 = vset.pattern.permute.xlu1 %v10483_v41 }
0x2457   :  { %6440 = vperm.xlu1 %9934, %v5865_v22  }
0x245b   :  { %9935 = vset.pattern.permute.xlu1 %v10484_v61 }
0x245c   :  { %6540 = vperm.xlu1 %9935, %v5865_v22  }
0x2460   :  { %9936 = vset.pattern.permute.xlu1 %v10485_v31 }
0x2461   :  { %6640 = vperm.xlu1 %9936, %v5865_v22  }
0x2465   :  { %9937 = vset.pattern.permute.xlu1 %v10479_v46 }
0x24be   :  { %v6040_v49 = vpop.permute.xlu1 %6039  ;;  %v5943_v58 = vpop.permute.xlu0 %5942 }
0x24bf   :  { %v6046_v11 = vadd.f32 %v6045_v50, %v6040_v49  ;;  %v5949_v59 = vadd.f32 %v5948_v36, %v5943_v58  ;;  %v6646_v36 = vrot.slane %v12766_v63, %v6645_v3 }
0x24c1   :  { %vm6047_vm7 = vcmp.gt.f32.partialorder %v6046_v11, 0.0  ;;  %v6048_v29 = vmul.f32 0.2, %v6046_v11  ;;  %vm5950_vm8 = vcmp.gt.f32.partialorder %v5949_v59, 0.0  ;;  %v5951_v57 = vmul.f32 0.2, %v5949_v59 }
0x24c3   :  { %v6141_v26 = vpop.permute.xlu1 %6140  ;;  %v6049_v60 = vsel %vm6047_vm7, %v6046_v11, %v6048_v29  ;;  %v5952_v48 = vsel %vm5950_vm8, %v5949_v59, %v5951_v57  ;;  %vm6774_vm7 = vcmask 785408   ;;  %vm6776_vm8 = vcmask 916480  }
0x24c4   :  { %v6147_v54 = vadd.f32 %v6146_v18, %v6141_v26  ;;  %v12792_v7 = vadd.f32 %v6049_v60, %v12788_v25  ;;  %v12795_v51 = vadd.f32 %v5952_v48, %v12788_v25 }
0x24c6   :  { %vm6148_vm9 = vcmp.gt.f32.partialorder %v6147_v54, 0.0  ;;  %v6149_v45 = vmul.f32 0.2, %v6147_v54  ;;  %v6051_v37 = vsel %vm443_vm1, %v12792_v7, -inf  ;;  %v5954_v34 = vsel %vm443_vm1, %v12795_v51, -inf }
0x24c7   :  { %6052 = vmax.xlane.f32.xlu0 %v6051_v37  ;;  %5955 = vmax.xlane.f32.xlu1 %v5954_v34 }
0x24c8   :  { %v6241_v28 = vpop.permute.xlu1 %6240  ;;  %v6150_v56 = vsel %vm6148_vm9, %v6147_v54, %v6149_v45 }
0x24c9   :  { %v6247_v27 = vadd.f32 %v6246_v44, %v6241_v28  ;;  %v12806_v14 = vadd.f32 %v6150_v56, %v12788_v25 }
0x24cb   :  { %vm6248_vm10 = vcmp.gt.f32.partialorder %v6247_v27, 0.0  ;;  %v6249_v13 = vmul.f32 0.2, %v6247_v27  ;;  %v6152_v21 = vsel %vm443_vm1, %v12806_v14, -inf }
0x24cc   :  { %6153 = vmax.xlane.f32.xlu0 %v6152_v21 }
0x24cd   :  { %v6341_v4 = vpop.permute.xlu1 %6340  ;;  %v6250_v12 = vsel %vm6248_vm10, %v6247_v27, %v6249_v13 }
0x24ce   :  { %v6347_v2 = vadd.f32 %v6346_v10, %v6341_v4  ;;  %v6251_v8 = vadd.f32 %v6250_v12, %v12788_v25 }
0x24d0   :  { %vm6348_vm11 = vcmp.gt.f32.partialorder %v6347_v2, 0.0  ;;  %v6349_v24 = vmul.f32 0.2, %v6347_v2  ;;  %v6252_v47 = vsel %vm443_vm1, %v6251_v8, -inf }
0x24d1   :  { %6253 = vmax.xlane.f32.xlu1 %v6252_v47 }
0x24d2   :  { %v6441_v1 = vpop.permute.xlu1 %6440  ;;  %v6350_v23 = vsel %vm6348_vm11, %v6347_v2, %v6349_v24 }
0x24d3   :  { %v6447_v30 = vadd.f32 %v6446_v40, %v6441_v1  ;;  %v6351_v42 = vadd.f32 %v6350_v23, %v12788_v25 }
0x24d5   :  { %vm6448_vm12 = vcmp.gt.f32.partialorder %v6447_v30, 0.0  ;;  %v6449_v39 = vmul.f32 0.2, %v6447_v30  ;;  %v6352_v5 = vsel %vm443_vm1, %v6351_v42, -inf }
0x24d6   :  { %6353 = vmax.xlane.f32.xlu0 %v6352_v5 }
0x24d7   :  { %v6541_v46 = vpop.permute.xlu1 %6540  ;;  %v6450_v33 = vsel %vm6448_vm12, %v6447_v30, %v6449_v39 }
0x24d8   :  { %v6547_v22 = vadd.f32 %v6546_v9, %v6541_v46  ;;  %v6451_v20 = vadd.f32 %v6450_v33, %v12788_v25 }
0x24da   :  { %vm6548_vm13 = vcmp.gt.f32.partialorder %v6547_v22, 0.0  ;;  %v6549_v17 = vmul.f32 0.2, %v6547_v22  ;;  %v6452_v50 = vsel %vm443_vm1, %v6451_v20, -inf }
0x24db   :  { %6453 = vmax.xlane.f32.xlu1 %v6452_v50 }
0x24dc   :  { %v6641_v49 = vpop.permute.xlu1 %6640  ;;  %v6550_v58 = vsel %vm6548_vm13, %v6547_v22, %v6549_v17 }
0x24dd   :  { %v6647_v11 = vadd.f32 %v6646_v36, %v6641_v49  ;;  %v6551_v59 = vadd.f32 %v6550_v58, %v12788_v25 }
0x24df   :  { %vm6648_vm14 = vcmp.gt.f32.partialorder %v6647_v11, 0.0  ;;  %v6649_v18 = vmul.f32 0.2, %v6647_v11  ;;  %v6552_v29 = vsel %vm443_vm1, %v6551_v59, -inf }
0x24e0   :  { %6553 = vmax.xlane.f32.xlu0 %v6552_v29 }
0x24e1   :  { %v6650_v57 = vsel %vm6648_vm14, %v6647_v11, %v6649_v18 }
0x24e2   :  { %v6651_v26 = vadd.f32 %v6650_v57, %v12788_v25 }
0x24e4   :  { %v6652_v60 = vsel %vm443_vm1, %v6651_v26, -inf }
0x24e5   :  { %6653 = vmax.xlane.f32.xlu1 %v6652_v60 }
0x24f6   :  { %6063 = vrot.lane.b32.xlu0 %v12754_v32, %s10468_s18  ;;  %6163 = vrot.lane.b32.xlu1 %v12754_v32, %s10462_s0 }
0x24fa   :  { %6363 = vrot.lane.b32.xlu0 %v12754_v32, %s10463_s5  ;;  %6263 = vrot.lane.b32.xlu1 %v12754_v32, %s10467_s16 }
0x24fe   :  { %6463 = vrot.lane.b32.xlu1 %v12754_v32, %s10469_s22 }
0x2550   :  { %v6053_v63 = vpop.xlane.xlu0 %6052  ;;  %v5956_v48 = vpop.xlane.xlu1 %5955 }
0x2551   :  { %v6054_v54 = vsub.f32 %v12792_v7, %v6053_v63  ;;  %v5957_v44 = vsub.f32 %v12795_v51, %v5956_v48 }
0x2553   :  { %v6055_v45 = vmul.f32 1.442695, %v6054_v54  ;;  %v5958_v37 = vmul.f32 1.442695, %v5957_v44 }
0x2555   :  { %10313 = vpow2.f32 %v6055_v45  ;;  %v6154_v34 = vpop.xlane.xlu0 %6153 }
0x2556   :  { %10315 = vpow2.f32 %v5958_v37  ;;  %v6155_v28 = vsub.f32 %v12806_v14, %v6154_v34 }
0x2558   :  { %v6156_v56 = vmul.f32 1.442695, %v6155_v28 }
0x255a   :  { %10317 = vpow2.f32 %v6156_v56  ;;  %v6254_v27 = vpop.xlane.xlu1 %6253 }
0x255b   :  { %v6255_v10 = vsub.f32 %v6251_v8, %v6254_v27 }
0x255d   :  { %v6256_v13 = vmul.f32 1.442695, %v6255_v10 }
0x255f   :  { %10319 = vpow2.f32 %v6256_v13  ;;  %v6354_v21 = vpop.xlane.xlu0 %6353 }
0x2560   :  { %v6355_v4 = vsub.f32 %v6351_v42, %v6354_v21 }
0x2562   :  { %v10314_v12 = vpop.eup %10313  ;;  %v6356_v2 = vmul.f32 1.442695, %v6355_v4 }
0x2563   :  { %v10316_v7 = vpop.eup %10315  ;;  %v6057_v51 = vsel %vm443_vm1, %v10314_v12, 0.0 }
0x2564   :  { %10321 = vpow2.f32 %v6356_v2  ;;  %6058 = vadd.xlane.f32.xlu1 %v6057_v51  ;;  %v5960_v24 = vsel %vm443_vm1, %v10316_v7, 0.0  ;;  %v6454_v47 = vpop.xlane.xlu1 %6453 }
0x2565   :  { %5961 = vadd.xlane.f32.xlu0 %v5960_v24  ;;  %v6455_v14 = vsub.f32 %v6451_v20, %v6454_v47 }
0x2567   :  { %v10318_v40 = vpop.eup %10317  ;;  %v6456_v1 = vmul.f32 1.442695, %v6455_v14 }
0x2568   :  { %v6158_v8 = vsel %vm443_vm1, %v10318_v40, 0.0 }
0x2569   :  { %10323 = vpow2.f32 %v6456_v1  ;;  %v6554_v23 = vpop.xlane.xlu0 %6553  ;;  %6159 = vadd.xlane.f32.xlu0 %v6158_v8 }
0x256a   :  { %v6555_v30 = vsub.f32 %v6551_v59, %v6554_v23 }
0x256c   :  { %v12851_v42 = vpop.eup %10319  ;;  %v6556_v39 = vmul.f32 1.442695, %v6555_v30 }
0x256d   :  { %v6064_v5 = vpop.permute.xlu0 %6063  ;;  %v6258_v9 = vsel %vm443_vm1, %v12851_v42, 0.0 }
0x256e   :  { %10325 = vpow2.f32 %v6556_v39  ;;  %9720 = vmatpush3.msra.mxu0 %v6064_v5  ;;  %6259 = vadd.xlane.f32.xlu1 %v6258_v9  ;;  %v6654_v46 = vpop.xlane.xlu1 %6653 }
0x256f   :  { %v6655_v33 = vsub.f32 %v6651_v26, %v6654_v46  ;;  %9729 = vmatprep.subr.mxu0 %v10476_v19  ;;  %v6807_v46 = vld [vmem:[%s13173_s14 + $0x78] sm:$0xff] }
0x2571   :  { %v10322_v22 = vpop.eup %10321  ;;  %v6656_v20 = vmul.f32 1.442695, %v6655_v33  ;;  %v6364_v26 = vpop.permute.xlu0 %6363 }
0x2572   :  { %v6358_v17 = vsel %vm443_vm1, %v10322_v22, 0.0  ;;  %v6164_v18 = vpop.permute.xlu1 %6163 }
0x2573   :  { %10327 = vpow2.f32 %v6656_v20  ;;  %6359 = vadd.xlane.f32.xlu0 %v6358_v17  ;;  %v6806_v20 = vld [vmem:[%s13173_s14 + $0x70] sm:$0xff]  ;;  %v6805_v17 = vld [vmem:[%s13173_s14 + $0x68] sm:$0xff] }
0x2576   :  { %v12857_v50 = vpop.eup %10323  ;;  %v6264_v29 = vpop.permute.xlu1 %6263 }
0x2577   :  { %v6458_v36 = vsel %vm443_vm1, %v12857_v50, 0.0 }
0x2578   :  { %6459 = vadd.xlane.f32.xlu1 %v6458_v36  ;;  %v6804_v36 = vld [vmem:[%s13173_s14 + $0x60] sm:$0xff] }
0x257a   :  { %v6464_v57 = vpop.permute.xlu1 %6463 }
0x257b   :  { %v12861_v49 = vpop.eup %10325 }
0x257c   :  { %v6558_v58 = vsel %vm443_vm1, %v12861_v49, 0.0 }
0x257d   :  { %6559 = vadd.xlane.f32.xlu0 %v6558_v58 }
0x2580   :  { %v12865_v11 = vpop.eup %10327 }
0x2581   :  { %v6658_v59 = vsel %vm443_vm1, %v12865_v11, 0.0 }
0x2582   :  { %6659 = vadd.xlane.f32.xlu1 %v6658_v59 }
0x2593   :  { %6563 = vrot.lane.b32.xlu0 %v12754_v32, %s10486_s8  ;;  %6663 = vrot.lane.b32.xlu1 %v12754_v32, %s10474_s2 }
0x25ed   :  { %v6059_v60 = vpop.xlane.xlu1 %6058 }
0x25ee   :  { %v5962_v63 = vpop.xlane.xlu0 %5961  ;;  %10329 = vrcp.f32 %v6059_v60  ;;  %v6799_v60 = vld [vmem:[%s13173_s14 + $0x38] sm:$0xff] }
0x25ef   :  { %10331 = vrcp.f32 %v5962_v63 }
0x25f2   :  { %v6160_v48 = vpop.xlane.xlu0 %6159 }
0x25f3   :  { %10333 = vrcp.f32 %v6160_v48  ;;  %v6798_v48 = vld [vmem:[%s13173_s14 + $0x30] sm:$0xff] }
0x25f7   :  { %v6260_v54 = vpop.xlane.xlu1 %6259 }
0x25f8   :  { %10335 = vrcp.f32 %v6260_v54 }
0x25fb   :  { %v10330_v44 = vpop.eup %10329 }
0x25fc   :  { %v10332_v45 = vpop.eup %10331  ;;  %v6360_v37 = vpop.xlane.xlu0 %6359  ;;  %v6061_v34 = vmul.f32 %v10330_v44, %v10314_v12  ;;  %v6797_v44 = vld [vmem:[%s13173_s14 + $0x28] sm:$0xff] }
0x25fd   :  { %10337 = vrcp.f32 %v6360_v37  ;;  %v5964_v28 = vmul.f32 %v10332_v45, %v10316_v7  ;;  %v6796_v37 = vld [vmem:[%s13173_s14 + $0x20] sm:$0xff] }
0x25fe   :  { %9722 = vmatmul.mubr.msk.f32.vlgmr.msra.gmra.mxu0 %vm443_vm1, %v6061_v34  ;;  %v6795_v34 = vld [vmem:[%s13173_s14 + $0x18] sm:$0xff] }
0x25ff   :  { %9717 = vmatmul.mubr.msk.f32.vlgmr.msra.gmra.mxu1 %vm443_vm1, %v5964_v28  ;;  %9730 = vmatpush3.msra.mxu0 %v6264_v29  ;;  %v6801_v29 = vld [vmem:[%s13173_s14 + $0x48] sm:$0xff]  ;;  %v6794_v28 = vld [vmem:[%s13173_s14 + $0x10] sm:$0xff] }
0x2600   :  { %v10334_v32 = vpop.eup %10333  ;;  %9725 = vmatpush3.msra.mxu1 %v6164_v18  ;;  %9726 = vmatprep.mubr.msk.f32.mxu1 %vm10477_vm5, %v10476_v19  ;;  %v6802_v18 = vld [vmem:[%s13173_s14 + $0x50] sm:$0xff] }
0x2601   :  { %v6460_v56 = vpop.xlane.xlu1 %6459  ;;  %9734 = vmatprep.subr.mxu1 %v10476_v19  ;;  %v6162_v27 = vmul.f32 %v10334_v32, %v10318_v40  ;;  %9731 = vmatprep.mubr.msk.f32.mxu0 %vm10477_vm5, %v10476_v19  ;;  %v6793_v32 = vld [vmem:[%s13173_s14 + $0x8] sm:$0xff] }
0x2602   :  { %10339 = vrcp.f32 %v6460_v56  ;;  %9739 = vmatprep.subr.mxu0 %v10476_v19  ;;  %v6792_v56 = vld [vmem:[%s13173_s14] sm:$0xff] }
0x2603   :  { %9727 = vmatmul.mubr.msk.f32.vlgmr.msra.gmra.mxu1 %vm443_vm1, %v6162_v27  ;;  %v6878_v27 = vld [vmem:[%s13174_s19] sm:$0xff] }
0x2604   :  { %9735 = vmatpush3.msra.mxu1 %v6364_v26  ;;  %9736 = vmatprep.mubr.msk.f32.mxu1 %vm10477_vm5, %v10476_v19  ;;  %v6800_v26 = vld [vmem:[%s13173_s14 + $0x40] sm:$0xff] }
0x2605   :  { %v10336_v10 = vpop.eup %10335  ;;  %9744 = vmatprep.subr.mxu1 %v10476_v19 }
0x2606   :  { %v6560_v13 = vpop.xlane.xlu0 %6559  ;;  %v6262_v21 = vmul.f32 %v10336_v10, %v12851_v42 }
0x2607   :  { %10341 = vrcp.f32 %v6560_v13 }
0x2608   :  { %9732 = vmatmul.mubr.msk.f32.vlgmr.msra.gmra.mxu0 %vm443_vm1, %v6262_v21 }
0x2609   :  { %9740 = vmatpush3.msra.mxu0 %v6464_v57  ;;  %9741 = vmatprep.mubr.msk.f32.mxu0 %vm10477_vm5, %v10476_v19 }
0x260a   :  { %v10338_v4 = vpop.eup %10337  ;;  %9749 = vmatprep.subr.mxu0 %v10476_v19  ;;  %v6564_v7 = vpop.permute.xlu0 %6563 }
0x260b   :  { %v6660_v12 = vpop.xlane.xlu1 %6659  ;;  %v6362_v2 = vmul.f32 %v10338_v4, %v10322_v22 }
0x260c   :  { %10343 = vrcp.f32 %v6660_v12 }
0x260d   :  { %9737 = vmatmul.mubr.msk.f32.vlgmr.msra.gmra.mxu1 %vm443_vm1, %v6362_v2 }
0x260e   :  { %9745 = vmatpush3.msra.mxu1 %v6564_v7  ;;  %9746 = vmatprep.mubr.msk.f32.mxu1 %vm10477_vm5, %v10476_v19 }
0x260f   :  { %v10340_v51 = vpop.eup %10339  ;;  %9754 = vmatprep.subr.mxu1 %v10476_v19  ;;  %v6664_v47 = vpop.permute.xlu1 %6663 }
0x2610   :  { %v6462_v24 = vmul.f32 %v10340_v51, %v12857_v50 }
0x2612   :  { %9742 = vmatmul.mubr.msk.f32.vlgmr.msra.gmra.mxu0 %vm443_vm1, %v6462_v24 }
0x2613   :  { %9750 = vmatpush3.msra.mxu0 %v6664_v47  ;;  %9751 = vmatprep.mubr.msk.f32.mxu0 %vm10477_vm5, %v10476_v19 }
0x2614   :  { %v10342_v14 = vpop.eup %10341  ;;  %9789 = vmatprep.subr.mxu0 %v10476_v19 }
0x2615   :  { %v6562_v40 = vmul.f32 %v10342_v14, %v12861_v49 }
0x2617   :  { %9747 = vmatmul.mubr.msk.f32.vlgmr.msra.gmra.mxu1 %vm443_vm1, %v6562_v40  ;;  %v8581_v40 = vld [vmem:[%s13175_s24] ss:$0 sm:$0xff] }
0x2618   :  { %9786 = vmatprep.mubr.msk.f32.mxu1 %vm10477_vm5, %v10476_v19  ;;  %9755 = vmatpush3.msra.mxu1 %v6807_v46 }
0x2619   :  { %v10344_v1 = vpop.eup %10343  ;;  %9756 = vmatprep.subr.mxu1 %v10476_v19 }
0x261a   :  { %v6662_v8 = vmul.f32 %v10344_v1, %v12865_v11  ;;  %9757 = vmatpush3.msra.mxu1 %v6806_v20  ;;  %v6803_v11 = vld [vmem:[%s13173_s14 + $0x58] sm:$0xff]  ;;  %v6955_v20 = vld [vmem:[%s13176_s30] sm:$0xff] }
0x261b   :  { %9758 = vmatprep.subr.mxu1 %v10476_v19 }
0x261c   :  { %9752 = vmatmul.mubr.msk.f32.vlgmr.msra.gmra.mxu0 %vm443_vm1, %v6662_v8  ;;  %9759 = vmatpush3.msra.mxu1 %v6805_v17 }
0x261d   :  { %9791 = vmatprep.mubr.msk.f32.mxu0 %vm10477_vm5, %v10476_v19  ;;  %9760 = vmatprep.subr.mxu1 %v10476_v19 }
0x261e   :  { %9761 = vmatpush3.msra.mxu1 %v6804_v36  ;;  %9790 = vmatpush3.xpose.msk.msra.mxu0 %vm581_vm2, %v6878_v27 }
0x261f   :  { %9762 = vmatprep.subr.mxu1 %v10476_v19  ;;  %9794 = vmatprep.subr.mxu0 %v10476_v19 }
0x2620   :  { %9763 = vmatpush3.msra.mxu1 %v6803_v11 }
0x2621   :  { %9764 = vmatprep.subr.mxu1 %v10476_v19 }
0x2622   :  { %9765 = vmatpush3.msra.mxu1 %v6802_v18 }
0x2623   :  { %9766 = vmatprep.subr.mxu1 %v10476_v19 }
0x2624   :  { %9767 = vmatpush3.msra.mxu1 %v6801_v29 }
0x2625   :  { %9768 = vmatprep.subr.mxu1 %v10476_v19 }
0x2626   :  { %9769 = vmatpush3.msra.mxu1 %v6800_v26 }
0x2627   :  { %9770 = vmatprep.subr.mxu1 %v10476_v19 }
0x2628   :  { %9771 = vmatpush3.msra.mxu1 %v6799_v60 }
0x2629   :  { %9772 = vmatprep.subr.mxu1 %v10476_v19 }
0x262a   :  { %9773 = vmatpush3.msra.mxu1 %v6798_v48 }
0x262b   :  { %9774 = vmatprep.subr.mxu1 %v10476_v19 }
0x262c   :  { %9775 = vmatpush3.msra.mxu1 %v6797_v44 }
0x262d   :  { %9776 = vmatprep.subr.mxu1 %v10476_v19 }
0x262e   :  { %9777 = vmatpush3.msra.mxu1 %v6796_v37 }
0x262f   :  { %9778 = vmatprep.subr.mxu1 %v10476_v19 }
0x2630   :  { %9779 = vmatpush3.msra.mxu1 %v6795_v34 }
0x2631   :  { %9780 = vmatprep.subr.mxu1 %v10476_v19 }
0x2632   :  { %9781 = vmatpush3.msra.mxu1 %v6794_v28 }
0x2633   :  { %9782 = vmatprep.subr.mxu1 %v10476_v19 }
0x2634   :  { %9783 = vmatpush3.msra.mxu1 %v6793_v32 }
0x2635   :  { %9784 = vmatprep.subr.mxu1 %v10476_v19 }
0x2636   :  { %9785 = vmatpush3.msra.mxu1 %v6792_v56 }
0x2637   :  { %9829 = vmatprep.subr.mxu1 %v10476_v19 }
0x26be   :  { %v6135_v23 = vpop.f32.mrf.mxu0 }
0x26bf   :  { %v12907_v30 = vpop.f32.mrf.mxu1  ;;  %6740 = vrot.lane.b32.xlu0 %v6135_v23, %s10474_s2 }
0x26c0   :  { %v9723_v42 = vpop.f32.mrf.mxu0 }
0x26c1   :  { %v9718_v39 = vpop.f32.mrf.mxu1 }
0x26c3   :  { %v6235_v5 = vpop.f32.mrf.mxu1 }
0x26c4   :  { %6744 = vrot.lane.b32.xlu1 %v6235_v5, %s10486_s8 }
0x26c5   :  { %v9728_v9 = vpop.f32.mrf.mxu1 }
0x26c8   :  { %v6335_v33 = vpop.f32.mrf.mxu0 }
0x26c9   :  { %6748 = vrot.lane.b32.xlu0 %v6335_v33, %s10469_s22 }
0x26ca   :  { %v9733_v22 = vpop.f32.mrf.mxu0 }
0x26cd   :  { %v6435_v50 = vpop.f32.mrf.mxu1 }
0x26ce   :  { %6752 = vrot.lane.b32.xlu1 %v6435_v50, %s10463_s5 }
0x26cf   :  { %v9738_v49 = vpop.f32.mrf.mxu1 }
0x26d2   :  { %v6535_v58 = vpop.f32.mrf.mxu0 }
0x26d3   :  { %6756 = vrot.lane.b32.xlu0 %v6535_v58, %s10467_s16 }
0x26d4   :  { %v9743_v59 = vpop.f32.mrf.mxu0 }
0x26d7   :  { %v6635_v57 = vpop.f32.mrf.mxu1 }
0x26d8   :  { %6760 = vrot.lane.b32.xlu1 %v6635_v57, %s10462_s0 }
0x26d9   :  { %v9748_v63 = vpop.f32.mrf.mxu1 }
0x26dc   :  { %v6735_v54 = vpop.f32.mrf.mxu0 }
0x26dd   :  { %6764 = vrot.lane.b32.xlu0 %v6735_v54, %s10468_s18 }
0x26de   :  { %v9753_v45 = vpop.f32.mrf.mxu0 }
0x2731   :  { %v6741_v10 = vpop.permute.xlu0 %6740 }
0x2732   :  { %v6767_v12 = vsel %vm2157_vm3, %v12907_v30, %v6741_v10 }
0x2736   :  { %v6745_v13 = vpop.permute.xlu1 %6744 }
0x2737   :  { %v6768_v2 = vsel %vm137_vm0, %v6767_v12, %v6745_v13 }
0x273b   :  { %v6749_v21 = vpop.permute.xlu0 %6748 }
0x273c   :  { %v6770_v51 = vsel %vm6769_vm15, %v6768_v2, %v6749_v21 }
0x2740   :  { %v6753_v4 = vpop.permute.xlu1 %6752 }
0x2741   :  { %v6771_v47 = vsel %vm581_vm2, %v6770_v51, %v6753_v4 }
0x2745   :  { %v6757_v7 = vpop.permute.xlu0 %6756 }
0x2746   :  { %v6773_v14 = vsel %vm6772_vm6, %v6771_v47, %v6757_v7 }
0x274a   :  { %v6761_v24 = vpop.permute.xlu1 %6760 }
0x274b   :  { %v6775_v1 = vsel %vm6774_vm7, %v6773_v14, %v6761_v24 }
0x274f   :  { %v6765_v8 = vpop.permute.xlu0 %6764 }
0x2750   :  { %v6777_v23 = vsel %vm6776_vm8, %v6775_v1, %v6765_v8 }
0x2751   :  { %v6785_v42 = vadd.f32 %v8581_v40, %v6777_v23 }
0x2753   :  { %v6787_v39 = vmin.f32 %v6785_v42, 0.0  ;;  %vm6786_vm9 = vcmp.gt.f32.partialorder %v6785_v42, 0.0 }
0x2755   :  { %v6788_v30 = vmul.f32 1.442695, %v6787_v39 }
0x2757   :  { %10345 = vpow2.f32 %v6788_v30 }
0x2764   :  { %v10346_v5 = vpop.eup %10345 }
0x2765   :  { %v8582_v9 = vadd.f32 -1.0, %v10346_v5 }
0x2767   :  { %v6791_v46 = vsel %vm6786_vm9, %v6785_v42, %v8582_v9  ;;  %vm7859_vm9 = vcmask 326656  }
0x2768   :  { %9787 = vmatmul.mubr.f32.vlgmr.msra.gmra.mxu1 %v6791_v46 }
0x2769   :  { %9831 = vmatprep.mubr.msk.f32.mxu1 %vm10477_vm5, %v10476_v19 }
0x2828   :  { %v12959_v33 = vpop.f32.mrf.mxu1 }
0x2829   :  { %9792 = vmatmul.mubr.msk.f32.vlgmr.msra.gmra.mxu0 %vm581_vm2, %v12959_v33 }
0x282a   :  { %9795 = vmatpush3.xpose.msk.msra.mxu0 %vm581_vm2, %v12959_v33  ;;  %v9788_v22 = vpop.f32.mrf.mxu1  ;;  %9796 = vmatprep.mubr.msk.f32.mxu0 %vm10477_vm5, %v10476_v19 }
0x282b   :  { %9799 = vmatprep.subr.mxu0 %v10476_v19 }
0x282d   :  { %9797 = vmatmul.mubr.msk.f32.vlgmr.msra.gmra.mxu0 %vm581_vm2, %v6955_v20 }
0x282e   :  { %9800 = vmatpush3.msra.mxu0 %v12959_v33  ;;  %9801 = vmatprep.mubr.msk.f32.mxu0 %vm10477_vm5, %v10476_v19 }
0x282f   :  { %9804 = vmatprep.subr.mxu0 %v10476_v19 }
0x28e9   :  { %v6951_v17 = vpop.f32.mrf.mxu0 }
0x28ea   :  { %7128 = vperm.xlu0 %9938, %v6951_v17   ;;  %7031 = vperm.xlu1 %9937, %v6951_v17  }
0x28eb   :  { %v9793_v50 = vpop.f32.mrf.mxu0 }
0x28ed   :  { %v12974_v36 = vpop.f32.mrf.mxu0 }
0x28ee   :  { %9941 = vset.pattern.permute.xlu0 %v10482_v0  ;;  %9939 = vset.pattern.permute.xlu1 %v10480_v35  ;;  %v7134_v35 = vrot.slane %v12974_v36, %v6044_v43  ;;  %v7037_v0 = vrot.slane %v12974_v36, %v12776_v53  ;;  %v7234_v18 = vrot.slane %v12974_v36, %v6145_v6 }
0x28ef   :  { %7428 = vperm.xlu0 %9941, %v6951_v17   ;;  %7228 = vperm.xlu1 %9939, %v6951_v17   ;;  %v9798_v49 = vpop.f32.mrf.mxu0  ;;  %v7334_v6 = vrot.slane %v12974_v36, %v6245_v16  ;;  %v7734_v28 = vrot.slane %v12974_v36, %v6645_v3  ;;  %v7534_v12 = vrot.slane %v12974_v36, %v6445_v55 }
0x28f0   :  { %v7634_v55 = vrot.slane %v12974_v36, %v6545_v52 }
0x28f3   :  { %9944 = vset.pattern.permute.xlu0 %v10485_v31  ;;  %9940 = vset.pattern.permute.xlu1 %v10481_v15 }
0x28f4   :  { %7728 = vperm.xlu0 %9944, %v6951_v17   ;;  %7328 = vperm.xlu1 %9940, %v6951_v17  }
0x28f8   :  { %9942 = vset.pattern.permute.xlu1 %v10483_v41 }
0x28f9   :  { %7528 = vperm.xlu1 %9942, %v6951_v17  }
0x28fd   :  { %9943 = vset.pattern.permute.xlu1 %v10484_v61  ;;  %v7434_v61 = vrot.slane %v12974_v36, %v6345_v62 }
0x28fe   :  { %7628 = vperm.xlu1 %9943, %v6951_v17  }
0x2902   :  { %7151 = vrot.lane.b32.xlu1 %v12959_v33, %s10465_s17 }
0x2965   :  { %v7129_v31 = vpop.permute.xlu0 %7128  ;;  %v7032_v15 = vpop.permute.xlu1 %7031 }
0x2966   :  { %v7135_v58 = vadd.f32 %v7134_v35, %v7129_v31  ;;  %v7038_v11 = vadd.f32 %v7037_v0, %v7032_v15 }
0x2968   :  { %vm7136_vm10 = vcmp.gt.f32.partialorder %v7135_v58, 0.0  ;;  %v7137_v41 = vmul.f32 0.2, %v7135_v58  ;;  %vm7039_vm11 = vcmp.gt.f32.partialorder %v7038_v11, 0.0  ;;  %v7040_v59 = vmul.f32 0.2, %v7038_v11 }
0x296a   :  { %v7429_v43 = vpop.permute.xlu0 %7428  ;;  %v7229_v29 = vpop.permute.xlu1 %7228  ;;  %v7138_v57 = vsel %vm7136_vm10, %v7135_v58, %v7137_v41  ;;  %v7041_v26 = vsel %vm7039_vm11, %v7038_v11, %v7040_v59  ;;  %vm7862_vm10 = vcmask 457728  }
0x296b   :  { %v7435_v60 = vadd.f32 %v7434_v61, %v7429_v43  ;;  %v7235_v63 = vadd.f32 %v7234_v18, %v7229_v29  ;;  %v7139_v48 = vadd.f32 %v7138_v57, %v12788_v25  ;;  %v7042_v54 = vadd.f32 %v7041_v26, %v12788_v25 }
0x296d   :  { %vm7436_vm12 = vcmp.gt.f32.partialorder %v7435_v60, 0.0  ;;  %v7437_v44 = vmul.f32 0.2, %v7435_v60  ;;  %vm7236_vm13 = vcmp.gt.f32.partialorder %v7235_v63, 0.0  ;;  %v7237_v45 = vmul.f32 0.2, %v7235_v63 }
0x296e   :  { %v7140_v62 = vsel %vm443_vm1, %v7139_v48, -inf  ;;  %v7043_v37 = vsel %vm443_vm1, %v7042_v54, -inf }
0x296f   :  { %7141 = vmax.xlane.f32.xlu0 %v7140_v62  ;;  %7044 = vmax.xlane.f32.xlu1 %v7043_v37  ;;  %v7729_v34 = vpop.permute.xlu0 %7728  ;;  %v7329_v32 = vpop.permute.xlu1 %7328  ;;  %v7238_v56 = vsel %vm7236_vm13, %v7235_v63, %v7237_v45  ;;  %v7438_v13 = vsel %vm7436_vm12, %v7435_v60, %v7437_v44 }
0x2970   :  { %v7335_v27 = vadd.f32 %v7334_v6, %v7329_v32  ;;  %v13006_v10 = vadd.f32 %v7238_v56, %v12788_v25  ;;  %v7735_v21 = vadd.f32 %v7734_v28, %v7729_v34  ;;  %v13014_v2 = vadd.f32 %v7438_v13, %v12788_v25 }
0x2972   :  { %vm7336_vm14 = vcmp.gt.f32.partialorder %v7335_v27, 0.0  ;;  %v7337_v4 = vmul.f32 0.2, %v7335_v27  ;;  %v7240_v16 = vsel %vm443_vm1, %v13006_v10, -inf  ;;  %v7737_v51 = vmul.f32 0.2, %v7735_v21 }
0x2973   :  { %7241 = vmax.xlane.f32.xlu1 %v7240_v16  ;;  %vm7736_vm6 = vcmp.gt.f32.partialorder %v7735_v21, 0.0  ;;  %v7440_v40 = vsel %vm443_vm1, %v13014_v2, -inf }
0x2974   :  { %v7529_v3 = vpop.permute.xlu1 %7528  ;;  %v7338_v7 = vsel %vm7336_vm14, %v7335_v27, %v7337_v4  ;;  %v7738_v42 = vsel %vm7736_vm6, %v7735_v21, %v7737_v51 }
0x2975   :  { %v7535_v24 = vadd.f32 %v7534_v12, %v7529_v3  ;;  %v7339_v47 = vadd.f32 %v7338_v7, %v12788_v25  ;;  %v7739_v46 = vadd.f32 %v7738_v42, %v12788_v25 }
0x2977   :  { %vm7536_vm7 = vcmp.gt.f32.partialorder %v7535_v24, 0.0  ;;  %v7537_v14 = vmul.f32 0.2, %v7535_v24  ;;  %v7340_v1 = vsel %vm443_vm1, %v7339_v47, -inf  ;;  %7441 = vmax.xlane.f32.xlu1 %v7440_v40  ;;  %v7740_v38 = vsel %vm443_vm1, %v7739_v46, -inf }
0x2978   :  { %7341 = vmax.xlane.f32.xlu0 %v7340_v1 }
0x2979   :  { %v7629_v8 = vpop.permute.xlu1 %7628  ;;  %v7538_v23 = vsel %vm7536_vm7, %v7535_v24, %v7537_v14 }
0x297a   :  { %v7635_v39 = vadd.f32 %v7634_v55, %v7629_v8  ;;  %v7539_v30 = vadd.f32 %v7538_v23, %v12788_v25 }
0x297c   :  { %vm7636_vm8 = vcmp.gt.f32.partialorder %v7635_v39, 0.0  ;;  %v7637_v5 = vmul.f32 0.2, %v7635_v39  ;;  %v7540_v9 = vsel %vm443_vm1, %v7539_v30, -inf }
0x297d   :  { %7541 = vmax.xlane.f32.xlu0 %v7540_v9  ;;  %v13033_v17 = vpop.permute.xlu1 %7151 }
0x297e   :  { %v7638_v22 = vsel %vm7636_vm8, %v7635_v39, %v7637_v5 }
0x297f   :  { %v7639_v20 = vadd.f32 %v7638_v22, %v12788_v25 }
0x2981   :  { %7741 = vmax.xlane.f32.xlu0 %v7740_v38  ;;  %v7640_v52 = vsel %vm443_vm1, %v7639_v20, -inf }
0x2982   :  { %7641 = vmax.xlane.f32.xlu1 %v7640_v52 }
0x2993   :  { %7351 = vrot.lane.b32.xlu1 %v12959_v33, %s10471_s26 }
0x2997   :  { %7251 = vrot.lane.b32.xlu0 %v12959_v33, %s10468_s18 }
0x29f8   :  { %v7142_v50 = vpop.xlane.xlu0 %7141  ;;  %v7045_v36 = vpop.xlane.xlu1 %7044 }
0x29f9   :  { %v7143_v49 = vsub.f32 %v7139_v48, %v7142_v50  ;;  %v7046_v35 = vsub.f32 %v7042_v54, %v7045_v36 }
0x29fb   :  { %v7144_v0 = vmul.f32 1.442695, %v7143_v49  ;;  %v7047_v25 = vmul.f32 1.442695, %v7046_v35 }
0x29fc   :  { %v7242_v59 = vpop.xlane.xlu1 %7241 }
0x29fd   :  { %10347 = vpow2.f32 %v7144_v0  ;;  %v7243_v43 = vsub.f32 %v13006_v10, %v7242_v59 }
0x29fe   :  { %10349 = vpow2.f32 %v7047_v25 }
0x29ff   :  { %v7244_v60 = vmul.f32 1.442695, %v7243_v43 }
0x2a00   :  { %v7442_v29 = vpop.xlane.xlu1 %7441 }
0x2a01   :  { %v7342_v41 = vpop.xlane.xlu0 %7341  ;;  %v7443_v63 = vsub.f32 %v13014_v2, %v7442_v29 }
0x2a02   :  { %v7343_v18 = vsub.f32 %v7339_v47, %v7342_v41 }
0x2a03   :  { %v7444_v62 = vmul.f32 1.442695, %v7443_v63 }
0x2a04   :  { %v7344_v57 = vmul.f32 1.442695, %v7343_v18 }
0x2a06   :  { %v7542_v61 = vpop.xlane.xlu0 %7541  ;;  %10351 = vpow2.f32 %v7344_v57 }
0x2a07   :  { %v7543_v26 = vsub.f32 %v7539_v30, %v7542_v61  ;;  %10353 = vpow2.f32 %v7244_v60 }
0x2a09   :  { %v7544_v44 = vmul.f32 1.442695, %v7543_v26 }
0x2a0a   :  { %v13035_v31 = vpop.eup %10347  ;;  %v7742_v48 = vpop.xlane.xlu0 %7741 }
0x2a0b   :  { %v10350_v15 = vpop.eup %10349  ;;  %v7146_v58 = vsel %vm443_vm1, %v13035_v31, 0.0  ;;  %v7642_v54 = vpop.xlane.xlu1 %7641  ;;  %v7743_v45 = vsub.f32 %v7739_v46, %v7742_v48  ;;  %10355 = vpow2.f32 %v7544_v44  ;;  %v7885_v48 = vld [vmem:[%s13177_s6 + $0x38] sm:$0xff]  ;;  %v7884_v44 = vld [vmem:[%s13177_s6 + $0x30] sm:$0xff] }
0x2a0c   :  { %7147 = vadd.xlane.f32.xlu0 %v7146_v58  ;;  %v7049_v11 = vsel %vm443_vm1, %v10350_v15, 0.0  ;;  %v7643_v37 = vsub.f32 %v7639_v20, %v7642_v54  ;;  %10357 = vpow2.f32 %v7444_v62  ;;  %v7883_v62 = vld [vmem:[%s13177_s6 + $0x28] sm:$0xff] }
0x2a0d   :  { %7050 = vadd.xlane.f32.xlu1 %v7049_v11  ;;  %v7744_v6 = vmul.f32 1.442695, %v7743_v45 }
0x2a0e   :  { %v7644_v34 = vmul.f32 1.442695, %v7643_v37  ;;  %v7252_v7 = vpop.permute.xlu0 %7251 }
0x2a0f   :  { %10359 = vpow2.f32 %v7744_v6  ;;  %v7352_v51 = vpop.permute.xlu1 %7351  ;;  %v7882_v6 = vld [vmem:[%s13177_s6 + $0x20] sm:$0xff] }
0x2a10   :  { %10361 = vpow2.f32 %v7644_v34 }
0x2a13   :  { %v10352_v28 = vpop.eup %10351 }
0x2a14   :  { %v10354_v32 = vpop.eup %10353  ;;  %v7346_v56 = vsel %vm443_vm1, %v10352_v28, 0.0 }
0x2a15   :  { %v7246_v10 = vsel %vm443_vm1, %v10354_v32, 0.0 }
0x2a18   :  { %v13047_v27 = vpop.eup %10355 }
0x2a19   :  { %v10358_v13 = vpop.eup %10357  ;;  %v7546_v21 = vsel %vm443_vm1, %v13047_v27, 0.0 }
0x2a1a   :  { %v7446_v16 = vsel %vm443_vm1, %v10358_v13, 0.0 }
0x2a1c   :  { %v13052_v4 = vpop.eup %10359 }
0x2a1d   :  { %v10362_v12 = vpop.eup %10361  ;;  %v7746_v2 = vsel %vm443_vm1, %v13052_v4, 0.0 }
0x2a1e   :  { %7451 = vrot.lane.b32.xlu1 %v12959_v33, %s10462_s0  ;;  %v7646_v3 = vsel %vm443_vm1, %v10362_v12, 0.0  ;;  %s13179_s0 = sld [smem:[#allocation17_spill]] }
0x2a22   :  { %7551 = vrot.lane.b32.xlu0 %v12959_v33, %s10464_s13 }
0x2a41   :  { %7347 = vadd.xlane.f32.xlu0 %v7346_v56  ;;  %v7879_v56 = vld [vmem:[%s13177_s6 + $0x8] sm:$0xff] }
0x2a42   :  { %7247 = vadd.xlane.f32.xlu1 %v7246_v10 }
0x2a45   :  { %7547 = vadd.xlane.f32.xlu0 %v7546_v21 }
0x2a46   :  { %7447 = vadd.xlane.f32.xlu1 %v7446_v16 }
0x2a49   :  { %7747 = vadd.xlane.f32.xlu0 %v7746_v2 }
0x2a4a   :  { %7647 = vadd.xlane.f32.xlu1 %v7646_v3 }
0x2a5b   :  { %7651 = vrot.lane.b32.xlu1 %v12959_v33, %s10467_s16 }
0x2a5f   :  { %7751 = vrot.lane.b32.xlu0 %v12959_v33, %s10470_s23 }
0x2a95   :  { %v7148_v24 = vpop.xlane.xlu0 %7147 }
0x2a96   :  { %v7051_v47 = vpop.xlane.xlu1 %7050 }
0x2a97   :  { %10363 = vrcp.f32 %v7051_v47  ;;  %v8595_v47 = vld [vmem:[%s13178_s11] ss:$0 sm:$0xff] }
0x2a98   :  { %10365 = vrcp.f32 %v7148_v24 }
0x2a99   :  { %v7552_v33 = vpop.permute.xlu0 %7551 }
0x2a9a   :  { %v7452_v8 = vpop.permute.xlu1 %7451 }
0x2aa4   :  { %v10364_v14 = vpop.eup %10363 }
0x2aa5   :  { %v7053_v40 = vmul.f32 %v10364_v14, %v10350_v15  ;;  %v10366_v1 = vpop.eup %10365 }
0x2aa6   :  { %v7150_v55 = vmul.f32 %v10366_v1, %v13035_v31 }
0x2aa7   :  { %9802 = vmatmul.mubr.msk.f32.vlgmr.msra.gmra.mxu0 %vm443_vm1, %v7053_v40 }
0x2aa8   :  { %9805 = vmatpush3.msra.mxu0 %v13033_v17  ;;  %9806 = vmatprep.mubr.msk.f32.mxu0 %vm10477_vm5, %v10476_v19 }
0x2aa9   :  { %9809 = vmatprep.subr.mxu0 %v10476_v19 }
0x2aab   :  { %9807 = vmatmul.mubr.msk.f32.vlgmr.msra.gmra.mxu0 %vm443_vm1, %v7150_v55 }
0x2aac   :  { %9810 = vmatpush3.msra.mxu0 %v7252_v7  ;;  %9811 = vmatprep.mubr.msk.f32.mxu0 %vm10477_vm5, %v10476_v19 }
0x2aad   :  { %9814 = vmatprep.subr.mxu0 %v10476_v19 }
0x2aca   :  { %v7348_v23 = vpop.xlane.xlu0 %7347 }
0x2acb   :  { %v7248_v42 = vpop.xlane.xlu1 %7247 }
0x2acc   :  { %10367 = vrcp.f32 %v7248_v42 }
0x2acd   :  { %10369 = vrcp.f32 %v7348_v23 }
0x2ace   :  { %v7548_v30 = vpop.xlane.xlu0 %7547 }
0x2acf   :  { %v7448_v39 = vpop.xlane.xlu1 %7447 }
0x2ad0   :  { %10371 = vrcp.f32 %v7448_v39 }
0x2ad2   :  { %v7748_v9 = vpop.xlane.xlu0 %7747 }
0x2ad3   :  { %v7648_v5 = vpop.xlane.xlu1 %7647 }
0x2ad4   :  { %10373 = vrcp.f32 %v7648_v5 }
0x2ad5   :  { %10375 = vrcp.f32 %v7548_v30  ;;  %v8598_v30 = vld [vmem:[%s10631_s20] ss:$0 sm:$0xff]  ;;  %s10487_s20 = smov [#allocation2]  }
0x2ad6   :  { %10377 = vrcp.f32 %v7748_v9  ;;  %v7752_v31 = vpop.permute.xlu0 %7751  ;;  %s8230_s5 = sshll.u32 %s10487_s20, 4  ;;  %s8231_s5 = int_to_ptr.vmem [resolvable:$true] %s8230_s5 }
0x2ad7   :  { %v7652_v46 = vpop.permute.xlu1 %7651  ;;  %s10410_s13 = scalar_lea.vmem %s8231_s5, 32  ;;  %p10415_p1 = scmp.lt.s32.totalorder %s8231_s5, %s8231_s5 }
0x2ad8   :  { %9830 = vmatpush3.msra.mxu1 %v7652_v46  ;;  %v7971_v46 = vld [vmem:[%s13179_s0] sm:$0x1]  ;;  %p10411_p0 = scmp.ne.s32.totalorder %s8231_s5, %s10410_s13  ;;  %p10416_p2 = scmp.lt.s32.totalorder %s10410_s13, %s10410_s13 }
0x2ad9   :  { %v10368_v22 = vpop.eup %10367  ;;  %9839 = vmatprep.subr.mxu1 %v10476_v19 }
0x2ada   :  { %v7250_v20 = vmul.f32 %v10368_v22, %v10354_v32  ;;  %v10370_v38 = vpop.eup %10369  ;;  %v7880_v32 = vld [vmem:[%s13177_s6 + $0x10] sm:$0xff]  ;;  %p10417_p3 = por %p10416_p2, %p10415_p1 }
0x2adb   :  { %v7350_v52 = vmul.f32 %v10370_v38, %v10352_v28  ;;  %v7881_v28 = vld [vmem:[%s13177_s6 + $0x18] sm:$0xff] }
0x2adc   :  { %9812 = vmatmul.mubr.msk.f32.vlgmr.msra.gmra.mxu0 %vm443_vm1, %v7250_v20  ;;  %p10418_p4 = pnand %p10417_p3, %p10411_p0 }
0x2add   :  { %9815 = vmatpush3.msra.mxu0 %v7352_v51  ;;  %9816 = vmatprep.mubr.msk.f32.mxu0 %vm10477_vm5, %v10476_v19  ;;  %v10372_v17 = vpop.eup %10371 }
0x2ade   :  { %9819 = vmatprep.subr.mxu0 %v10476_v19  ;;  %v7450_v36 = vmul.f32 %v10372_v17, %v10358_v13 }
0x2ae0   :  { %9817 = vmatmul.mubr.msk.f32.vlgmr.msra.gmra.mxu0 %vm443_vm1, %v7350_v52 }
0x2ae1   :  { %v10374_v50 = vpop.eup %10373  ;;  %9820 = vmatpush3.msra.mxu0 %v7452_v8  ;;  %9821 = vmatprep.mubr.msk.f32.mxu0 %vm10477_vm5, %v10476_v19 }
0x2ae2   :  { %9824 = vmatprep.subr.mxu0 %v10476_v19  ;;  %v7650_v49 = vmul.f32 %v10374_v50, %v10362_v12  ;;  %v10376_v35 = vpop.eup %10375 }
0x2ae3   :  { %v7550_v0 = vmul.f32 %v10376_v35, %v13047_v27  ;;  %v10378_v25 = vpop.eup %10377  ;;  %v7878_v27 = vld [vmem:[%s13177_s6] sm:$0xff] }
0x2ae4   :  { %9822 = vmatmul.mubr.msk.f32.vlgmr.msra.gmra.mxu0 %vm443_vm1, %v7450_v36  ;;  %9832 = vmatmul.mubr.msk.f32.vlgmr.msra.gmra.mxu1 %vm443_vm1, %v7650_v49  ;;  %v7750_v15 = vmul.f32 %v10378_v25, %v13052_v4 }
0x2ae5   :  { %9825 = vmatpush3.msra.mxu0 %v7552_v33  ;;  %9826 = vmatprep.mubr.msk.f32.mxu0 %vm10477_vm5, %v10476_v19 }
0x2ae6   :  { %9834 = vmatprep.subr.mxu0 %v10476_v19  ;;  %9855 = vmatprep.mubr.msk.f32.mxu1 %vm10477_vm5, %v10476_v19 }
0x2ae7   :  { %9840 = vmatpush3.msra.mxu1 %v7885_v48 }
0x2ae8   :  { %9827 = vmatmul.mubr.msk.f32.vlgmr.msra.gmra.mxu0 %vm443_vm1, %v7550_v0  ;;  %9841 = vmatprep.subr.mxu1 %v10476_v19  ;;  %v10409_v0 = vld [vmem:[%s13172_s3] sm:$0xff] }
0x2ae9   :  { %9835 = vmatpush3.msra.mxu0 %v7752_v31  ;;  %9836 = vmatprep.mubr.msk.f32.mxu0 %vm10477_vm5, %v10476_v19 }
0x2aea   :  { %9858 = vmatprep.subr.mxu0 %v10476_v19  ;;  %9842 = vmatpush3.msra.mxu1 %v7884_v44 }
0x2aeb   :  { %9843 = vmatprep.subr.mxu1 %v10476_v19 }
0x2aec   :  { %9837 = vmatmul.mubr.msk.f32.vlgmr.msra.gmra.mxu0 %vm443_vm1, %v7750_v15  ;;  %9844 = vmatpush3.msra.mxu1 %v7883_v62 }
0x2aed   :  { %9860 = vmatprep.mubr.msk.f32.mxu0 %vm10477_vm5, %v10476_v19  ;;  %9845 = vmatprep.subr.mxu1 %v10476_v19 }
0x2aee   :  { %9846 = vmatpush3.msra.mxu1 %v7882_v6 }
0x2aef   :  { %9847 = vmatprep.subr.mxu1 %v10476_v19 }
0x2af0   :  { %9848 = vmatpush3.msra.mxu1 %v7881_v28 }
0x2af1   :  { %9849 = vmatprep.subr.mxu1 %v10476_v19 }
0x2af2   :  { %9850 = vmatpush3.msra.mxu1 %v7880_v32 }
0x2af3   :  { %9851 = vmatprep.subr.mxu1 %v10476_v19 }
0x2af4   :  { %9852 = vmatpush3.msra.mxu1 %v7879_v56 }
0x2af5   :  { %9853 = vmatprep.subr.mxu1 %v10476_v19 }
0x2af6   :  { %9854 = vmatpush3.msra.mxu1 %v7878_v27 }
0x2b67   :  { %v7123_v58 = vpop.f32.mrf.mxu0 }
0x2b69   :  { %v9803_v11 = vpop.f32.mrf.mxu0 }
0x2b6b   :  { %v7223_v41 = vpop.f32.mrf.mxu0 }
0x2b6c   :  { %7828 = vrot.lane.b32.xlu1 %v7223_v41, %s10473_s1 }
0x2b6d   :  { %v9808_v59 = vpop.f32.mrf.mxu0 }
0x2b9c   :  { %v7323_v61 = vpop.f32.mrf.mxu0 }
0x2b9d   :  { %7832 = vrot.lane.b32.xlu0 %v7323_v61, %s10474_s2 }
0x2b9e   :  { %v9813_v18 = vpop.f32.mrf.mxu0 }
0x2ba0   :  { %v7423_v43 = vpop.f32.mrf.mxu0 }
0x2ba1   :  { %7836 = vrot.lane.b32.xlu1 %v7423_v43, %s10475_s7  ;;  %v8601_v43 = vld [vmem:[%s10636_s27] ss:$0 sm:$0xff] }
0x2ba2   :  { %v9818_v29 = vpop.f32.mrf.mxu0 }
0x2ba4   :  { %v7523_v57 = vpop.f32.mrf.mxu0  ;;  %v7723_v26 = vpop.f32.mrf.mxu1 }
0x2ba5   :  { %7840 = vrot.lane.b32.xlu0 %v7523_v57, %s10486_s8 }
0x2ba6   :  { %v9823_v60 = vpop.f32.mrf.mxu0  ;;  %v9833_v63 = vpop.f32.mrf.mxu1 }
0x2ba8   :  { %v7623_v54 = vpop.f32.mrf.mxu0 }
0x2ba9   :  { %7848 = vrot.lane.b32.xlu0 %v7723_v26, %s10469_s22  ;;  %7844 = vrot.lane.b32.xlu1 %v7623_v54, %s10472_s28  ;;  %v8148_v26 = vld [vmem:[%s10641_s4] sm:$0x3] }
0x2baa   :  { %v9828_v45 = vpop.f32.mrf.mxu0 }
0x2bac   :  { %v7823_v37 = vpop.f32.mrf.mxu0 }
0x2bad   :  { %7852 = vrot.lane.b32.xlu1 %v7823_v37, %s10466_s15 }
0x2bae   :  { %v9838_v34 = vpop.f32.mrf.mxu0 }
0x2bde   :  { %v7829_v10 = vpop.permute.xlu1 %7828 }
0x2bdf   :  { %v7855_v16 = vsel %vm443_vm1, %v7123_v58, %v7829_v10 }
0x2c0f   :  { %v7833_v13 = vpop.permute.xlu0 %7832 }
0x2c10   :  { %v7856_v12 = vsel %vm2157_vm3, %v7855_v16, %v7833_v13 }
0x2c13   :  { %v7837_v21 = vpop.permute.xlu1 %7836 }
0x2c14   :  { %v7857_v2 = vsel %vm2166_vm4, %v7856_v12, %v7837_v21 }
0x2c17   :  { %v7841_v4 = vpop.permute.xlu0 %7840 }
0x2c18   :  { %v7858_v3 = vsel %vm137_vm0, %v7857_v2, %v7841_v4  ;;  %vm7967_vm0 = vcmask 31744  }
0x2c1b   :  { %v7845_v7 = vpop.permute.xlu1 %7844  ;;  %v7849_v51 = vpop.permute.xlu0 %7848 }
0x2c1c   :  { %v7860_v24 = vsel %vm7859_vm9, %v7858_v3, %v7845_v7 }
0x2c1d   :  { %v7861_v14 = vsel %vm6769_vm15, %v7860_v24, %v7849_v51 }
0x2c1f   :  { %v7853_v40 = vpop.permute.xlu1 %7852 }
0x2c20   :  { %v7863_v1 = vsel %vm7862_vm10, %v7861_v14, %v7853_v40 }
0x2c21   :  { %v7871_v55 = vadd.f32 %v8595_v47, %v7863_v1 }
0x2c23   :  { %v7873_v33 = vmin.f32 %v7871_v55, 0.0  ;;  %vm7872_vm3 = vcmp.gt.f32.partialorder %v7871_v55, 0.0 }
0x2c25   :  { %v7874_v8 = vmul.f32 1.442695, %v7873_v33 }
0x2c27   :  { %10379 = vpow2.f32 %v7874_v8 }
0x2c34   :  { %v10380_v23 = vpop.eup %10379 }
0x2c35   :  { %v8596_v42 = vadd.f32 -1.0, %v10380_v23 }
0x2c37   :  { %v7877_v39 = vsel %vm7872_vm3, %v7871_v55, %v8596_v42 }
0x2c38   :  { %9856 = vmatmul.mubr.msk.f32.vlgmr.msra.gmra.mxu1 %vm581_vm2, %v7877_v39 }
0x2cf8   :  { %v7955_v5 = vpop.f32.mrf.mxu1 }
0x2cf9   :  { %v7966_v9 = vmul.f32 %v8598_v30, %v7955_v5  ;;  %9859 = vmatpush3.xpose.msk.msra.mxu0 %vm7967_vm0, %v7955_v5 }
0x2cfa   :  { %v9857_v22 = vpop.f32.mrf.mxu1  ;;  %9863 = vmatprep.subr.mxu0 %v10476_v19 }
0x2cfb   :  { %v7968_v20 = vsel %vm7967_vm0, %v7966_v9, 0.0 }
0x2cfc   :  { %9861 = vmatmul.mubr.msk.f32.vlgmr.msra.gmra.mxu0 %vm7967_vm0, %v7971_v46  ;;  %7969 = vadd.xlane.f32.xlu0 %v7968_v20 }
0x2cfd   :  { %9864 = vmatpush3.msra.mxu0 %v7955_v5  ;;  %9865 = vmatprep.mubr.msk.f32.mxu0 %vm10477_vm5, %v10476_v19 }
0x2cfe   :  { %9868 = vmatprep.subr.mxu0 %v10476_v19 }
0x2d85   :  { %v7970_v17 = vpop.xlane.xlu0 %7969 }
0x2dbc   :  { %v8044_v38 = vpop.f32.mrf.mxu0 }
0x2dbd   :  { %v8051_v52 = vrot.slane %v8044_v38, %v12776_v53 }
0x2dbe   :  { %v9862_v50 = vpop.f32.mrf.mxu0 }
0x2dbf   :  { %v8052_v36 = vadd.f32 %v8051_v52, %v7970_v17 }
0x2dc1   :  { %v8054_v49 = vmul.f32 0.2, %v8052_v36  ;;  %vm8053_vm2 = vcmp.gt.f32.partialorder %v8052_v36, 0.0 }
0x2dc3   :  { %v8055_v35 = vsel %vm8053_vm2, %v8052_v36, %v8054_v49 }
0x2dc4   :  { %v8056_v25 = vadd.f32 %v10409_v0, %v8055_v35 }
0x2dc6   :  { %v8057_v31 = vsel %vm443_vm1, %v8056_v25, -inf }
0x2dc7   :  { %8058 = vmax.xlane.f32.xlu1 %v8057_v31 }
0x2e50   :  { %v8059_v15 = vpop.xlane.xlu1 %8058 }
0x2e51   :  { %v8060_v58 = vsub.f32 %v8056_v25, %v8059_v15 }
0x2e53   :  { %v8061_v11 = vmul.f32 1.442695, %v8060_v58 }
0x2e55   :  { %10381 = vpow2.f32 %v8061_v11 }
0x2e62   :  { %v10382_v41 = vpop.eup %10381 }
0x2e63   :  { %v8063_v53 = vsel %vm443_vm1, %v10382_v41, 0.0 }
0x2e64   :  { %8064 = vadd.xlane.f32.xlu0 %v8063_v53 }
0x2eed   :  { %v8065_v59 = vpop.xlane.xlu0 %8064 }
0x2eee   :  { %10383 = vrcp.f32 %v8065_v59 }
0x2efb   :  { %v10384_v61 = vpop.eup %10383 }
0x2efc   :  { %v8067_v18 = vmul.f32 %v10384_v61, %v10382_v41 }
0x2efe   :  { %9866 = vmatmul.mubr.msk.f32.vlgmr.msra.gmra.mxu0 %vm443_vm1, %v8067_v18 }
0x2eff   :  { %9870 = vmatprep.mubr.msk.f32.mxu0 %vm10477_vm5, %v10476_v19 }
0x2fbe   :  { %v8144_v29 = vpop.f32.mrf.mxu0 }
0x2fbf   :  { %v8145_v57 = vadd.f32 %v8601_v43, %v8144_v29 }
0x2fc0   :  { %v9867_v60 = vpop.f32.mrf.mxu0 }
0x2fc1   :  { %9869 = vmatpush3.msra.mxu0 %v8145_v57 }
0x2fc2   :  { %9871 = vmatmul.mubr.msk.f32.vlgmr.msra.gmra.mxu0 %vm443_vm1, %v8148_v26 }
0x3082   :  { %v8218_v63 = vpop.f32.mrf.mxu0 }
0x3083   :  { %v8222_v48 = vsel %vm7967_vm0, %v8218_v63, 0.0 }
0x3084   :  { %8223 = vst [vmem:[#allocation2] sm:$0x3] %v8222_v48  ;;  %v9872_v54 = vpop.f32.mrf.mxu0 }
0x3085   :  { %10421 = shalt.err (!%p10418_p4)
}
0x3086   :  { %8233 = dma.vmem_to_hbm [thread:$0]  %s8231_s5, 32, %s10646_s12, [#allocation3]  }
0x3087   :  { %10430 = dma.done.wait [#allocation3], 32  }
0x3088   :  { %10431 = vsyncadd [#allocation3], 4294967264 }
0x3089   :  { %8237 = vsyncpa [#allocation3], 1 }

</bundles_post_ra>
